<compile_context>
chip_gen: v7x
topology: tpu7x:2x2x1
jax: 0.10.0
libtpu: 0.0.40
codegen_flags: <defaults>
</compile_context>

<pallas_src>
import functools

import jax
import jax.numpy as jnp
from jax import lax
from jax.experimental import pallas as pl
from jax.experimental.pallas import tpu as pltpu


def se_resblock_kernel(x_ref, w1_ref, w2_ref, b1_ref, b2_ref,
                       fc1_ref, fc2_ref, out_ref, slab_ref, pad_ref):
    """One batch image per grid step.

    x_ref   : (1, H+2, W+2, C) f32   spatially zero-padded input
    w1_ref  : (9*C, C)        bf16   conv1 weights, BN1 scale folded in
    w2_ref  : (9*C, C)        bf16   conv2 weights, BN2 scale folded in
    b1_ref  : (1, C)          f32    BN1 folded bias
    b2_ref  : (1, C)          f32    BN2 folded bias
    fc1_ref : (Cmid, C)       f32    SE reduce weight (PyTorch (out, in))
    fc2_ref : (Cmid, C)       f32    SE expand weight, transposed to (in, out)^T
    out_ref : (1, H, W, C)    f32
    slab_ref: VMEM (H*W, 9*C) bf16   shared im2col slab (conv1 then conv2)
    pad_ref : VMEM (H+2, W+2, C) bf16 zero-bordered conv1 activation
    """
    Hp, Wp, C = x_ref.shape[1], x_ref.shape[2], x_ref.shape[3]
    H, W = Hp - 2, Wp - 2
    HW = H * W

    # ---- conv1: build (H*W, 9*C) im2col slab, single K = 9*C MXU matmul ----
    for k in range(9):
        dy, dx = k // 3, k % 3
        patch = x_ref[:, dy:dy + H, dx:dx + W, :].astype(jnp.bfloat16)
        slab_ref[:, k * C:(k + 1) * C] = patch.reshape(HW, C)
    acc1 = jnp.dot(slab_ref[...], w1_ref[...],
                   preferred_element_type=jnp.float32)          # (HW, C) f32
    act1 = jnp.maximum(acc1 + b1_ref[...], 0.0)                 # BN1 bias + ReLU

    # ---- stage conv1 activation for conv2: zero only the 1-px border ----
    zrow = jnp.zeros((1, Wp, C), jnp.bfloat16)
    zcol = jnp.zeros((Hp, 1, C), jnp.bfloat16)
    pad_ref[0:1, :, :] = zrow
    pad_ref[Hp - 1:Hp, :, :] = zrow
    pad_ref[:, 0:1, :] = zcol
    pad_ref[:, Wp - 1:Wp, :] = zcol
    pad_ref[1:1 + H, 1:1 + W, :] = act1.astype(jnp.bfloat16).reshape(H, W, C)

    # ---- conv2: rebuild the slab (scratch reused), single matmul ----
    for k in range(9):
        dy, dx = k // 3, k % 3
        slab_ref[:, k * C:(k + 1) * C] = \
            pad_ref[dy:dy + H, dx:dx + W, :].reshape(HW, C)
    out2 = jnp.dot(slab_ref[...], w2_ref[...],
                   preferred_element_type=jnp.float32)          # (HW, C) f32
    out2 = out2 + b2_ref[...]                                   # BN2 bias

    # ---- SE block on VPU/XLU only (no MXU pushes on the serial tail) ----
    y = jnp.mean(out2, axis=0, keepdims=True)                   # (1, C)
    h = jnp.sum(fc1_ref[...] * y, axis=1, keepdims=True)        # (Cmid, 1)
    h = jnp.maximum(h, 0.0)
    gate = jax.nn.sigmoid(
        jnp.sum(fc2_ref[...] * h, axis=0, keepdims=True))       # (1, C)

    # ---- residual add (f32 identity from the resident input block) + ReLU ----
    identity = x_ref[:, 1:1 + H, 1:1 + W, :].reshape(HW, C)     # f32
    res = jnp.maximum(out2 * gate + identity, 0.0)
    out_ref[...] = res.reshape(1, H, W, C).astype(out_ref.dtype)


def se_residual_block(x_nchw, params):
    """Wrapper: NCHW in / NCHW out, matching the PyTorch block."""
    (w1_hwio, w2_hwio, bn1s, bn1b, bn2s, bn2b, fc1_w, fc2_w) = params
    B, C, H, W = x_nchw.shape
    Cout = w1_hwio.shape[-1]
    Cmid = fc1_w.shape[0]
    assert C == Cout, "downsample=None requires in_channels == out_channels"

    x_nhwc = jnp.transpose(x_nchw, (0, 2, 3, 1)).astype(jnp.float32)
    x_pad = jnp.pad(x_nhwc, ((0, 0), (1, 1), (1, 1), (0, 0)))

    # Fold BN scale into the conv weights (inference-mode BN), flatten the
    # 3x3 taps into the contraction dim and cast to bf16 for the MXU.
    w1f = (w1_hwio * bn1s).reshape(9 * C, C).astype(jnp.bfloat16)
    w2f = (w2_hwio * bn2s).reshape(9 * C, C).astype(jnp.bfloat16)
    b1 = bn1b.reshape(1, C).astype(jnp.float32)
    b2 = bn2b.reshape(1, C).astype(jnp.float32)
    fc1 = fc1_w.astype(jnp.float32)            # (Cmid, C)
    fc2t = fc2_w.T.astype(jnp.float32)         # (Cmid, C)

    out_nhwc = pl.pallas_call(
        se_resblock_kernel,
        out_shape=jax.ShapeDtypeStruct((B, H, W, C), jnp.float32),
        grid=(B,),
        in_specs=[
            pl.BlockSpec((1, H + 2, W + 2, C), lambda b: (b, 0, 0, 0)),
            pl.BlockSpec((9 * C, C), lambda b: (0, 0)),
            pl.BlockSpec((9 * C, C), lambda b: (0, 0)),
            pl.BlockSpec((1, C), lambda b: (0, 0)),
            pl.BlockSpec((1, C), lambda b: (0, 0)),
            pl.BlockSpec((Cmid, C), lambda b: (0, 0)),
            pl.BlockSpec((Cmid, C), lambda b: (0, 0)),
        ],
        out_specs=pl.BlockSpec((1, H, W, C), lambda b: (b, 0, 0, 0)),
        scratch_shapes=[
            pltpu.VMEM((H * W, 9 * C), jnp.bfloat16),       # im2col slab
            pltpu.VMEM((H + 2, W + 2, C), jnp.bfloat16),    # padded act1
        ],
        compiler_params=pltpu.CompilerParams(
            dimension_semantics=("parallel",)),
    )(x_pad, w1f, w2f, b1, b2, fc1, fc2t)

    return jnp.transpose(out_nhwc, (0, 3, 1, 2))


def ref_forward(x_nchw, params):
    """Pure-JAX reference of the same forward pass (same bf16/f32 numerics)."""
    (w1_hwio, w2_hwio, bn1s, bn1b, bn2s, bn2b, fc1_w, fc2_w) = params
    x = jnp.transpose(x_nchw, (0, 2, 3, 1)).astype(jnp.float32)
    w1f = (w1_hwio * bn1s).astype(jnp.bfloat16)
    w2f = (w2_hwio * bn2s).astype(jnp.bfloat16)
    conv = functools.partial(
        lax.conv_general_dilated,
        window_strides=(1, 1), padding="SAME",
        dimension_numbers=("NHWC", "HWIO", "NHWC"),
        preferred_element_type=jnp.float32)
    out = conv(x.astype(jnp.bfloat16), w1f)
    out = jnp.maximum(out + bn1b, 0.0)
    out = conv(out.astype(jnp.bfloat16), w2f)
    out = out + bn2b
    y = jnp.mean(out, axis=(1, 2))                        # (B, C)
    h = jnp.maximum(y @ fc1_w.T, 0.0)                     # (B, Cmid)
    gate = jax.nn.sigmoid(h @ fc2_w.T)                    # (B, C)
    out = out * gate[:, None, None, :]
    out = jnp.maximum(out + x, 0.0)
    return jnp.transpose(out, (0, 3, 1, 2))


def make_params(key, channels, reduction=16):
    c = channels
    cmid = max(c // reduction, 1)
    ks = jax.random.split(key, 8)
    eps = 1e-5
    w1 = 0.03 * jax.random.normal(ks[0], (3, 3, c, c), jnp.float32)   # HWIO
    w2 = 0.03 * jax.random.normal(ks[1], (3, 3, c, c), jnp.float32)
    g1 = 1.0 + 0.1 * jax.random.normal(ks[2], (c,), jnp.float32)
    b1 = 0.1 * jax.random.normal(ks[3], (c,), jnp.float32)
    m1 = 0.05 * jax.random.normal(ks[4], (c,), jnp.float32)
    v1 = jnp.abs(1.0 + 0.1 * jax.random.normal(ks[5], (c,), jnp.float32))
    g2, b2, m2, v2 = g1[::-1], b1[::-1], m1[::-1], v1[::-1]
    bn1s = g1 / jnp.sqrt(v1 + eps)
    bn1b = b1 - m1 * bn1s
    bn2s = g2 / jnp.sqrt(v2 + eps)
    bn2b = b2 - m2 * bn2s
    # SE linear layers in PyTorch (out, in) layout.
    fc1_w = 0.1 * jax.random.normal(ks[6], (cmid, c), jnp.float32)
    fc2_w = 0.1 * jax.random.normal(ks[7], (c, cmid), jnp.float32)
    return (w1, w2, bn1s, bn1b, bn2s, bn2b, fc1_w, fc2_w)


if __name__ == "__main__":
    # A layer2-style block of ModifiedResNet (128 = int(128 * width_factor=1)
    # channels at 16x16 spatial); SE hidden = 128 / 16 = 8.
    B, C, H, W = 2, 128, 16, 16
    key = jax.random.PRNGKey(0)
    kx, kp = jax.random.split(key)
    x = jax.random.normal(kx, (B, C, H, W), jnp.float32)   # NCHW like PyTorch
    params = make_params(kp, C, reduction=16)

    out = jax.block_until_ready(se_residual_block(x, params))
    ref = jax.block_until_ready(ref_forward(x, params))

    assert out.shape == (B, C, H, W)
    max_err = float(jnp.max(jnp.abs(out - ref)))
    assert jnp.allclose(out, ref, atol=2e-3, rtol=2e-3), max_err
    print("KERNEL_OK")
</pallas_src>

<mosaic_0001>
module attributes {stable_mosaic.version = 11 : i64} {
  func.func @se_resblock_kernel(%arg0: i32, %arg1: memref<1x18x18x128xf32, #tpu.memory_space<vmem>>, %arg2: memref<1152x128xbf16, #tpu.memory_space<vmem>>, %arg3: memref<1152x128xbf16, #tpu.memory_space<vmem>>, %arg4: memref<1x128xf32, #tpu.memory_space<vmem>>, %arg5: memref<1x128xf32, #tpu.memory_space<vmem>>, %arg6: memref<8x128xf32, #tpu.memory_space<vmem>>, %arg7: memref<8x128xf32, #tpu.memory_space<vmem>>, %arg8: memref<1x16x16x128xf32, #tpu.memory_space<vmem>>, %arg9: memref<256x1152xbf16, #tpu.memory_space<vmem>>, %arg10: memref<18x18x128xbf16, #tpu.memory_space<vmem>>) attributes {dimension_semantics = [#tpu.dimension_semantics<parallel>], iteration_bounds = array<i64: 2>, scalar_prefetch = 0 : i64, scratch_operands = 2 : i64, tpu.core_type = #tpu.core_type<tc>, window_params = [{transform_indices = @transform_0, window_bounds = array<i64: 1, 18, 18, 128>}, {pipeline_mode = #tpu.pipeline_mode<synchronous>, transform_indices = @transform_1, window_bounds = array<i64: 1152, 128>}, {pipeline_mode = #tpu.pipeline_mode<synchronous>, transform_indices = @transform_2, window_bounds = array<i64: 1152, 128>}, {pipeline_mode = #tpu.pipeline_mode<synchronous>, transform_indices = @transform_3, window_bounds = array<i64: 1, 128>}, {pipeline_mode = #tpu.pipeline_mode<synchronous>, transform_indices = @transform_4, window_bounds = array<i64: 1, 128>}, {pipeline_mode = #tpu.pipeline_mode<synchronous>, transform_indices = @transform_5, window_bounds = array<i64: 8, 128>}, {pipeline_mode = #tpu.pipeline_mode<synchronous>, transform_indices = @transform_6, window_bounds = array<i64: 8, 128>}, {transform_indices = @transform_7, window_bounds = array<i64: 1, 16, 16, 128>}]} {
    %c0 = arith.constant 0 : index
    %c0_0 = arith.constant 0 : index
    %c0_1 = arith.constant 0 : index
    %c0_2 = arith.constant 0 : index
    %0 = vector.load %arg1[%c0, %c0_0, %c0_1, %c0_2] : memref<1x18x18x128xf32, #tpu.memory_space<vmem>>, vector<1x16x16x128xf32>
    %1 = arith.truncf %0 : vector<1x16x16x128xf32> to vector<1x16x16x128xbf16>
    %2 = vector.shape_cast %1 : vector<1x16x16x128xbf16> to vector<256x128xbf16>
    %c0_3 = arith.constant 0 : index
    %c0_4 = arith.constant 0 : index
    %3 = vector.load %arg9[%c0_3, %c0_4] : memref<256x1152xbf16, #tpu.memory_space<vmem>>, vector<256x128xbf16>
    tpu.vector_store %arg9[%c0_3, %c0_4], %2 {strides = array<i32>} : memref<256x1152xbf16, #tpu.memory_space<vmem>>, vector<256x128xbf16>,
    %c0_5 = arith.constant 0 : index
    %c0_6 = arith.constant 0 : index
    %c1 = arith.constant 1 : index
    %c0_7 = arith.constant 0 : index
    %4 = vector.load %arg1[%c0_5, %c0_6, %c1, %c0_7] : memref<1x18x18x128xf32, #tpu.memory_space<vmem>>, vector<1x16x16x128xf32>
    %5 = arith.truncf %4 : vector<1x16x16x128xf32> to vector<1x16x16x128xbf16>
    %6 = vector.shape_cast %5 : vector<1x16x16x128xbf16> to vector<256x128xbf16>
    %c0_8 = arith.constant 0 : index
    %c128 = arith.constant 128 : index
    %7 = vector.load %arg9[%c0_8, %c128] : memref<256x1152xbf16, #tpu.memory_space<vmem>>, vector<256x128xbf16>
    tpu.vector_store %arg9[%c0_8, %c128], %6 {strides = array<i32>} : memref<256x1152xbf16, #tpu.memory_space<vmem>>, vector<256x128xbf16>,
    %c0_9 = arith.constant 0 : index
    %c0_10 = arith.constant 0 : index
    %c2 = arith.constant 2 : index
    %c0_11 = arith.constant 0 : index
    %8 = vector.load %arg1[%c0_9, %c0_10, %c2, %c0_11] : memref<1x18x18x128xf32, #tpu.memory_space<vmem>>, vector<1x16x16x128xf32>
    %9 = arith.truncf %8 : vector<1x16x16x128xf32> to vector<1x16x16x128xbf16>
    %10 = vector.shape_cast %9 : vector<1x16x16x128xbf16> to vector<256x128xbf16>
    %c0_12 = arith.constant 0 : index
    %c256 = arith.constant 256 : index
    %11 = vector.load %arg9[%c0_12, %c256] : memref<256x1152xbf16, #tpu.memory_space<vmem>>, vector<256x128xbf16>
    tpu.vector_store %arg9[%c0_12, %c256], %10 {strides = array<i32>} : memref<256x1152xbf16, #tpu.memory_space<vmem>>, vector<256x128xbf16>,
    %c0_13 = arith.constant 0 : index
    %c1_14 = arith.constant 1 : index
    %c0_15 = arith.constant 0 : index
    %c0_16 = arith.constant 0 : index
    %12 = vector.load %arg1[%c0_13, %c1_14, %c0_15, %c0_16] : memref<1x18x18x128xf32, #tpu.memory_space<vmem>>, vector<1x16x16x128xf32>
    %13 = arith.truncf %12 : vector<1x16x16x128xf32> to vector<1x16x16x128xbf16>
    %14 = vector.shape_cast %13 : vector<1x16x16x128xbf16> to vector<256x128xbf16>
    %c0_17 = arith.constant 0 : index
    %c384 = arith.constant 384 : index
    %15 = vector.load %arg9[%c0_17, %c384] : memref<256x1152xbf16, #tpu.memory_space<vmem>>, vector<256x128xbf16>
    tpu.vector_store %arg9[%c0_17, %c384], %14 {strides = array<i32>} : memref<256x1152xbf16, #tpu.memory_space<vmem>>, vector<256x128xbf16>,
    %c0_18 = arith.constant 0 : index
    %c1_19 = arith.constant 1 : index
    %c1_20 = arith.constant 1 : index
    %c0_21 = arith.constant 0 : index
    %16 = vector.load %arg1[%c0_18, %c1_19, %c1_20, %c0_21] : memref<1x18x18x128xf32, #tpu.memory_space<vmem>>, vector<1x16x16x128xf32>
    %17 = arith.truncf %16 : vector<1x16x16x128xf32> to vector<1x16x16x128xbf16>
    %18 = vector.shape_cast %17 : vector<1x16x16x128xbf16> to vector<256x128xbf16>
    %c0_22 = arith.constant 0 : index
    %c512 = arith.constant 512 : index
    %19 = vector.load %arg9[%c0_22, %c512] : memref<256x1152xbf16, #tpu.memory_space<vmem>>, vector<256x128xbf16>
    tpu.vector_store %arg9[%c0_22, %c512], %18 {strides = array<i32>} : memref<256x1152xbf16, #tpu.memory_space<vmem>>, vector<256x128xbf16>,
    %c0_23 = arith.constant 0 : index
    %c1_24 = arith.constant 1 : index
    %c2_25 = arith.constant 2 : index
    %c0_26 = arith.constant 0 : index
    %20 = vector.load %arg1[%c0_23, %c1_24, %c2_25, %c0_26] : memref<1x18x18x128xf32, #tpu.memory_space<vmem>>, vector<1x16x16x128xf32>
    %21 = arith.truncf %20 : vector<1x16x16x128xf32> to vector<1x16x16x128xbf16>
    %22 = vector.shape_cast %21 : vector<1x16x16x128xbf16> to vector<256x128xbf16>
    %c0_27 = arith.constant 0 : index
    %c640 = arith.constant 640 : index
    %23 = vector.load %arg9[%c0_27, %c640] : memref<256x1152xbf16, #tpu.memory_space<vmem>>, vector<256x128xbf16>
    tpu.vector_store %arg9[%c0_27, %c640], %22 {strides = array<i32>} : memref<256x1152xbf16, #tpu.memory_space<vmem>>, vector<256x128xbf16>,
    %c0_28 = arith.constant 0 : index
    %c2_29 = arith.constant 2 : index
    %c0_30 = arith.constant 0 : index
    %c0_31 = arith.constant 0 : index
    %24 = vector.load %arg1[%c0_28, %c2_29, %c0_30, %c0_31] : memref<1x18x18x128xf32, #tpu.memory_space<vmem>>, vector<1x16x16x128xf32>
    %25 = arith.truncf %24 : vector<1x16x16x128xf32> to vector<1x16x16x128xbf16>
    %26 = vector.shape_cast %25 : vector<1x16x16x128xbf16> to vector<256x128xbf16>
    %c0_32 = arith.constant 0 : index
    %c768 = arith.constant 768 : index
    %27 = vector.load %arg9[%c0_32, %c768] : memref<256x1152xbf16, #tpu.memory_space<vmem>>, vector<256x128xbf16>
    tpu.vector_store %arg9[%c0_32, %c768], %26 {strides = array<i32>} : memref<256x1152xbf16, #tpu.memory_space<vmem>>, vector<256x128xbf16>,
    %c0_33 = arith.constant 0 : index
    %c2_34 = arith.constant 2 : index
    %c1_35 = arith.constant 1 : index
    %c0_36 = arith.constant 0 : index
    %28 = vector.load %arg1[%c0_33, %c2_34, %c1_35, %c0_36] : memref<1x18x18x128xf32, #tpu.memory_space<vmem>>, vector<1x16x16x128xf32>
    %29 = arith.truncf %28 : vector<1x16x16x128xf32> to vector<1x16x16x128xbf16>
    %30 = vector.shape_cast %29 : vector<1x16x16x128xbf16> to vector<256x128xbf16>
    %c0_37 = arith.constant 0 : index
    %c896 = arith.constant 896 : index
    %31 = vector.load %arg9[%c0_37, %c896] : memref<256x1152xbf16, #tpu.memory_space<vmem>>, vector<256x128xbf16>
    tpu.vector_store %arg9[%c0_37, %c896], %30 {strides = array<i32>} : memref<256x1152xbf16, #tpu.memory_space<vmem>>, vector<256x128xbf16>,
    %c0_38 = arith.constant 0 : index
    %c2_39 = arith.constant 2 : index
    %c2_40 = arith.constant 2 : index
    %c0_41 = arith.constant 0 : index
    %32 = vector.load %arg1[%c0_38, %c2_39, %c2_40, %c0_41] : memref<1x18x18x128xf32, #tpu.memory_space<vmem>>, vector<1x16x16x128xf32>
    %33 = arith.truncf %32 : vector<1x16x16x128xf32> to vector<1x16x16x128xbf16>
    %34 = vector.shape_cast %33 : vector<1x16x16x128xbf16> to vector<256x128xbf16>
    %c0_42 = arith.constant 0 : index
    %c1024 = arith.constant 1024 : index
    %35 = vector.load %arg9[%c0_42, %c1024] : memref<256x1152xbf16, #tpu.memory_space<vmem>>, vector<256x128xbf16>
    tpu.vector_store %arg9[%c0_42, %c1024], %34 {strides = array<i32>} : memref<256x1152xbf16, #tpu.memory_space<vmem>>, vector<256x128xbf16>,
    %c0_43 = arith.constant 0 : index
    %c0_44 = arith.constant 0 : index
    %36 = vector.load %arg9[%c0_43, %c0_44] : memref<256x1152xbf16, #tpu.memory_space<vmem>>, vector<256x1152xbf16>
    %c0_45 = arith.constant 0 : index
    %c0_46 = arith.constant 0 : index
    %37 = vector.load %arg2[%c0_45, %c0_46] : memref<1152x128xbf16, #tpu.memory_space<vmem>>, vector<1152x128xbf16>
    %cst = arith.constant dense<0.000000e+00> : vector<256x128xf32>
    %38 = tpu.matmul %36, %37, %cst {dimension_numbers = #tpu.dot_dimension_numbers<[1], [0], [0], [1], [0, 0, 1, 1], [], []>} : vector<256x1152xbf16>, vector<1152x128xbf16>, vector<256x128xf32> -> vector<256x128xf32>
    %c0_47 = arith.constant 0 : index
    %c0_48 = arith.constant 0 : index
    %39 = vector.load %arg4[%c0_47, %c0_48] : memref<1x128xf32, #tpu.memory_space<vmem>>, vector<1x128xf32>
    %40 = vector.broadcast %39 : vector<1x128xf32> to vector<256x128xf32>
    %41 = arith.addf %38, %40 : vector<256x128xf32>
    %cst_49 = arith.constant 0.000000e+00 : f32
    %42 = vector.broadcast %cst_49 : f32 to vector<256x128xf32>
    %43 = arith.maximumf %41, %42 : vector<256x128xf32>
    %cst_50 = arith.constant 0.000000e+00 : bf16
    %44 = vector.broadcast %cst_50 : bf16 to vector<1x18x128xbf16>
    %cst_51 = arith.constant 0.000000e+00 : bf16
    %45 = vector.broadcast %cst_51 : bf16 to vector<18x1x128xbf16>
    %c0_52 = arith.constant 0 : index
    %c0_53 = arith.constant 0 : index
    %c0_54 = arith.constant 0 : index
    %46 = vector.load %arg10[%c0_52, %c0_53, %c0_54] : memref<18x18x128xbf16, #tpu.memory_space<vmem>>, vector<1x18x128xbf16>
    tpu.vector_store %arg10[%c0_52, %c0_53, %c0_54], %44 {strides = array<i32>} : memref<18x18x128xbf16, #tpu.memory_space<vmem>>, vector<1x18x128xbf16>,
    %c17 = arith.constant 17 : index
    %c0_55 = arith.constant 0 : index
    %c0_56 = arith.constant 0 : index
    %47 = vector.load %arg10[%c17, %c0_55, %c0_56] : memref<18x18x128xbf16, #tpu.memory_space<vmem>>, vector<1x18x128xbf16>
    tpu.vector_store %arg10[%c17, %c0_55, %c0_56], %44 {strides = array<i32>} : memref<18x18x128xbf16, #tpu.memory_space<vmem>>, vector<1x18x128xbf16>,
    %c0_57 = arith.constant 0 : index
    %c0_58 = arith.constant 0 : index
    %c0_59 = arith.constant 0 : index
    %48 = vector.load %arg10[%c0_57, %c0_58, %c0_59] : memref<18x18x128xbf16, #tpu.memory_space<vmem>>, vector<18x1x128xbf16>
    tpu.vector_store %arg10[%c0_57, %c0_58, %c0_59], %45 {strides = array<i32>} : memref<18x18x128xbf16, #tpu.memory_space<vmem>>, vector<18x1x128xbf16>,
    %c0_60 = arith.constant 0 : index
    %c17_61 = arith.constant 17 : index
    %c0_62 = arith.constant 0 : index
    %49 = vector.load %arg10[%c0_60, %c17_61, %c0_62] : memref<18x18x128xbf16, #tpu.memory_space<vmem>>, vector<18x1x128xbf16>
    tpu.vector_store %arg10[%c0_60, %c17_61, %c0_62], %45 {strides = array<i32>} : memref<18x18x128xbf16, #tpu.memory_space<vmem>>, vector<18x1x128xbf16>,
    %50 = arith.truncf %43 : vector<256x128xf32> to vector<256x128xbf16>
    %51 = vector.shape_cast %50 : vector<256x128xbf16> to vector<16x16x128xbf16>
    %c1_63 = arith.constant 1 : index
    %c1_64 = arith.constant 1 : index
    %c0_65 = arith.constant 0 : index
    %52 = vector.load %arg10[%c1_63, %c1_64, %c0_65] : memref<18x18x128xbf16, #tpu.memory_space<vmem>>, vector<16x16x128xbf16>
    tpu.vector_store %arg10[%c1_63, %c1_64, %c0_65], %51 {strides = array<i32>} : memref<18x18x128xbf16, #tpu.memory_space<vmem>>, vector<16x16x128xbf16>,
    %c0_66 = arith.constant 0 : index
    %c0_67 = arith.constant 0 : index
    %c0_68 = arith.constant 0 : index
    %53 = vector.load %arg10[%c0_66, %c0_67, %c0_68] : memref<18x18x128xbf16, #tpu.memory_space<vmem>>, vector<16x16x128xbf16>
    %54 = vector.shape_cast %53 : vector<16x16x128xbf16> to vector<256x128xbf16>
    %c0_69 = arith.constant 0 : index
    %c0_70 = arith.constant 0 : index
    %55 = vector.load %arg9[%c0_69, %c0_70] : memref<256x1152xbf16, #tpu.memory_space<vmem>>, vector<256x128xbf16>
    tpu.vector_store %arg9[%c0_69, %c0_70], %54 {strides = array<i32>} : memref<256x1152xbf16, #tpu.memory_space<vmem>>, vector<256x128xbf16>,
    %c0_71 = arith.constant 0 : index
    %c1_72 = arith.constant 1 : index
    %c0_73 = arith.constant 0 : index
    %56 = vector.load %arg10[%c0_71, %c1_72, %c0_73] : memref<18x18x128xbf16, #tpu.memory_space<vmem>>, vector<16x16x128xbf16>
    %57 = vector.shape_cast %56 : vector<16x16x128xbf16> to vector<256x128xbf16>
    %c0_74 = arith.constant 0 : index
    %c128_75 = arith.constant 128 : index
    %58 = vector.load %arg9[%c0_74, %c128_75] : memref<256x1152xbf16, #tpu.memory_space<vmem>>, vector<256x128xbf16>
    tpu.vector_store %arg9[%c0_74, %c128_75], %57 {strides = array<i32>} : memref<256x1152xbf16, #tpu.memory_space<vmem>>, vector<256x128xbf16>,
    %c0_76 = arith.constant 0 : index
    %c2_77 = arith.constant 2 : index
    %c0_78 = arith.constant 0 : index
    %59 = vector.load %arg10[%c0_76, %c2_77, %c0_78] : memref<18x18x128xbf16, #tpu.memory_space<vmem>>, vector<16x16x128xbf16>
    %60 = vector.shape_cast %59 : vector<16x16x128xbf16> to vector<256x128xbf16>
    %c0_79 = arith.constant 0 : index
    %c256_80 = arith.constant 256 : index
    %61 = vector.load %arg9[%c0_79, %c256_80] : memref<256x1152xbf16, #tpu.memory_space<vmem>>, vector<256x128xbf16>
    tpu.vector_store %arg9[%c0_79, %c256_80], %60 {strides = array<i32>} : memref<256x1152xbf16, #tpu.memory_space<vmem>>, vector<256x128xbf16>,
    %c1_81 = arith.constant 1 : index
    %c0_82 = arith.constant 0 : index
    %c0_83 = arith.constant 0 : index
    %62 = vector.load %arg10[%c1_81, %c0_82, %c0_83] : memref<18x18x128xbf16, #tpu.memory_space<vmem>>, vector<16x16x128xbf16>
    %63 = vector.shape_cast %62 : vector<16x16x128xbf16> to vector<256x128xbf16>
    %c0_84 = arith.constant 0 : index
    %c384_85 = arith.constant 384 : index
    %64 = vector.load %arg9[%c0_84, %c384_85] : memref<256x1152xbf16, #tpu.memory_space<vmem>>, vector<256x128xbf16>
    tpu.vector_store %arg9[%c0_84, %c384_85], %63 {strides = array<i32>} : memref<256x1152xbf16, #tpu.memory_space<vmem>>, vector<256x128xbf16>,
    %c1_86 = arith.constant 1 : index
    %c1_87 = arith.constant 1 : index
    %c0_88 = arith.constant 0 : index
    %65 = vector.load %arg10[%c1_86, %c1_87, %c0_88] : memref<18x18x128xbf16, #tpu.memory_space<vmem>>, vector<16x16x128xbf16>
    %66 = vector.shape_cast %65 : vector<16x16x128xbf16> to vector<256x128xbf16>
    %c0_89 = arith.constant 0 : index
    %c512_90 = arith.constant 512 : index
    %67 = vector.load %arg9[%c0_89, %c512_90] : memref<256x1152xbf16, #tpu.memory_space<vmem>>, vector<256x128xbf16>
    tpu.vector_store %arg9[%c0_89, %c512_90], %66 {strides = array<i32>} : memref<256x1152xbf16, #tpu.memory_space<vmem>>, vector<256x128xbf16>,
    %c1_91 = arith.constant 1 : index
    %c2_92 = arith.constant 2 : index
    %c0_93 = arith.constant 0 : index
    %68 = vector.load %arg10[%c1_91, %c2_92, %c0_93] : memref<18x18x128xbf16, #tpu.memory_space<vmem>>, vector<16x16x128xbf16>
    %69 = vector.shape_cast %68 : vector<16x16x128xbf16> to vector<256x128xbf16>
    %c0_94 = arith.constant 0 : index
    %c640_95 = arith.constant 640 : index
    %70 = vector.load %arg9[%c0_94, %c640_95] : memref<256x1152xbf16, #tpu.memory_space<vmem>>, vector<256x128xbf16>
    tpu.vector_store %arg9[%c0_94, %c640_95], %69 {strides = array<i32>} : memref<256x1152xbf16, #tpu.memory_space<vmem>>, vector<256x128xbf16>,
    %c2_96 = arith.constant 2 : index
    %c0_97 = arith.constant 0 : index
    %c0_98 = arith.constant 0 : index
    %71 = vector.load %arg10[%c2_96, %c0_97, %c0_98] : memref<18x18x128xbf16, #tpu.memory_space<vmem>>, vector<16x16x128xbf16>
    %72 = vector.shape_cast %71 : vector<16x16x128xbf16> to vector<256x128xbf16>
    %c0_99 = arith.constant 0 : index
    %c768_100 = arith.constant 768 : index
    %73 = vector.load %arg9[%c0_99, %c768_100] : memref<256x1152xbf16, #tpu.memory_space<vmem>>, vector<256x128xbf16>
    tpu.vector_store %arg9[%c0_99, %c768_100], %72 {strides = array<i32>} : memref<256x1152xbf16, #tpu.memory_space<vmem>>, vector<256x128xbf16>,
    %c2_101 = arith.constant 2 : index
    %c1_102 = arith.constant 1 : index
    %c0_103 = arith.constant 0 : index
    %74 = vector.load %arg10[%c2_101, %c1_102, %c0_103] : memref<18x18x128xbf16, #tpu.memory_space<vmem>>, vector<16x16x128xbf16>
    %75 = vector.shape_cast %74 : vector<16x16x128xbf16> to vector<256x128xbf16>
    %c0_104 = arith.constant 0 : index
    %c896_105 = arith.constant 896 : index
    %76 = vector.load %arg9[%c0_104, %c896_105] : memref<256x1152xbf16, #tpu.memory_space<vmem>>, vector<256x128xbf16>
    tpu.vector_store %arg9[%c0_104, %c896_105], %75 {strides = array<i32>} : memref<256x1152xbf16, #tpu.memory_space<vmem>>, vector<256x128xbf16>,
    %c2_106 = arith.constant 2 : index
    %c2_107 = arith.constant 2 : index
    %c0_108 = arith.constant 0 : index
    %77 = vector.load %arg10[%c2_106, %c2_107, %c0_108] : memref<18x18x128xbf16, #tpu.memory_space<vmem>>, vector<16x16x128xbf16>
    %78 = vector.shape_cast %77 : vector<16x16x128xbf16> to vector<256x128xbf16>
    %c0_109 = arith.constant 0 : index
    %c1024_110 = arith.constant 1024 : index
    %79 = vector.load %arg9[%c0_109, %c1024_110] : memref<256x1152xbf16, #tpu.memory_space<vmem>>, vector<256x128xbf16>
    tpu.vector_store %arg9[%c0_109, %c1024_110], %78 {strides = array<i32>} : memref<256x1152xbf16, #tpu.memory_space<vmem>>, vector<256x128xbf16>,
    %c0_111 = arith.constant 0 : index
    %c0_112 = arith.constant 0 : index
    %80 = vector.load %arg9[%c0_111, %c0_112] : memref<256x1152xbf16, #tpu.memory_space<vmem>>, vector<256x1152xbf16>
    %c0_113 = arith.constant 0 : index
    %c0_114 = arith.constant 0 : index
    %81 = vector.load %arg3[%c0_113, %c0_114] : memref<1152x128xbf16, #tpu.memory_space<vmem>>, vector<1152x128xbf16>
    %cst_115 = arith.constant dense<0.000000e+00> : vector<256x128xf32>
    %82 = tpu.matmul %80, %81, %cst_115 {dimension_numbers = #tpu.dot_dimension_numbers<[1], [0], [0], [1], [0, 0, 1, 1], [], []>} : vector<256x1152xbf16>, vector<1152x128xbf16>, vector<256x128xf32> -> vector<256x128xf32>
    %c0_116 = arith.constant 0 : index
    %c0_117 = arith.constant 0 : index
    %83 = vector.load %arg5[%c0_116, %c0_117] : memref<1x128xf32, #tpu.memory_space<vmem>>, vector<1x128xf32>
    %84 = vector.broadcast %83 : vector<1x128xf32> to vector<256x128xf32>
    %85 = arith.addf %82, %84 : vector<256x128xf32>
    %cst_118 = arith.constant dense<0.000000e+00> : vector<128xf32>
    %86 = vector.multi_reduction <add>, %85, %cst_118 [0] : vector<256x128xf32> to vector<128xf32>
    %87 = vector.shape_cast %86 : vector<128xf32> to vector<1x128xf32>
    %cst_119 = arith.constant 2.560000e+02 : f32
    %88 = vector.broadcast %cst_119 : f32 to vector<1x128xf32>
    %89 = arith.divf %87, %88 : vector<1x128xf32>
    %c0_120 = arith.constant 0 : index
    %c0_121 = arith.constant 0 : index
    %90 = vector.load %arg6[%c0_120, %c0_121] : memref<8x128xf32, #tpu.memory_space<vmem>>, vector<8x128xf32>
    %91 = vector.broadcast %89 : vector<1x128xf32> to vector<8x128xf32>
    %92 = arith.mulf %90, %91 : vector<8x128xf32>
    %cst_122 = arith.constant dense<0.000000e+00> : vector<8xf32>
    %93 = vector.multi_reduction <add>, %92, %cst_122 [1] : vector<8x128xf32> to vector<8xf32>
    %94 = vector.shape_cast %93 : vector<8xf32> to vector<8x1xf32>
    %cst_123 = arith.constant 0.000000e+00 : f32
    %95 = vector.broadcast %cst_123 : f32 to vector<8x1xf32>
    %96 = arith.maximumf %94, %95 : vector<8x1xf32>
    %c0_124 = arith.constant 0 : index
    %c0_125 = arith.constant 0 : index
    %97 = vector.load %arg7[%c0_124, %c0_125] : memref<8x128xf32, #tpu.memory_space<vmem>>, vector<8x128xf32>
    %98 = vector.broadcast %96 : vector<8x1xf32> to vector<8x128xf32>
    %99 = arith.mulf %97, %98 : vector<8x128xf32>
    %cst_126 = arith.constant dense<0.000000e+00> : vector<128xf32>
    %100 = vector.multi_reduction <add>, %99, %cst_126 [0] : vector<8x128xf32> to vector<128xf32>
    %101 = vector.shape_cast %100 : vector<128xf32> to vector<1x128xf32>
    %102 = arith.negf %101 : vector<1x128xf32>
    %103 = math.exp %102 : vector<1x128xf32>
    %cst_127 = arith.constant 1.000000e+00 : f32
    %104 = vector.broadcast %cst_127 : f32 to vector<1x128xf32>
    %105 = arith.addf %104, %103 : vector<1x128xf32>
    %106 = arith.divf %104, %105 : vector<1x128xf32>
    %c0_128 = arith.constant 0 : index
    %c1_129 = arith.constant 1 : index
    %c1_130 = arith.constant 1 : index
    %c0_131 = arith.constant 0 : index
    %107 = vector.load %arg1[%c0_128, %c1_129, %c1_130, %c0_131] : memref<1x18x18x128xf32, #tpu.memory_space<vmem>>, vector<1x16x16x128xf32>
    %108 = vector.shape_cast %107 : vector<1x16x16x128xf32> to vector<256x128xf32>
    %109 = vector.broadcast %106 : vector<1x128xf32> to vector<256x128xf32>
    %110 = arith.mulf %85, %109 : vector<256x128xf32>
    %111 = arith.addf %110, %108 : vector<256x128xf32>
    %cst_132 = arith.constant 0.000000e+00 : f32
    %112 = vector.broadcast %cst_132 : f32 to vector<256x128xf32>
    %113 = arith.maximumf %111, %112 : vector<256x128xf32>
    %114 = vector.shape_cast %113 : vector<256x128xf32> to vector<1x16x16x128xf32>
    %c0_133 = arith.constant 0 : index
    %c0_134 = arith.constant 0 : index
    %c0_135 = arith.constant 0 : index
    %c0_136 = arith.constant 0 : index
    %115 = vector.load %arg8[%c0_133, %c0_134, %c0_135, %c0_136] : memref<1x16x16x128xf32, #tpu.memory_space<vmem>>, vector<1x16x16x128xf32>
    tpu.vector_store %arg8[%c0_133, %c0_134, %c0_135, %c0_136], %114 {strides = array<i32>} : memref<1x16x16x128xf32, #tpu.memory_space<vmem>>, vector<1x16x16x128xf32>,
    return
  }
  func.func @transform_0(%arg0: i32) -> (i32, i32, i32, i32) {
    %c0_i32 = arith.constant 0 : i32
    %c0_i32_0 = arith.constant 0 : i32
    %c0_i32_1 = arith.constant 0 : i32
    %c0_i32_2 = arith.constant 0 : i32
    return %arg0, %c0_i32, %c0_i32_0, %c0_i32_1 : i32, i32, i32, i32
  }
  func.func @transform_1(%arg0: i32) -> (i32, i32) {
    %c0_i32 = arith.constant 0 : i32
    %c0_i32_0 = arith.constant 0 : i32
    %c0_i32_1 = arith.constant 0 : i32
    return %c0_i32, %c0_i32_0 : i32, i32
  }
  func.func @transform_2(%arg0: i32) -> (i32, i32) {
    %c0_i32 = arith.constant 0 : i32
    %c0_i32_0 = arith.constant 0 : i32
    %c0_i32_1 = arith.constant 0 : i32
    return %c0_i32, %c0_i32_0 : i32, i32
  }
  func.func @transform_3(%arg0: i32) -> (i32, i32) {
    %c0_i32 = arith.constant 0 : i32
    %c0_i32_0 = arith.constant 0 : i32
    %c0_i32_1 = arith.constant 0 : i32
    return %c0_i32, %c0_i32_0 : i32, i32
  }
  func.func @transform_4(%arg0: i32) -> (i32, i32) {
    %c0_i32 = arith.constant 0 : i32
    %c0_i32_0 = arith.constant 0 : i32
    %c0_i32_1 = arith.constant 0 : i32
    return %c0_i32, %c0_i32_0 : i32, i32
  }
  func.func @transform_5(%arg0: i32) -> (i32, i32) {
    %c0_i32 = arith.constant 0 : i32
    %c0_i32_0 = arith.constant 0 : i32
    %c0_i32_1 = arith.constant 0 : i32
    return %c0_i32, %c0_i32_0 : i32, i32
  }
  func.func @transform_6(%arg0: i32) -> (i32, i32) {
    %c0_i32 = arith.constant 0 : i32
    %c0_i32_0 = arith.constant 0 : i32
    %c0_i32_1 = arith.constant 0 : i32
    return %c0_i32, %c0_i32_0 : i32, i32
  }
  func.func @transform_7(%arg0: i32) -> (i32, i32, i32, i32) {
    %c0_i32 = arith.constant 0 : i32
    %c0_i32_0 = arith.constant 0 : i32
    %c0_i32_1 = arith.constant 0 : i32
    %c0_i32_2 = arith.constant 0 : i32
    return %arg0, %c0_i32, %c0_i32_0, %c0_i32_1 : i32, i32, i32, i32
  }
}

</mosaic_0001>

<bundles_post_ra>
// kernel: tpu_custom_call.1
= control target key start
LH: loop header
LB: loop body
LE: loop exit
PB: predicated region body
PF: predicated region fallthrough
CT: control target
= control target key end

     0   :  { %12 = vsyncpa [#allocation5], 0  ;;  %s12586_s0 = inlined_call_operand.vmem [shape: f32[2,18,18,128], index: 0, kind: input, shape index: {}]   ;;  %s12587_s1 = inlined_call_operand.vmem [shape: bf16[1152,128], index: 1, kind: input, shape index: {}]   ;;  %s12588_s2 = inlined_call_operand.vmem [shape: bf16[1152,128], index: 2, kind: input, shape index: {}]   ;;  %s12589_s3 = inlined_call_operand.vmem [shape: f32[1,128], index: 3, kind: input, shape index: {}]   ;;  %s12590_s4 = inlined_call_operand.vmem [shape: f32[1,128], index: 4, kind: input, shape index: {}]   ;;  %s12591_s5 = inlined_call_operand.vmem [shape: f32[8,128], index: 5, kind: input, shape index: {}]   ;;  %s12592_s6 = inlined_call_operand.vmem [shape: f32[8,128], index: 6, kind: input, shape index: {}]   ;;  %s12593_s7 = inlined_call_operand.hbm [shape: f32[2,16,16,128], index: 7, kind: output, shape index: {}]  }
   0x1   :  { %14 = vsyncpa [#allocation5 + $0x1], 0  ;;  %s9765_s24 = smov 0   ;;  %s9767_s25 = smov 0  }
   0x2   :  { %s9769_s26 = smov 0   ;;  %s9771_s27 = smov 0  }
   0x3 LB: > { %s9786_s28 = sadd.s32 4294967295, %s9719_s27   ;;  %s7738_s29 = sadd.s32 4294967294, %s9719_s27   ;;  %s9719_s27 = sphi %s9771_s27, %s12633_s27   ;;  %s9715_s26 = sphi %s9769_s26, %s12632_s26   ;;  %s9711_s25 = sphi %s9767_s25, %s12631_s25   ;;  %s9707_s24 = sphi %s9765_s24, %s12630_s24  }
   0x4   : > { %s9790_s30 = sadd.s32 1, %s9719_s27   ;;  %s179_s8 = sadd.s32 1, %s9715_s26 }
   0x5   : > { %s176_s9 = ssub.s32 %s9719_s27, %s9790_s30  ;;  %p189_p0 = scmp.ne.s32.totalorder %s9715_s26, %s9711_s25 }
   0x6   : > { %p177_p1 = scmp.eq.s32.totalorder %s176_s9, 0  ;;  %p190_p2 = scmp.eq.s32.totalorder %s9786_s28, 1 }
   0x7   : > { %p195_p3 = scmp.ne.s32.totalorder %s9711_s25, %s9707_s24  ;;  %p196_p4 = scmp.eq.s32.totalorder %s7738_s29, 1 }
   0x8   : > { %s9801_s10 = scalar_select %p177_p1, %s9715_s26, %s179_s8  }
   0x9   : > { %p9803_p5 = por %p190_p2, %p189_p0  ;;  %p9807_p6 = por %p196_p4, %p195_p3 }
   0xa   : > { %p7741_p7 = scmp.ge.s32.totalorder %s9719_s27, 1  ;;  %p240_p8 = scmp.lt.s32.totalorder %s9719_s27, 3 }
   0xc   : > { %p241_p9 = pnand %p7741_p7, %p240_p8 }
   0xe   : > { %244 = sbr.rel (%p241_p9) target bundleno = 1403 (0x57b), region = 48 }
  0x15   : > { %v9460_v0 = vld [vmem:[%s12587_s1 + $0x40] sm:$0xff]   ;;  %v9464_v4 = vld [vmem:[%s12587_s1 + $0x48] sm:$0xff]   ;;  %v9468_v8 = vld [vmem:[%s12587_s1 + $0x50] sm:$0xff]   ;;  %p272_p10 = scmp.lt.s32.totalorder %s9786_s28, 1  ;;  %vm2427_vm0 = vcmask 1040384   ;;  %vm3828_vm8 = vcmask 1042432  }
  0x16   : > { %v9461_v1 = vld [vmem:[%s12587_s1] sm:$0xff]   ;;  %8377 = vmatprep.subr.bf16.mxu0 %v9460_v0  ;;  %v9465_v5 = vld [vmem:[%s12587_s1 + $0x8] sm:$0xff]   ;;  %v9469_v9 = vld [vmem:[%s12587_s1 + $0x10] sm:$0xff]   ;;  %vm2428_vm1 = vsmask.f32 256  ;;  %vm3829_vm9 = vcmask 1046532  }
  0x17   : > { %v9462_v2 = vld [vmem:[%s12587_s1 + $0xc0] sm:$0xff]   ;;  %8378 = vmatpush3.bf16.msra.mxu0 %v9461_v1  ;;  %v9466_v6 = vld [vmem:[%s12587_s1 + $0xc8] sm:$0xff]   ;;  %v9470_v10 = vld [vmem:[%s12587_s1 + $0xd0] sm:$0xff]   ;;  %s273_s13 = scalar_select %p272_p10, %s9786_s28, 1  ;;  %vm2484_vm3 = vsmask.f32 7938 }
  0x18   : > { %v9463_v3 = vld [vmem:[%s12587_s1 + $0x80] sm:$0xff]   ;;  %8489 = vmatprep.subr.bf16.mxu1 %v9462_v2  ;;  %8379 = vmatprep.subr.bf16.mxu0 %v9464_v4  ;;  %v9467_v7 = vld [vmem:[%s12587_s1 + $0x88] sm:$0xff]   ;;  %v9471_v11 = vld [vmem:[%s12587_s1 + $0x90] sm:$0xff]   ;;  %vm3265_vm5 = vsmask.f32 3328  ;;  %vm2959_vm11 = vcmask 1043456  }
  0x19   : > { %8490 = vmatpush3.bf16.msra.mxu1 %v9463_v3  ;;  %v9472_v12 = vld [vmem:[%s12587_s1 + $0x58] sm:$0xff]   ;;  %v9476_v16 = vld [vmem:[%s12587_s1 + $0x60] sm:$0xff]   ;;  %v9480_v20 = vld [vmem:[%s12587_s1 + $0x68] sm:$0xff]   ;;  %s9417_s22 = smul.u32 432, %s273_s13  ;;  %vm3266_vm6 = vsmask.f32 7440 }
  0x1a   : > { %8491 = vmatprep.subr.bf16.mxu1 %v9466_v6  ;;  %v9473_v13 = vld [vmem:[%s12587_s1 + $0x18] sm:$0xff]   ;;  %v9477_v17 = vld [vmem:[%s12587_s1 + $0x20] sm:$0xff]   ;;  %v9481_v21 = vld [vmem:[%s12587_s1 + $0x28] sm:$0xff]   ;;  %vm2636_vm12 = vsmask.f32 4368  ;;  %s269_s9 = sand.u32 1, %s9711_s25  }
  0x1b   : > { %8380 = vmatpush3.bf16.msra.mxu0 %v9465_v5  ;;  %v9474_v14 = vld [vmem:[%s12587_s1 + $0xd8] sm:$0xff]   ;;  %v9478_v18 = vld [vmem:[%s12587_s1 + $0xe0] sm:$0xff]   ;;  %v9482_v22 = vld [vmem:[%s12587_s1 + $0xe8] sm:$0xff]   ;;  %s9905_s19 = scalar_lea.vmem %s12586_s0, %s9417_s22  ;;  %s12442_s14 = sshll.u32 %s269_s9, 8 }
  0x1c   : > { %8381 = vmatprep.subr.bf16.mxu0 %v9468_v8  ;;  %v9475_v15 = vld [vmem:[%s12587_s1 + $0x98] sm:$0xff]   ;;  %v9479_v19 = vld [vmem:[%s12587_s1 + $0xa0] sm:$0xff]   ;;  %v9483_v23 = vld [vmem:[%s12587_s1 + $0xa8] sm:$0xff]   ;;  %s8376_s15 = sshll.u32 %s9786_s28, 12  ;;  %s12545_s18 = scalar_lea.sflag [#allocation5], %s269_s9 }
  0x1d   : > { %8492 = vmatpush3.bf16.msra.mxu1 %v9467_v7  ;;  %v9484_v24 = vld [vmem:[%s12587_s1 + $0x70] sm:$0xff]   ;;  %v9488_v28 = vld [vmem:[%s12587_s1 + $0x78] sm:$0xff]   ;;  %v342_v31 = vld [vmem:[%s9905_s19 + $0x1] sm:$0xff]  ;;  %s12523_s13 = scalar_lea.hbm %s12593_s7, %s8376_s15  ;;  %s9722_s21 = smov [#allocation4]  }
  0x1e   : > { %8493 = vmatprep.subr.bf16.mxu1 %v9470_v10  ;;  %v9485_v25 = vld [vmem:[%s12587_s1 + $0x30] sm:$0xff]   ;;  %v9489_v29 = vld [vmem:[%s12587_s1 + $0x38] sm:$0xff]   ;;  %v278_v35 = vld [vmem:[%s9905_s19] sm:$0xff]  ;;  %s9661_s23 = sshll.u32 %s9722_s21, 4  ;;  %s9662_s23 = int_to_ptr.vmem [resolvable:$false] %s9661_s23 }
  0x1f   : > { %8382 = vmatpush3.bf16.msra.mxu0 %v9469_v9  ;;  %v9486_v26 = vld [vmem:[%s12587_s1 + $0xf0] sm:$0xff]   ;;  %v9490_v30 = vld [vmem:[%s12587_s1 + $0xf8] sm:$0xff]   ;;  %v279_v36 = vld [vmem:[%s9905_s19 + $0x8] sm:$0xff]  ;;  %s9663_s29 = scalar_lea.vmem %s9662_s23, 8192 }
  0x20   : > { %8383 = vmatprep.subr.bf16.mxu0 %v9472_v12  ;;  %v9487_v27 = vld [vmem:[%s12587_s1 + $0xb0] sm:$0xff]   ;;  %v9491_v34 = vld [vmem:[%s12587_s1 + $0xb8] sm:$0xff]   ;;  %v310_v37 = vpack.c.bf16 %v279_v36, %v278_v35  ;;  %v9492_v38 = vld [vmem:[%s12587_s1 + $0x140] sm:$0xff]  }
  0x21   : > { %8494 = vmatpush3.bf16.msra.mxu1 %v9471_v11  ;;  %v343_v32 = vld [vmem:[%s9905_s19 + $0x9] sm:$0xff]  ;;  %v7744_v39 = vld [vmem:[%s9905_s19 + $0x18] sm:$0xff]  ;;  %v7745_v40 = vld [vmem:[%s9905_s19 + $0x20] sm:$0xff] }
  0x22   : > { %8495 = vmatprep.subr.bf16.mxu1 %v9474_v14  ;;  %v374_v33 = vpack.c.bf16 %v343_v32, %v342_v31  ;;  %v503_v41 = vpack.c.bf16 %v7745_v40, %v7744_v39  ;;  %v9493_v42 = vld [vmem:[%s12587_s1 + $0x100] sm:$0xff]   ;;  %v407_v44 = vld [vmem:[%s9905_s19 + $0xa] sm:$0xff]  ;;  %v7747_v49 = vld [vmem:[%s9905_s19 + $0x38] sm:$0xff] }
  0x23   : > { %8384 = vmatpush3.bf16.msra.mxu0 %v9473_v13  ;;  %v406_v43 = vld [vmem:[%s9905_s19 + $0x2] sm:$0xff]  ;;  %v344_v45 = vld [vmem:[%s9905_s19 + $0x19] sm:$0xff]  ;;  %v7746_v48 = vld [vmem:[%s9905_s19 + $0x30] sm:$0xff] }
  0x24   : > { %8385 = vmatprep.subr.bf16.mxu0 %v9476_v16  ;;  %1615 = vmatprep.mubr.bf16.mxu0 %v374_v33  ;;  %v438_v46 = vpack.c.bf16 %v407_v44, %v406_v43  ;;  %v345_v47 = vld [vmem:[%s9905_s19 + $0x21] sm:$0xff]  ;;  %v9936_v51 = vpack.c.bf16 %v7747_v49, %v7746_v48  ;;  %v346_v54 = vld [vmem:[%s9905_s19 + $0x31] sm:$0xff]  ;;  %v347_v55 = vld [vmem:[%s9905_s19 + $0x39] sm:$0xff] }
  0x25   : > { %8496 = vmatpush3.bf16.msra.mxu1 %v9475_v15  ;;  %1776 = vmatprep.mubr.bf16.mxu1 %v503_v41  ;;  %v9934_v50 = vpack.c.bf16 %v345_v47, %v344_v45  ;;  %v408_v52 = vld [vmem:[%s9905_s19 + $0x1a] sm:$0xff]  ;;  %v409_v53 = vld [vmem:[%s9905_s19 + $0x22] sm:$0xff]  ;;  %v7749_v58 = vld [vmem:[%s9905_s19 + $0x50] sm:$0xff]  ;;  %v9949_v59 = vpack.c.bf16 %v347_v55, %v346_v54 }
  0x26   : > { %8497 = vmatprep.subr.bf16.mxu1 %v9478_v18  ;;  %v9494_v56 = vld [vmem:[%s12587_s1 + $0x148] sm:$0xff]   ;;  %v9954_v61 = vpack.c.bf16 %v409_v53, %v408_v52  ;;  %v349_v0 = vld [vmem:[%s9905_s19 + $0x51] sm:$0xff]  ;;  %v411_v4 = vld [vmem:[%s9905_s19 + $0x3a] sm:$0xff] }
  0x27   : > { %8386 = vmatpush3.bf16.msra.mxu0 %v9477_v17  ;;  %v7748_v57 = vld [vmem:[%s9905_s19 + $0x48] sm:$0xff]  ;;  %v9496_v1 = vld [vmem:[%s12587_s1 + $0x150] sm:$0xff]   ;;  %v7750_v6 = vld [vmem:[%s9905_s19 + $0x60] sm:$0xff] }
  0x28   : > { %8387 = vmatprep.subr.bf16.mxu0 %v9480_v20  ;;  %v9495_v60 = vld [vmem:[%s12587_s1 + $0x108] sm:$0xff]   ;;  %v9956_v62 = vpack.c.bf16 %v7749_v58, %v7748_v57  ;;  %v9497_v2 = vld [vmem:[%s12587_s1 + $0x110] sm:$0xff]   ;;  %v9498_v10 = vld [vmem:[%s12587_s1 + $0x158] sm:$0xff]  }
  0x29   : > { %8498 = vmatpush3.bf16.msra.mxu1 %v9479_v19  ;;  %v348_v63 = vld [vmem:[%s9905_s19 + $0x49] sm:$0xff]  ;;  %v410_v3 = vld [vmem:[%s9905_s19 + $0x32] sm:$0xff]  ;;  %v350_v12 = vld [vmem:[%s9905_s19 + $0x61] sm:$0xff] }
  0x2a   : > { %8499 = vmatprep.subr.bf16.mxu1 %v9482_v22  ;;  %v9971_v5 = vpack.c.bf16 %v349_v0, %v348_v63  ;;  %v7751_v7 = vld [vmem:[%s9905_s19 + $0x68] sm:$0xff]  ;;  %v9975_v8 = vpack.c.bf16 %v411_v4, %v410_v3  ;;  %v9499_v11 = vld [vmem:[%s12587_s1 + $0x118] sm:$0xff]   ;;  %v7753_v18 = vld [vmem:[%s9905_s19 + $0x80] sm:$0xff] }
  0x2b   : > { %8388 = vmatpush3.bf16.msra.mxu0 %v9481_v21  ;;  %v9978_v9 = vpack.c.bf16 %v7751_v7, %v7750_v6  ;;  %v351_v13 = vld [vmem:[%s9905_s19 + $0x69] sm:$0xff]  ;;  %v413_v15 = vld [vmem:[%s9905_s19 + $0x52] sm:$0xff]  ;;  %v9500_v19 = vld [vmem:[%s12587_s1 + $0x160] sm:$0xff]  }
  0x2c   : > { %8389 = vmatprep.subr.bf16.mxu0 %v9484_v24  ;;  %v412_v14 = vld [vmem:[%s9905_s19 + $0x4a] sm:$0xff]  ;;  %v7752_v16 = vld [vmem:[%s9905_s19 + $0x78] sm:$0xff]  ;;  %v9994_v17 = vpack.c.bf16 %v351_v13, %v350_v12  ;;  %v9501_v21 = vld [vmem:[%s12587_s1 + $0x120] sm:$0xff]  }
  0x2d   : > { %8500 = vmatpush3.bf16.msra.mxu1 %v9483_v23  ;;  %v10000_v20 = vpack.c.bf16 %v413_v15, %v412_v14  ;;  %v10006_v22 = vpack.c.bf16 %v7753_v18, %v7752_v16  ;;  %v414_v23 = vld [vmem:[%s9905_s19 + $0x62] sm:$0xff]  ;;  %v352_v24 = vld [vmem:[%s9905_s19 + $0x79] sm:$0xff]  ;;  %v354_v36 = vld [vmem:[%s9905_s19 + $0x91] sm:$0xff] }
  0x2e   : > { %8501 = vmatprep.subr.bf16.mxu1 %v9486_v26  ;;  %v415_v26 = vld [vmem:[%s9905_s19 + $0x6a] sm:$0xff]  ;;  %v417_v35 = vld [vmem:[%s9905_s19 + $0x82] sm:$0xff]  ;;  %v418_v49 = vld [vmem:[%s9905_s19 + $0x92] sm:$0xff] }
  0x2f   : > { %8390 = vmatpush3.bf16.msra.mxu0 %v9485_v25  ;;  %v353_v25 = vld [vmem:[%s9905_s19 + $0x81] sm:$0xff]  ;;  %v10025_v32 = vpack.c.bf16 %v415_v26, %v414_v23  ;;  %v9505_v39 = vld [vmem:[%s12587_s1 + $0x130] sm:$0xff]   ;;  %v9512_v63 = vld [vmem:[%s12587_s1 + $0x1d8] sm:$0xff]  }
  0x30   : > { %8391 = vmatprep.subr.bf16.mxu0 %v9488_v28  ;;  %v7755_v28 = vld [vmem:[%s9905_s19 + $0x98] sm:$0xff]  ;;  %v9503_v31 = vld [vmem:[%s12587_s1 + $0x128] sm:$0xff]   ;;  %v9506_v43 = vld [vmem:[%s12587_s1 + $0x1c0] sm:$0xff]  }
  0x31   : > { %8502 = vmatpush3.bf16.msra.mxu1 %v9487_v27  ;;  %v7754_v27 = vld [vmem:[%s9905_s19 + $0x90] sm:$0xff]  ;;  %v7756_v40 = vld [vmem:[%s9905_s19 + $0xa8] sm:$0xff]  ;;  %v9507_v44 = vld [vmem:[%s12587_s1 + $0x180] sm:$0xff]  }
  0x32   : > { %8503 = vmatprep.subr.bf16.mxu1 %v9490_v30  ;;  %v10020_v30 = vpack.c.bf16 %v353_v25, %v352_v24  ;;  %v10028_v33 = vpack.c.bf16 %v7755_v28, %v7754_v27  ;;  %v9509_v48 = vld [vmem:[%s12587_s1 + $0x188] sm:$0xff]   ;;  %v419_v52 = vld [vmem:[%s9905_s19 + $0x9a] sm:$0xff]  ;;  %v357_v54 = vld [vmem:[%s9905_s19 + $0xb1] sm:$0xff] }
  0x33   : > { %8392 = vmatpush3.bf16.msra.mxu0 %v9489_v29  ;;  %v9502_v29 = vld [vmem:[%s12587_s1 + $0x168] sm:$0xff]   ;;  %v7758_v55 = vld [vmem:[%s9905_s19 + $0xc0] sm:$0xff]  ;;  %v9511_v57 = vld [vmem:[%s12587_s1 + $0x190] sm:$0xff]   ;;  %v10084_v0 = vpack.c.bf16 %v419_v52, %v418_v49 }
  0x34   : > { %8601 = vmatprep.subr.bf16.mxu0 %v9492_v38  ;;  %v9504_v38 = vld [vmem:[%s12587_s1 + $0x170] sm:$0xff]   ;;  %v9514_v3 = vld [vmem:[%s12587_s1 + $0x178] sm:$0xff]   ;;  %v9516_v13 = vld [vmem:[%s12587_s1 + $0x1e0] sm:$0xff]  }
  0x35   : > { %8504 = vmatpush3.bf16.msra.mxu1 %v9491_v34  ;;  %v416_v34 = vld [vmem:[%s9905_s19 + $0x7a] sm:$0xff]  ;;  %v356_v53 = vld [vmem:[%s9905_s19 + $0xa9] sm:$0xff]  ;;  %v421_v7 = vld [vmem:[%s9905_s19 + $0xb2] sm:$0xff] }
  0x36   : > { %1616 = vmatmul.mubr.bf16.vlgmr.msra.gmra.mrb[0].mxu0 %v310_v37  ;;  %v355_v37 = vld [vmem:[%s9905_s19 + $0x99] sm:$0xff]  ;;  %v10053_v45 = vpack.c.bf16 %v417_v35, %v416_v34  ;;  %8713 = vmatprep.subr.bf16.mxu1 %v9506_v43  ;;  %v10078_v58 = vpack.c.bf16 %v357_v54, %v356_v53  ;;  %v420_v6 = vld [vmem:[%s9905_s19 + $0xaa] sm:$0xff]  ;;  %v422_v26 = vld [vmem:[%s9905_s19 + $0xc2] sm:$0xff] }
  0x37   : > { %8602 = vmatpush3.bf16.msra.mxu0 %v9493_v42  ;;  %1623 = vmatprep.mubr.bf16.mxu0 %v9934_v50  ;;  %v10045_v42 = vpack.c.bf16 %v355_v37, %v354_v36  ;;  %v9515_v4 = vld [vmem:[%s12587_s1 + $0x138] sm:$0xff]   ;;  %v9517_v14 = vld [vmem:[%s12587_s1 + $0x1a0] sm:$0xff]   ;;  %v9518_v18 = vld [vmem:[%s12587_s1 + $0x1e8] sm:$0xff]  }
  0x38   : > { %1777 = vmatmul.mubr.bf16.vlgmr.msra.gmra.mrb[0].mxu1 %v438_v46  ;;  %8603 = vmatprep.subr.bf16.mxu0 %v9494_v56  ;;  %v9508_v46 = vld [vmem:[%s12587_s1 + $0x1c8] sm:$0xff]   ;;  %v9510_v56 = vld [vmem:[%s12587_s1 + $0x1d0] sm:$0xff]   ;;  %v7760_v12 = vld [vmem:[%s9905_s19 + $0xd8] sm:$0xff] }
  0x39   : > { %1784 = vmatprep.mubr.bf16.mxu1 %v9936_v51  ;;  %8714 = vmatpush3.bf16.msra.mxu1 %v9507_v44  ;;  %v7761_v16 = vld [vmem:[%s9905_s19 + $0xe0] sm:$0xff]  ;;  %v9519_v24 = vld [vmem:[%s12587_s1 + $0x1a8] sm:$0xff]   ;;  %v9520_v25 = vld [vmem:[%s12587_s1 + $0x1f0] sm:$0xff]  }
  0x3a   : > { %8715 = vmatprep.subr.bf16.mxu1 %v9508_v46  ;;  %v360_v23 = vld [vmem:[%s9905_s19 + $0xd9] sm:$0xff]  ;;  %v423_v27 = vld [vmem:[%s9905_s19 + $0xca] sm:$0xff]  ;;  %v361_v28 = vld [vmem:[%s9905_s19 + $0xe1] sm:$0xff] }
  0x3b   : > { %8604 = vmatpush3.bf16.msra.mxu0 %v9495_v60  ;;  %v7759_v60 = vld [vmem:[%s9905_s19 + $0xc8] sm:$0xff]  ;;  %v9521_v34 = vld [vmem:[%s12587_s1 + $0x1b0] sm:$0xff]   ;;  %v9522_v35 = vld [vmem:[%s12587_s1 + $0x1f8] sm:$0xff]   ;;  %v10144_v36 = vpack.c.bf16 %v361_v28, %v360_v23 }
  0x3c   : > { %8605 = vmatprep.subr.bf16.mxu0 %v9496_v1  ;;  %v10087_v1 = vpack.c.bf16 %v7759_v60, %v7758_v55  ;;  %v10149_v37 = vld [vmem:[%s12587_s1 + $0x200] sm:$0xff]   ;;  %v7765_v49 = vld [vmem:[%s9905_s19 + $0x110] sm:$0xff]  ;;  %vm10551_vm2 = vmand %vm2427_vm0, %vm2428_vm1 }
  0x3d   : > { %8716 = vmatpush3.bf16.msra.mxu1 %v9509_v48  ;;  %v363_v43 = vld [vmem:[%s9905_s19 + $0xf9] sm:$0xff]  ;;  %v425_v46 = vld [vmem:[%s9905_s19 + $0xe2] sm:$0xff]  ;;  %v7770_v28 = vld [vmem:[%s9905_s19 + $0x150] sm:$0xff] }
  0x3e   : > { %1624 = vmatmul.mubr.bf16.gmra.mrb[4].mxu0 %v503_v41  ;;  %v7757_v41 = vld [vmem:[%s9905_s19 + $0xb0] sm:$0xff]  ;;  %8717 = vmatprep.subr.bf16.mxu1 %v9510_v56  ;;  %v424_v44 = vld [vmem:[%s9905_s19 + $0xda] sm:$0xff]  ;;  %v7764_v48 = vld [vmem:[%s9905_s19 + $0x108] sm:$0xff] }
  0x3f   : > { %1631 = vmatprep.mubr.bf16.mxu0 %v9949_v59  ;;  %8606 = vmatpush3.bf16.msra.mxu0 %v9497_v2  ;;  %v10059_v47 = vpack.c.bf16 %v7757_v41, %v7756_v40  ;;  %v9513_v2 = vld [vmem:[%s12587_s1 + $0x198] sm:$0xff]   ;;  %v10171_v53 = vpack.c.bf16 %v425_v46, %v424_v44  ;;  %v10174_v54 = vpack.c.bf16 %v7765_v49, %v7764_v48  ;;  %v364_v55 = vld [vmem:[%s9905_s19 + $0x109] sm:$0xff]  ;;  %vm10558_vm4 = vmand %vm2427_vm0, %vm2484_vm3 }
  0x40   : > { %1785 = vmatmul.mubr.bf16.gmra.mrb[4].mxu1 %v9954_v61  ;;  %8607 = vmatprep.subr.bf16.mxu0 %v9498_v10  ;;  %v358_v10 = vld [vmem:[%s9905_s19 + $0xc1] sm:$0xff]  ;;  %v362_v40 = vld [vmem:[%s9905_s19 + $0xf1] sm:$0xff]  ;;  %v371_v44 = vld [vmem:[%s9905_s19 + $0x159] sm:$0xff] }
  0x41   : > { %1792 = vmatprep.mubr.bf16.mxu1 %v9956_v62  ;;  %8718 = vmatpush3.bf16.msra.mxu1 %v9511_v57  ;;  %v9523_v41 = vld [vmem:[%s12587_s1 + $0x1b8] sm:$0xff]   ;;  %v10169_v52 = vpack.c.bf16 %v363_v43, %v362_v40  ;;  %v433_v43 = vld [vmem:[%s9905_s19 + $0x142] sm:$0xff]  ;;  %v7773_v48 = vld [vmem:[%s9905_s19 + $0x170] sm:$0xff] }
  0x42   : > { %8719 = vmatprep.subr.bf16.mxu1 %v9512_v63  ;;  %v365_v56 = vld [vmem:[%s9905_s19 + $0x111] sm:$0xff]  ;;  %v427_v60 = vld [vmem:[%s9905_s19 + $0xfa] sm:$0xff]  ;;  %v7772_v46 = vld [vmem:[%s9905_s19 + $0x168] sm:$0xff] }
  0x43   : > { %8608 = vmatpush3.bf16.msra.mxu0 %v9499_v11  ;;  %v359_v11 = vld [vmem:[%s9905_s19 + $0xc9] sm:$0xff]  ;;  %v426_v57 = vld [vmem:[%s9905_s19 + $0xf2] sm:$0xff]  ;;  %v7766_v63 = vld [vmem:[%s9905_s19 + $0x120] sm:$0xff] }
  0x44   : > { %8609 = vmatprep.subr.bf16.mxu0 %v9500_v19  ;;  %v10112_v15 = vpack.c.bf16 %v359_v11, %v358_v10  ;;  %v10118_v19 = vpack.c.bf16 %v421_v7, %v420_v6  ;;  %v366_v7 = vld [vmem:[%s9905_s19 + $0x121] sm:$0xff]  ;;  %v367_v10 = vld [vmem:[%s9905_s19 + $0x129] sm:$0xff]  ;;  %v370_v40 = vld [vmem:[%s9905_s19 + $0x151] sm:$0xff] }
  0x45   : > { %8720 = vmatpush3.bf16.msra.mxu1 %v9513_v2  ;;  %v7767_v2 = vld [vmem:[%s9905_s19 + $0x128] sm:$0xff]  ;;  %v10233_v49 = vpack.c.bf16 %v371_v44, %v370_v40  ;;  %vm10648_vm7 = vmor %vm3265_vm5, %vm3266_vm6 }
  0x46   : > { %1632 = vmatmul.mubr.bf16.gmra.mrb[8].mxu0 %v9936_v51  ;;  %8721 = vmatprep.subr.bf16.mxu1 %v9516_v13  ;;  %v10190_v6 = vpack.c.bf16 %v7767_v2, %v7766_v63  ;;  %v428_v11 = vld [vmem:[%s9905_s19 + $0x10a] sm:$0xff]  ;;  %v7768_v13 = vld [vmem:[%s9905_s19 + $0x138] sm:$0xff]  ;;  %vm10798_vm10 = vmor %vm3828_vm8, %vm3829_vm9 }
  0x47   : > { %1639 = vmatprep.mubr.bf16.mxu0 %v9971_v5  ;;  %8610 = vmatpush3.bf16.msra.mxu0 %v9501_v21  ;;  %v10121_v21 = vpack.c.bf16 %v7761_v16, %v7760_v12  ;;  %v429_v12 = vld [vmem:[%s9905_s19 + $0x112] sm:$0xff]  ;;  %v10201_v16 = vpack.c.bf16 %v367_v10, %v366_v7  ;;  %v435_v2 = vld [vmem:[%s9905_s19 + $0x15a] sm:$0xff]  ;;  %v7775_v10 = vld [vmem:[%s9905_s19 + $0x188] sm:$0xff] }
  0x48   : > { %1793 = vmatmul.mubr.bf16.gmra.mrb[8].mxu1 %v9975_v8  ;;  %8611 = vmatprep.subr.bf16.mxu0 %v9502_v29  ;;  %v7762_v29 = vld [vmem:[%s9905_s19 + $0xf0] sm:$0xff]  ;;  %v7774_v7 = vld [vmem:[%s9905_s19 + $0x180] sm:$0xff]  ;;  %vm10810_vm13 = vmand %vm2959_vm11, %vm2484_vm3 }
  0x49   : > { %1800 = vmatprep.mubr.bf16.mxu1 %v9978_v9  ;;  %8722 = vmatpush3.bf16.msra.mxu1 %v9517_v14  ;;  %v7769_v14 = vld [vmem:[%s9905_s19 + $0x140] sm:$0xff]  ;;  %v434_v63 = vld [vmem:[%s9905_s19 + $0x152] sm:$0xff]  ;;  %v7901_v44 = vld [vmem:[%s9905_s19 + $0x189] sm:$0xff] }
  0x4a   : > { %8723 = vmatprep.subr.bf16.mxu1 %v9518_v18  ;;  %v10203_v18 = vpack.c.bf16 %v429_v12, %v428_v11  ;;  %v10206_v23 = vpack.c.bf16 %v7769_v14, %v7768_v13  ;;  %v10251_v12 = vpack.c.bf16 %v435_v2, %v434_v63  ;;  %v10254_v13 = vpack.c.bf16 %v7775_v10, %v7774_v7  ;;  %v436_v14 = vld [vmem:[%s9905_s19 + $0x16a] sm:$0xff]  ;;  %vm10817_vm14 = vmor %vm2428_vm1, %vm2636_vm12 }
  0x4b   : > { %8612 = vmatpush3.bf16.msra.mxu0 %v9503_v31  ;;  %v7763_v31 = vld [vmem:[%s9905_s19 + $0xf8] sm:$0xff] }
  0x4c   : > { %8613 = vmatprep.subr.bf16.mxu0 %v9504_v38  ;;  %v10151_v38 = vpack.c.bf16 %v423_v27, %v422_v26  ;;  %v430_v26 = vld [vmem:[%s9905_s19 + $0x122] sm:$0xff]  ;;  %v431_v27 = vld [vmem:[%s9905_s19 + $0x12a] sm:$0xff] }
  0x4d   : > { %8724 = vmatpush3.bf16.msra.mxu1 %v9519_v24  ;;  %v368_v24 = vld [vmem:[%s9905_s19 + $0x139] sm:$0xff] }
  0x4e   : > { %1640 = vmatmul.mubr.bf16.gmra.mrb[12].mxu0 %v9956_v62  ;;  %8725 = vmatprep.subr.bf16.mxu1 %v9520_v25  ;;  %v369_v25 = vld [vmem:[%s9905_s19 + $0x141] sm:$0xff] }
  0x4f   : > { %1647 = vmatprep.mubr.bf16.mxu0 %v9994_v17  ;;  %8614 = vmatpush3.bf16.msra.mxu0 %v9505_v39  ;;  %v10155_v39 = vpack.c.bf16 %v7763_v31, %v7762_v29  ;;  %v7771_v29 = vld [vmem:[%s9905_s19 + $0x158] sm:$0xff]  ;;  %v10217_v31 = vpack.c.bf16 %v369_v25, %v368_v24 }
  0x50   : > { %1801 = vmatmul.mubr.bf16.gmra.mrb[12].mxu1 %v10000_v20  ;;  %8615 = vmatprep.subr.bf16.mxu0 %v9514_v3  ;;  %v10185_v3 = vpack.c.bf16 %v365_v56, %v364_v55  ;;  %v10238_v56 = vpack.c.bf16 %v7773_v48, %v7772_v46  ;;  %v437_v24 = vld [vmem:[%s9905_s19 + $0x172] sm:$0xff] }
  0x51   : > { %1808 = vmatprep.mubr.bf16.mxu1 %v10006_v22  ;;  %8726 = vmatpush3.bf16.msra.mxu1 %v9521_v34  ;;  %v10219_v34 = vpack.c.bf16 %v431_v27, %v430_v26  ;;  %v10261_v25 = vpack.c.bf16 %v437_v24, %v436_v14  ;;  %v9525_v26 = vld [vmem:[%s12587_s1 + $0x208] sm:$0xff]   ;;  %v9526_v27 = vld [vmem:[%s12587_s1 + $0x210] sm:$0xff]  }
  0x52   : > { %8727 = vmatprep.subr.bf16.mxu1 %v9522_v35  ;;  %v10222_v35 = vpack.c.bf16 %v7771_v29, %v7770_v28  ;;  %v7838_v14 = vld [vmem:[%s9905_s19 + $0x182] sm:$0xff]  ;;  %v7839_v24 = vld [vmem:[%s9905_s19 + $0x18a] sm:$0xff] }
  0x53   : > { %8616 = vmatpush3.bf16.msra.mxu0 %v9515_v4  ;;  %v10187_v4 = vpack.c.bf16 %v427_v60, %v426_v57  ;;  %v372_v57 = vld [vmem:[%s9905_s19 + $0x169] sm:$0xff]  ;;  %v373_v60 = vld [vmem:[%s9905_s19 + $0x171] sm:$0xff] }
  0x54   : > { %9321 = vmatprep.subr.bf16.mxu0 %v10149_v37  ;;  %v10249_v11 = vpack.c.bf16 %v373_v60, %v372_v57 }
  0x55   : > { %8728 = vmatpush3.bf16.msra.mxu1 %v9523_v41  ;;  %v432_v41 = vld [vmem:[%s9905_s19 + $0x13a] sm:$0xff] }
  0x56   : > { %1648 = vmatmul.mubr.bf16.gmra.mrb[16].mxu0 %v9978_v9  ;;  %v10235_v55 = vpack.c.bf16 %v433_v43, %v432_v41 }
  0x57   : > { %1655 = vmatprep.mubr.bf16.mxu0 %v10020_v30 }
  0x58   : > { %1809 = vmatmul.mubr.bf16.gmra.mrb[16].mxu1 %v10025_v32 }
  0x59   : > { %1816 = vmatprep.mubr.bf16.mxu1 %v10028_v33 }
  0x5e   : > { %1656 = vmatmul.mubr.bf16.gmra.mrb[20].mxu0 %v10006_v22 }
  0x5f   : > { %1663 = vmatprep.mubr.bf16.mxu0 %v10045_v42 }
  0x60   : > { %1817 = vmatmul.mubr.bf16.gmra.mrb[20].mxu1 %v10053_v45 }
  0x61   : > { %1824 = vmatprep.mubr.bf16.mxu1 %v10059_v47 }
  0x66   : > { %1664 = vmatmul.mubr.bf16.gmra.mrb[24].mxu0 %v10028_v33 }
  0x67   : > { %1671 = vmatprep.mubr.bf16.mxu0 %v10078_v58 }
  0x68   : > { %1825 = vmatmul.mubr.bf16.gmra.mrb[24].mxu1 %v10084_v0 }
  0x69   : > { %1832 = vmatprep.mubr.bf16.mxu1 %v10087_v1 }
  0x6e   : > { %1672 = vmatmul.mubr.bf16.gmra.mrb[28].mxu0 %v10059_v47 }
  0x6f   : > { %1679 = vmatprep.mubr.bf16.mxu0 %v10112_v15 }
  0x70   : > { %1833 = vmatmul.mubr.bf16.gmra.mrb[28].mxu1 %v10118_v19 }
  0x71   : > { %1840 = vmatprep.mubr.bf16.mxu1 %v10121_v21 }
  0x76   : > { %1680 = vmatmul.mubr.bf16.gmra.mrb[32].mxu0 %v10087_v1 }
  0x77   : > { %1687 = vmatprep.mubr.bf16.mxu0 %v10144_v36 }
  0x78   : > { %1841 = vmatmul.mubr.bf16.gmra.mrb[32].mxu1 %v10151_v38 }
  0x79   : > { %1848 = vmatprep.mubr.bf16.mxu1 %v10155_v39 }
  0x7e   : > { %1688 = vmatmul.mubr.bf16.gmra.mrb[36].mxu0 %v10121_v21 }
  0x7f   : > { %1695 = vmatprep.mubr.bf16.mxu0 %v10169_v52 }
  0x80   : > { %1849 = vmatmul.mubr.bf16.gmra.mrb[36].mxu1 %v10171_v53 }
  0x81   : > { %1856 = vmatprep.mubr.bf16.mxu1 %v10174_v54 }
  0x86   : > { %1696 = vmatmul.mubr.bf16.gmra.mrb[40].mxu0 %v10155_v39 }
  0x87   : > { %1703 = vmatprep.mubr.bf16.mxu0 %v10185_v3 }
  0x88   : > { %1857 = vmatmul.mubr.bf16.gmra.mrb[40].mxu1 %v10187_v4 }
  0x89   : > { %1864 = vmatprep.mubr.bf16.mxu1 %v10190_v6 }
  0x8e   : > { %1704 = vmatmul.mubr.bf16.gmra.mrb[44].mxu0 %v10174_v54 }
  0x8f   : > { %1711 = vmatprep.mubr.bf16.mxu0 %v10201_v16 }
  0x90   : > { %1865 = vmatmul.mubr.bf16.gmra.mrb[44].mxu1 %v10203_v18 }
  0x91   : > { %1872 = vmatprep.mubr.bf16.mxu1 %v10206_v23 }
  0x96   : > { %1712 = vmatmul.mubr.bf16.gmra.mrb[48].mxu0 %v10190_v6 }
  0x97   : > { %1719 = vmatprep.mubr.bf16.mxu0 %v10217_v31 }
  0x98   : > { %1873 = vmatmul.mubr.bf16.gmra.mrb[48].mxu1 %v10219_v34 }
  0x99   : > { %1880 = vmatprep.mubr.bf16.mxu1 %v10222_v35 }
  0x9e   : > { %1720 = vmatmul.mubr.bf16.gmra.mrb[52].mxu0 %v10206_v23 }
  0x9f   : > { %1727 = vmatprep.mubr.bf16.mxu0 %v10233_v49 }
  0xa0   : > { %1881 = vmatmul.mubr.bf16.gmra.mrb[52].mxu1 %v10235_v55 }
  0xa1   : > { %1888 = vmatprep.mubr.bf16.mxu1 %v10238_v56 }
  0xa6   : > { %1728 = vmatmul.mubr.bf16.gmra.mrb[56].mxu0 %v10222_v35 }
  0xa7   : > { %1735 = vmatprep.mubr.bf16.mxu0 %v10249_v11 }
  0xa8   : > { %1889 = vmatmul.mubr.bf16.gmra.mrb[56].mxu1 %v10251_v12 }
  0xa9   : > { %1896 = vmatprep.mubr.bf16.mxu1 %v10254_v13 }
  0xae   : > { %1736 = vmatmul.mubr.bf16.gmra.mrb[60].mxu0 %v10238_v56 }
  0xaf   : > { %1937 = vmatprep.mubr.bf16.mxu0 %v9954_v61  ;;  %v9527_v61 = vld [vmem:[%s12587_s1 + $0x218] sm:$0xff]  }
  0xb0   : > { %1897 = vmatmul.mubr.bf16.gmra.mrb[60].mxu1 %v10261_v25 }
  0xb1   : > { %2098 = vmatprep.mubr.bf16.mxu1 %v9949_v59 }
  0xb6   : > { %1938 = vmatmul.mubr.bf16.vlgmr.msra.gmra.mrb[64].mxu0 %v9934_v50  ;;  %v9528_v50 = vld [vmem:[%s12587_s1 + $0x220] sm:$0xff]  }
  0xb7   : > { %9322 = vmatpush3.bf16.msra.mxu0 %v10149_v37  ;;  %1945 = vmatprep.mubr.bf16.mxu0 %v9975_v8  ;;  %v10335_v8 = vld [vmem:[%s12589_s3] ss:$0 sm:$0xff] }
  0xb8   : > { %9323 = vmatprep.subr.bf16.mxu0 %v9525_v26  ;;  %2099 = vmatmul.mubr.bf16.vlgmr.msra.gmra.mrb[64].mxu1 %v9936_v51  ;;  %v9529_v51 = vld [vmem:[%s12587_s1 + $0x228] sm:$0xff]  }
  0xb9   : > { %2106 = vmatprep.mubr.bf16.mxu1 %v9971_v5 }
  0xbb   : > { %9324 = vmatpush3.bf16.msra.mxu0 %v9525_v26 }
  0xbc   : > { %9325 = vmatprep.subr.bf16.mxu0 %v9526_v27 }
  0xbe   : > { %1946 = vmatmul.mubr.bf16.gmra.mrb[68].mxu0 %v9949_v59  ;;  %v9530_v59 = vld [vmem:[%s12587_s1 + $0x230] sm:$0xff]  }
  0xbf   : > { %1953 = vmatprep.mubr.bf16.mxu0 %v10000_v20  ;;  %9326 = vmatpush3.bf16.msra.mxu0 %v9526_v27 }
  0xc0   : > { %9327 = vmatprep.subr.bf16.mxu0 %v9527_v61  ;;  %2107 = vmatmul.mubr.bf16.gmra.mrb[68].mxu1 %v9956_v62  ;;  %v9531_v62 = vld [vmem:[%s12587_s1 + $0x238] sm:$0xff]  }
  0xc1   : > { %2114 = vmatprep.mubr.bf16.mxu1 %v9994_v17 }
  0xc3   : > { %9328 = vmatpush3.bf16.msra.mxu0 %v9527_v61 }
  0xc4   : > { %9329 = vmatprep.subr.bf16.mxu0 %v9528_v50 }
  0xc6   : > { %1954 = vmatmul.mubr.bf16.gmra.mrb[72].mxu0 %v9971_v5 }
  0xc7   : > { %1961 = vmatprep.mubr.bf16.mxu0 %v10025_v32  ;;  %9330 = vmatpush3.bf16.msra.mxu0 %v9528_v50 }
  0xc8   : > { %9331 = vmatprep.subr.bf16.mxu0 %v9529_v51  ;;  %2115 = vmatmul.mubr.bf16.gmra.mrb[72].mxu1 %v9978_v9 }
  0xc9   : > { %2122 = vmatprep.mubr.bf16.mxu1 %v10020_v30 }
  0xcb   : > { %9332 = vmatpush3.bf16.msra.mxu0 %v9529_v51 }
  0xcc   : > { %9333 = vmatprep.subr.bf16.mxu0 %v9530_v59 }
  0xce   : > { %1962 = vmatmul.mubr.bf16.gmra.mrb[76].mxu0 %v9994_v17 }
  0xcf   : > { %1969 = vmatprep.mubr.bf16.mxu0 %v10053_v45  ;;  %9334 = vmatpush3.bf16.msra.mxu0 %v9530_v59  ;;  %v10371_v59 = vpack.c.bf16 %v7839_v24, %v7838_v14 }
  0xd0   : > { %9335 = vmatprep.subr.bf16.mxu0 %v9531_v62  ;;  %2123 = vmatmul.mubr.bf16.gmra.mrb[76].mxu1 %v10006_v22 }
  0xd1   : > { %2130 = vmatprep.mubr.bf16.mxu1 %v10045_v42 }
  0xd3   : > { %9336 = vmatpush3.bf16.msra.mxu0 %v9531_v62  ;;  %v7902_v62 = vld [vmem:[%s9905_s19 + $0x199] sm:$0xff] }
  0xd6   : > { %1970 = vmatmul.mubr.bf16.gmra.mrb[80].mxu0 %v10020_v30 }
  0xd7   : > { %1977 = vmatprep.mubr.bf16.mxu0 %v10084_v0 }
  0xd8   : > { %2131 = vmatmul.mubr.bf16.gmra.mrb[80].mxu1 %v10028_v33 }
  0xd9   : > { %2138 = vmatprep.mubr.bf16.mxu1 %v10078_v58 }
  0xde   : > { %1978 = vmatmul.mubr.bf16.gmra.mrb[84].mxu0 %v10045_v42 }
  0xdf   : > { %1985 = vmatprep.mubr.bf16.mxu0 %v10118_v19 }
  0xe0   : > { %2139 = vmatmul.mubr.bf16.gmra.mrb[84].mxu1 %v10059_v47 }
  0xe1   : > { %2146 = vmatprep.mubr.bf16.mxu1 %v10112_v15 }
  0xe6   : > { %1986 = vmatmul.mubr.bf16.gmra.mrb[88].mxu0 %v10078_v58 }
  0xe7   : > { %1993 = vmatprep.mubr.bf16.mxu0 %v10151_v38 }
  0xe8   : > { %2147 = vmatmul.mubr.bf16.gmra.mrb[88].mxu1 %v10087_v1 }
  0xe9   : > { %2154 = vmatprep.mubr.bf16.mxu1 %v10144_v36 }
  0xee   : > { %1994 = vmatmul.mubr.bf16.gmra.mrb[92].mxu0 %v10112_v15 }
  0xef   : > { %2001 = vmatprep.mubr.bf16.mxu0 %v10171_v53 }
  0xf0   : > { %2155 = vmatmul.mubr.bf16.gmra.mrb[92].mxu1 %v10121_v21 }
  0xf1   : > { %2162 = vmatprep.mubr.bf16.mxu1 %v10169_v52 }
  0xf6   : > { %2002 = vmatmul.mubr.bf16.gmra.mrb[96].mxu0 %v10144_v36 }
  0xf7   : > { %2009 = vmatprep.mubr.bf16.mxu0 %v10187_v4 }
  0xf8   : > { %2163 = vmatmul.mubr.bf16.gmra.mrb[96].mxu1 %v10155_v39 }
  0xf9   : > { %2170 = vmatprep.mubr.bf16.mxu1 %v10185_v3 }
  0xfe   : > { %2010 = vmatmul.mubr.bf16.gmra.mrb[100].mxu0 %v10169_v52 }
  0xff   : > { %2017 = vmatprep.mubr.bf16.mxu0 %v10203_v18 }
 0x100   : > { %2171 = vmatmul.mubr.bf16.gmra.mrb[100].mxu1 %v10174_v54 }
 0x101   : > { %2178 = vmatprep.mubr.bf16.mxu1 %v10201_v16 }
 0x106   : > { %2018 = vmatmul.mubr.bf16.gmra.mrb[104].mxu0 %v10185_v3 }
 0x107   : > { %2025 = vmatprep.mubr.bf16.mxu0 %v10219_v34 }
 0x108   : > { %2179 = vmatmul.mubr.bf16.gmra.mrb[104].mxu1 %v10190_v6 }
 0x109   : > { %v8393_v5 = vpop.f32.mrb[0].mxu0  ;;  %2186 = vmatprep.mubr.bf16.mxu1 %v10217_v31 }
 0x10a   : > { %v8394_v9 = vpop.f32.mrb[1].mxu0 }
 0x10b   : > { %v8395_v17 = vadd.f32 %v8394_v9, %v8393_v5  ;;  %v8396_v20 = vpop.f32.mrb[2].mxu0  ;;  %v8505_v22 = vpop.f32.mrb[0].mxu1 }
 0x10c   : > { %v8397_v30 = vpop.f32.mrb[3].mxu0  ;;  %v8506_v42 = vpop.f32.mrb[1].mxu1 }
 0x10d   : > { %v1618_v32 = vadd.f32 %v8395_v17, %v10335_v8  ;;  %v8398_v33 = vadd.f32 %v8397_v30, %v8396_v20  ;;  %v8507_v45 = vadd.f32 %v8506_v42, %v8505_v22  ;;  %v8508_v47 = vpop.f32.mrb[2].mxu1 }
 0x10e   : > { %2026 = vmatmul.mubr.bf16.gmra.mrb[108].mxu0 %v10201_v16  ;;  %v8509_v0 = vpop.f32.mrb[3].mxu1 }
 0x10f   : > { %v1621_v58 = vadd.f32 %v8398_v33, %v10335_v8  ;;  %2033 = vmatprep.mubr.bf16.mxu0 %v10235_v55  ;;  %v8510_v1 = vadd.f32 %v8509_v0, %v8508_v47  ;;  %v10342_v15 = vadd.f32 %v8507_v45, %v1618_v32  ;;  %v7904_v45 = vld [vmem:[%s9905_s19 + $0x32] sm:$0xff] }
 0x110   : > { %2187 = vmatmul.mubr.bf16.gmra.mrb[108].mxu1 %v10206_v23 }
 0x111   : > { %v8399_v19 = vpop.f32.mrb[4].mxu0  ;;  %2194 = vmatprep.mubr.bf16.mxu1 %v10233_v49  ;;  %v10346_v36 = vadd.f32 %v8510_v1, %v1621_v58  ;;  %v7905_v58 = vld [vmem:[%s9905_s19 + $0x3a] sm:$0xff] }
 0x112   : > { %v8400_v21 = vpop.f32.mrb[5].mxu0  ;;  %v9532_v1 = vld [vmem:[%s12588_s2 + $0x40] sm:$0xff]  }
 0x113   : > { %v8401_v37 = vadd.f32 %v8400_v21, %v8399_v19  ;;  %v8402_v38 = vpop.f32.mrb[6].mxu0  ;;  %v8511_v39 = vpop.f32.mrb[4].mxu1  ;;  %8849 = vmatprep.subr.bf16.mxu1 %v9532_v1 }
 0x114   : > { %v8403_v52 = vpop.f32.mrb[7].mxu0  ;;  %v8512_v3 = vpop.f32.mrb[5].mxu1 }
 0x115   : > { %v1626_v53 = vadd.f32 %v8401_v37, %v10335_v8  ;;  %v8404_v54 = vadd.f32 %v8403_v52, %v8402_v38  ;;  %v8513_v4 = vadd.f32 %v8512_v3, %v8511_v39  ;;  %v8514_v6 = vpop.f32.mrb[6].mxu1  ;;  %v7870_v37 = vld [vmem:[%s9905_s19 + $0x198] sm:$0xff]  ;;  %v7871_v38 = vld [vmem:[%s9905_s19 + $0x1a0] sm:$0xff] }
 0x116   : > { %2034 = vmatmul.mubr.bf16.gmra.mrb[112].mxu0 %v10217_v31  ;;  %v8515_v18 = vpop.f32.mrb[7].mxu1  ;;  %v7900_v31 = vld [vmem:[%s9905_s19 + $0x181] sm:$0xff] }
 0x117   : > { %v1629_v16 = vadd.f32 %v8404_v54, %v10335_v8  ;;  %2041 = vmatprep.mubr.bf16.mxu0 %v10251_v12  ;;  %v8516_v23 = vadd.f32 %v8515_v18, %v8514_v6  ;;  %v10352_v28 = vadd.f32 %v8513_v4, %v1626_v53  ;;  %v774_v2 = vpack.c.bf16 %v7901_v44, %v7900_v31  ;;  %v7907_v31 = vld [vmem:[%s9905_s19 + $0x52] sm:$0xff] }
 0x118   : > { %2195 = vmatmul.mubr.bf16.gmra.mrb[112].mxu1 %v10222_v35  ;;  %v824_v54 = vpack.c.bf16 %v7905_v58, %v7904_v45  ;;  %v711_v18 = vpack.c.bf16 %v7871_v38, %v7870_v37 }
 0x119   : > { %v8405_v29 = vpop.f32.mrb[8].mxu0  ;;  %2202 = vmatprep.mubr.bf16.mxu1 %v10249_v11  ;;  %v10356_v40 = vadd.f32 %v8516_v23, %v1629_v16 }
 0x11a   : > { %v8406_v34 = vpop.f32.mrb[9].mxu0 }
 0x11b   : > { %v8407_v41 = vadd.f32 %v8406_v34, %v8405_v29  ;;  %v8408_v43 = vpop.f32.mrb[10].mxu0  ;;  %v8517_v46 = vpop.f32.mrb[8].mxu1 }
 0x11c   : > { %v8409_v48 = vpop.f32.mrb[11].mxu0  ;;  %v8518_v60 = vpop.f32.mrb[9].mxu1 }
 0x11d   : > { %v1634_v55 = vadd.f32 %v8407_v41, %v10335_v8  ;;  %v8410_v57 = vadd.f32 %v8409_v48, %v8408_v43  ;;  %v8519_v63 = vadd.f32 %v8518_v60, %v8517_v46  ;;  %v8520_v35 = vpop.f32.mrb[10].mxu1  ;;  %v7906_v43 = vld [vmem:[%s9905_s19 + $0x4a] sm:$0xff]  ;;  %v7908_v46 = vld [vmem:[%s9905_s19 + $0x62] sm:$0xff] }
 0x11e   : > { %2042 = vmatmul.mubr.bf16.gmra.mrb[116].mxu0 %v10233_v49  ;;  %v8521_v10 = vpop.f32.mrb[11].mxu1  ;;  %v7909_v48 = vld [vmem:[%s9905_s19 + $0x6a] sm:$0xff] }
 0x11f   : > { %v1637_v7 = vadd.f32 %v8410_v57, %v10335_v8  ;;  %2049 = vmatprep.mubr.bf16.mxu0 %v10261_v25  ;;  %v8522_v12 = vadd.f32 %v8521_v10, %v8520_v35  ;;  %v10366_v26 = vadd.f32 %v8519_v63, %v1634_v55  ;;  %v7903_v25 = vld [vmem:[%s9905_s19 + $0x1a1] sm:$0xff]  ;;  %v825_v63 = vpack.c.bf16 %v7907_v31, %v7906_v43 }
 0x120   : > { %2203 = vmatmul.mubr.bf16.gmra.mrb[116].mxu1 %v10238_v56  ;;  %v775_v32 = vpack.c.bf16 %v7903_v25, %v7902_v62  ;;  %v826_v10 = vpack.c.bf16 %v7909_v48, %v7908_v46 }
 0x121   : > { %v8411_v27 = vpop.f32.mrb[12].mxu0  ;;  %2210 = vmatprep.mubr.bf16.mxu1 %v774_v2  ;;  %v10369_v50 = vadd.f32 %v8522_v12, %v1637_v7 }
 0x122   : > { %v8412_v61 = vpop.f32.mrb[13].mxu0 }
 0x123   : > { %v8413_v49 = vadd.f32 %v8412_v61, %v8411_v27  ;;  %v8414_v51 = vpop.f32.mrb[14].mxu0  ;;  %v8523_v5 = vpop.f32.mrb[12].mxu1 }
 0x124   : > { %v8415_v9 = vpop.f32.mrb[15].mxu0  ;;  %v8524_v22 = vpop.f32.mrb[13].mxu1 }
 0x125   : > { %v1642_v17 = vadd.f32 %v8413_v49, %v10335_v8  ;;  %v8416_v20 = vadd.f32 %v8415_v9, %v8414_v51  ;;  %v8525_v56 = vadd.f32 %v8524_v22, %v8523_v5  ;;  %v8526_v30 = vpop.f32.mrb[14].mxu1  ;;  %v7910_v5 = vld [vmem:[%s9905_s19 + $0x7a] sm:$0xff]  ;;  %v7911_v9 = vld [vmem:[%s9905_s19 + $0x82] sm:$0xff] }
 0x126   : > { %2050 = vmatmul.mubr.bf16.gmra.mrb[120].mxu0 %v10249_v11  ;;  %v8527_v42 = vpop.f32.mrb[15].mxu1  ;;  %v9533_v11 = vld [vmem:[%s12588_s2] sm:$0xff]   ;;  %v827_v45 = vpack.c.bf16 %v7911_v9, %v7910_v5  ;;  %v9536_v5 = vld [vmem:[%s12588_s2 + $0x50] sm:$0xff]  }
 0x127   : > { %v1645_v33 = vadd.f32 %v8416_v20, %v10335_v8  ;;  %2057 = vmatprep.mubr.bf16.mxu0 %v10371_v59  ;;  %v8528_v47 = vadd.f32 %v8527_v42, %v8526_v30  ;;  %v10381_v0 = vadd.f32 %v8525_v56, %v1642_v17  ;;  %8850 = vmatpush3.bf16.msra.mxu1 %v9533_v11  ;;  %v7912_v17 = vld [vmem:[%s9905_s19 + $0x92] sm:$0xff]  ;;  %v7913_v22 = vld [vmem:[%s9905_s19 + $0x9a] sm:$0xff]  ;;  %v9534_v30 = vld [vmem:[%s12588_s2 + $0x48] sm:$0xff]  }
 0x128   : > { %2211 = vmatmul.mubr.bf16.gmra.mrb[120].mxu1 %v10254_v13  ;;  %8851 = vmatprep.subr.bf16.mxu1 %v9534_v30  ;;  %v828_v11 = vpack.c.bf16 %v7913_v22, %v7912_v17  ;;  %v9537_v9 = vld [vmem:[%s12588_s2 + $0x10] sm:$0xff]  }
 0x129   : > { %v8417_v19 = vpop.f32.mrb[16].mxu0  ;;  %2218 = vmatprep.mubr.bf16.mxu1 %v775_v32  ;;  %v10392_v39 = vadd.f32 %v8528_v47, %v1645_v33  ;;  %v9535_v32 = vld [vmem:[%s12588_s2 + $0x8] sm:$0xff]  }
 0x12a   : > { %v8418_v21 = vpop.f32.mrb[17].mxu0 }
 0x12b   : > { %v8419_v52 = vadd.f32 %v8418_v21, %v8417_v19  ;;  %v8420_v53 = vpop.f32.mrb[18].mxu0  ;;  %v8529_v3 = vpop.f32.mrb[16].mxu1  ;;  %8852 = vmatpush3.bf16.msra.mxu1 %v9535_v32 }
 0x12c   : > { %v8421_v4 = vpop.f32.mrb[19].mxu0  ;;  %v8530_v16 = vpop.f32.mrb[17].mxu1  ;;  %8853 = vmatprep.subr.bf16.mxu1 %v9536_v5  ;;  %v9539_v5 = vld [vmem:[%s12588_s2 + $0x18] sm:$0xff]  }
 0x12d   : > { %v1650_v13 = vadd.f32 %v8419_v52, %v10335_v8  ;;  %v8422_v6 = vadd.f32 %v8421_v4, %v8420_v53  ;;  %v8531_v23 = vadd.f32 %v8530_v16, %v8529_v3  ;;  %v8532_v29 = vpop.f32.mrb[18].mxu1 }
 0x12e   : > { %2058 = vmatmul.mubr.bf16.gmra.mrb[124].mxu0 %v774_v2  ;;  %v8533_v41 = vpop.f32.mrb[19].mxu1 }
 0x12f   : > { %v1653_v34 = vadd.f32 %v8422_v6, %v10335_v8  ;;  %9337 = vmatprep.mubr.bf16.mxu0 %v824_v54  ;;  %v8534_v44 = vadd.f32 %v8533_v41, %v8532_v29  ;;  %v10400_v55 = vadd.f32 %v8531_v23, %v1650_v13  ;;  %v7914_v13 = vld [vmem:[%s9905_s19 + $0xaa] sm:$0xff]  ;;  %v7915_v6 = vld [vmem:[%s9905_s19 + $0xb2] sm:$0xff]  ;;  %8854 = vmatpush3.bf16.msra.mxu1 %v9537_v9 }
 0x130   : > { %2219 = vmatmul.mubr.bf16.gmra.mrb[124].mxu1 %v711_v18  ;;  %v7916_v18 = vld [vmem:[%s9905_s19 + $0xc2] sm:$0xff]  ;;  %v7917_v23 = vld [vmem:[%s9905_s19 + $0xca] sm:$0xff]  ;;  %v829_v43 = vpack.c.bf16 %v7915_v6, %v7914_v13 }
 0x131   : > { %v8423_v57 = vpop.f32.mrb[20].mxu0  ;;  %v10402_v35 = vadd.f32 %v8534_v44, %v1653_v34  ;;  %v830_v48 = vpack.c.bf16 %v7917_v23, %v7916_v18  ;;  %v7924_v13 = vld [vmem:[%s9905_s19 + $0x122] sm:$0xff]  ;;  %v7925_v6 = vld [vmem:[%s9905_s19 + $0x12a] sm:$0xff] }
 0x132   : > { %v8424_v60 = vpop.f32.mrb[21].mxu0 }
 0x133   : > { %v8425_v2 = vadd.f32 %v8424_v60, %v8423_v57  ;;  %v8426_v7 = vpop.f32.mrb[22].mxu0  ;;  %v8535_v12 = vpop.f32.mrb[20].mxu1 }
 0x134   : > { %v8427_v14 = vpop.f32.mrb[23].mxu0  ;;  %v8536_v61 = vpop.f32.mrb[21].mxu1 }
 0x135   : > { %v1658_v24 = vadd.f32 %v8425_v2, %v10335_v8  ;;  %v8428_v27 = vadd.f32 %v8427_v14, %v8426_v7  ;;  %v8537_v49 = vadd.f32 %v8536_v61, %v8535_v12  ;;  %v8538_v51 = vpop.f32.mrb[22].mxu1  ;;  %v7919_v61 = vld [vmem:[%s9905_s19 + $0xe2] sm:$0xff] }
 0x136   : > { %9338 = vmatmul.mubr.bf16.vlgmr.msra.gmra.mrb[128].mxu0 %v825_v63  ;;  %v8539_v25 = vpop.f32.mrb[23].mxu1 }
 0x137   : > { %v1661_v62 = vadd.f32 %v8428_v27, %v10335_v8  ;;  %9341 = vmatprep.mubr.bf16.mxu0 %v826_v10  ;;  %v8540_v20 = vadd.f32 %v8539_v25, %v8538_v51  ;;  %v10410_v56 = vadd.f32 %v8537_v49, %v1658_v24  ;;  %v7918_v27 = vld [vmem:[%s9905_s19 + $0xda] sm:$0xff]  ;;  %v7920_v49 = vld [vmem:[%s9905_s19 + $0xf2] sm:$0xff] }
 0x138   : > { %v831_v22 = vpack.c.bf16 %v7919_v61, %v7918_v27  ;;  %v7928_v27 = vld [vmem:[%s9905_s19 + $0x152] sm:$0xff] }
 0x139   : > { %v8429_v33 = vpop.f32.mrb[24].mxu0  ;;  %v10418_v47 = vadd.f32 %v8540_v20, %v1661_v62  ;;  %v7921_v62 = vld [vmem:[%s9905_s19 + $0xfa] sm:$0xff] }
 0x13a   : > { %v8430_v42 = vpop.f32.mrb[25].mxu0 }
 0x13b   : > { %v8431_v58 = vadd.f32 %v8430_v42, %v8429_v33  ;;  %v8432_v1 = vpop.f32.mrb[26].mxu0  ;;  %v8541_v19 = vpop.f32.mrb[24].mxu1  ;;  %v832_v42 = vpack.c.bf16 %v7921_v62, %v7920_v49  ;;  %v9538_v62 = vld [vmem:[%s12588_s2 + $0x58] sm:$0xff]  }
 0x13c   : > { %v8433_v21 = vpop.f32.mrb[27].mxu0  ;;  %v8542_v52 = vpop.f32.mrb[25].mxu1  ;;  %8855 = vmatprep.subr.bf16.mxu1 %v9538_v62 }
 0x13d   : > { %v1666_v37 = vadd.f32 %v8431_v58, %v10335_v8  ;;  %v8434_v38 = vadd.f32 %v8433_v21, %v8432_v1  ;;  %v8543_v53 = vadd.f32 %v8542_v52, %v8541_v19  ;;  %v8544_v54 = vpop.f32.mrb[26].mxu1  ;;  %8856 = vmatpush3.bf16.msra.mxu1 %v9539_v5 }
 0x13e   : > { %9342 = vmatmul.mubr.bf16.gmra.mrb[132].mxu0 %v827_v45  ;;  %v8545_v4 = vpop.f32.mrb[27].mxu1 }
 0x13f   : > { %v1669_v3 = vadd.f32 %v8434_v38, %v10335_v8  ;;  %9345 = vmatprep.mubr.bf16.mxu0 %v828_v11  ;;  %v8546_v16 = vadd.f32 %v8545_v4, %v8544_v54  ;;  %v10426_v29 = vadd.f32 %v8543_v53, %v1666_v37  ;;  %v7922_v53 = vld [vmem:[%s9905_s19 + $0x10a] sm:$0xff]  ;;  %v7923_v54 = vld [vmem:[%s9905_s19 + $0x112] sm:$0xff] }
 0x141   : > { %v8435_v34 = vpop.f32.mrb[28].mxu0  ;;  %v10428_v31 = vadd.f32 %v8546_v16, %v1669_v3 }
 0x142   : > { %v8436_v41 = vpop.f32.mrb[29].mxu0 }
 0x143   : > { %v8437_v44 = vadd.f32 %v8436_v41, %v8435_v34  ;;  %v8438_v46 = vpop.f32.mrb[30].mxu0  ;;  %v8547_v57 = vpop.f32.mrb[28].mxu1  ;;  %v833_v34 = vpack.c.bf16 %v7923_v54, %v7922_v53  ;;  %v7930_v53 = vld [vmem:[%s9905_s19 + $0x16a] sm:$0xff]  ;;  %v7931_v54 = vld [vmem:[%s9905_s19 + $0x172] sm:$0xff] }
 0x144   : > { %v8439_v60 = vpop.f32.mrb[31].mxu0  ;;  %v8548_v7 = vpop.f32.mrb[29].mxu1 }
 0x145   : > { %v1674_v63 = vadd.f32 %v8437_v44, %v10335_v8  ;;  %v8440_v2 = vadd.f32 %v8439_v60, %v8438_v46  ;;  %v8549_v10 = vadd.f32 %v8548_v7, %v8547_v57  ;;  %v8550_v12 = vpop.f32.mrb[30].mxu1  ;;  %v834_v44 = vpack.c.bf16 %v7925_v6, %v7924_v13 }
 0x146   : > { %9346 = vmatmul.mubr.bf16.gmra.mrb[136].mxu0 %v829_v43  ;;  %v8551_v24 = vpop.f32.mrb[31].mxu1 }
 0x147   : > { %v1677_v14 = vadd.f32 %v8440_v2, %v10335_v8  ;;  %9349 = vmatprep.mubr.bf16.mxu0 %v830_v48  ;;  %v8552_v51 = vadd.f32 %v8551_v24, %v8550_v12  ;;  %v10436_v25 = vadd.f32 %v8549_v10, %v1674_v63  ;;  %v7927_v24 = vld [vmem:[%s9905_s19 + $0x142] sm:$0xff] }
 0x149   : > { %v8441_v17 = vpop.f32.mrb[32].mxu0  ;;  %v10444_v30 = vadd.f32 %v8552_v51, %v1677_v14  ;;  %v7926_v14 = vld [vmem:[%s9905_s19 + $0x13a] sm:$0xff] }
 0x14a   : > { %v8442_v20 = vpop.f32.mrb[33].mxu0  ;;  %v7929_v51 = vld [vmem:[%s9905_s19 + $0x15a] sm:$0xff] }
 0x14b   : > { %v8443_v32 = vadd.f32 %v8442_v20, %v8441_v17  ;;  %v8444_v33 = vpop.f32.mrb[34].mxu0  ;;  %v8553_v45 = vpop.f32.mrb[32].mxu1 }
 0x14c   : > { %v8445_v58 = vpop.f32.mrb[35].mxu0  ;;  %v8554_v19 = vpop.f32.mrb[33].mxu1 }
 0x14d   : > { %v1682_v1 = vadd.f32 %v8443_v32, %v10335_v8  ;;  %v8446_v11 = vadd.f32 %v8445_v58, %v8444_v33  ;;  %v8555_v21 = vadd.f32 %v8554_v19, %v8553_v45  ;;  %v8556_v37 = vpop.f32.mrb[34].mxu1 }
 0x14e   : > { %9350 = vmatmul.mubr.bf16.gmra.mrb[140].mxu0 %v831_v22  ;;  %v8557_v52 = vpop.f32.mrb[35].mxu1  ;;  %v835_v22 = vpack.c.bf16 %v7927_v24, %v7926_v14  ;;  %v7935_v14 = vld [vmem:[%s9905_s19 + $0x1a2] sm:$0xff] }
 0x14f   : > { %v1685_v38 = vadd.f32 %v8446_v11, %v10335_v8  ;;  %9353 = vmatprep.mubr.bf16.mxu0 %v832_v42  ;;  %v10450_v3 = vadd.f32 %v8555_v21, %v1682_v1  ;;  %v8558_v4 = vadd.f32 %v8557_v52, %v8556_v37  ;;  %v836_v42 = vpack.c.bf16 %v7929_v51, %v7928_v27  ;;  %v9541_v51 = vld [vmem:[%s12588_s2 + $0x20] sm:$0xff]  }
 0x151   : > { %v8447_v16 = vpop.f32.mrb[36].mxu0  ;;  %v10454_v18 = vadd.f32 %v8558_v4, %v1685_v38 }
 0x152   : > { %v8448_v23 = vpop.f32.mrb[37].mxu0 }
 0x153   : > { %v8449_v41 = vadd.f32 %v8448_v23, %v8447_v16  ;;  %v8450_v43 = vpop.f32.mrb[38].mxu0  ;;  %v8559_v46 = vpop.f32.mrb[36].mxu1 }
 0x154   : > { %v8451_v48 = vpop.f32.mrb[39].mxu0  ;;  %v8560_v63 = vpop.f32.mrb[37].mxu1 }
 0x155   : > { %v1690_v57 = vadd.f32 %v8449_v41, %v10335_v8  ;;  %v8452_v60 = vadd.f32 %v8451_v48, %v8450_v43  ;;  %v8561_v2 = vadd.f32 %v8560_v63, %v8559_v46  ;;  %v8562_v7 = vpop.f32.mrb[38].mxu1 }
 0x156   : > { %9354 = vmatmul.mubr.bf16.gmra.mrb[144].mxu0 %v833_v34  ;;  %v8563_v12 = vpop.f32.mrb[39].mxu1  ;;  %v837_v34 = vpack.c.bf16 %v7931_v54, %v7930_v53 }
 0x157   : > { %v1693_v10 = vadd.f32 %v8452_v60, %v10335_v8  ;;  %9357 = vmatprep.mubr.bf16.mxu0 %v834_v44  ;;  %v10461_v61 = vadd.f32 %v8561_v2, %v1690_v57  ;;  %v8564_v49 = vadd.f32 %v8563_v12, %v8562_v7  ;;  %v7934_v12 = vld [vmem:[%s9905_s19 + $0x19a] sm:$0xff] }
 0x159   : > { %v8453_v9 = vpop.f32.mrb[40].mxu0  ;;  %v10470_v17 = vadd.f32 %v8564_v49, %v1693_v10  ;;  %v9540_v49 = vld [vmem:[%s12588_s2 + $0x60] sm:$0xff]  }
 0x15a   : > { %v8454_v20 = vpop.f32.mrb[41].mxu0  ;;  %8857 = vmatprep.subr.bf16.mxu1 %v9540_v49 }
 0x15b   : > { %v8455_v32 = vadd.f32 %v8454_v20, %v8453_v9  ;;  %v8456_v33 = vpop.f32.mrb[42].mxu0  ;;  %v8565_v45 = vpop.f32.mrb[40].mxu1  ;;  %v839_v20 = vpack.c.bf16 %v7935_v14, %v7934_v12  ;;  %8858 = vmatpush3.bf16.msra.mxu1 %v9541_v51 }
 0x15c   : > { %v8457_v58 = vpop.f32.mrb[43].mxu0  ;;  %v8566_v19 = vpop.f32.mrb[41].mxu1 }
 0x15d   : > { %v1698_v1 = vadd.f32 %v8455_v32, %v10335_v8  ;;  %v8458_v11 = vadd.f32 %v8457_v58, %v8456_v33  ;;  %v8567_v21 = vadd.f32 %v8566_v19, %v8565_v45  ;;  %v8568_v37 = vpop.f32.mrb[42].mxu1 }
 0x15e   : > { %9358 = vmatmul.mubr.bf16.gmra.mrb[148].mxu0 %v835_v22  ;;  %v8569_v52 = vpop.f32.mrb[43].mxu1 }
 0x15f   : > { %v1701_v38 = vadd.f32 %v8458_v11, %v10335_v8  ;;  %9361 = vmatprep.mubr.bf16.mxu0 %v836_v42  ;;  %v10476_v4 = vadd.f32 %v8567_v21, %v1698_v1  ;;  %v8570_v13 = vadd.f32 %v8569_v52, %v8568_v37 }
 0x161   : > { %v8459_v6 = vpop.f32.mrb[44].mxu0  ;;  %v10478_v16 = vadd.f32 %v8570_v13, %v1701_v38 }
 0x162   : > { %v8460_v23 = vpop.f32.mrb[45].mxu0 }
 0x163   : > { %v8461_v41 = vadd.f32 %v8460_v23, %v8459_v6  ;;  %v8462_v43 = vpop.f32.mrb[46].mxu0  ;;  %v8571_v44 = vpop.f32.mrb[44].mxu1 }
 0x164   : > { %v8463_v46 = vpop.f32.mrb[47].mxu0  ;;  %v8572_v60 = vpop.f32.mrb[45].mxu1 }
 0x165   : > { %v1706_v48 = vadd.f32 %v8461_v41, %v10335_v8  ;;  %v8464_v57 = vadd.f32 %v8463_v46, %v8462_v43  ;;  %v8573_v63 = vadd.f32 %v8572_v60, %v8571_v44  ;;  %v8574_v2 = vpop.f32.mrb[46].mxu1 }
 0x166   : > { %9362 = vmatmul.mubr.bf16.gmra.mrb[152].mxu0 %v837_v34  ;;  %v8575_v10 = vpop.f32.mrb[47].mxu1 }
 0x167   : > { %v1709_v7 = vadd.f32 %v8464_v57, %v10335_v8  ;;  %9365 = vmatprep.mubr.bf16.mxu0 %v10371_v59  ;;  %v10485_v24 = vadd.f32 %v8573_v63, %v1706_v48  ;;  %v8576_v27 = vadd.f32 %v8575_v10, %v8574_v2  ;;  %v9543_v10 = vld [vmem:[%s12588_s2 + $0x28] sm:$0xff]  }
 0x169   : > { %v8465_v62 = vpop.f32.mrb[48].mxu0  ;;  %v10493_v5 = vadd.f32 %v8576_v27, %v1709_v7  ;;  %v9542_v7 = vld [vmem:[%s12588_s2 + $0x68] sm:$0xff]  }
 0x16a   : > { %v8466_v9 = vpop.f32.mrb[49].mxu0  ;;  %8859 = vmatprep.subr.bf16.mxu1 %v9542_v7 }
 0x16b   : > { %v8467_v59 = vadd.f32 %v8466_v9, %v8465_v62  ;;  %v8468_v22 = vpop.f32.mrb[50].mxu0  ;;  %v8577_v32 = vpop.f32.mrb[48].mxu1  ;;  %8860 = vmatpush3.bf16.msra.mxu1 %v9543_v10  ;;  %v9545_v10 = vld [vmem:[%s12588_s2 + $0x70] sm:$0xff]  }
 0x16c   : > { %v8469_v33 = vpop.f32.mrb[51].mxu0  ;;  %v8578_v58 = vpop.f32.mrb[49].mxu1  ;;  %8861 = vmatprep.subr.bf16.mxu1 %v9545_v10 }
 0x16d   : > { %v1714_v42 = vadd.f32 %v8467_v59, %v10335_v8  ;;  %v8470_v45 = vadd.f32 %v8469_v33, %v8468_v22  ;;  %v8579_v1 = vadd.f32 %v8578_v58, %v8577_v32  ;;  %v8580_v11 = vpop.f32.mrb[50].mxu1 }
 0x16e   : > { %9366 = vmatmul.mubr.bf16.gmra.mrb[156].mxu0 %v839_v20  ;;  %v8581_v21 = vpop.f32.mrb[51].mxu1 }
 0x16f   : > { %v1717_v19 = vadd.f32 %v8470_v45, %v10335_v8  ;;  %v10497_v37 = vadd.f32 %v8579_v1, %v1714_v42  ;;  %v8582_v38 = vadd.f32 %v8581_v21, %v8580_v11 }
 0x171   : > { %v8471_v52 = vpop.f32.mrb[52].mxu0  ;;  %v10499_v53 = vadd.f32 %v8582_v38, %v1717_v19 }
 0x172   : > { %v8472_v54 = vpop.f32.mrb[53].mxu0 }
 0x173   : > { %v8473_v13 = vadd.f32 %v8472_v54, %v8471_v52  ;;  %v8474_v6 = vpop.f32.mrb[54].mxu0  ;;  %v8583_v23 = vpop.f32.mrb[52].mxu1  ;;  %v9544_v54 = vld [vmem:[%s12588_s2 + $0xc0] sm:$0xff]  }
 0x174   : > { %v8475_v34 = vpop.f32.mrb[55].mxu0  ;;  %v8584_v44 = vpop.f32.mrb[53].mxu1  ;;  %8961 = vmatprep.subr.bf16.mxu0 %v9544_v54 }
 0x175   : > { %v1722_v41 = vadd.f32 %v8473_v13, %v10335_v8  ;;  %v8476_v43 = vadd.f32 %v8475_v34, %v8474_v6  ;;  %v8585_v46 = vadd.f32 %v8584_v44, %v8583_v23  ;;  %v8586_v48 = vpop.f32.mrb[54].mxu1  ;;  %v9546_v23 = vld [vmem:[%s12588_s2 + $0x80] sm:$0xff]  }
 0x176   : > { %v8587_v60 = vpop.f32.mrb[55].mxu1  ;;  %8962 = vmatpush3.bf16.msra.mxu0 %v9546_v23 }
 0x177   : > { %v1725_v57 = vadd.f32 %v8476_v43, %v10335_v8  ;;  %v10503_v63 = vadd.f32 %v8585_v46, %v1722_v41  ;;  %v8588_v2 = vadd.f32 %v8587_v60, %v8586_v48  ;;  %v9548_v60 = vld [vmem:[%s12588_s2 + $0xc8] sm:$0xff]  }
 0x178   : > { %8963 = vmatprep.subr.bf16.mxu0 %v9548_v60 }
 0x179   : > { %v8477_v12 = vpop.f32.mrb[56].mxu0  ;;  %v10511_v14 = vadd.f32 %v8588_v2, %v1725_v57 }
 0x17a   : > { %v8478_v27 = vpop.f32.mrb[57].mxu0 }
 0x17b   : > { %v8479_v49 = vadd.f32 %v8478_v27, %v8477_v12  ;;  %v8480_v51 = vpop.f32.mrb[58].mxu0  ;;  %v8589_v62 = vpop.f32.mrb[56].mxu1  ;;  %v9547_v12 = vld [vmem:[%s12588_s2 + $0x30] sm:$0xff]  }
 0x17c   : > { %v8481_v9 = vpop.f32.mrb[59].mxu0  ;;  %v8590_v22 = vpop.f32.mrb[57].mxu1  ;;  %8862 = vmatpush3.bf16.msra.mxu1 %v9547_v12 }
 0x17d   : > { %v1730_v20 = vadd.f32 %v8479_v49, %v10335_v8  ;;  %v8482_v59 = vadd.f32 %v8481_v9, %v8480_v51  ;;  %v8591_v32 = vadd.f32 %v8590_v22, %v8589_v62  ;;  %v8592_v33 = vpop.f32.mrb[58].mxu1 }
 0x17e   : > { %v8593_v45 = vpop.f32.mrb[59].mxu1 }
 0x17f   : > { %v1733_v42 = vadd.f32 %v8482_v59, %v10335_v8  ;;  %v10515_v58 = vadd.f32 %v8591_v32, %v1730_v20  ;;  %v8594_v1 = vadd.f32 %v8593_v45, %v8592_v33  ;;  %v9550_v20 = vld [vmem:[%s12588_s2 + $0xd0] sm:$0xff]  }
 0x180   : > { %v9551_v32 = vld [vmem:[%s12588_s2 + $0x90] sm:$0xff]  }
 0x181   : > { %v8483_v11 = vpop.f32.mrb[60].mxu0  ;;  %v10517_v19 = vadd.f32 %v8594_v1, %v1733_v42 }
 0x182   : > { %v8484_v21 = vpop.f32.mrb[61].mxu0 }
 0x183   : > { %v8485_v38 = vadd.f32 %v8484_v21, %v8483_v11  ;;  %v8486_v52 = vpop.f32.mrb[62].mxu0  ;;  %v8595_v13 = vpop.f32.mrb[60].mxu1  ;;  %v2436_v11 = vld [vmem:[#allocation3 + $0x18] sm:$0x1] }
 0x184   : > { %v8487_v6 = vpop.f32.mrb[63].mxu0  ;;  %v8596_v43 = vpop.f32.mrb[61].mxu1 }
 0x185   : > { %v1738_v34 = vadd.f32 %v8485_v38, %v10335_v8  ;;  %v8488_v41 = vadd.f32 %v8487_v6, %v8486_v52  ;;  %v8597_v44 = vadd.f32 %v8596_v43, %v8595_v13  ;;  %v8598_v46 = vpop.f32.mrb[62].mxu1  ;;  %v2437_v52 = vsel %vm10551_vm2, 0, %v2436_v11  ;;  %v9552_v43 = vld [vmem:[%s12588_s2 + $0xd8] sm:$0xff]   ;;  %v2439_v11 = vld [vmem:[#allocation3 + $0x24] sm:$0x1] }
 0x186   : > { %v8599_v57 = vpop.f32.mrb[63].mxu1  ;;  %v9721_v13 = vmov 0   ;;  %2438 = vst [vmem:[#allocation3 + $0x18] sm:$0x1] %v2437_v52  ;;  %v2440_v52 = vsel %vm10551_vm2, 0, %v2439_v11 }
 0x187   : > { %v1741_v48 = vadd.f32 %v8488_v41, %v10335_v8  ;;  %v10530_v2 = vadd.f32 %v8597_v44, %v1738_v34  ;;  %v8600_v7 = vadd.f32 %v8599_v57, %v8598_v46  ;;  %v9549_v8 = vld [vmem:[%s12588_s2 + $0x88] sm:$0xff]   ;;  %2420 = vst [vmem:[#allocation3] sm:$0xf] %v9721_v13  ;;  %2421 = vst [vmem:[#allocation3 + $0x4] sm:$0xf] %v9721_v13 }
 0x188   : > { %8964 = vmatpush3.bf16.msra.mxu0 %v9549_v8  ;;  %2422 = vst [vmem:[#allocation3 + $0x8] sm:$0x1] %v9721_v13  ;;  %2424 = vst [vmem:[#allocation3 + $0xcc] sm:$0xf] %v9721_v13  ;;  %v2492_v41 = vld [vmem:[#allocation3 + $0x20] sm:$0x1] }
 0x189   : > { %v8617_v27 = vpop.f32.mrb[64].mxu0  ;;  %v10541_v49 = vadd.f32 %v8600_v7, %v1741_v48  ;;  %8965 = vmatprep.subr.bf16.mxu0 %v9550_v20  ;;  %2425 = vst [vmem:[#allocation3 + $0xd0] sm:$0xf] %v9721_v13  ;;  %2426 = vst [vmem:[#allocation3 + $0xd4] sm:$0x1] %v9721_v13  ;;  %v2493_v48 = vsel %vm10558_vm4, 0, %v2492_v41 }
 0x18a   : > { %v8618_v51 = vpop.f32.mrb[65].mxu0  ;;  %v2489_v57 = vld [vmem:[#allocation3 + $0x14] sm:$0x1]  ;;  %2494 = vst [vmem:[#allocation3 + $0x20] sm:$0x1] %v2493_v48 }
 0x18b   : > { %v8619_v62 = vadd.f32 %v8618_v51, %v8617_v27  ;;  %v8620_v9 = vpop.f32.mrb[66].mxu0  ;;  %v8729_v59 = vpop.f32.mrb[64].mxu1  ;;  %v2490_v7 = vsel %vm10558_vm4, 0, %v2489_v57  ;;  %2441 = vst [vmem:[#allocation3 + $0x24] sm:$0x1] %v2440_v52 }
 0x18c   : > { %v8621_v22 = vpop.f32.mrb[67].mxu0  ;;  %v8730_v45 = vpop.f32.mrb[65].mxu1  ;;  %8966 = vmatpush3.bf16.msra.mxu0 %v9551_v32  ;;  %2491 = vst [vmem:[#allocation3 + $0x14] sm:$0x1] %v2490_v7  ;;  %v2498_v7 = vld [vmem:[#allocation3 + $0x38] sm:$0x1] }
 0x18d   : > { %v1940_v33 = vadd.f32 %v8619_v62, %v10342_v15  ;;  %v8622_v42 = vadd.f32 %v8621_v22, %v8620_v9  ;;  %v8731_v21 = vadd.f32 %v8730_v45, %v8729_v59  ;;  %v8732_v38 = vpop.f32.mrb[66].mxu1  ;;  %v2433_v15 = vld [vmem:[#allocation3 + $0xc] sm:$0x1]  ;;  %8967 = vmatprep.subr.bf16.mxu0 %v9552_v43  ;;  %v2442_v22 = vld [vmem:[#allocation3 + $0x30] sm:$0x1] }
 0x18e   : > { %v8733_v23 = vpop.f32.mrb[67].mxu1  ;;  %v2434_v34 = vsel %vm10551_vm2, 0, %v2433_v15  ;;  %v2430_v32 = vld [vmem:[#allocation3] sm:$0x1]  ;;  %v2443_v45 = vsel %vm10551_vm2, 0, %v2442_v22 }
 0x18f   : > { %v1943_v6 = vadd.f32 %v8622_v42, %v10346_v36  ;;  %v8734_v44 = vadd.f32 %v8733_v23, %v8732_v38  ;;  %v10568_v46 = vadd.f32 %v8731_v21, %v1940_v33  ;;  %2435 = vst [vmem:[#allocation3 + $0xc] sm:$0x1] %v2434_v34  ;;  %v9553_v36 = vld [vmem:[%s12588_s2 + $0x98] sm:$0xff]   ;;  %2444 = vst [vmem:[#allocation3 + $0x30] sm:$0x1] %v2443_v45 }
 0x190   : > { %8968 = vmatpush3.bf16.msra.mxu0 %v9553_v36  ;;  %v2486_v34 = vld [vmem:[#allocation3 + $0x8] sm:$0x1] }
 0x191   : > { %v8623_v60 = vpop.f32.mrb[68].mxu0  ;;  %v10577_v12 = vadd.f32 %v8734_v44, %v1943_v6  ;;  %v2431_v6 = vsel %vm10551_vm2, 0, %v2430_v32  ;;  %v2487_v44 = vsel %vm10558_vm4, 0, %v2486_v34 }
 0x192   : > { %v8624_v10 = vpop.f32.mrb[69].mxu0  ;;  %2432 = vst [vmem:[#allocation3] sm:$0x1] %v2431_v6  ;;  %2488 = vst [vmem:[#allocation3 + $0x8] sm:$0x1] %v2487_v44 }
 0x193   : > { %v8625_v8 = vadd.f32 %v8624_v10, %v8623_v60  ;;  %v8626_v27 = vpop.f32.mrb[70].mxu0  ;;  %v8735_v51 = vpop.f32.mrb[68].mxu1  ;;  %v9558_v10 = vld [vmem:[%s12588_s2 + $0xe8] sm:$0xff]  }
 0x194   : > { %v8627_v62 = vpop.f32.mrb[71].mxu0  ;;  %v8736_v59 = vpop.f32.mrb[69].mxu1  ;;  %v2448_v44 = vld [vmem:[#allocation3 + $0x48] sm:$0x1] }
 0x195   : > { %v1948_v9 = vadd.f32 %v8625_v8, %v10352_v28  ;;  %v8628_v20 = vadd.f32 %v8627_v62, %v8626_v27  ;;  %v8737_v33 = vadd.f32 %v8736_v59, %v8735_v51  ;;  %v8738_v42 = vpop.f32.mrb[70].mxu1  ;;  %v9554_v28 = vld [vmem:[%s12588_s2 + $0xe0] sm:$0xff]   ;;  %v2499_v62 = vsel %vm10558_vm4, 0, %v2498_v7 }
 0x196   : > { %v8739_v38 = vpop.f32.mrb[71].mxu1  ;;  %8969 = vmatprep.subr.bf16.mxu0 %v9554_v28  ;;  %2500 = vst [vmem:[#allocation3 + $0x38] sm:$0x1] %v2499_v62  ;;  %v9560_v28 = vld [vmem:[%s12588_s2 + $0xf0] sm:$0xff]   ;;  %v2449_v7 = vsel %vm10551_vm2, 0, %v2448_v44  ;;  %v9557_v62 = vld [vmem:[%s12588_s2 + $0x38] sm:$0xff]  }
 0x197   : > { %v1951_v21 = vadd.f32 %v8628_v20, %v10356_v40  ;;  %v8740_v15 = vadd.f32 %v8739_v38, %v8738_v42  ;;  %v10585_v13 = vadd.f32 %v8737_v33, %v1948_v9  ;;  %v9556_v40 = vld [vmem:[%s12588_s2 + $0xa0] sm:$0xff]   ;;  %v2495_v9 = vld [vmem:[#allocation3 + $0x2c] sm:$0x1]  ;;  %2450 = vst [vmem:[#allocation3 + $0x48] sm:$0x1] %v2449_v7 }
 0x198   : > { %8970 = vmatpush3.bf16.msra.mxu0 %v9556_v40  ;;  %v9559_v20 = vld [vmem:[%s12588_s2 + $0xa8] sm:$0xff]   ;;  %v2496_v32 = vsel %vm10558_vm4, 0, %v2495_v9  ;;  %v3218_v33 = vld [vmem:[#allocation3 + $0x4] sm:$0xf] }
 0x199   : > { %v8629_v23 = vpop.f32.mrb[72].mxu0  ;;  %v10595_v43 = vadd.f32 %v8740_v15, %v1951_v21  ;;  %8971 = vmatprep.subr.bf16.mxu0 %v9558_v10  ;;  %2497 = vst [vmem:[#allocation3 + $0x2c] sm:$0x1] %v2496_v32  ;;  %v3278_v45 = vshll.u32 %v3218_v33, 16  ;;  %v3282_v11 = vshrl.u32 %v3218_v33, 16 }
 0x19a   : > { %v8630_v41 = vpop.f32.mrb[73].mxu0  ;;  %v3217_v52 = vld [vmem:[#allocation3] sm:$0xf]  ;;  %v2445_v10 = vld [vmem:[#allocation3 + $0x3c] sm:$0x1] }
 0x19b   : > { %v8631_v48 = vadd.f32 %v8630_v41, %v8629_v23  ;;  %v8632_v57 = vpop.f32.mrb[74].mxu0  ;;  %v8741_v36 = vpop.f32.mrb[72].mxu1  ;;  %v3269_v6 = vshrl.u32 %v3217_v52, 16  ;;  %v3272_v23 = vshll.u32 %v3217_v52, 16  ;;  %v10616_v40 = vrot.slane %v3278_v45, 5 }
 0x19c   : > { %v8633_v60 = vpop.f32.mrb[75].mxu0  ;;  %v8742_v51 = vpop.f32.mrb[73].mxu1  ;;  %8972 = vmatpush3.bf16.msra.mxu0 %v9559_v20  ;;  %v3284_v34 = vrot.slane %v3282_v11, 4  ;;  %v2446_v9 = vsel %vm10551_vm2, 0, %v2445_v10  ;;  %v2504_v20 = vld [vmem:[#allocation3 + $0x50] sm:$0x1] }
 0x19d   : > { %v1956_v8 = vadd.f32 %v8631_v48, %v10366_v26  ;;  %v8634_v27 = vadd.f32 %v8633_v60, %v8632_v57  ;;  %v8743_v59 = vadd.f32 %v8742_v51, %v8741_v36  ;;  %v8744_v22 = vpop.f32.mrb[74].mxu1  ;;  %v9561_v48 = vld [vmem:[%s12588_s2 + $0xb0] sm:$0xff]   ;;  %v9555_v60 = vld [vmem:[%s12588_s2 + $0x78] sm:$0xff]   ;;  %8973 = vmatprep.subr.bf16.mxu0 %v9560_v28  ;;  %2447 = vst [vmem:[#allocation3 + $0x3c] sm:$0x1] %v2446_v9  ;;  %v3274_v45 = vrot.slane %v3272_v23, 5 }
 0x19e   : > { %v8745_v42 = vpop.f32.mrb[75].mxu1  ;;  %8863 = vmatprep.subr.bf16.mxu1 %v9555_v60  ;;  %v2501_v52 = vld [vmem:[#allocation3 + $0x44] sm:$0x1] }
 0x19f   : > { %v1959_v26 = vadd.f32 %v8634_v27, %v10369_v50  ;;  %v8746_v21 = vadd.f32 %v8745_v42, %v8744_v22  ;;  %v10611_v38 = vadd.f32 %v8743_v59, %v1956_v8  ;;  %v3271_v8 = vrot.slane %v3269_v6, 4  ;;  %v9562_v42 = vld [vmem:[%s12588_s2 + $0xf8] sm:$0xff]   ;;  %8864 = vmatpush3.bf16.msra.mxu1 %v9557_v62  ;;  %v2454_v62 = vld [vmem:[#allocation3 + $0x60] sm:$0x1] }
 0x1a0   : > { %8974 = vmatpush3.bf16.msra.mxu0 %v9561_v48  ;;  %v3285_v59 = vor.u32 %v3284_v34, %v10616_v40  ;;  %v2502_v34 = vsel %vm10558_vm4, 0, %v2501_v52 }
 0x1a1   : > { %v8635_v15 = vpop.f32.mrb[76].mxu0  ;;  %v10618_v41 = vadd.f32 %v8746_v21, %v1959_v26  ;;  %v2505_v26 = vsel %vm10558_vm4, 0, %v2504_v20  ;;  %8975 = vmatprep.subr.bf16.mxu0 %v9562_v42  ;;  %2503 = vst [vmem:[#allocation3 + $0x44] sm:$0x1] %v2502_v34  ;;  %v3275_v44 = vor.u32 %v3274_v45, %v3271_v8  ;;  %v2455_v8 = vsel %vm10551_vm2, 0, %v2454_v62 }
 0x1a2   : > { %v8636_v50 = vpop.f32.mrb[77].mxu0  ;;  %2506 = vst [vmem:[#allocation3 + $0x50] sm:$0x1] %v2505_v26  ;;  %2456 = vst [vmem:[#allocation3 + $0x60] sm:$0x1] %v2455_v8 }
 0x1a3   : > { %v8637_v57 = vadd.f32 %v8636_v50, %v8635_v15  ;;  %v8638_v36 = vpop.f32.mrb[78].mxu0  ;;  %v8747_v27 = vpop.f32.mrb[76].mxu1  ;;  %v3219_v15 = vld [vmem:[#allocation3 + $0x8] sm:$0x1]  ;;  %v3276_v10 = vrot.slane %v3275_v44, 4 }
 0x1a4   : > { %v8639_v51 = vpop.f32.mrb[79].mxu0  ;;  %v8748_v33 = vpop.f32.mrb[77].mxu1  ;;  %v2451_v42 = vld [vmem:[#allocation3 + $0x54] sm:$0x1]  ;;  %v2510_v45 = vld [vmem:[#allocation3 + $0x68] sm:$0x1] }
 0x1a5   : > { %v1964_v22 = vadd.f32 %v8637_v57, %v10381_v0  ;;  %v8640_v32 = vadd.f32 %v8639_v51, %v8638_v36  ;;  %v8749_v11 = vadd.f32 %v8748_v33, %v8747_v27  ;;  %v8750_v21 = vpop.f32.mrb[78].mxu1  ;;  %v9563_v0 = vld [vmem:[%s12588_s2 + $0xb8] sm:$0xff]   ;;  %v3286_v36 = vrot.slane %v3285_v59, 4 }
 0x1a6   : > { %v8751_v6 = vpop.f32.mrb[79].mxu1  ;;  %8976 = vmatpush3.bf16.msra.mxu0 %v9563_v0  ;;  %v2507_v34 = vld [vmem:[#allocation3 + $0x5c] sm:$0x1] }
 0x1a7   : > { %v1967_v28 = vadd.f32 %v8640_v32, %v10392_v39  ;;  %v8752_v23 = vadd.f32 %v8751_v6, %v8750_v21  ;;  %v10646_v50 = vadd.f32 %v8749_v11, %v1964_v22  ;;  %v3288_v39 = vshll.u32 %v3219_v15, 16  ;;  %v9564_v21 = vld [vmem:[#allocation3] sm:$0xff]  }
 0x1a8   : > { %v3281_v32 = vsel %vm10648_vm7, %v3276_v10, %v10616_v40  ;;  %v2452_v15 = vsel %vm10551_vm2, 0, %v2451_v42 }
 0x1a9   : > { %v8641_v48 = vpop.f32.mrb[80].mxu0  ;;  %v10652_v7 = vadd.f32 %v8752_v23, %v1967_v28  ;;  %v3290_v9 = vrot.slane %v3288_v39, 5  ;;  %v2511_v28 = vsel %vm10558_vm4, 0, %v2510_v45  ;;  %2453 = vst [vmem:[#allocation3 + $0x54] sm:$0x1] %v2452_v15 }
 0x1aa   : > { %v8642_v60 = vpop.f32.mrb[81].mxu0  ;;  %2512 = vst [vmem:[#allocation3 + $0x68] sm:$0x1] %v2511_v28  ;;  %v9567_v28 = vld [vmem:[%s12588_s2 + $0x140] sm:$0xff]  }
 0x1ab   : > { %v8643_v27 = vadd.f32 %v8642_v60, %v8641_v48  ;;  %v8644_v51 = vpop.f32.mrb[82].mxu0  ;;  %v8753_v20 = vpop.f32.mrb[80].mxu1  ;;  %v3291_v11 = vsel %vm10648_vm7, %v3286_v36, %v3290_v9  ;;  %v2508_v48 = vsel %vm10558_vm4, 0, %v2507_v34  ;;  %9073 = vmatprep.subr.bf16.mxu1 %v9567_v28 }
 0x1ac   : > { %v8645_v22 = vpop.f32.mrb[83].mxu0  ;;  %v8754_v26 = vpop.f32.mrb[81].mxu1  ;;  %v8057_v40 = vcombine.low %v3281_v32, %v3291_v11  ;;  %2509 = vst [vmem:[#allocation3 + $0x5c] sm:$0x1] %v2508_v48  ;;  %v2457_v32 = vld [vmem:[#allocation3 + $0x6c] sm:$0x1] }
 0x1ad   : > { %v1972_v59 = vadd.f32 %v8643_v27, %v10400_v55  ;;  %v8646_v33 = vadd.f32 %v8645_v22, %v8644_v51  ;;  %v8755_v52 = vadd.f32 %v8754_v26, %v8753_v20  ;;  %v8756_v0 = vpop.f32.mrb[82].mxu1  ;;  %v2458_v26 = vsel %vm10551_vm2, 0, %v2457_v32  ;;  %v2516_v11 = vld [vmem:[#allocation3 + $0x80] sm:$0x1] }
 0x1ae   : > { %v8757_v6 = vpop.f32.mrb[83].mxu1  ;;  %6671 = vmatprep.mubr.bf16.mxu1 %v8057_v40  ;;  %2459 = vst [vmem:[#allocation3 + $0x6c] sm:$0x1] %v2458_v26  ;;  %v9568_v40 = vld [vmem:[%s12588_s2 + $0x100] sm:$0xff]  }
 0x1af   : > { %v1975_v55 = vadd.f32 %v8646_v33, %v10402_v35  ;;  %v8758_v23 = vadd.f32 %v8757_v6, %v8756_v0  ;;  %v10667_v44 = vadd.f32 %v8755_v52, %v1972_v59  ;;  %6672 = vmatmul.mubr.bf16.vlgmr.msra.gmra.mrb[128].mxu1 %v9564_v21  ;;  %v2460_v35 = vld [vmem:[#allocation3 + $0x78] sm:$0x1]  ;;  %v2513_v0 = vld [vmem:[#allocation3 + $0x74] sm:$0x1] }
 0x1b0   : > { %v2461_v9 = vsel %vm10551_vm2, 0, %v2460_v35  ;;  %9074 = vmatpush3.bf16.msra.mxu1 %v9568_v40 }
 0x1b1   : > { %v8647_v36 = vpop.f32.mrb[84].mxu0  ;;  %v10671_v60 = vadd.f32 %v8758_v23, %v1975_v55  ;;  %2462 = vst [vmem:[#allocation3 + $0x78] sm:$0x1] %v2461_v9 }
 0x1b2   : > { %v8648_v39 = vpop.f32.mrb[85].mxu0 }
 0x1b3   : > { %v8649_v10 = vadd.f32 %v8648_v39, %v8647_v36  ;;  %v8650_v27 = vpop.f32.mrb[86].mxu0  ;;  %v8759_v51 = vpop.f32.mrb[84].mxu1 }
 0x1b4   : > { %v8651_v62 = vpop.f32.mrb[87].mxu0  ;;  %v8760_v8 = vpop.f32.mrb[85].mxu1 }
 0x1b5   : > { %v1980_v20 = vadd.f32 %v8649_v10, %v10410_v56  ;;  %v8652_v22 = vadd.f32 %v8651_v62, %v8650_v27  ;;  %v8761_v59 = vadd.f32 %v8760_v8, %v8759_v51  ;;  %v8762_v33 = vpop.f32.mrb[86].mxu1  ;;  %v2517_v56 = vsel %vm10558_vm4, 0, %v2516_v11 }
 0x1b6   : > { %v8763_v45 = vpop.f32.mrb[87].mxu1  ;;  %2518 = vst [vmem:[#allocation3 + $0x80] sm:$0x1] %v2517_v56 }
 0x1b7   : > { %v1983_v42 = vadd.f32 %v8652_v22, %v10418_v47  ;;  %v8764_v21 = vadd.f32 %v8763_v45, %v8762_v33  ;;  %v10679_v52 = vadd.f32 %v8761_v59, %v1980_v20  ;;  %v2514_v47 = vsel %vm10558_vm4, 0, %v2513_v0 }
 0x1b8   : > { %2515 = vst [vmem:[#allocation3 + $0x74] sm:$0x1] %v2514_v47 }
 0x1b9   : > { %v8653_v15 = vpop.f32.mrb[88].mxu0  ;;  %v10691_v6 = vadd.f32 %v8764_v21, %v1983_v42 }
 0x1ba   : > { %v8654_v55 = vpop.f32.mrb[89].mxu0 }
 0x1bb   : > { %v8655_v34 = vadd.f32 %v8654_v55, %v8653_v15  ;;  %v8656_v23 = vpop.f32.mrb[90].mxu0  ;;  %v8765_v48 = vpop.f32.mrb[88].mxu1 }
 0x1bc   : > { %v8657_v36 = vpop.f32.mrb[91].mxu0  ;;  %v8766_v27 = vpop.f32.mrb[89].mxu1 }
 0x1bd   : > { %v1988_v39 = vadd.f32 %v8655_v34, %v10426_v29  ;;  %v8658_v10 = vadd.f32 %v8657_v36, %v8656_v23  ;;  %v8767_v35 = vadd.f32 %v8766_v27, %v8765_v48  ;;  %v8768_v51 = vpop.f32.mrb[90].mxu1 }
 0x1be   : > { %v8769_v9 = vpop.f32.mrb[91].mxu1 }
 0x1bf   : > { %v1991_v62 = vadd.f32 %v8658_v10, %v10428_v31  ;;  %v8770_v20 = vadd.f32 %v8769_v9, %v8768_v51  ;;  %v10695_v22 = vadd.f32 %v8767_v35, %v1988_v39  ;;  %v2466_v9 = vld [vmem:[#allocation3 + $0x90] sm:$0x1] }
 0x1c1   : > { %v8659_v8 = vpop.f32.mrb[92].mxu0  ;;  %v10697_v59 = vadd.f32 %v8770_v20, %v1991_v62 }
 0x1c2   : > { %v8660_v32 = vpop.f32.mrb[93].mxu0 }
 0x1c3   : > { %v8661_v33 = vadd.f32 %v8660_v32, %v8659_v8  ;;  %v8662_v26 = vpop.f32.mrb[94].mxu0  ;;  %v8771_v42 = vpop.f32.mrb[92].mxu1  ;;  %v2467_v32 = vsel %vm10551_vm2, 0, %v2466_v9 }
 0x1c4   : > { %v8663_v45 = vpop.f32.mrb[95].mxu0  ;;  %v8772_v21 = vpop.f32.mrb[93].mxu1  ;;  %2468 = vst [vmem:[#allocation3 + $0x90] sm:$0x1] %v2467_v32 }
 0x1c5   : > { %v1996_v29 = vadd.f32 %v8661_v33, %v10436_v25  ;;  %v8664_v11 = vadd.f32 %v8663_v45, %v8662_v26  ;;  %v8773_v56 = vadd.f32 %v8772_v21, %v8771_v42  ;;  %v8774_v0 = vpop.f32.mrb[94].mxu1  ;;  %v2463_v21 = vld [vmem:[#allocation3 + $0x84] sm:$0x1] }
 0x1c6   : > { %v8775_v15 = vpop.f32.mrb[95].mxu1 }
 0x1c7   : > { %v1999_v31 = vadd.f32 %v8664_v11, %v10444_v30  ;;  %v8776_v28 = vadd.f32 %v8775_v15, %v8774_v0  ;;  %v10701_v40 = vadd.f32 %v8773_v56, %v1996_v29  ;;  %v2522_v56 = vld [vmem:[#allocation3 + $0x98] sm:$0x1]  ;;  %v2464_v15 = vsel %vm10551_vm2, 0, %v2463_v21 }
 0x1c8   : > { %2465 = vst [vmem:[#allocation3 + $0x84] sm:$0x1] %v2464_v15 }
 0x1c9   : > { %v8665_v47 = vpop.f32.mrb[96].mxu0  ;;  %v10703_v34 = vadd.f32 %v8776_v28, %v1999_v31  ;;  %v2523_v28 = vsel %vm10558_vm4, 0, %v2522_v56  ;;  %v9574_v56 = vld [vmem:[%s12588_s2 + $0x108] sm:$0xff]  }
 0x1ca   : > { %v8666_v55 = vpop.f32.mrb[97].mxu0  ;;  %2524 = vst [vmem:[#allocation3 + $0x98] sm:$0x1] %v2523_v28 }
 0x1cb   : > { %v8667_v23 = vadd.f32 %v8666_v55, %v8665_v47  ;;  %v8668_v48 = vpop.f32.mrb[98].mxu0  ;;  %v8777_v36 = vpop.f32.mrb[96].mxu1  ;;  %v2519_v47 = vld [vmem:[#allocation3 + $0x8c] sm:$0x1] }
 0x1cc   : > { %v8669_v39 = vpop.f32.mrb[99].mxu0  ;;  %v8778_v27 = vpop.f32.mrb[97].mxu1  ;;  %v9573_v55 = vld [vmem:[%s12588_s2 + $0x148] sm:$0xff]  }
 0x1cd   : > { %v2004_v25 = vadd.f32 %v8667_v23, %v10450_v3  ;;  %v8670_v10 = vadd.f32 %v8669_v39, %v8668_v48  ;;  %v8779_v35 = vadd.f32 %v8778_v27, %v8777_v36  ;;  %v8780_v51 = vpop.f32.mrb[98].mxu1  ;;  %9075 = vmatprep.subr.bf16.mxu1 %v9573_v55  ;;  %v2528_v55 = vld [vmem:[#allocation3 + $0xb0] sm:$0x1] }
 0x1ce   : > { %v8781_v62 = vpop.f32.mrb[99].mxu1  ;;  %9076 = vmatpush3.bf16.msra.mxu1 %v9574_v56 }
 0x1cf   : > { %v2007_v30 = vadd.f32 %v8670_v10, %v10454_v18  ;;  %v8782_v20 = vadd.f32 %v8781_v62, %v8780_v51  ;;  %v10707_v8 = vadd.f32 %v8779_v35, %v2004_v25 }
 0x1d1   : > { %v8671_v33 = vpop.f32.mrb[100].mxu0  ;;  %v10711_v42 = vadd.f32 %v8782_v20, %v2007_v30 }
 0x1d2   : > { %v8672_v26 = vpop.f32.mrb[101].mxu0 }
 0x1d3   : > { %v8673_v3 = vadd.f32 %v8672_v26, %v8671_v33  ;;  %v8674_v45 = vpop.f32.mrb[102].mxu0  ;;  %v8783_v29 = vpop.f32.mrb[100].mxu1 }
 0x1d4   : > { %v8675_v11 = vpop.f32.mrb[103].mxu0  ;;  %v8784_v31 = vpop.f32.mrb[101].mxu1 }
 0x1d5   : > { %v2012_v18 = vadd.f32 %v8673_v3, %v10461_v61  ;;  %v8676_v0 = vadd.f32 %v8675_v11, %v8674_v45  ;;  %v8785_v23 = vadd.f32 %v8784_v31, %v8783_v29  ;;  %v8786_v48 = vpop.f32.mrb[102].mxu1  ;;  %v2520_v61 = vsel %vm10558_vm4, 0, %v2519_v47  ;;  %v2469_v47 = vld [vmem:[#allocation3 + $0x9c] sm:$0x1] }
 0x1d6   : > { %v8787_v39 = vpop.f32.mrb[103].mxu1  ;;  %2521 = vst [vmem:[#allocation3 + $0x8c] sm:$0x1] %v2520_v61  ;;  %v2470_v61 = vsel %vm10551_vm2, 0, %v2469_v47  ;;  %v2478_v47 = vld [vmem:[#allocation3 + $0xc0] sm:$0x1] }
 0x1d7   : > { %v2015_v36 = vadd.f32 %v8676_v0, %v10470_v17  ;;  %v8788_v25 = vadd.f32 %v8787_v39, %v8786_v48  ;;  %v10724_v10 = vadd.f32 %v8785_v23, %v2012_v18  ;;  %v2472_v18 = vld [vmem:[#allocation3 + $0xa8] sm:$0x1]  ;;  %v2525_v39 = vld [vmem:[#allocation3 + $0xa4] sm:$0x1]  ;;  %2471 = vst [vmem:[#allocation3 + $0x9c] sm:$0x1] %v2470_v61 }
 0x1d8   : > { %v2473_v31 = vsel %vm10551_vm2, 0, %v2472_v18 }
 0x1d9   : > { %v8677_v27 = vpop.f32.mrb[104].mxu0  ;;  %v10726_v51 = vadd.f32 %v8788_v25, %v2015_v36  ;;  %2474 = vst [vmem:[#allocation3 + $0xa8] sm:$0x1] %v2473_v31  ;;  %v2529_v36 = vsel %vm10558_vm4, 0, %v2528_v55 }
 0x1da   : > { %v8678_v35 = vpop.f32.mrb[105].mxu0  ;;  %2530 = vst [vmem:[#allocation3 + $0xb0] sm:$0x1] %v2529_v36 }
 0x1db   : > { %v8679_v30 = vadd.f32 %v8678_v35, %v8677_v27  ;;  %v8680_v62 = vpop.f32.mrb[106].mxu0  ;;  %v8789_v9 = vpop.f32.mrb[104].mxu1 }
 0x1dc   : > { %v8681_v20 = vpop.f32.mrb[107].mxu0  ;;  %v8790_v26 = vpop.f32.mrb[105].mxu1 }
 0x1dd   : > { %v2020_v32 = vadd.f32 %v8679_v30, %v10476_v4  ;;  %v8682_v33 = vadd.f32 %v8681_v20, %v8680_v62  ;;  %v8791_v3 = vadd.f32 %v8790_v26, %v8789_v9  ;;  %v8792_v17 = vpop.f32.mrb[106].mxu1  ;;  %v2526_v30 = vsel %vm10558_vm4, 0, %v2525_v39 }
 0x1de   : > { %v8793_v29 = vpop.f32.mrb[107].mxu1  ;;  %2527 = vst [vmem:[#allocation3 + $0xa4] sm:$0x1] %v2526_v30 }
 0x1df   : > { %v2023_v45 = vadd.f32 %v8682_v33, %v10478_v16  ;;  %v8794_v11 = vadd.f32 %v8793_v29, %v8792_v17  ;;  %v10730_v21 = vadd.f32 %v8791_v3, %v2020_v32 }
 0x1e1   : > { %v8683_v0 = vpop.f32.mrb[108].mxu0  ;;  %v10737_v15 = vadd.f32 %v8794_v11, %v2023_v45 }
 0x1e2   : > { %v8684_v4 = vpop.f32.mrb[109].mxu0 }
 0x1e3   : > { %v8685_v28 = vadd.f32 %v8684_v4, %v8683_v0  ;;  %v8686_v16 = vpop.f32.mrb[110].mxu0  ;;  %v8795_v23 = vpop.f32.mrb[108].mxu1 }
 0x1e4   : > { %v8687_v48 = vpop.f32.mrb[111].mxu0  ;;  %v8796_v35 = vpop.f32.mrb[109].mxu1 }
 0x1e5   : > { %v2028_v25 = vadd.f32 %v8685_v28, %v10485_v24  ;;  %v8688_v27 = vadd.f32 %v8687_v48, %v8686_v16  ;;  %v8797_v62 = vadd.f32 %v8796_v35, %v8795_v23  ;;  %v8798_v9 = vpop.f32.mrb[110].mxu1  ;;  %v2479_v48 = vsel %vm10551_vm2, 0, %v2478_v47 }
 0x1e6   : > { %v8799_v32 = vpop.f32.mrb[111].mxu1  ;;  %2480 = vst [vmem:[#allocation3 + $0xc0] sm:$0x1] %v2479_v48 }
 0x1e7   : > { %v2031_v20 = vadd.f32 %v8688_v27, %v10493_v5  ;;  %v8800_v33 = vadd.f32 %v8799_v32, %v8798_v9  ;;  %v10747_v26 = vadd.f32 %v8797_v62, %v2028_v25  ;;  %v2534_v25 = vld [vmem:[#allocation3 + $0xc8] sm:$0x1]  ;;  %v2531_v62 = vld [vmem:[#allocation3 + $0xbc] sm:$0x1] }
 0x1e8   : > { %v2535_v30 = vsel %vm10558_vm4, 0, %v2534_v25  ;;  %v2532_v32 = vsel %vm10558_vm4, 0, %v2531_v62 }
 0x1e9   : > { %v8689_v3 = vpop.f32.mrb[112].mxu0  ;;  %v10749_v45 = vadd.f32 %v8800_v33, %v2031_v20  ;;  %2536 = vst [vmem:[#allocation3 + $0xc8] sm:$0x1] %v2535_v30  ;;  %2533 = vst [vmem:[#allocation3 + $0xbc] sm:$0x1] %v2532_v32 }
 0x1ea   : > { %v8690_v17 = vpop.f32.mrb[113].mxu0 }
 0x1eb   : > { %v8691_v24 = vadd.f32 %v8690_v17, %v8689_v3  ;;  %v8692_v29 = vpop.f32.mrb[114].mxu0  ;;  %v8801_v11 = vpop.f32.mrb[112].mxu1 }
 0x1ec   : > { %v8693_v56 = vpop.f32.mrb[115].mxu0  ;;  %v8802_v31 = vpop.f32.mrb[113].mxu1 }
 0x1ed   : > { %v2036_v18 = vadd.f32 %v8691_v24, %v10497_v37  ;;  %v8694_v0 = vadd.f32 %v8693_v56, %v8692_v29  ;;  %v8803_v4 = vadd.f32 %v8802_v31, %v8801_v11  ;;  %v8804_v28 = vpop.f32.mrb[114].mxu1  ;;  %v2475_v37 = vld [vmem:[#allocation3 + $0xb4] sm:$0x1] }
 0x1ee   : > { %v8805_v16 = vpop.f32.mrb[115].mxu1  ;;  %v9579_v24 = vld [vmem:[%s12588_s2 + $0x150] sm:$0xff]  }
 0x1ef   : > { %v2039_v5 = vadd.f32 %v8694_v0, %v10499_v53  ;;  %v8806_v55 = vadd.f32 %v8805_v16, %v8804_v28  ;;  %v10753_v23 = vadd.f32 %v8803_v4, %v2036_v18  ;;  %v2476_v53 = vsel %vm10551_vm2, 0, %v2475_v37  ;;  %9077 = vmatprep.subr.bf16.mxu1 %v9579_v24 }
 0x1f0   : > { %2477 = vst [vmem:[#allocation3 + $0xb4] sm:$0x1] %v2476_v53 }
 0x1f1   : > { %v8695_v61 = vpop.f32.mrb[116].mxu0  ;;  %v10757_v39 = vadd.f32 %v8806_v55, %v2039_v5 }
 0x1f2   : > { %v8696_v36 = vpop.f32.mrb[117].mxu0 }
 0x1f3   : > { %v8697_v27 = vadd.f32 %v8696_v36, %v8695_v61  ;;  %v8698_v35 = vpop.f32.mrb[118].mxu0  ;;  %v8807_v9 = vpop.f32.mrb[116].mxu1 }
 0x1f4   : > { %v8699_v20 = vpop.f32.mrb[119].mxu0  ;;  %v8808_v17 = vpop.f32.mrb[117].mxu1 }
 0x1f5   : > { %v2044_v33 = vadd.f32 %v8697_v27, %v10503_v63  ;;  %v8700_v3 = vadd.f32 %v8699_v20, %v8698_v35  ;;  %v8809_v29 = vadd.f32 %v8808_v17, %v8807_v9  ;;  %v8810_v11 = vpop.f32.mrb[118].mxu1 }
 0x1f6   : > { %v8811_v18 = vpop.f32.mrb[119].mxu1 }
 0x1f7   : > { %v2047_v56 = vadd.f32 %v8700_v3, %v10511_v14  ;;  %v8812_v0 = vadd.f32 %v8811_v18, %v8810_v11  ;;  %v10770_v31 = vadd.f32 %v8809_v29, %v2044_v33  ;;  %v9580_v14 = vld [vmem:[%s12588_s2 + $0x110] sm:$0xff]  }
 0x1f8   : > { %9078 = vmatpush3.bf16.msra.mxu1 %v9580_v14 }
 0x1f9   : > { %v8701_v4 = vpop.f32.mrb[120].mxu0  ;;  %v10772_v5 = vadd.f32 %v8812_v0, %v2047_v56  ;;  %v9585_v0 = vld [vmem:[%s12588_s2 + $0x158] sm:$0xff]  }
 0x1fa   : > { %v8702_v28 = vpop.f32.mrb[121].mxu0  ;;  %9079 = vmatprep.subr.bf16.mxu1 %v9585_v0 }
 0x1fb   : > { %v8703_v63 = vadd.f32 %v8702_v28, %v8701_v4  ;;  %v8704_v16 = vpop.f32.mrb[122].mxu0  ;;  %v8813_v47 = vpop.f32.mrb[120].mxu1  ;;  %v3732_v28 = vld [vmem:[#allocation3] sm:$0xe] }
 0x1fc   : > { %v8705_v55 = vpop.f32.mrb[123].mxu0  ;;  %v8814_v36 = vpop.f32.mrb[121].mxu1 }
 0x1fd   : > { %v2052_v48 = vadd.f32 %v8703_v63, %v10515_v58  ;;  %v8706_v61 = vadd.f32 %v8705_v55, %v8704_v16  ;;  %v8815_v37 = vadd.f32 %v8814_v36, %v8813_v47  ;;  %v8816_v25 = vpop.f32.mrb[122].mxu1  ;;  %v3733_v47 = vld [vmem:[#allocation3 + $0x4] sm:$0xf] }
 0x1fe   : > { %v8817_v35 = vpop.f32.mrb[123].mxu1 }
 0x1ff   : > { %v2055_v27 = vadd.f32 %v8706_v61, %v10517_v19  ;;  %v8818_v53 = vadd.f32 %v8817_v35, %v8816_v25  ;;  %v10779_v30 = vadd.f32 %v8815_v37, %v2052_v48  ;;  %v8073_v37 = vrot.slane %v3732_v28, 9 }
 0x201   : > { %v8707_v62 = vpop.f32.mrb[124].mxu0  ;;  %v10781_v20 = vadd.f32 %v8818_v53, %v2055_v27  ;;  %v3833_v53 = vrot.slane %v3733_v47, 5 }
 0x202   : > { %v8708_v9 = vpop.f32.mrb[125].mxu0 }
 0x203   : > { %v8709_v58 = vadd.f32 %v8708_v9, %v8707_v62  ;;  %v8710_v32 = vpop.f32.mrb[126].mxu0  ;;  %v8819_v33 = vpop.f32.mrb[124].mxu1  ;;  %v3734_v9 = vld [vmem:[#allocation3 + $0x8] sm:$0x1] }
 0x204   : > { %v8711_v3 = vpop.f32.mrb[127].mxu0  ;;  %v8820_v29 = vpop.f32.mrb[125].mxu1 }
 0x205   : > { %v2060_v17 = vadd.f32 %v8709_v58, %v10530_v2  ;;  %v8712_v24 = vadd.f32 %v8711_v3, %v8710_v32  ;;  %v8821_v11 = vadd.f32 %v8820_v29, %v8819_v33  ;;  %v8822_v56 = vpop.f32.mrb[126].mxu1  ;;  %v9586_v2 = vld [vmem:[%s12588_s2 + $0x118] sm:$0xff]   ;;  %v10805_v3 = vsel %vm10798_vm10, %v8073_v37, %v3833_v53 }
 0x206   : > { %v8823_v18 = vpop.f32.mrb[127].mxu1  ;;  %9080 = vmatpush3.bf16.msra.mxu1 %v9586_v2  ;;  %v3836_v29 = vrot.slane %v3734_v9, 5  ;;  %v9613_v2 = vld [vmem:[%s12588_s2 + $0x1d8] sm:$0xff]  }
 0x207   : > { %v2063_v19 = vadd.f32 %v8712_v24, %v10541_v49  ;;  %v8824_v4 = vadd.f32 %v8823_v18, %v8822_v56  ;;  %v10788_v63 = vadd.f32 %v8821_v11, %v2060_v17  ;;  %v3835_v24 = vrot.slane %v3833_v53, 4  ;;  %v2961_v53 = vld [vmem:[#allocation3 + $0xc] sm:$0xf] }
 0x209   : > { %v9339_v16 = vpop.f32.mrb[128].mxu0  ;;  %v10794_v48 = vadd.f32 %v8824_v4, %v2063_v19 }
 0x20a   : > { %v2270_v49 = vadd.f32 %v9339_v16, %v10585_v13  ;;  %v2261_v55 = vpop.f32.mrb[129].mxu0 }
 0x20b   : > { %v2262_v61 = vadd.f32 %v2261_v55, %v10568_v46  ;;  %v9340_v36 = vpop.f32.mrb[130].mxu0 }
 0x20c   : > { %v2390_v25 = vmax.f32 %v2270_v49, 0.0  ;;  %v2273_v14 = vadd.f32 %v9340_v36, %v10595_v43  ;;  %v2264_v27 = vpop.f32.mrb[131].mxu0  ;;  %v2968_v49 = vld [vmem:[#allocation3 + $0x18] sm:$0xf] }
 0x20d   : > { %v2388_v62 = vmax.f32 %v2262_v61, 0.0  ;;  %v2265_v13 = vadd.f32 %v2264_v27, %v10577_v12 }
 0x20e   : > { %v8346_v58 = vpack.c.bf16 %v2390_v25, %v2390_v25  ;;  %v2391_v32 = vmax.f32 %v2273_v14, 0.0 }
 0x20f   : > { %v8344_v46 = vpack.c.bf16 %v2388_v62, %v2388_v62  ;;  %v2389_v33 = vmax.f32 %v2265_v13, 0.0 }
 0x210   : > { %v2656_v43 = vshrl.u32 %v8346_v58, 16  ;;  %v8347_v17 = vpack.c.bf16 %v2391_v32, %v2391_v32  ;;  %v2659_v11 = vshll.u32 %v8346_v58, 16 }
 0x211   : > { %v2639_v56 = vshrl.u32 %v8344_v46, 16  ;;  %v2642_v19 = vshll.u32 %v8344_v46, 16  ;;  %v8345_v18 = vpack.c.bf16 %v2389_v33, %v2389_v33  ;;  %v9343_v12 = vpop.f32.mrb[132].mxu0  ;;  %v2972_v46 = vld [vmem:[#allocation3 + $0x20] sm:$0x1] }
 0x212   : > { %v2658_v0 = vrot.slane %v2656_v43, 7  ;;  %v2664_v4 = vshrl.u32 %v8347_v17, 16  ;;  %v2667_v28 = vshll.u32 %v8347_v17, 16  ;;  %v2286_v16 = vadd.f32 %v9343_v12, %v10646_v50  ;;  %v2277_v47 = vpop.f32.mrb[133].mxu0 }
 0x213   : > { %v2641_v55 = vrot.slane %v2639_v56, 7  ;;  %v2647_v61 = vshrl.u32 %v8345_v18, 16  ;;  %v2650_v36 = vshll.u32 %v8345_v18, 16  ;;  %v2278_v37 = vadd.f32 %v2277_v47, %v10611_v38  ;;  %v9344_v25 = vpop.f32.mrb[134].mxu0  ;;  %v2965_v56 = vld [vmem:[#allocation3 + $0x14] sm:$0x1] }
 0x214   : > { %v2661_v14 = vor.u32 %v2659_v11, %v2658_v0  ;;  %v2662_v27 = vrot.slane %v2658_v0, 4  ;;  %v2666_v62 = vrot.slane %v2664_v4, 7  ;;  %v2394_v13 = vmax.f32 %v2286_v16, 0.0  ;;  %v2280_v50 = vpop.f32.mrb[135].mxu0  ;;  %v9591_v16 = vld [vmem:[%s12588_s2 + $0x160] sm:$0xff]  }
 0x215   : > { %v2644_v9 = vor.u32 %v2642_v19, %v2641_v55  ;;  %v2645_v58 = vrot.slane %v2641_v55, 4  ;;  %v2649_v33 = vrot.slane %v2647_v61, 7  ;;  %v2392_v43 = vmax.f32 %v2278_v37, 0.0  ;;  %v9592_v47 = vld [vmem:[%s12588_s2 + $0x1c0] sm:$0xff]   ;;  %9081 = vmatprep.subr.bf16.mxu1 %v9591_v16 }
 0x216   : > { %v2969_v38 = vsel %vm10810_vm13, %v2661_v14, %v2968_v49  ;;  %v2669_v17 = vor.u32 %v2667_v28, %v2666_v62  ;;  %v2671_v11 = vrot.slane %v2666_v62, 4  ;;  %v8350_v18 = vpack.c.bf16 %v2394_v13, %v2394_v13  ;;  %9185 = vmatprep.subr.bf16.mxu0 %v9592_v47 }
 0x217   : > { %2970 = vst [vmem:[#allocation3 + $0x18] sm:$0xf] %v2969_v38  ;;  %v2962_v19 = vsel %vm10810_vm13, %v2644_v9, %v2961_v53  ;;  %v2652_v12 = vor.u32 %v2650_v36, %v2649_v33  ;;  %v2654_v0 = vrot.slane %v2649_v33, 4  ;;  %v8348_v4 = vpack.c.bf16 %v2392_v43, %v2392_v43  ;;  %v9593_v36 = vld [vmem:[%s12588_s2 + $0x120] sm:$0xff]  }
 0x218   : > { %2963 = vst [vmem:[#allocation3 + $0xc] sm:$0xf] %v2962_v19  ;;  %v2670_v28 = vsel %vm10817_vm14, %v2662_v27, %v2669_v17  ;;  %v2973_v49 = vsel %vm10551_vm2, %v2671_v11, %v2972_v46  ;;  %v2690_v55 = vshrl.u32 %v8350_v18, 16  ;;  %v10837_v61 = vsel %vm10798_vm10, %v3835_v24, %v3836_v29  ;;  %9082 = vmatpush3.bf16.msra.mxu1 %v9593_v36 }
 0x219   : > { %2971 = vst [vmem:[#allocation3 + $0x1c] sm:$0xf] %v2670_v28  ;;  %2974 = vst [vmem:[#allocation3 + $0x20] sm:$0x1] %v2973_v49  ;;  %v2653_v37 = vsel %vm10817_vm14, %v2645_v58, %v2652_v12  ;;  %v2966_v14 = vsel %vm10551_vm2, %v2654_v0, %v2965_v56  ;;  %v2693_v27 = vshll.u32 %v8350_v18, 16  ;;  %v2673_v53 = vshrl.u32 %v8348_v4, 16 }
 0x21a   : > { %v9347_v62 = vpop.f32.mrb[136].mxu0  ;;  %2964 = vst [vmem:[#allocation3 + $0x10] sm:$0xf] %v2653_v37  ;;  %2967 = vst [vmem:[#allocation3 + $0x14] sm:$0x1] %v2966_v14  ;;  %v10846_v24 = vrot.slane %v2690_v55, 7  ;;  %v2289_v29 = vadd.f32 %v9344_v25, %v10652_v7  ;;  %v2281_v13 = vadd.f32 %v2280_v50, %v10618_v41  ;;  %v8089_v11 = vcombine.low %v10805_v3, %v10837_v61 }
 0x21b   : > { %v2302_v9 = vadd.f32 %v9347_v62, %v10679_v52  ;;  %v2293_v46 = vpop.f32.mrb[137].mxu0  ;;  %v2982_v58 = vld [vmem:[#allocation3 + $0x30] sm:$0xf]  ;;  %v10851_v33 = vrot.slane %v2673_v53, 7  ;;  %v2676_v43 = vshll.u32 %v8348_v4, 16  ;;  %v9594_v61 = vld [vmem:[%s12588_s2 + $0x180] sm:$0xff]  }
 0x21c   : > { %v2294_v38 = vadd.f32 %v2293_v46, %v10667_v44  ;;  %v9348_v17 = vpop.f32.mrb[138].mxu0  ;;  %v2695_v56 = vor.u32 %v2693_v27, %v10846_v24  ;;  %v2696_v7 = vrot.slane %v10846_v24, 4  ;;  %v2975_v25 = vld [vmem:[#allocation3 + $0x24] sm:$0xf]  ;;  %v2395_v41 = vmax.f32 %v2289_v29, 0.0 }
 0x21d   : > { %v2393_v50 = vmax.f32 %v2281_v13, 0.0  ;;  %v2296_v52 = vpop.f32.mrb[139].mxu0  ;;  %v2678_v18 = vor.u32 %v2676_v43, %v10851_v33  ;;  %v2679_v19 = vrot.slane %v10851_v33, 4  ;;  %v2398_v12 = vmax.f32 %v2302_v9, 0.0  ;;  %v2986_v53 = vld [vmem:[#allocation3 + $0x38] sm:$0x1] }
 0x21e   : > { %v2396_v0 = vmax.f32 %v2294_v38, 0.0  ;;  %v2983_v44 = vsel %vm10810_vm13, %v2695_v56, %v2982_v58  ;;  %v8351_v4 = vpack.c.bf16 %v2395_v41, %v2395_v41  ;;  %v2305_v3 = vadd.f32 %v9348_v17, %v10691_v6  ;;  %v2979_v62 = vld [vmem:[#allocation3 + $0x2c] sm:$0x1] }
 0x21f   : > { %v8349_v16 = vpack.c.bf16 %v2393_v50, %v2393_v50  ;;  %2984 = vst [vmem:[#allocation3 + $0x30] sm:$0xf] %v2983_v44  ;;  %v2976_v47 = vsel %vm10810_vm13, %v2678_v18, %v2975_v25  ;;  %v8354_v28 = vpack.c.bf16 %v2398_v12, %v2398_v12  ;;  %v2297_v55 = vadd.f32 %v2296_v52, %v10671_v60  ;;  %v2996_v60 = vld [vmem:[#allocation3 + $0x48] sm:$0xf] }
 0x220   : > { %v8352_v49 = vpack.c.bf16 %v2396_v0, %v2396_v0  ;;  %2977 = vst [vmem:[#allocation3 + $0x24] sm:$0xf] %v2976_v47  ;;  %v2698_v36 = vshrl.u32 %v8351_v4, 16  ;;  %v2701_v37 = vshll.u32 %v8351_v4, 16  ;;  %v2399_v43 = vmax.f32 %v2305_v3, 0.0  ;;  %v9566_v18 = vld [vmem:[#allocation3 + $0x18] sm:$0xff]  }
 0x221   : > { %v2681_v14 = vshrl.u32 %v8349_v16, 16  ;;  %v2684_v27 = vshll.u32 %v8349_v16, 16  ;;  %v2724_v6 = vshrl.u32 %v8354_v28, 16  ;;  %v2727_v24 = vshll.u32 %v8354_v28, 16  ;;  %v9351_v9 = vpop.f32.mrb[140].mxu0  ;;  %v9565_v46 = vld [vmem:[#allocation3 + $0xc] sm:$0xff]  }
 0x222   : > { %v2707_v29 = vshrl.u32 %v8352_v49, 16  ;;  %v2710_v13 = vshll.u32 %v8352_v49, 16  ;;  %v2700_v58 = vrot.slane %v2698_v36, 7  ;;  %v2397_v38 = vmax.f32 %v2297_v55, 0.0  ;;  %v2309_v17 = vpop.f32.mrb[141].mxu0  ;;  %6832 = vmatprep.mubr.bf16.mxu0 %v9565_v46  ;;  %v9599_v46 = vld [vmem:[%s12588_s2 + $0x168] sm:$0xff]  }
 0x223   : > { %v2683_v33 = vrot.slane %v2681_v14, 7  ;;  %v10869_v56 = vrot.slane %v2724_v6, 7  ;;  %v2318_v41 = vadd.f32 %v9351_v9, %v10701_v40  ;;  %v2310_v50 = vadd.f32 %v2309_v17, %v10695_v22  ;;  %v9352_v52 = vpop.f32.mrb[142].mxu0  ;;  %v2989_v16 = vld [vmem:[#allocation3 + $0x3c] sm:$0xf]  ;;  %6833 = vmatmul.mubr.bf16.vlgmr.msra.gmra.mrb[160].mxu0 %v8089_v11  ;;  %9083 = vmatprep.subr.bf16.mxu1 %v9599_v46 }
 0x224   : > { %v10871_v25 = vrot.slane %v2707_v29, 7  ;;  %v2703_v12 = vor.u32 %v2701_v37, %v2700_v58  ;;  %v2705_v0 = vrot.slane %v2700_v58, 4  ;;  %v2312_v47 = vpop.f32.mrb[143].mxu0  ;;  %6840 = vmatprep.mubr.bf16.mxu0 %v9566_v18  ;;  %9186 = vmatpush3.bf16.msra.mxu0 %v9594_v61  ;;  %v8353_v14 = vpack.c.bf16 %v2397_v38, %v2397_v38  ;;  %v3000_v58 = vld [vmem:[#allocation3 + $0x50] sm:$0x1] }
 0x225   : > { %v2686_v44 = vor.u32 %v2684_v27, %v2683_v33  ;;  %v2688_v4 = vrot.slane %v2683_v33, 4  ;;  %v2729_v3 = vor.u32 %v2727_v24, %v10869_v56  ;;  %v2730_v28 = vrot.slane %v10869_v56, 4 }
 0x226   : > { %v2712_v49 = vor.u32 %v2710_v13, %v10871_v25  ;;  %v2713_v40 = vrot.slane %v10871_v25, 4  ;;  %v2704_v22 = vsel %vm10817_vm14, %v2696_v7, %v2703_v12  ;;  %v2987_v55 = vsel %vm10551_vm2, %v2705_v0, %v2986_v53 }
 0x227   : > { %v2687_v36 = vsel %vm10817_vm14, %v2679_v19, %v2686_v44  ;;  %v2980_v11 = vsel %vm10551_vm2, %v2688_v4, %v2979_v62  ;;  %2985 = vst [vmem:[#allocation3 + $0x34] sm:$0xf] %v2704_v22  ;;  %2988 = vst [vmem:[#allocation3 + $0x38] sm:$0x1] %v2987_v55  ;;  %v2997_v37 = vsel %vm10810_vm13, %v2729_v3, %v2996_v60  ;;  %v2402_v27 = vmax.f32 %v2318_v41, 0.0 }
 0x228   : > { %2978 = vst [vmem:[#allocation3 + $0x28] sm:$0xf] %v2687_v36  ;;  %2981 = vst [vmem:[#allocation3 + $0x2c] sm:$0x1] %v2980_v11  ;;  %v2990_v61 = vsel %vm10810_vm13, %v2712_v49, %v2989_v16  ;;  %v8355_v7 = vpack.c.bf16 %v2399_v43, %v2399_v43  ;;  %v2400_v53 = vmax.f32 %v2310_v50, 0.0  ;;  %v2321_v19 = vadd.f32 %v9352_v52, %v10703_v34  ;;  %v9600_v34 = vld [vmem:[%s12588_s2 + $0x1c8] sm:$0xff]  }
 0x229   : > { %2998 = vst [vmem:[#allocation3 + $0x48] sm:$0xf] %v2997_v37  ;;  %2991 = vst [vmem:[#allocation3 + $0x3c] sm:$0xf] %v2990_v61  ;;  %v2313_v62 = vadd.f32 %v2312_v47, %v10697_v59  ;;  %v2715_v29 = vshrl.u32 %v8353_v14, 16  ;;  %v2718_v13 = vshll.u32 %v8353_v14, 16  ;;  %v8358_v33 = vpack.c.bf16 %v2402_v27, %v2402_v27  ;;  %9187 = vmatprep.subr.bf16.mxu0 %v9600_v34 }
 0x22a   : > { %v2732_v6 = vshrl.u32 %v8355_v7, 16  ;;  %v2735_v24 = vshll.u32 %v8355_v7, 16  ;;  %v9355_v9 = vpop.f32.mrb[144].mxu0  ;;  %v8356_v60 = vpack.c.bf16 %v2400_v53, %v2400_v53  ;;  %v2403_v43 = vmax.f32 %v2321_v19, 0.0  ;;  %v9601_v52 = vld [vmem:[%s12588_s2 + $0x128] sm:$0xff]  }
 0x22b   : > { %v2401_v38 = vmax.f32 %v2313_v62, 0.0  ;;  %v2325_v17 = vpop.f32.mrb[145].mxu0  ;;  %v2717_v56 = vrot.slane %v2715_v29, 7  ;;  %v10900_v25 = vadd.f32 %v9355_v9, %v10724_v10  ;;  %v2758_v18 = vshrl.u32 %v8358_v33, 16  ;;  %v9602_v10 = vld [vmem:[%s12588_s2 + $0x188] sm:$0xff]   ;;  %9084 = vmatpush3.bf16.msra.mxu1 %v9601_v52 }
 0x22c   : > { %v2734_v59 = vrot.slane %v2732_v6, 7  ;;  %v10903_v41 = vadd.f32 %v2325_v17, %v10707_v8  ;;  %v9356_v50 = vpop.f32.mrb[146].mxu0  ;;  %v2761_v12 = vshll.u32 %v8358_v33, 16  ;;  %v2741_v0 = vshrl.u32 %v8356_v60, 16  ;;  %v2993_v49 = vld [vmem:[#allocation3 + $0x44] sm:$0x1]  ;;  %9188 = vmatpush3.bf16.msra.mxu0 %v9602_v10 }
 0x22d   : > { %v2744_v44 = vshll.u32 %v8356_v60, 16  ;;  %v2328_v4 = vpop.f32.mrb[147].mxu0  ;;  %v2720_v8 = vor.u32 %v2718_v13, %v2717_v56  ;;  %v2722_v3 = vrot.slane %v2717_v56, 4  ;;  %v2760_v22 = vrot.slane %v2758_v18, 7  ;;  %v3010_v14 = vld [vmem:[#allocation3 + $0x60] sm:$0xf] }
 0x22e   : > { %v2737_v16 = vor.u32 %v2735_v24, %v2734_v59  ;;  %v2739_v47 = vrot.slane %v2734_v59, 4  ;;  %v2743_v55 = vrot.slane %v2741_v0, 7  ;;  %v8359_v36 = vpack.c.bf16 %v2403_v43, %v2403_v43  ;;  %v3003_v27 = vld [vmem:[#allocation3 + $0x54] sm:$0xf]  ;;  %v3220_v6 = vld [vmem:[#allocation3 + $0xc] sm:$0xf] }
 0x22f   : > { %v8357_v11 = vpack.c.bf16 %v2401_v38, %v2401_v38  ;;  %v2721_v7 = vsel %vm10817_vm14, %v2713_v40, %v2720_v8  ;;  %v2994_v53 = vsel %vm10551_vm2, %v2722_v3, %v2993_v49  ;;  %v2763_v19 = vor.u32 %v2761_v12, %v2760_v22  ;;  %v3014_v38 = vld [vmem:[#allocation3 + $0x68] sm:$0x1]  ;;  %v3007_v18 = vld [vmem:[#allocation3 + $0x5c] sm:$0x1] }
 0x230   : > { %v2738_v37 = vsel %vm10817_vm14, %v2730_v28, %v2737_v16  ;;  %v3001_v61 = vsel %vm10551_vm2, %v2739_v47, %v3000_v58  ;;  %2992 = vst [vmem:[#allocation3 + $0x40] sm:$0xf] %v2721_v7  ;;  %v2746_v62 = vor.u32 %v2744_v44, %v2743_v55  ;;  %2995 = vst [vmem:[#allocation3 + $0x44] sm:$0x1] %v2994_v53  ;;  %v2764_v24 = vrot.slane %v2760_v22, 4 }
 0x231   : > { %2999 = vst [vmem:[#allocation3 + $0x4c] sm:$0xf] %v2738_v37  ;;  %3002 = vst [vmem:[#allocation3 + $0x50] sm:$0x1] %v3001_v61  ;;  %v2747_v28 = vrot.slane %v2743_v55, 4  ;;  %v2766_v29 = vshrl.u32 %v8359_v36, 16  ;;  %v3011_v40 = vsel %vm10810_vm13, %v2763_v19, %v3010_v14  ;;  %v2337_v59 = vadd.f32 %v9356_v50, %v10726_v51 }
 0x232   : > { %v2769_v13 = vshll.u32 %v8359_v36, 16  ;;  %v10919_v9 = vpop.f32.mrb[148].mxu0  ;;  %v3004_v46 = vsel %vm10810_vm13, %v2746_v62, %v3003_v27  ;;  %v2749_v58 = vshrl.u32 %v8357_v11, 16  ;;  %v2752_v33 = vshll.u32 %v8357_v11, 16  ;;  %3012 = vst [vmem:[#allocation3 + $0x60] sm:$0xf] %v3011_v40 }
 0x233   : > { %v10925_v60 = vpop.f32.mrb[149].mxu0  ;;  %3005 = vst [vmem:[#allocation3 + $0x54] sm:$0xf] %v3004_v46  ;;  %v2768_v43 = vrot.slane %v2766_v29, 7  ;;  %v2406_v17 = vmax.f32 %v10900_v25, 0.0  ;;  %v2404_v34 = vmax.f32 %v10903_v41, 0.0  ;;  %v2329_v12 = vadd.f32 %v2328_v4, %v10711_v42 }
 0x234   : > { %v10930_v56 = vpop.f32.mrb[150].mxu0  ;;  %v2751_v52 = vrot.slane %v2749_v58, 7  ;;  %v3293_v0 = vshrl.u32 %v3220_v6, 16  ;;  %v3296_v44 = vshll.u32 %v3220_v6, 16  ;;  %v2407_v22 = vmax.f32 %v2337_v59, 0.0 }
 0x235   : > { %v10933_v10 = vpop.f32.mrb[151].mxu0  ;;  %v2771_v16 = vor.u32 %v2769_v13, %v2768_v43  ;;  %v2773_v47 = vrot.slane %v2768_v43, 4  ;;  %v8362_v8 = vpack.c.bf16 %v2406_v17, %v2406_v17  ;;  %v8360_v3 = vpack.c.bf16 %v2404_v34, %v2404_v34  ;;  %v3221_v4 = vld [vmem:[#allocation3 + $0x10] sm:$0xf]  ;;  %v3024_v37 = vld [vmem:[#allocation3 + $0x78] sm:$0xf] }
 0x236   : > { %v2754_v49 = vor.u32 %v2752_v33, %v2751_v52  ;;  %v2756_v25 = vrot.slane %v2751_v52, 4  ;;  %v2405_v41 = vmax.f32 %v2329_v12, 0.0  ;;  %v3017_v27 = vld [vmem:[#allocation3 + $0x6c] sm:$0xf]  ;;  %v8363_v53 = vpack.c.bf16 %v2407_v22, %v2407_v22  ;;  %v3222_v17 = vld [vmem:[#allocation3 + $0x14] sm:$0x1] }
 0x237   : > { %v2772_v51 = vsel %vm10817_vm14, %v2764_v24, %v2771_v16  ;;  %v3015_v50 = vsel %vm10551_vm2, %v2773_v47, %v3014_v38  ;;  %v2792_v55 = vshrl.u32 %v8362_v8, 16  ;;  %v2795_v42 = vshll.u32 %v8362_v8, 16  ;;  %v3736_v16 = vld [vmem:[#allocation3 + $0x10] sm:$0xf]  ;;  %v3737_v22 = vld [vmem:[#allocation3 + $0x14] sm:$0x1] }
 0x238   : > { %3013 = vst [vmem:[#allocation3 + $0x64] sm:$0xf] %v2772_v51  ;;  %3016 = vst [vmem:[#allocation3 + $0x68] sm:$0x1] %v3015_v50  ;;  %v2755_v36 = vsel %vm10817_vm14, %v2747_v28, %v2754_v49  ;;  %v3008_v11 = vsel %vm10551_vm2, %v2756_v25, %v3007_v18  ;;  %v2775_v61 = vshrl.u32 %v8360_v3, 16  ;;  %v2778_v7 = vshll.u32 %v8360_v3, 16 }
 0x239   : > { %3006 = vst [vmem:[#allocation3 + $0x58] sm:$0xf] %v2755_v36  ;;  %3009 = vst [vmem:[#allocation3 + $0x5c] sm:$0x1] %v3008_v11  ;;  %v2794_v14 = vrot.slane %v2792_v55, 7  ;;  %v8361_v19 = vpack.c.bf16 %v2405_v41, %v2405_v41  ;;  %v3295_v62 = vrot.slane %v3293_v0, 4 }
 0x23a   : > { %v10943_v6 = vpop.f32.mrb[152].mxu0  ;;  %v2777_v24 = vrot.slane %v2775_v61, 7  ;;  %v3298_v29 = vrot.slane %v3296_v44, 5  ;;  %v3302_v13 = vshll.u32 %v3221_v4, 16  ;;  %v3306_v40 = vshrl.u32 %v3221_v4, 16 }
 0x23b   : > { %v3735_v28 = vld [vmem:[#allocation3 + $0xc] sm:$0xe]  ;;  %v10945_v46 = vpop.f32.mrb[153].mxu0  ;;  %v2797_v58 = vor.u32 %v2795_v42, %v2794_v14  ;;  %v2798_v33 = vrot.slane %v2794_v14, 4  ;;  %v2800_v43 = vshrl.u32 %v8363_v53, 16  ;;  %v2803_v38 = vshll.u32 %v8363_v53, 16 }
 0x23c   : > { %v10947_v34 = vpop.f32.mrb[154].mxu0  ;;  %v2780_v59 = vor.u32 %v2778_v7, %v2777_v24  ;;  %v2781_v52 = vrot.slane %v2777_v24, 4  ;;  %v3028_v18 = vld [vmem:[#allocation3 + $0x80] sm:$0x1]  ;;  %v2783_v12 = vshrl.u32 %v8361_v19, 16  ;;  %v2786_v0 = vshll.u32 %v8361_v19, 16 }
 0x23d   : > { %v10949_v47 = vpop.f32.mrb[155].mxu0  ;;  %v3025_v44 = vsel %vm10810_vm13, %v2797_v58, %v3024_v37  ;;  %v2802_v8 = vrot.slane %v2800_v43, 7  ;;  %v3021_v3 = vld [vmem:[#allocation3 + $0x74] sm:$0x1]  ;;  %v3299_v49 = vor.u32 %v3298_v29, %v3295_v62  ;;  %v3304_v25 = vrot.slane %v3302_v13, 5 }
 0x23e   : > { %3026 = vst [vmem:[#allocation3 + $0x78] sm:$0xf] %v3025_v44  ;;  %v3018_v41 = vsel %vm10810_vm13, %v2780_v59, %v3017_v27  ;;  %v2785_v51 = vrot.slane %v2783_v12, 7  ;;  %v3308_v50 = vrot.slane %v3306_v40, 4  ;;  %v3312_v55 = vshll.u32 %v3222_v17, 16  ;;  %v9607_v42 = vld [vmem:[%s12588_s2 + $0x170] sm:$0xff]  }
 0x23f   : > { %3019 = vst [vmem:[#allocation3 + $0x6c] sm:$0xf] %v3018_v41  ;;  %v2805_v4 = vor.u32 %v2803_v38, %v2802_v8  ;;  %v2807_v36 = vrot.slane %v2802_v8, 4  ;;  %v3300_v11 = vrot.slane %v3299_v49, 4  ;;  %v8074_v37 = vrot.slane %v3735_v28, 9  ;;  %9085 = vmatprep.subr.bf16.mxu1 %v9607_v42 }
 0x240   : > { %v2788_v61 = vor.u32 %v2786_v0, %v2785_v51  ;;  %v2790_v7 = vrot.slane %v2785_v51, 4  ;;  %v3309_v14 = vor.u32 %v3308_v50, %v3304_v25  ;;  %v3314_v53 = vrot.slane %v3312_v55, 5  ;;  %v3223_v19 = vld [vmem:[#allocation3 + $0x18] sm:$0xf]  ;;  %v3224_v13 = vld [vmem:[#allocation3 + $0x1c] sm:$0xf] }
 0x241   : > { %v2806_v27 = vsel %vm10817_vm14, %v2798_v33, %v2805_v4  ;;  %v3029_v62 = vsel %vm10551_vm2, %v2807_v36, %v3028_v18  ;;  %v3305_v24 = vsel %vm10648_vm7, %v3300_v11, %v3304_v25  ;;  %v3840_v29 = vrot.slane %v3736_v16, 5  ;;  %v3225_v40 = vld [vmem:[#allocation3 + $0x20] sm:$0x1]  ;;  %v10964_v58 = vpop.f32.mrb[156].mxu0  ;;  %v3738_v16 = vld [vmem:[#allocation3 + $0x18] sm:$0xe] }
 0x242   : > { %3027 = vst [vmem:[#allocation3 + $0x7c] sm:$0xf] %v2806_v27  ;;  %3030 = vst [vmem:[#allocation3 + $0x80] sm:$0x1] %v3029_v62  ;;  %v2789_v28 = vsel %vm10817_vm14, %v2781_v52, %v2788_v61  ;;  %v3022_v43 = vsel %vm10551_vm2, %v2790_v7, %v3021_v3  ;;  %v3310_v33 = vrot.slane %v3309_v14, 4  ;;  %v3843_v38 = vrot.slane %v3737_v22, 5 }
 0x243   : > { %v10970_v17 = vpop.f32.mrb[157].mxu0  ;;  %3020 = vst [vmem:[#allocation3 + $0x70] sm:$0xf] %v2789_v28  ;;  %3023 = vst [vmem:[#allocation3 + $0x74] sm:$0x1] %v3022_v43  ;;  %v3841_v59 = vsel %vm10798_vm10, %v8074_v37, %v3840_v29  ;;  %v3842_v18 = vrot.slane %v3840_v29, 4  ;;  %v2350_v14 = vadd.f32 %v10919_v9, %v10747_v26  ;;  %v2345_v62 = vadd.f32 %v10933_v10, %v10737_v15 }
 0x244   : > { %v3317_v12 = vshrl.u32 %v3223_v19, 16  ;;  %v3320_v0 = vshll.u32 %v3223_v19, 16  ;;  %v10974_v44 = vpop.f32.mrb[158].mxu0  ;;  %v3315_v52 = vsel %vm10648_vm7, %v3310_v33, %v3314_v53  ;;  %v3326_v8 = vshll.u32 %v3224_v13, 16  ;;  %v3739_v25 = vld [vmem:[#allocation3 + $0x1c] sm:$0xf] }
 0x245   : > { %v3330_v3 = vshrl.u32 %v3224_v13, 16  ;;  %v3336_v49 = vshll.u32 %v3225_v40, 16  ;;  %v10978_v22 = vpop.f32.mrb[159].mxu0  ;;  %v8058_v41 = vcombine.low %v3305_v24, %v3315_v52  ;;  %v3844_v51 = vsel %vm10798_vm10, %v3842_v18, %v3843_v38  ;;  %v9569_v4 = vld [vmem:[#allocation3 + $0xc] sm:$0xff]   ;;  %v9570_v61 = vld [vmem:[#allocation3 + $0x24] sm:$0xff]  }
 0x246   : > { %v3319_v50 = vrot.slane %v3317_v12, 4  ;;  %v3322_v55 = vrot.slane %v3320_v0, 5  ;;  %v8090_v42 = vcombine.low %v3841_v59, %v3844_v51  ;;  %v3328_v36 = vrot.slane %v3326_v8, 5  ;;  %v3740_v24 = vld [vmem:[#allocation3 + $0x20] sm:$0x1] }
 0x247   : > { %v3332_v11 = vrot.slane %v3330_v3, 4  ;;  %v3338_v37 = vrot.slane %v3336_v49, 5  ;;  %6679 = vmatprep.mubr.bf16.mxu1 %v8058_v41  ;;  %v2342_v53 = vadd.f32 %v10925_v60, %v10730_v21  ;;  %v2353_v19 = vadd.f32 %v10930_v56, %v10749_v45  ;;  %v10990_v9 = vld [vmem:[#allocation3 + $0x24] sm:$0xf]  ;;  %v3038_v49 = vld [vmem:[#allocation3 + $0x90] sm:$0xf] }
 0x248   : > { %v3323_v7 = vor.u32 %v3322_v55, %v3319_v50  ;;  %6841 = vmatmul.mubr.bf16.gmra.mrb[164].mxu0 %v8090_v42  ;;  %6680 = vmatmul.mubr.bf16.gmra.mrb[132].mxu1 %v9569_v4  ;;  %v8075_v29 = vrot.slane %v3738_v16, 9  ;;  %v3847_v13 = vrot.slane %v3739_v25, 5  ;;  %v2410_v28 = vmax.f32 %v2350_v14, 0.0  ;;  %v3031_v41 = vld [vmem:[#allocation3 + $0x84] sm:$0xf]  ;;  %v9571_v42 = vld [vmem:[#allocation3 + $0x18] sm:$0xff]  }
 0x249   : > { %v3333_v27 = vor.u32 %v3332_v11, %v3328_v36  ;;  %6848 = vmatprep.mubr.bf16.mxu0 %v9570_v61  ;;  %v2408_v43 = vmax.f32 %v2342_v53, 0.0  ;;  %v2411_v26 = vmax.f32 %v2353_v19, 0.0  ;;  %v2409_v60 = vmax.f32 %v2345_v62, 0.0  ;;  %v3042_v11 = vld [vmem:[#allocation3 + $0x98] sm:$0x1] }
 0x24a   : > { %v3324_v40 = vrot.slane %v3323_v7, 4  ;;  %v3848_v45 = vsel %vm10798_vm10, %v8075_v29, %v3847_v13  ;;  %v3849_v56 = vrot.slane %v3847_v13, 4  ;;  %v8366_v15 = vpack.c.bf16 %v2410_v28, %v2410_v28  ;;  %v3035_v61 = vld [vmem:[#allocation3 + $0x8c] sm:$0x1]  ;;  %v3227_v62 = vld [vmem:[#allocation3 + $0x28] sm:$0xf] }
 0x24b   : > { %v3334_v21 = vrot.slane %v3333_v27, 4  ;;  %v8364_v10 = vpack.c.bf16 %v2408_v43, %v2408_v43  ;;  %v8367_v38 = vpack.c.bf16 %v2411_v26, %v2411_v26  ;;  %v8365_v18 = vpack.c.bf16 %v2409_v60, %v2409_v60  ;;  %v9572_v27 = vld [vmem:[#allocation3 + $0x30] sm:$0xff]   ;;  %v3228_v43 = vld [vmem:[#allocation3 + $0x2c] sm:$0x1] }
 0x24c   : > { %v3329_v33 = vsel %vm10648_vm7, %v3324_v40, %v3328_v36  ;;  %v3850_v12 = vrot.slane %v3740_v24, 5  ;;  %v3341_v0 = vshrl.u32 %v10990_v9, 16  ;;  %v2826_v52 = vshrl.u32 %v8366_v15, 16 }
 0x24d   : > { %v3339_v59 = vsel %vm10648_vm7, %v3334_v21, %v3338_v37  ;;  %v2829_v8 = vshll.u32 %v8366_v15, 16  ;;  %v2809_v3 = vshrl.u32 %v8364_v10, 16  ;;  %v2812_v25 = vshll.u32 %v8364_v10, 16 }
 0x24e   : > { %v8059_v16 = vcombine.low %v3329_v33, %v3339_v59  ;;  %v2834_v51 = vshrl.u32 %v8367_v38, 16  ;;  %v2837_v50 = vshll.u32 %v8367_v38, 16  ;;  %v2817_v55 = vshrl.u32 %v8365_v18, 16 }
 0x24f   : > { %v2828_v4 = vrot.slane %v2826_v52, 7  ;;  %v2811_v36 = vrot.slane %v2809_v3, 7  ;;  %v2820_v37 = vshll.u32 %v8365_v18, 16  ;;  %v3851_v7 = vsel %vm10798_vm10, %v3849_v56, %v3850_v12  ;;  %v3742_v3 = vld [vmem:[#allocation3 + $0x28] sm:$0xf] }
 0x250   : > { %6687 = vmatprep.mubr.bf16.mxu1 %v8059_v16  ;;  %v2836_v14 = vrot.slane %v2834_v51, 7  ;;  %v2819_v53 = vrot.slane %v2817_v55, 7  ;;  %v8091_v19 = vcombine.low %v3848_v45, %v3851_v7  ;;  %v3343_v24 = vrot.slane %v3341_v0, 4  ;;  %v3741_v0 = vld [vmem:[#allocation3 + $0x24] sm:$0xe] }
 0x251   : > { %6688 = vmatmul.mubr.bf16.gmra.mrb[136].mxu1 %v9571_v42  ;;  %v2831_v29 = vor.u32 %v2829_v8, %v2828_v4  ;;  %v2832_v13 = vrot.slane %v2828_v4, 4  ;;  %v2814_v40 = vor.u32 %v2812_v25, %v2811_v36  ;;  %v2815_v28 = vrot.slane %v2811_v36, 4 }
 0x252   : > { %v2839_v26 = vor.u32 %v2837_v50, %v2836_v14  ;;  %v2841_v21 = vrot.slane %v2836_v14, 4  ;;  %v2822_v60 = vor.u32 %v2820_v37, %v2819_v53  ;;  %v2824_v33 = vrot.slane %v2819_v53, 4  ;;  %6849 = vmatmul.mubr.bf16.gmra.mrb[168].mxu0 %v8091_v19  ;;  %v3743_v50 = vld [vmem:[#allocation3 + $0x2c] sm:$0x1] }
 0x253   : > { %v3039_v56 = vsel %vm10810_vm13, %v2831_v29, %v3038_v49  ;;  %v3032_v45 = vsel %vm10810_vm13, %v2814_v40, %v3031_v41  ;;  %6856 = vmatprep.mubr.bf16.mxu0 %v9572_v27  ;;  %v3344_v15 = vshll.u32 %v10990_v9, 16  ;;  %v3350_v10 = vshll.u32 %v3227_v62, 16 }
 0x254   : > { %3040 = vst [vmem:[#allocation3 + $0x90] sm:$0xf] %v3039_v56  ;;  %3033 = vst [vmem:[#allocation3 + $0x84] sm:$0xf] %v3032_v45  ;;  %v2840_v38 = vsel %vm10817_vm14, %v2832_v13, %v2839_v26  ;;  %v3043_v59 = vsel %vm10551_vm2, %v2841_v21, %v3042_v11  ;;  %v2823_v18 = vsel %vm10817_vm14, %v2815_v28, %v2822_v60  ;;  %v3354_v52 = vshrl.u32 %v3227_v62, 16 }
 0x255   : > { %v3036_v12 = vsel %vm10551_vm2, %v2824_v33, %v3035_v61  ;;  %3041 = vst [vmem:[#allocation3 + $0x94] sm:$0xf] %v2840_v38  ;;  %3044 = vst [vmem:[#allocation3 + $0x98] sm:$0x1] %v3043_v59  ;;  %v3346_v9 = vrot.slane %v3344_v15, 5  ;;  %v3352_v16 = vrot.slane %v3350_v10, 5  ;;  %v2366_v49 = vadd.f32 %v10943_v6, %v10770_v31 }
 0x256   : > { %3034 = vst [vmem:[#allocation3 + $0x88] sm:$0xf] %v2823_v18  ;;  %3037 = vst [vmem:[#allocation3 + $0x8c] sm:$0x1] %v3036_v12  ;;  %v3360_v8 = vshll.u32 %v3228_v43, 16  ;;  %v2358_v25 = vadd.f32 %v10945_v46, %v10753_v23  ;;  %v2369_v41 = vadd.f32 %v10947_v34, %v10772_v5  ;;  %v2361_v51 = vadd.f32 %v10949_v47, %v10757_v39  ;;  %v9608_v23 = vld [vmem:[%s12588_s2 + $0x1d0] sm:$0xff]  }
 0x257   : > { %v3347_v55 = vor.u32 %v3346_v9, %v3343_v24  ;;  %v3356_v42 = vrot.slane %v3354_v52, 4  ;;  %v8076_v36 = vrot.slane %v3741_v0, 9  ;;  %v2414_v11 = vmax.f32 %v2366_v49, 0.0  ;;  %v3229_v24 = vld [vmem:[#allocation3 + $0x30] sm:$0xf]  ;;  %9189 = vmatprep.subr.bf16.mxu0 %v9608_v23  ;;  %v9575_v0 = vld [vmem:[#allocation3 + $0x24] sm:$0xff]  }
 0x258   : > { %v3362_v4 = vrot.slane %v3360_v8, 5  ;;  %v2412_v37 = vmax.f32 %v2358_v25, 0.0  ;;  %v2415_v61 = vmax.f32 %v2369_v41, 0.0  ;;  %v2413_v7 = vmax.f32 %v2361_v51, 0.0  ;;  %v3052_v26 = vld [vmem:[#allocation3 + $0xa8] sm:$0xf] }
 0x259   : > { %v3348_v14 = vrot.slane %v3347_v55, 4  ;;  %v3357_v31 = vor.u32 %v3356_v42, %v3352_v16  ;;  %v3854_v6 = vrot.slane %v3742_v3, 5  ;;  %v3857_v53 = vrot.slane %v3743_v50, 5  ;;  %v3045_v21 = vld [vmem:[#allocation3 + $0x9c] sm:$0xf] }
 0x25a   : > { %v8370_v5 = vpack.c.bf16 %v2414_v11, %v2414_v11  ;;  %v8368_v46 = vpack.c.bf16 %v2412_v37, %v2412_v37  ;;  %v8371_v39 = vpack.c.bf16 %v2415_v61, %v2415_v61  ;;  %v8369_v34 = vpack.c.bf16 %v2413_v7, %v2413_v7  ;;  %v3056_v49 = vld [vmem:[#allocation3 + $0xb0] sm:$0x1]  ;;  %v3049_v25 = vld [vmem:[#allocation3 + $0xa4] sm:$0x1]  ;;  %v3230_v42 = vld [vmem:[#allocation3 + $0x34] sm:$0xf] }
 0x25b   : > { %v3353_v47 = vsel %vm10648_vm7, %v3348_v14, %v3352_v16  ;;  %v3358_v19 = vrot.slane %v3357_v31, 4  ;;  %v3855_v27 = vsel %vm10798_vm10, %v8076_v36, %v3854_v6  ;;  %v3856_v62 = vrot.slane %v3854_v6, 4  ;;  %v9576_v61 = vld [vmem:[#allocation3 + $0x3c] sm:$0xff]  }
 0x25c   : > { %v2860_v29 = vshrl.u32 %v8370_v5, 16  ;;  %v2863_v13 = vshll.u32 %v8370_v5, 16  ;;  %v2843_v40 = vshrl.u32 %v8368_v46, 16  ;;  %v2846_v28 = vshll.u32 %v8368_v46, 16 }
 0x25d   : > { %v3363_v43 = vsel %vm10648_vm7, %v3358_v19, %v3362_v4  ;;  %v2868_v60 = vshrl.u32 %v8371_v39, 16  ;;  %v2871_v33 = vshll.u32 %v8371_v39, 16  ;;  %v2851_v56 = vshrl.u32 %v8369_v34, 16  ;;  %v3231_v4 = vld [vmem:[#allocation3 + $0x38] sm:$0x1] }
 0x25e   : > { %v8060_v45 = vcombine.low %v3353_v47, %v3363_v43  ;;  %v2862_v15 = vrot.slane %v2860_v29, 7  ;;  %v2845_v10 = vrot.slane %v2843_v40, 7  ;;  %v2854_v38 = vshll.u32 %v8369_v34, 16  ;;  %v3745_v29 = vld [vmem:[#allocation3 + $0x34] sm:$0xf] }
 0x25f   : > { %v2870_v59 = vrot.slane %v2868_v60, 7  ;;  %v2853_v18 = vrot.slane %v2851_v56, 7  ;;  %v3858_v12 = vsel %vm10798_vm10, %v3856_v62, %v3857_v53  ;;  %v3365_v9 = vshrl.u32 %v3229_v24, 16  ;;  %v3744_v62 = vld [vmem:[#allocation3 + $0x30] sm:$0xe] }
 0x260   : > { %6695 = vmatprep.mubr.bf16.mxu1 %v8060_v45  ;;  %v2865_v16 = vor.u32 %v2863_v13, %v2862_v15  ;;  %v2866_v52 = vrot.slane %v2862_v15, 4  ;;  %v2848_v8 = vor.u32 %v2846_v28, %v2845_v10  ;;  %v2849_v3 = vrot.slane %v2845_v10, 4  ;;  %v3746_v45 = vld [vmem:[#allocation3 + $0x38] sm:$0x1] }
 0x261   : > { %v2873_v41 = vor.u32 %v2871_v33, %v2870_v59  ;;  %v2875_v51 = vrot.slane %v2870_v59, 4  ;;  %v2856_v50 = vor.u32 %v2854_v38, %v2853_v18  ;;  %v2858_v55 = vrot.slane %v2853_v18, 4  ;;  %6696 = vmatmul.mubr.bf16.gmra.mrb[140].mxu1 %v9575_v0  ;;  %v9609_v59 = vld [vmem:[%s12588_s2 + $0x130] sm:$0xff]  }
 0x262   : > { %v3053_v36 = vsel %vm10810_vm13, %v2865_v16, %v3052_v26  ;;  %v3046_v11 = vsel %vm10810_vm13, %v2848_v8, %v3045_v21  ;;  %v8092_v37 = vcombine.low %v3855_v27, %v3858_v12  ;;  %v3367_v7 = vrot.slane %v3365_v9, 4  ;;  %v3066_v8 = vld [vmem:[#allocation3 + $0xc0] sm:$0xf]  ;;  %9086 = vmatpush3.bf16.msra.mxu1 %v9609_v59 }
 0x263   : > { %3054 = vst [vmem:[#allocation3 + $0xa8] sm:$0xf] %v3053_v36  ;;  %3047 = vst [vmem:[#allocation3 + $0x9c] sm:$0xf] %v3046_v11  ;;  %v2874_v14 = vsel %vm10817_vm14, %v2866_v52, %v2873_v41  ;;  %v3057_v31 = vsel %vm10551_vm2, %v2875_v51, %v3056_v49  ;;  %v2857_v6 = vsel %vm10817_vm14, %v2849_v3, %v2856_v50  ;;  %v3368_v23 = vshll.u32 %v3229_v24, 16  ;;  %v9610_v36 = vld [vmem:[%s12588_s2 + $0x190] sm:$0xff]  }
 0x264   : > { %v3050_v53 = vsel %vm10551_vm2, %v2858_v55, %v3049_v25  ;;  %3055 = vst [vmem:[#allocation3 + $0xac] sm:$0xf] %v2874_v14  ;;  %3058 = vst [vmem:[#allocation3 + $0xb0] sm:$0x1] %v3057_v31  ;;  %6857 = vmatmul.mubr.bf16.gmra.mrb[172].mxu0 %v8092_v37  ;;  %v3374_v5 = vshll.u32 %v3230_v42, 16  ;;  %v3378_v46 = vshrl.u32 %v3230_v42, 16  ;;  %v2382_v34 = vadd.f32 %v10964_v58, %v10788_v63 }
 0x265   : > { %3048 = vst [vmem:[#allocation3 + $0xa0] sm:$0xf] %v2857_v6  ;;  %3051 = vst [vmem:[#allocation3 + $0xa4] sm:$0x1] %v3050_v53  ;;  %v3384_v39 = vshll.u32 %v3231_v4, 16  ;;  %6864 = vmatprep.mubr.bf16.mxu0 %v9576_v61  ;;  %v2374_v47 = vadd.f32 %v10970_v17, %v10779_v30  ;;  %v2385_v19 = vadd.f32 %v10974_v44, %v10794_v48  ;;  %v3370_v13 = vrot.slane %v3368_v23, 5 }
 0x266   : > { %v2377_v27 = vadd.f32 %v10978_v22, %v10781_v20  ;;  %v3376_v24 = vrot.slane %v3374_v5, 5  ;;  %v3380_v40 = vrot.slane %v3378_v46, 4  ;;  %v2418_v43 = vmax.f32 %v2382_v34, 0.0  ;;  %v11053_v20 = vld [vmem:[#allocation3 + $0x3c] sm:$0xf]  ;;  %v9577_v4 = vld [vmem:[#allocation3 + $0x30] sm:$0xff]   ;;  %9190 = vmatpush3.bf16.msra.mxu0 %v9610_v36 }
 0x267   : > { %v3386_v28 = vrot.slane %v3384_v39, 5  ;;  %v2416_v26 = vmax.f32 %v2374_v47, 0.0  ;;  %v2419_v21 = vmax.f32 %v2385_v19, 0.0  ;;  %v3371_v63 = vor.u32 %v3370_v13, %v3367_v7  ;;  %v3059_v3 = vld [vmem:[#allocation3 + $0xb4] sm:$0xf]  ;;  %9191 = vmatprep.subr.bf16.mxu0 %v9613_v2 }
 0x268   : > { %v2417_v60 = vmax.f32 %v2377_v27, 0.0  ;;  %v3381_v58 = vor.u32 %v3380_v40, %v3376_v24  ;;  %v8077_v33 = vrot.slane %v3744_v62, 9  ;;  %v3861_v30 = vrot.slane %v3745_v29, 5  ;;  %v3070_v55 = vld [vmem:[#allocation3 + $0xc8] sm:$0x1] }
 0x269   : > { %v8374_v17 = vpack.c.bf16 %v2418_v43, %v2418_v43  ;;  %v8372_v56 = vpack.c.bf16 %v2416_v26, %v2416_v26  ;;  %v8375_v48 = vpack.c.bf16 %v2419_v21, %v2419_v21  ;;  %v3372_v22 = vrot.slane %v3371_v63, 4  ;;  %v3233_v7 = vld [vmem:[#allocation3 + $0x40] sm:$0xf]  ;;  %v3234_v14 = vld [vmem:[#allocation3 + $0x44] sm:$0x1] }
 0x26a   : > { %v8373_v44 = vpack.c.bf16 %v2417_v60, %v2417_v60  ;;  %v3382_v15 = vrot.slane %v3381_v58, 4  ;;  %v3862_v10 = vsel %vm10798_vm10, %v8077_v33, %v3861_v30  ;;  %v3863_v38 = vrot.slane %v3861_v30, 4  ;;  %v3063_v46 = vld [vmem:[#allocation3 + $0xbc] sm:$0x1]  ;;  %v3747_v39 = vld [vmem:[#allocation3 + $0x3c] sm:$0xe] }
 0x26b   : > { %v2894_v18 = vshrl.u32 %v8374_v17, 16  ;;  %v2897_v12 = vshll.u32 %v8374_v17, 16  ;;  %v2877_v0 = vshrl.u32 %v8372_v56, 16  ;;  %v2880_v9 = vshll.u32 %v8372_v56, 16  ;;  %v3748_v40 = vld [vmem:[#allocation3 + $0x40] sm:$0xf] }
 0x26c   : > { %v3377_v16 = vsel %vm10648_vm7, %v3372_v22, %v3376_v24  ;;  %v3387_v52 = vsel %vm10648_vm7, %v3382_v15, %v3386_v28  ;;  %v2902_v49 = vshrl.u32 %v8375_v48, 16  ;;  %v2905_v25 = vshll.u32 %v8375_v48, 16  ;;  %v9578_v60 = vld [vmem:[#allocation3 + $0x48] sm:$0xff]   ;;  %v3749_v63 = vld [vmem:[#allocation3 + $0x44] sm:$0x1] }
 0x26d   : > { %v8061_v41 = vcombine.low %v3377_v16, %v3387_v52  ;;  %v2896_v51 = vrot.slane %v2894_v18, 7  ;;  %v2879_v50 = vrot.slane %v2877_v0, 7  ;;  %v2885_v42 = vshrl.u32 %v8373_v44, 16  ;;  %v3235_v56 = vld [vmem:[#allocation3 + $0x48] sm:$0xf]  ;;  %v9614_v52 = vld [vmem:[%s12588_s2 + $0x198] sm:$0xff]  }
 0x26e   : > { %v2904_v11 = vrot.slane %v2902_v49, 7  ;;  %v2888_v37 = vshll.u32 %v8373_v44, 16  ;;  %v3864_v61 = vrot.slane %v3746_v45, 5  ;;  %v3389_v31 = vshrl.u32 %v11053_v20, 16  ;;  %v3236_v15 = vld [vmem:[#allocation3 + $0x4c] sm:$0xf]  ;;  %9192 = vmatpush3.bf16.msra.mxu0 %v9614_v52 }
 0x26f   : > { %6703 = vmatprep.mubr.bf16.mxu1 %v8061_v41  ;;  %v2899_v6 = vor.u32 %v2897_v12, %v2896_v51  ;;  %v2900_v53 = vrot.slane %v2896_v51, 4  ;;  %v2882_v23 = vor.u32 %v2880_v9, %v2879_v50  ;;  %v2883_v5 = vrot.slane %v2879_v50, 4  ;;  %v3750_v12 = vld [vmem:[#allocation3 + $0x48] sm:$0xe]  ;;  %v3751_v41 = vld [vmem:[#allocation3 + $0x4c] sm:$0xf] }
 0x270   : > { %v2907_v34 = vor.u32 %v2905_v25, %v2904_v11  ;;  %v2909_v47 = vrot.slane %v2904_v11, 4  ;;  %v2887_v19 = vrot.slane %v2885_v42, 7  ;;  %v3865_v27 = vsel %vm10798_vm10, %v3863_v38, %v3864_v61  ;;  %6704 = vmatmul.mubr.bf16.gmra.mrb[144].mxu1 %v9577_v4  ;;  %v3752_v51 = vld [vmem:[#allocation3 + $0x50] sm:$0x1]  ;;  %v3238_v36 = vld [vmem:[#allocation3 + $0x54] sm:$0xf] }
 0x271   : > { %v3067_v62 = vsel %vm10810_vm13, %v2899_v6, %v3066_v8  ;;  %v3060_v29 = vsel %vm10810_vm13, %v2882_v23, %v3059_v3  ;;  %v8093_v13 = vcombine.low %v3862_v10, %v3865_v27  ;;  %v3391_v24 = vrot.slane %v3389_v31, 4  ;;  %v3237_v10 = vld [vmem:[#allocation3 + $0x50] sm:$0x1]  ;;  %v9615_v11 = vld [vmem:[%s12588_s2 + $0x1e0] sm:$0xff]   ;;  %v9582_v31 = vld [vmem:[#allocation3 + $0x54] sm:$0xff]  }
 0x272   : > { %3068 = vst [vmem:[#allocation3 + $0xc0] sm:$0xf] %v3067_v62  ;;  %3061 = vst [vmem:[#allocation3 + $0xb4] sm:$0xf] %v3060_v29  ;;  %v2908_v28 = vsel %vm10817_vm14, %v2900_v53, %v2907_v34  ;;  %v3071_v43 = vsel %vm10551_vm2, %v2909_v47, %v3070_v55  ;;  %v2890_v26 = vor.u32 %v2888_v37, %v2887_v19  ;;  %v2892_v21 = vrot.slane %v2887_v19, 4  ;;  %v9581_v29 = vld [vmem:[#allocation3 + $0x3c] sm:$0xff]  }
 0x273   : > { %3069 = vst [vmem:[#allocation3 + $0xc4] sm:$0xf] %v2908_v28  ;;  %3072 = vst [vmem:[#allocation3 + $0xc8] sm:$0x1] %v3071_v43  ;;  %6865 = vmatmul.mubr.bf16.gmra.mrb[176].mxu0 %v8093_v13  ;;  %v3392_v58 = vshll.u32 %v11053_v20, 16  ;;  %v3398_v33 = vshll.u32 %v3233_v7, 16  ;;  %9193 = vmatprep.subr.bf16.mxu0 %v9615_v11 }
 0x274   : > { %v3402_v30 = vshrl.u32 %v3233_v7, 16  ;;  %v3408_v17 = vshll.u32 %v3234_v14, 16  ;;  %v2891_v48 = vsel %vm10817_vm14, %v2883_v5, %v2890_v26  ;;  %v3064_v44 = vsel %vm10551_vm2, %v2892_v21, %v3063_v46  ;;  %6872 = vmatprep.mubr.bf16.mxu0 %v9578_v60  ;;  %v3239_v19 = vld [vmem:[#allocation3 + $0x58] sm:$0xf]  ;;  %v3240_v27 = vld [vmem:[#allocation3 + $0x5c] sm:$0x1] }
 0x275   : > { %v8078_v45 = vrot.slane %v3747_v39, 9  ;;  %v3868_v22 = vrot.slane %v3748_v40, 5  ;;  %3062 = vst [vmem:[#allocation3 + $0xb8] sm:$0xf] %v2891_v48  ;;  %3065 = vst [vmem:[#allocation3 + $0xbc] sm:$0x1] %v3064_v44 }
 0x276   : > { %v3394_v38 = vrot.slane %v3392_v58, 5  ;;  %v3400_v20 = vrot.slane %v3398_v33, 5  ;;  %v3404_v59 = vrot.slane %v3402_v30, 4  ;;  %v3410_v18 = vrot.slane %v3408_v17, 5  ;;  %v3753_v28 = vld [vmem:[#allocation3 + $0x54] sm:$0xe] }
 0x277   : > { %v3869_v32 = vsel %vm10798_vm10, %v8078_v45, %v3868_v22  ;;  %v3870_v0 = vrot.slane %v3868_v22, 4  ;;  %v3871_v9 = vrot.slane %v3749_v63, 5  ;;  %v3413_v16 = vshrl.u32 %v3235_v56, 16  ;;  %v9618_v43 = vld [vmem:[%s12588_s2 + $0x178] sm:$0xff]   ;;  %v3241_v33 = vld [vmem:[#allocation3 + $0x60] sm:$0xf] }
 0x278   : > { %v3395_v8 = vor.u32 %v3394_v38, %v3391_v24  ;;  %v3405_v3 = vor.u32 %v3404_v59, %v3400_v20  ;;  %v3416_v49 = vshll.u32 %v3235_v56, 16  ;;  %v3422_v25 = vshll.u32 %v3236_v15, 16  ;;  %v3754_v2 = vld [vmem:[#allocation3 + $0x58] sm:$0xf]  ;;  %v3755_v58 = vld [vmem:[#allocation3 + $0x5c] sm:$0x1]  ;;  %9087 = vmatprep.subr.bf16.mxu1 %v9618_v43 }
 0x279   : > { %v3872_v50 = vsel %vm10798_vm10, %v3870_v0, %v3871_v9  ;;  %v3415_v55 = vrot.slane %v3413_v16, 4  ;;  %v3426_v42 = vshrl.u32 %v3236_v15, 16  ;;  %v3432_v4 = vshll.u32 %v3237_v10, 16  ;;  %v9619_v30 = vld [vmem:[%s12588_s2 + $0x1a0] sm:$0xff]  }
 0x27a   : > { %v3396_v37 = vrot.slane %v3395_v8, 4  ;;  %v3406_v61 = vrot.slane %v3405_v3, 4  ;;  %v8094_v7 = vcombine.low %v3869_v32, %v3872_v50  ;;  %v3418_v14 = vrot.slane %v3416_v49, 5  ;;  %9194 = vmatpush3.bf16.msra.mxu0 %v9619_v30  ;;  %v9584_v59 = vld [vmem:[#allocation3 + $0x60] sm:$0xff]   ;;  %v3243_v8 = vld [vmem:[#allocation3 + $0x68] sm:$0x1] }
 0x27b   : > { %v3424_v6 = vrot.slane %v3422_v25, 5  ;;  %v3428_v53 = vrot.slane %v3426_v42, 4  ;;  %v3434_v23 = vrot.slane %v3432_v4, 5  ;;  %v8079_v5 = vrot.slane %v3750_v12, 9  ;;  %v3242_v32 = vld [vmem:[#allocation3 + $0x64] sm:$0xf] }
 0x27c   : > { %v3401_v46 = vsel %vm10648_vm7, %v3396_v37, %v3400_v20  ;;  %v3411_v39 = vsel %vm10648_vm7, %v3406_v61, %v3410_v18  ;;  %6873 = vmatmul.mubr.bf16.gmra.mrb[180].mxu0 %v8094_v7  ;;  %v3419_v34 = vor.u32 %v3418_v14, %v3415_v55  ;;  %v3875_v47 = vrot.slane %v3751_v41, 5  ;;  %v9620_v3 = vld [vmem:[%s12588_s2 + $0x138] sm:$0xff]   ;;  %v9621_v49 = vld [vmem:[%s12588_s2 + $0x1e8] sm:$0xff]   ;;  %v3756_v55 = vld [vmem:[#allocation3 + $0x60] sm:$0xe] }
 0x27d   : > { %v8062_v62 = vcombine.low %v3401_v46, %v3411_v39  ;;  %6880 = vmatprep.mubr.bf16.mxu0 %v9582_v31  ;;  %v3429_v13 = vor.u32 %v3428_v53, %v3424_v6  ;;  %v3878_v24 = vrot.slane %v3752_v51, 5  ;;  %v3437_v40 = vshrl.u32 %v3238_v36, 16  ;;  %v9622_v42 = vld [vmem:[%s12588_s2 + $0x1a8] sm:$0xff]   ;;  %v3757_v61 = vld [vmem:[#allocation3 + $0x64] sm:$0xf]  ;;  %9088 = vmatpush3.bf16.msra.mxu1 %v9620_v3  ;;  %v9623_v46 = vld [vmem:[%s12588_s2 + $0x1f0] sm:$0xff]  }
 0x27e   : > { %v3420_v26 = vrot.slane %v3419_v34, 4  ;;  %v3876_v21 = vsel %vm10798_vm10, %v8079_v5, %v3875_v47  ;;  %v3877_v60 = vrot.slane %v3875_v47, 4  ;;  %v3440_v63 = vshll.u32 %v3238_v36, 16  ;;  %v3758_v7 = vld [vmem:[#allocation3 + $0x68] sm:$0x1]  ;;  %9195 = vmatprep.subr.bf16.mxu0 %v9621_v49 }
 0x27f   : > { %6711 = vmatprep.mubr.bf16.mxu1 %v8062_v62  ;;  %v3430_v17 = vrot.slane %v3429_v13, 4  ;;  %v3439_v56 = vrot.slane %v3437_v40, 4  ;;  %v3446_v48 = vshll.u32 %v3239_v19, 16  ;;  %v3450_v44 = vshrl.u32 %v3239_v19, 16  ;;  %v3244_v14 = vld [vmem:[#allocation3 + $0x6c] sm:$0xf]  ;;  %9196 = vmatpush3.bf16.msra.mxu0 %v9622_v42 }
 0x280   : > { %6712 = vmatmul.mubr.bf16.gmra.mrb[148].mxu1 %v9581_v29  ;;  %v3425_v45 = vsel %vm10648_vm7, %v3420_v26, %v3424_v6  ;;  %v3879_v22 = vsel %vm10798_vm10, %v3877_v60, %v3878_v24  ;;  %v3442_v15 = vrot.slane %v3440_v63, 5  ;;  %v3456_v10 = vshll.u32 %v3240_v27, 16  ;;  %v3245_v5 = vld [vmem:[#allocation3 + $0x70] sm:$0xf]  ;;  %v9583_v39 = vld [vmem:[#allocation3 + $0x48] sm:$0xff]   ;;  %v9626_v63 = vld [vmem:[%s12588_s2 + $0x1f8] sm:$0xff]   ;;  %9197 = vmatprep.subr.bf16.mxu0 %v9623_v46 }
 0x281   : > { %v3435_v38 = vsel %vm10648_vm7, %v3430_v17, %v3434_v23  ;;  %v8095_v20 = vcombine.low %v3876_v21, %v3879_v22  ;;  %v3448_v18 = vrot.slane %v3446_v48, 5  ;;  %v3452_v12 = vrot.slane %v3450_v44, 4  ;;  %v9625_v40 = vld [vmem:[%s12588_s2 + $0x1b0] sm:$0xff]   ;;  %v9590_v46 = vld [vmem:[#allocation3 + $0x78] sm:$0xff]  }
 0x282   : > { %v8063_v0 = vcombine.low %v3425_v45, %v3435_v38  ;;  %v3443_v9 = vor.u32 %v3442_v15, %v3439_v56  ;;  %v3458_v16 = vrot.slane %v3456_v10, 5  ;;  %v8080_v52 = vrot.slane %v3753_v28, 9  ;;  %v3246_v60 = vld [vmem:[#allocation3 + $0x74] sm:$0x1]  ;;  %v3759_v56 = vld [vmem:[#allocation3 + $0x6c] sm:$0xe] }
 0x283   : > { %v3453_v25 = vor.u32 %v3452_v12, %v3448_v18  ;;  %v3882_v41 = vrot.slane %v3754_v2, 5  ;;  %v3885_v51 = vrot.slane %v3755_v58, 5  ;;  %v3461_v50 = vshrl.u32 %v3241_v33, 16  ;;  %v9588_v2 = vld [vmem:[#allocation3 + $0x6c] sm:$0xff]   ;;  %v3761_v10 = vld [vmem:[#allocation3 + $0x74] sm:$0x1]  ;;  %9198 = vmatpush3.bf16.msra.mxu0 %v9625_v40 }
 0x284   : > { %6719 = vmatprep.mubr.bf16.mxu1 %v8063_v0  ;;  %6881 = vmatmul.mubr.bf16.gmra.mrb[184].mxu0 %v8095_v20  ;;  %v3444_v4 = vrot.slane %v3443_v9, 4  ;;  %v3464_v36 = vshll.u32 %v3241_v33, 16  ;;  %v3470_v11 = vshll.u32 %v3242_v32, 16  ;;  %v3474_v37 = vshrl.u32 %v3242_v32, 16  ;;  %v3760_v48 = vld [vmem:[#allocation3 + $0x70] sm:$0xf] }
 0x285   : > { %6888 = vmatprep.mubr.bf16.mxu0 %v9584_v59  ;;  %v3454_v31 = vrot.slane %v3453_v25, 4  ;;  %v3883_v6 = vsel %vm10798_vm10, %v8080_v52, %v3882_v41  ;;  %v3884_v53 = vrot.slane %v3882_v41, 4  ;;  %v3463_v23 = vrot.slane %v3461_v50, 4  ;;  %v3247_v12 = vld [vmem:[#allocation3 + $0x78] sm:$0xf]  ;;  %9199 = vmatprep.subr.bf16.mxu0 %v9626_v63  ;;  %v11154_v41 = vld [vmem:[%s12588_s2 + $0x200] sm:$0xff]  }
 0x286   : > { %v3449_v34 = vsel %vm10648_vm7, %v3444_v4, %v3448_v18  ;;  %v3466_v47 = vrot.slane %v3464_v36, 5  ;;  %v3472_v19 = vrot.slane %v3470_v11, 5  ;;  %v3476_v27 = vrot.slane %v3474_v37, 4  ;;  %v9627_v32 = vld [vmem:[%s12588_s2 + $0x1b8] sm:$0xff]   ;;  %9369 = vmatprep.subr.bf16.mxu1 %v11154_v41  ;;  %v3764_v40 = vld [vmem:[#allocation3 + $0x80] sm:$0x1] }
 0x287   : > { %v3459_v62 = vsel %vm10648_vm7, %v3454_v31, %v3458_v16  ;;  %v3886_v29 = vsel %vm10798_vm10, %v3884_v53, %v3885_v51  ;;  %v3480_v13 = vshll.u32 %v3243_v8, 16  ;;  %v8081_v24 = vrot.slane %v3756_v55, 9  ;;  %v9587_v51 = vld [vmem:[#allocation3 + $0x54] sm:$0xff]   ;;  %v3248_v36 = vld [vmem:[#allocation3 + $0x7c] sm:$0xf]  ;;  %9200 = vmatpush3.bf16.msra.mxu0 %v9627_v32 }
 0x288   : > { %6720 = vmatmul.mubr.bf16.gmra.mrb[152].mxu1 %v9583_v39  ;;  %v8064_v28 = vcombine.low %v3449_v34, %v3459_v62  ;;  %v8096_v43 = vcombine.low %v3883_v6, %v3886_v29  ;;  %v3467_v26 = vor.u32 %v3466_v47, %v3463_v23  ;;  %v3477_v21 = vor.u32 %v3476_v27, %v3472_v19  ;;  %v3763_v27 = vld [vmem:[#allocation3 + $0x7c] sm:$0xf]  ;;  %v3251_v63 = vld [vmem:[#allocation3 + $0x88] sm:$0xf] }
 0x289   : > { %v3482_v58 = vrot.slane %v3480_v13, 5  ;;  %v3889_v33 = vrot.slane %v3757_v61, 5  ;;  %v3892_v30 = vrot.slane %v3758_v7, 5  ;;  %v3485_v17 = vshrl.u32 %v3244_v14, 16  ;;  %v3249_v7 = vld [vmem:[#allocation3 + $0x80] sm:$0x1] }
 0x28a   : > { %6727 = vmatprep.mubr.bf16.mxu1 %v8064_v28  ;;  %v3468_v44 = vrot.slane %v3467_v26, 4  ;;  %v3478_v45 = vrot.slane %v3477_v21, 4  ;;  %v3488_v22 = vshll.u32 %v3244_v14, 16  ;;  %v3494_v15 = vshll.u32 %v3245_v5, 16  ;;  %v3250_v28 = vld [vmem:[#allocation3 + $0x84] sm:$0xf] }
 0x28b   : > { %v3890_v38 = vsel %vm10798_vm10, %v8081_v24, %v3889_v33  ;;  %v3891_v20 = vrot.slane %v3889_v33, 4  ;;  %v3487_v59 = vrot.slane %v3485_v17, 4  ;;  %v3498_v18 = vshrl.u32 %v3245_v5, 16  ;;  %v3762_v5 = vld [vmem:[#allocation3 + $0x78] sm:$0xe] }
 0x28c   : > { %6889 = vmatmul.mubr.bf16.gmra.mrb[188].mxu0 %v8096_v43  ;;  %v3473_v0 = vsel %vm10648_vm7, %v3468_v44, %v3472_v19  ;;  %v3483_v9 = vsel %vm10648_vm7, %v3478_v45, %v3482_v58  ;;  %v3490_v16 = vrot.slane %v3488_v22, 5  ;;  %v3496_v52 = vrot.slane %v3494_v15, 5  ;;  %v3252_v17 = vld [vmem:[#allocation3 + $0x8c] sm:$0x1]  ;;  %v3765_v15 = vld [vmem:[#allocation3 + $0x84] sm:$0xe] }
 0x28d   : > { %6896 = vmatprep.mubr.bf16.mxu0 %v9588_v2  ;;  %v8065_v8 = vcombine.low %v3473_v0, %v3483_v9  ;;  %v3893_v3 = vsel %vm10798_vm10, %v3891_v20, %v3892_v30  ;;  %v3500_v49 = vrot.slane %v3498_v18, 4  ;;  %v3504_v25 = vshll.u32 %v3246_v60, 16  ;;  %v3766_v18 = vld [vmem:[#allocation3 + $0x88] sm:$0xf] }
 0x28e   : > { %v8097_v50 = vcombine.low %v3890_v38, %v3893_v3  ;;  %v3491_v55 = vor.u32 %v3490_v16, %v3487_v59  ;;  %v8082_v42 = vrot.slane %v3759_v56, 9  ;;  %v3896_v4 = vrot.slane %v3760_v48, 5  ;;  %v9589_v56 = vld [vmem:[#allocation3 + $0x60] sm:$0xff]   ;;  %v3767_v16 = vld [vmem:[#allocation3 + $0x8c] sm:$0x1] }
 0x28f   : > { %v3501_v11 = vor.u32 %v3500_v49, %v3496_v52  ;;  %v3506_v37 = vrot.slane %v3504_v25, 5  ;;  %v3899_v61 = vrot.slane %v3761_v10, 5  ;;  %v3509_v14 = vshrl.u32 %v3247_v12, 16  ;;  %v3253_v25 = vld [vmem:[#allocation3 + $0x90] sm:$0xf] }
 0x290   : > { %6728 = vmatmul.mubr.bf16.gmra.mrb[156].mxu1 %v9587_v51  ;;  %v3492_v31 = vrot.slane %v3491_v55, 4  ;;  %v11159_v6 = vsel %vm10798_vm10, %v8082_v42, %v3896_v4  ;;  %v3898_v53 = vrot.slane %v3896_v4, 4  ;;  %v3512_v23 = vshll.u32 %v3247_v12, 16  ;;  %v3254_v4 = vld [vmem:[#allocation3 + $0x94] sm:$0xf] }
 0x291   : > { %6735 = vmatprep.mubr.bf16.mxu1 %v8065_v8  ;;  %v3502_v39 = vrot.slane %v3501_v11, 4  ;;  %v3511_v34 = vrot.slane %v3509_v14, 4  ;;  %v3518_v47 = vshll.u32 %v3248_v36, 16  ;;  %v3522_v19 = vshrl.u32 %v3248_v36, 16  ;;  %v9596_v36 = vld [vmem:[#allocation3 + $0x84] sm:$0xff]  }
 0x292   : > { %v3497_v62 = vsel %vm10648_vm7, %v3492_v31, %v3496_v52  ;;  %v3900_v29 = vsel %vm10798_vm10, %v3898_v53, %v3899_v61  ;;  %v3514_v13 = vrot.slane %v3512_v23, 5  ;;  %v3528_v24 = vshll.u32 %v3249_v7, 16  ;;  %v3255_v14 = vld [vmem:[#allocation3 + $0x98] sm:$0x1] }
 0x293   : > { %v3507_v43 = vsel %vm10648_vm7, %v3502_v39, %v3506_v37  ;;  %v8098_v26 = vcombine.low %v11159_v6, %v3900_v29  ;;  %v3520_v21 = vrot.slane %v3518_v47, 5  ;;  %v3524_v60 = vrot.slane %v3522_v19, 4  ;;  %v3768_v47 = vld [vmem:[#allocation3 + $0x90] sm:$0xe] }
 0x294   : > { %6897 = vmatmul.mubr.bf16.gmra.mrb[192].mxu0 %v8097_v50  ;;  %v8066_v2 = vcombine.low %v3497_v62, %v3507_v43  ;;  %v3515_v58 = vor.u32 %v3514_v13, %v3511_v34  ;;  %v3530_v33 = vrot.slane %v3528_v24, 5  ;;  %v8083_v30 = vrot.slane %v3762_v5, 9  ;;  %v9595_v19 = vld [vmem:[#allocation3 + $0x6c] sm:$0xff]   ;;  %v3769_v24 = vld [vmem:[#allocation3 + $0x94] sm:$0xf] }
 0x295   : > { %6904 = vmatprep.mubr.bf16.mxu0 %v9590_v46  ;;  %v3525_v48 = vor.u32 %v3524_v60, %v3520_v21  ;;  %v3903_v44 = vrot.slane %v3763_v27, 5  ;;  %v3906_v45 = vrot.slane %v3764_v40, 5  ;;  %v3533_v22 = vshrl.u32 %v3250_v28, 16  ;;  %v3256_v60 = vld [vmem:[#allocation3 + $0x9c] sm:$0xf] }
 0x296   : > { %v3516_v10 = vrot.slane %v3515_v58, 4  ;;  %v3536_v38 = vshll.u32 %v3250_v28, 16  ;;  %v3542_v20 = vshll.u32 %v3251_v63, 16  ;;  %v3546_v59 = vshrl.u32 %v3251_v63, 16 }
 0x297   : > { %v3526_v12 = vrot.slane %v3525_v48, 4  ;;  %v11170_v32 = vsel %vm10798_vm10, %v8083_v30, %v3903_v44  ;;  %v3905_v0 = vrot.slane %v3903_v44, 4  ;;  %v3535_v9 = vrot.slane %v3533_v22, 4  ;;  %v3257_v44 = vld [vmem:[#allocation3 + $0xa0] sm:$0xf] }
 0x298   : > { %6736 = vmatmul.mubr.bf16.gmra.mrb[160].mxu1 %v9589_v56  ;;  %v3521_v52 = vsel %vm10648_vm7, %v3516_v10, %v3520_v21  ;;  %v3538_v8 = vrot.slane %v3536_v38, 5  ;;  %v3544_v3 = vrot.slane %v3542_v20, 5  ;;  %v3548_v49 = vrot.slane %v3546_v59, 4  ;;  %v3770_v21 = vld [vmem:[#allocation3 + $0x98] sm:$0x1]  ;;  %v9598_v59 = vld [vmem:[#allocation3 + $0x90] sm:$0xff]  }
 0x299   : > { %6743 = vmatprep.mubr.bf16.mxu1 %v8066_v2  ;;  %v3531_v51 = vsel %vm10648_vm7, %v3526_v12, %v3530_v33  ;;  %v3907_v50 = vsel %vm10798_vm10, %v3905_v0, %v3906_v45  ;;  %v3552_v55 = vshll.u32 %v3252_v17, 16  ;;  %v8084_v42 = vrot.slane %v3765_v15, 9  ;;  %v3258_v45 = vld [vmem:[#allocation3 + $0xa4] sm:$0x1]  ;;  %v3771_v20 = vld [vmem:[#allocation3 + $0x9c] sm:$0xe] }
 0x29a   : > { %v8067_v11 = vcombine.low %v3521_v52, %v3531_v51  ;;  %v8099_v37 = vcombine.low %v11170_v32, %v3907_v50  ;;  %v3539_v61 = vor.u32 %v3538_v8, %v3535_v9  ;;  %v3549_v7 = vor.u32 %v3548_v49, %v3544_v3  ;;  %v3772_v9 = vld [vmem:[#allocation3 + $0xa0] sm:$0xf] }
 0x29b   : > { %v3554_v31 = vrot.slane %v3552_v55, 5  ;;  %v3910_v6 = vrot.slane %v3766_v18, 5  ;;  %v3913_v53 = vrot.slane %v3767_v16, 5  ;;  %v3557_v23 = vshrl.u32 %v3253_v25, 16  ;;  %v3773_v55 = vld [vmem:[#allocation3 + $0xa4] sm:$0x1] }
 0x29c   : > { %6905 = vmatmul.mubr.bf16.gmra.mrb[196].mxu0 %v8098_v26  ;;  %v3540_v5 = vrot.slane %v3539_v61, 4  ;;  %v3550_v46 = vrot.slane %v3549_v7, 4  ;;  %v3560_v39 = vshll.u32 %v3253_v25, 16  ;;  %v3566_v34 = vshll.u32 %v3254_v4, 16  ;;  %v3260_v61 = vld [vmem:[#allocation3 + $0xac] sm:$0xf] }
 0x29d   : > { %6912 = vmatprep.mubr.bf16.mxu0 %v9596_v36  ;;  %v11181_v27 = vsel %vm10798_vm10, %v8084_v42, %v3910_v6  ;;  %v3912_v62 = vrot.slane %v3910_v6, 4  ;;  %v3559_v29 = vrot.slane %v3557_v23, 4  ;;  %v3570_v13 = vshrl.u32 %v3254_v4, 16  ;;  %v3259_v42 = vld [vmem:[#allocation3 + $0xa8] sm:$0xf]  ;;  %v9597_v7 = vld [vmem:[#allocation3 + $0x78] sm:$0xff]  }
 0x29e   : > { %v3545_v40 = vsel %vm10648_vm7, %v3540_v5, %v3544_v3  ;;  %v3555_v28 = vsel %vm10648_vm7, %v3550_v46, %v3554_v31  ;;  %v3562_v43 = vrot.slane %v3560_v39, 5  ;;  %v3568_v26 = vrot.slane %v3566_v34, 5  ;;  %v3261_v23 = vld [vmem:[#allocation3 + $0xb0] sm:$0x1] }
 0x29f   : > { %v8068_v63 = vcombine.low %v3545_v40, %v3555_v28  ;;  %v11189_v2 = vsel %vm10798_vm10, %v3912_v62, %v3913_v53  ;;  %v3572_v58 = vrot.slane %v3570_v13, 4  ;;  %v3576_v33 = vshll.u32 %v3255_v14, 16  ;;  %v3776_v40 = vld [vmem:[#allocation3 + $0xb0] sm:$0x1] }
 0x2a0   : > { %6744 = vmatmul.mubr.bf16.gmra.mrb[164].mxu1 %v9595_v19  ;;  %v8100_v30 = vcombine.low %v11181_v27, %v11189_v2  ;;  %v3563_v17 = vor.u32 %v3562_v43, %v3559_v29  ;;  %v8085_v56 = vrot.slane %v3768_v47, 9  ;;  %v3917_v48 = vrot.slane %v3769_v24, 5  ;;  %v3774_v47 = vld [vmem:[#allocation3 + $0xa8] sm:$0xe]  ;;  %v3775_v24 = vld [vmem:[#allocation3 + $0xac] sm:$0xf] }
 0x2a1   : > { %6751 = vmatprep.mubr.bf16.mxu1 %v8067_v11  ;;  %v3573_v22 = vor.u32 %v3572_v58, %v3568_v26  ;;  %v3578_v15 = vrot.slane %v3576_v33, 5  ;;  %v3920_v10 = vrot.slane %v3770_v21, 5  ;;  %v3581_v38 = vshrl.u32 %v3256_v60, 16  ;;  %v9604_v58 = vld [vmem:[#allocation3 + $0x9c] sm:$0xff]   ;;  %v3777_v27 = vld [vmem:[#allocation3 + $0xb4] sm:$0xe] }
 0x2a2   : > { %v3564_v18 = vrot.slane %v3563_v17, 4  ;;  %v11195_v12 = vsel %vm10798_vm10, %v8085_v56, %v3917_v48  ;;  %v3919_v32 = vrot.slane %v3917_v48, 4  ;;  %v3584_v0 = vshll.u32 %v3256_v60, 16  ;;  %v3262_v60 = vld [vmem:[#allocation3 + $0xb4] sm:$0xf] }
 0x2a3   : > { %v3574_v16 = vrot.slane %v3573_v22, 4  ;;  %v3583_v52 = vrot.slane %v3581_v38, 4  ;;  %v3590_v8 = vshll.u32 %v3257_v44, 16  ;;  %v3594_v3 = vshrl.u32 %v3257_v44, 16 }
 0x2a4   : > { %6913 = vmatmul.mubr.bf16.gmra.mrb[200].mxu0 %v8099_v37  ;;  %v3569_v49 = vsel %vm10648_vm7, %v3564_v18, %v3568_v26  ;;  %v11201_v25 = vsel %vm10798_vm10, %v3919_v32, %v3920_v10  ;;  %v3586_v51 = vrot.slane %v3584_v0, 5  ;;  %v3600_v50 = vshll.u32 %v3258_v45, 16  ;;  %v9603_v10 = vld [vmem:[#allocation3 + $0x84] sm:$0xff]  }
 0x2a5   : > { %6920 = vmatprep.mubr.bf16.mxu0 %v9598_v59  ;;  %v3579_v4 = vsel %vm10648_vm7, %v3574_v16, %v3578_v15  ;;  %v8101_v36 = vcombine.low %v11195_v12, %v11201_v25  ;;  %v3592_v11 = vrot.slane %v3590_v8, 5  ;;  %v3596_v37 = vrot.slane %v3594_v3, 4  ;;  %v3263_v15 = vld [vmem:[#allocation3 + $0xb8] sm:$0xf]  ;;  %v3264_v16 = vld [vmem:[#allocation3 + $0xbc] sm:$0x1] }
 0x2a6   : > { %v8069_v14 = vcombine.low %v3569_v49, %v3579_v4  ;;  %v3587_v31 = vor.u32 %v3586_v51, %v3583_v52  ;;  %v3602_v6 = vrot.slane %v3600_v50, 5  ;;  %v8086_v53 = vrot.slane %v3771_v20, 9 }
 0x2a7   : > { %v3597_v5 = vor.u32 %v3596_v37, %v3592_v11  ;;  %v3924_v46 = vrot.slane %v3772_v9, 5  ;;  %v3927_v39 = vrot.slane %v3773_v55, 5  ;;  %v3605_v34 = vshrl.u32 %v3259_v42, 16 }
 0x2a8   : > { %6752 = vmatmul.mubr.bf16.gmra.mrb[168].mxu1 %v9597_v7  ;;  %v3588_v19 = vrot.slane %v3587_v31, 4  ;;  %v3608_v62 = vshll.u32 %v3259_v42, 16  ;;  %v3614_v29 = vshll.u32 %v3260_v61, 16  ;;  %v3618_v13 = vshrl.u32 %v3260_v61, 16  ;;  %v3778_v42 = vld [vmem:[#allocation3 + $0xb8] sm:$0xf] }
 0x2a9   : > { %6759 = vmatprep.mubr.bf16.mxu1 %v8068_v63  ;;  %v3598_v28 = vrot.slane %v3597_v5, 4  ;;  %v11209_v43 = vsel %vm10798_vm10, %v8086_v53, %v3924_v46  ;;  %v3926_v26 = vrot.slane %v3924_v46, 4  ;;  %v3607_v21 = vrot.slane %v3605_v34, 4  ;;  %v3779_v7 = vld [vmem:[#allocation3 + $0xbc] sm:$0x1] }
 0x2aa   : > { %v3593_v33 = vsel %vm10648_vm7, %v3588_v19, %v3592_v11  ;;  %v3610_v17 = vrot.slane %v3608_v62, 5  ;;  %v3616_v56 = vrot.slane %v3614_v29, 5  ;;  %v3620_v48 = vrot.slane %v3618_v13, 4  ;;  %v5112_v31 = vld [vmem:[#allocation3 + $0x18] sm:$0xf]  ;;  %v9606_v62 = vld [vmem:[#allocation3 + $0xa8] sm:$0xff]  }
 0x2ab   : > { %v3603_v44 = vsel %vm10648_vm7, %v3598_v28, %v3602_v6  ;;  %v11217_v63 = vsel %vm10798_vm10, %v3926_v26, %v3927_v39  ;;  %v3624_v45 = vshll.u32 %v3261_v23, 16  ;;  %v8087_v22 = vrot.slane %v3774_v47, 9  ;;  %v5113_v19 = vld [vmem:[#allocation3 + $0x1c] sm:$0xf]  ;;  %v9605_v28 = vld [vmem:[#allocation3 + $0x90] sm:$0xff]  }
 0x2ac   : > { %6921 = vmatmul.mubr.bf16.gmra.mrb[204].mxu0 %v8100_v30  ;;  %v11222_v38 = vcombine.low %v3593_v33, %v3603_v44  ;;  %v8102_v20 = vcombine.low %v11209_v43, %v11217_v63  ;;  %v3611_v59 = vor.u32 %v3610_v17, %v3607_v21  ;;  %v3621_v18 = vor.u32 %v3620_v48, %v3616_v56  ;;  %v4679_v33 = vld [vmem:[#allocation3 + $0xc] sm:$0xe]  ;;  %v5117_v43 = vld [vmem:[#allocation3 + $0x2c] sm:$0x1] }
 0x2ad   : > { %6928 = vmatprep.mubr.bf16.mxu0 %v9604_v58  ;;  %v3626_v32 = vrot.slane %v3624_v45, 5  ;;  %v3931_v0 = vrot.slane %v3775_v24, 5  ;;  %v3934_v9 = vrot.slane %v3776_v40, 5  ;;  %v3629_v52 = vshrl.u32 %v3262_v60, 16  ;;  %v4680_v45 = vld [vmem:[#allocation3 + $0x10] sm:$0xf] }
 0x2ae   : > { %v3612_v8 = vrot.slane %v3611_v59, 4  ;;  %v3622_v3 = vrot.slane %v3621_v18, 4  ;;  %v3632_v49 = vshll.u32 %v3262_v60, 16  ;;  %v3638_v51 = vshll.u32 %v3263_v15, 16 }
 0x2af   : > { %v11228_v2 = vsel %vm10798_vm10, %v8087_v22, %v3931_v0  ;;  %v3933_v30 = vrot.slane %v3931_v0, 4  ;;  %v3631_v50 = vrot.slane %v3629_v52, 4  ;;  %v3642_v55 = vshrl.u32 %v3263_v15, 16  ;;  %v4681_v15 = vld [vmem:[#allocation3 + $0x14] sm:$0x1] }
 0x2b0   : > { %6760 = vmatmul.mubr.bf16.gmra.mrb[172].mxu1 %v9603_v10  ;;  %v3617_v4 = vsel %vm10648_vm7, %v3612_v8, %v3616_v56  ;;  %v3627_v11 = vsel %vm10648_vm7, %v3622_v3, %v3626_v32  ;;  %v3634_v37 = vrot.slane %v3632_v49, 5  ;;  %v3640_v61 = vrot.slane %v3638_v51, 5  ;;  %v4167_v10 = vld [vmem:[#allocation3 + $0xc] sm:$0xf] }
 0x2b1   : > { %6767 = vmatprep.mubr.bf16.mxu1 %v8069_v14  ;;  %v11234_v6 = vcombine.low %v3617_v4, %v3627_v11  ;;  %v11238_v53 = vsel %vm10798_vm10, %v3933_v30, %v3934_v9  ;;  %v3644_v23 = vrot.slane %v3642_v55, 4  ;;  %v3648_v5 = vshll.u32 %v3264_v16, 16  ;;  %v5114_v14 = vld [vmem:[#allocation3 + $0x20] sm:$0x1]  ;;  %v4168_v9 = vld [vmem:[#allocation3 + $0x10] sm:$0xf] }
 0x2b2   : > { %v8103_v46 = vcombine.low %v11228_v2, %v11238_v53  ;;  %v3635_v39 = vor.u32 %v3634_v37, %v3631_v50  ;;  %v8088_v34 = vrot.slane %v3777_v27, 9  ;;  %v3938_v47 = vrot.slane %v3778_v42, 5  ;;  %v4169_v30 = vld [vmem:[#allocation3 + $0x14] sm:$0x1]  ;;  %v5115_v37 = vld [vmem:[#allocation3 + $0x24] sm:$0xf] }
 0x2b3   : > { %v3645_v29 = vor.u32 %v3644_v23, %v3640_v61  ;;  %v3650_v13 = vrot.slane %v3648_v5, 5  ;;  %v3941_v24 = vrot.slane %v3779_v7, 5  ;;  %v5161_v40 = vshrl.u32 %v5112_v31, 16 }
 0x2b4   : > { %6929 = vmatmul.mubr.bf16.gmra.mrb[208].mxu0 %v8101_v36  ;;  %v3636_v26 = vrot.slane %v3635_v39, 4  ;;  %v11247_v21 = vsel %vm10798_vm10, %v8088_v34, %v3938_v47  ;;  %v3940_v60 = vrot.slane %v3938_v47, 4  ;;  %v5164_v58 = vshll.u32 %v5112_v31, 16  ;;  %v11266_v39 = vpop.f32.mrb[128].mxu1 }
 0x2b5   : > { %6936 = vmatprep.mubr.bf16.mxu0 %v9606_v62  ;;  %v3646_v17 = vrot.slane %v3645_v29, 4  ;;  %v5163_v56 = vrot.slane %v5161_v40, 4  ;;  %v5170_v48 = vshll.u32 %v5113_v19, 16  ;;  %v5174_v44 = vshrl.u32 %v5113_v19, 16  ;;  %v5116_v62 = vld [vmem:[#allocation3 + $0x28] sm:$0xf] }
 0x2b6   : > { %v3641_v22 = vsel %vm10648_vm7, %v3636_v26, %v3640_v61  ;;  %v11253_v12 = vsel %vm10798_vm10, %v3940_v60, %v3941_v24  ;;  %v5166_v25 = vrot.slane %v5164_v58, 5  ;;  %v5180_v36 = vshll.u32 %v5114_v14, 16  ;;  %v9612_v61 = vld [vmem:[#allocation3 + $0xb4] sm:$0xff]   ;;  %v11273_v29 = vpop.f32.mrb[129].mxu1 }
 0x2b7   : > { %v3651_v59 = vsel %vm10648_vm7, %v3646_v17, %v3650_v13  ;;  %v8104_v18 = vcombine.low %v11247_v21, %v11253_v12  ;;  %v5172_v32 = vrot.slane %v5170_v48, 5  ;;  %v5176_v0 = vrot.slane %v5174_v44, 4  ;;  %v4682_v58 = vld [vmem:[#allocation3 + $0x18] sm:$0xe] }
 0x2b8   : > { %6768 = vmatmul.mubr.bf16.gmra.mrb[176].mxu1 %v9605_v28  ;;  %v11259_v16 = vcombine.low %v3641_v22, %v3651_v59  ;;  %v5167_v52 = vor.u32 %v5166_v25, %v5163_v56  ;;  %v5182_v8 = vrot.slane %v5180_v36, 5  ;;  %v8137_v3 = vrot.slane %v4679_v33, 9  ;;  %v4683_v33 = vld [vmem:[#allocation3 + $0x1c] sm:$0xf] }
 0x2b9   : > { %6775 = vmatprep.mubr.bf16.mxu1 %v11222_v38  ;;  %v5177_v49 = vor.u32 %v5176_v0, %v5172_v32  ;;  %v4777_v51 = vrot.slane %v4680_v45, 5  ;;  %v4780_v27 = vrot.slane %v4681_v15, 5  ;;  %v4216_v50 = vshrl.u32 %v4167_v10, 16  ;;  %v4684_v45 = vld [vmem:[#allocation3 + $0x20] sm:$0x1] }
 0x2ba   : > { %v5168_v55 = vrot.slane %v5167_v52, 4  ;;  %v4219_v42 = vshll.u32 %v4167_v10, 16  ;;  %v4225_v4 = vshll.u32 %v4168_v9, 16  ;;  %v4229_v11 = vshrl.u32 %v4168_v9, 16  ;;  %v4170_v9 = vld [vmem:[#allocation3 + $0x18] sm:$0xf] }
 0x2bb   : > { %v5178_v7 = vrot.slane %v5177_v49, 4  ;;  %v11264_v31 = vsel %vm10798_vm10, %v8137_v3, %v4777_v51  ;;  %v4779_v23 = vrot.slane %v4777_v51, 4  ;;  %v4218_v5 = vrot.slane %v4216_v50, 4  ;;  %v4171_v51 = vld [vmem:[#allocation3 + $0x1c] sm:$0xf] }
 0x2bc   : > { %6937 = vmatmul.mubr.bf16.gmra.mrb[212].mxu0 %v8102_v20  ;;  %v5173_v38 = vsel %vm10648_vm7, %v5168_v55, %v5172_v32  ;;  %v4221_v34 = vrot.slane %v4219_v42, 5  ;;  %v4227_v47 = vrot.slane %v4225_v4, 5  ;;  %v4231_v19 = vrot.slane %v4229_v11, 4  ;;  %v9611_v20 = vld [vmem:[#allocation3 + $0x9c] sm:$0xff]   ;;  %v11296_v4 = vpop.f32.mrb[130].mxu1 }
 0x2bd   : > { %6944 = vmatprep.mubr.bf16.mxu0 %v9612_v61  ;;  %v5183_v13 = vsel %vm10648_vm7, %v5178_v7, %v5182_v8  ;;  %v11279_v24 = vsel %vm10798_vm10, %v4779_v23, %v4780_v27  ;;  %v4235_v14 = vshll.u32 %v4169_v30, 16  ;;  %v5185_v63 = vshrl.u32 %v5115_v37, 16  ;;  %v4172_v27 = vld [vmem:[#allocation3 + $0x20] sm:$0x1]  ;;  %v11301_v23 = vpop.f32.mrb[131].mxu1 }
 0x2be   : > { %v11281_v40 = vcombine.low %v5173_v38, %v5183_v13  ;;  %v8153_v28 = vcombine.low %v11264_v31, %v11279_v24  ;;  %v4222_v26 = vor.u32 %v4221_v34, %v4218_v5  ;;  %v4232_v60 = vor.u32 %v4231_v19, %v4227_v47  ;;  %v9617_v30 = vld [vmem:[#allocation3 + $0xc0] sm:$0xff]   ;;  %v5118_v19 = vld [vmem:[#allocation3 + $0x30] sm:$0xf] }
 0x2bf   : > { %v4237_v17 = vrot.slane %v4235_v14, 5  ;;  %v5187_v56 = vrot.slane %v5185_v63, 4  ;;  %v5188_v48 = vshll.u32 %v5115_v37, 16  ;;  %v5194_v44 = vshll.u32 %v5116_v62, 16 }
 0x2c0   : > { %6776 = vmatmul.mubr.bf16.gmra.mrb[180].mxu1 %v9611_v20  ;;  %v4223_v22 = vrot.slane %v4222_v26, 4  ;;  %v4233_v25 = vrot.slane %v4232_v60, 4  ;;  %v5198_v36 = vshrl.u32 %v5116_v62, 16  ;;  %v5204_v15 = vshll.u32 %v5117_v43, 16  ;;  %v9616_v62 = vld [vmem:[#allocation3 + $0xa8] sm:$0xff]  }
 0x2c1   : > { %6783 = vmatprep.mubr.bf16.mxu1 %v11234_v6  ;;  %v5190_v10 = vrot.slane %v5188_v48, 5  ;;  %v5196_v59 = vrot.slane %v5194_v44, 5  ;;  %v8138_v32 = vrot.slane %v4682_v58, 9  ;;  %v4784_v0 = vrot.slane %v4683_v33, 5  ;;  %v5120_v60 = vld [vmem:[#allocation3 + $0x38] sm:$0x1] }
 0x2c2   : > { %v4228_v52 = vsel %vm10648_vm7, %v4223_v22, %v4227_v47  ;;  %v4238_v8 = vsel %vm10648_vm7, %v4233_v25, %v4237_v17  ;;  %v5200_v3 = vrot.slane %v5198_v36, 4  ;;  %v5206_v49 = vrot.slane %v5204_v15, 5  ;;  %v4685_v48 = vld [vmem:[#allocation3 + $0x24] sm:$0xe]  ;;  %v4686_v36 = vld [vmem:[#allocation3 + $0x28] sm:$0xf] }
 0x2c3   : > { %v11290_v50 = vcombine.low %v4228_v52, %v4238_v8  ;;  %v5191_v55 = vor.u32 %v5190_v10, %v5187_v56  ;;  %v11294_v6 = vsel %vm10798_vm10, %v8138_v32, %v4784_v0  ;;  %v4786_v42 = vrot.slane %v4784_v0, 4  ;;  %v4687_v15 = vld [vmem:[#allocation3 + $0x2c] sm:$0x1] }
 0x2c4   : > { %6945 = vmatmul.mubr.bf16.gmra.mrb[216].mxu0 %v8103_v46  ;;  %v5201_v11 = vor.u32 %v5200_v3, %v5196_v59  ;;  %v4787_v37 = vrot.slane %v4684_v45, 5  ;;  %v4240_v61 = vshrl.u32 %v4170_v9, 16  ;;  %v4243_v7 = vshll.u32 %v4170_v9, 16  ;;  %v5119_v46 = vld [vmem:[#allocation3 + $0x34] sm:$0xf] }
 0x2c5   : > { %6952 = vmatprep.mubr.bf16.mxu0 %v9617_v30  ;;  %v5192_v5 = vrot.slane %v5191_v55, 4  ;;  %v4249_v38 = vshll.u32 %v4171_v51, 16  ;;  %v4253_v34 = vshrl.u32 %v4171_v51, 16  ;;  %v4259_v47 = vshll.u32 %v4172_v27, 16  ;;  %v4173_v9 = vld [vmem:[#allocation3 + $0x24] sm:$0xf] }
 0x2c6   : > { %v5202_v13 = vrot.slane %v5201_v11, 4  ;;  %v11305_v14 = vsel %vm10798_vm10, %v4786_v42, %v4787_v37  ;;  %v4242_v2 = vrot.slane %v4240_v61, 4  ;;  %v4245_v53 = vrot.slane %v4243_v7, 5  ;;  %v4174_v55 = vld [vmem:[#allocation3 + $0x28] sm:$0xf] }
 0x2c7   : > { %v5197_v43 = vsel %vm10648_vm7, %v5192_v5, %v5196_v59  ;;  %v8154_v63 = vcombine.low %v11294_v6, %v11305_v14  ;;  %v4251_v20 = vrot.slane %v4249_v38, 5  ;;  %v4255_v26 = vrot.slane %v4253_v34, 4  ;;  %v4175_v61 = vld [vmem:[#allocation3 + $0x2c] sm:$0x1]  ;;  %v9624_v5 = vld [vmem:[#allocation3 + $0xb4] sm:$0xff]  }
 0x2c8   : > { %6784 = vmatmul.mubr.bf16.gmra.mrb[184].mxu1 %v9616_v62  ;;  %v5207_v58 = vsel %vm10648_vm7, %v5202_v13, %v5206_v49  ;;  %v4246_v33 = vor.u32 %v4245_v53, %v4242_v2  ;;  %v4261_v17 = vrot.slane %v4259_v47, 5  ;;  %v5209_v56 = vshrl.u32 %v5118_v19, 16  ;;  %v5121_v34 = vld [vmem:[#allocation3 + $0x3c] sm:$0xf]  ;;  %v9635_v6 = vld [vmem:[%s12588_s2 + $0x210] sm:$0xff]  }
 0x2c9   : > { %6791 = vmatprep.mubr.bf16.mxu1 %v11259_v16  ;;  %v11314_v44 = vcombine.low %v5197_v43, %v5207_v58  ;;  %v4256_v45 = vor.u32 %v4255_v26, %v4251_v20  ;;  %v5212_v22 = vshll.u32 %v5118_v19, 16  ;;  %v5218_v25 = vshll.u32 %v5119_v46, 16  ;;  %v5122_v43 = vld [vmem:[#allocation3 + $0x40] sm:$0xf] }
 0x2ca   : > { %v4247_v10 = vrot.slane %v4246_v33, 4  ;;  %v5211_v59 = vrot.slane %v5209_v56, 4  ;;  %v5222_v32 = vshrl.u32 %v5119_v46, 16  ;;  %v5228_v0 = vshll.u32 %v5120_v60, 16  ;;  %v5123_v33 = vld [vmem:[#allocation3 + $0x44] sm:$0x1] }
 0x2cb   : > { %v4257_v52 = vrot.slane %v4256_v45, 4  ;;  %v5214_v8 = vrot.slane %v5212_v22, 5  ;;  %v5220_v3 = vrot.slane %v5218_v25, 5  ;;  %v8139_v49 = vrot.slane %v4685_v48, 9  ;;  %v4688_v25 = vld [vmem:[#allocation3 + $0x30] sm:$0xe] }
 0x2cc   : > { %6953 = vmatmul.mubr.bf16.gmra.mrb[220].mxu0 %v8104_v18  ;;  %v4252_v16 = vsel %vm10648_vm7, %v4247_v10, %v4251_v20  ;;  %v5224_v51 = vrot.slane %v5222_v32, 4  ;;  %v5230_v27 = vrot.slane %v5228_v0, 5  ;;  %v4791_v30 = vrot.slane %v4686_v36, 5  ;;  %v4690_v10 = vld [vmem:[#allocation3 + $0x38] sm:$0x1] }
 0x2cd   : > { %7154 = vmatprep.mubr.bf16.mxu0 %v11281_v40  ;;  %v4262_v42 = vsel %vm10648_vm7, %v4257_v52, %v4261_v17  ;;  %v5215_v11 = vor.u32 %v5214_v8, %v5211_v59  ;;  %v4794_v37 = vrot.slane %v4687_v15, 5  ;;  %v4264_v7 = vshrl.u32 %v4173_v9, 16  ;;  %v9628_v17 = vld [vmem:[#allocation3 + $0x18] sm:$0xff]   ;;  %v4689_v15 = vld [vmem:[#allocation3 + $0x34] sm:$0xf] }
 0x2ce   : > { %v11324_v38 = vcombine.low %v4252_v16, %v4262_v42  ;;  %v5225_v21 = vor.u32 %v5224_v51, %v5220_v3  ;;  %v11328_v12 = vsel %vm10798_vm10, %v8139_v49, %v4791_v30  ;;  %v4793_v18 = vrot.slane %v4791_v30, 4  ;;  %v4176_v52 = vld [vmem:[#allocation3 + $0x30] sm:$0xf]  ;;  %v9632_v16 = vld [vmem:[%s12588_s2 + $0x208] sm:$0xff]  }
 0x2cf   : > { %v5216_v47 = vrot.slane %v5215_v11, 4  ;;  %v4266_v19 = vrot.slane %v4264_v7, 4  ;;  %v4267_v40 = vshll.u32 %v4173_v9, 16  ;;  %v4273_v62 = vshll.u32 %v4174_v55, 16  ;;  %v4177_v11 = vld [vmem:[#allocation3 + $0x34] sm:$0xf] }
 0x2d0   : > { %6792 = vmatmul.mubr.bf16.gmra.mrb[188].mxu1 %v9624_v5  ;;  %v5226_v13 = vrot.slane %v5225_v21, 4  ;;  %v11332_v2 = vsel %vm10798_vm10, %v4793_v18, %v4794_v37  ;;  %v4277_v53 = vshrl.u32 %v4174_v55, 16  ;;  %v4283_v46 = vshll.u32 %v4175_v61, 16 }
 0x2d1   : > { %6993 = vmatprep.mubr.bf16.mxu1 %v8153_v28  ;;  %v5221_v20 = vsel %vm10648_vm7, %v5216_v47, %v5220_v3  ;;  %v8155_v26 = vcombine.low %v11328_v12, %v11332_v2  ;;  %v4269_v60 = vrot.slane %v4267_v40, 5  ;;  %v4275_v58 = vrot.slane %v4273_v62, 5  ;;  %v4178_v47 = vld [vmem:[#allocation3 + $0x38] sm:$0x1]  ;;  %v4181_v12 = vld [vmem:[#allocation3 + $0x44] sm:$0x1] }
 0x2d2   : > { %v5231_v56 = vsel %vm10648_vm7, %v5226_v13, %v5230_v27  ;;  %v4279_v48 = vrot.slane %v4277_v53, 4  ;;  %v4285_v45 = vrot.slane %v4283_v46, 5  ;;  %v5233_v22 = vshrl.u32 %v5121_v34, 16  ;;  %v5124_v13 = vld [vmem:[#allocation3 + $0x48] sm:$0xf]  ;;  %v9641_v2 = vld [vmem:[%s12588_s2 + $0x220] sm:$0xff]  }
 0x2d3   : > { %v8187_v36 = vcombine.low %v5221_v20, %v5231_v56  ;;  %v4270_v31 = vor.u32 %v4269_v60, %v4266_v19  ;;  %v5236_v24 = vshll.u32 %v5121_v34, 16  ;;  %v5242_v28 = vshll.u32 %v5122_v43, 16  ;;  %v9630_v53 = vld [vmem:[#allocation3 + $0x24] sm:$0xff]  }
 0x2d4   : > { %7155 = vmatmul.mubr.bf16.vlgmr.msra.gmra.mrb[224].mxu0 %v9628_v17  ;;  %v4280_v59 = vor.u32 %v4279_v48, %v4275_v58  ;;  %v5235_v32 = vrot.slane %v5233_v22, 4  ;;  %v5246_v0 = vshrl.u32 %v5122_v43, 16  ;;  %v5252_v9 = vshll.u32 %v5123_v33, 16  ;;  %v5125_v33 = vld [vmem:[#allocation3 + $0x4c] sm:$0xf] }
 0x2d5   : > { %7162 = vmatprep.mubr.bf16.mxu0 %v11314_v44  ;;  %v4271_v8 = vrot.slane %v4270_v31, 4  ;;  %v5238_v3 = vrot.slane %v5236_v24, 5  ;;  %v5244_v49 = vrot.slane %v5242_v28, 5  ;;  %v8140_v51 = vrot.slane %v4688_v25, 9  ;;  %v5126_v17 = vld [vmem:[#allocation3 + $0x50] sm:$0x1] }
 0x2d6   : > { %v4281_v27 = vrot.slane %v4280_v59, 4  ;;  %v5248_v30 = vrot.slane %v5246_v0, 4  ;;  %v5254_v55 = vrot.slane %v5252_v9, 5  ;;  %v4798_v42 = vrot.slane %v4689_v15, 5  ;;  %v4691_v25 = vld [vmem:[#allocation3 + $0x3c] sm:$0xe] }
 0x2d7   : > { %v4276_v37 = vsel %vm10648_vm7, %v4271_v8, %v4275_v58  ;;  %v5239_v61 = vor.u32 %v5238_v3, %v5235_v32  ;;  %v4801_v7 = vrot.slane %v4690_v10, 5  ;;  %v4288_v5 = vshrl.u32 %v4176_v52, 16  ;;  %v4692_v10 = vld [vmem:[#allocation3 + $0x40] sm:$0xf]  ;;  %v4693_v59 = vld [vmem:[#allocation3 + $0x44] sm:$0x1] }
 0x2d8   : > { %6994 = vmatmul.mubr.bf16.vlgmr.msra.gmra.mrb[192].mxu1 %v11290_v50  ;;  %v4286_v44 = vsel %vm10648_vm7, %v4281_v27, %v4285_v45  ;;  %v5249_v21 = vor.u32 %v5248_v30, %v5244_v49  ;;  %v11354_v18 = vsel %vm10798_vm10, %v8140_v51, %v4798_v42  ;;  %v4800_v34 = vrot.slane %v4798_v42, 4  ;;  %v4179_v8 = vld [vmem:[#allocation3 + $0x3c] sm:$0xf] }
 0x2d9   : > { %7001 = vmatprep.mubr.bf16.mxu1 %v8154_v63  ;;  %9370 = vmatpush3.bf16.msra.mxu1 %v11154_v41  ;;  %v11360_v19 = vcombine.low %v4276_v37, %v4286_v44  ;;  %v5240_v40 = vrot.slane %v5239_v61, 4  ;;  %v4290_v50 = vrot.slane %v4288_v5, 4  ;;  %v4291_v62 = vshll.u32 %v4176_v52, 16  ;;  %v9638_v3 = vld [vmem:[%s12588_s2 + $0x218] sm:$0xff]   ;;  %v4180_v5 = vld [vmem:[#allocation3 + $0x40] sm:$0xf] }
 0x2da   : > { %v5250_v46 = vrot.slane %v5249_v21, 4  ;;  %9371 = vmatprep.subr.bf16.mxu1 %v9632_v16  ;;  %v11364_v43 = vsel %vm10798_vm10, %v4800_v34, %v4801_v7  ;;  %v4297_v20 = vshll.u32 %v4177_v11, 16  ;;  %v4301_v60 = vshrl.u32 %v4177_v11, 16  ;;  %v9631_v44 = vld [vmem:[#allocation3 + $0x30] sm:$0xff]  }
 0x2db   : > { %v5245_v41 = vsel %vm10648_vm7, %v5240_v40, %v5244_v49  ;;  %v8156_v14 = vcombine.low %v11354_v18, %v11364_v43  ;;  %v4293_v63 = vrot.slane %v4291_v62, 5  ;;  %v4307_v58 = vshll.u32 %v4178_v47, 16 }
 0x2dc   : > { %7163 = vmatmul.mubr.bf16.gmra.mrb[228].mxu0 %v9630_v53  ;;  %v5255_v56 = vsel %vm10648_vm7, %v5250_v46, %v5254_v55  ;;  %v4299_v48 = vrot.slane %v4297_v20, 5  ;;  %v4303_v45 = vrot.slane %v4301_v60, 4  ;;  %v5257_v22 = vshrl.u32 %v5124_v13, 16 }
 0x2dd   : > { %7170 = vmatprep.mubr.bf16.mxu0 %v8187_v36  ;;  %v8188_v31 = vcombine.low %v5245_v41, %v5255_v56  ;;  %9372 = vmatpush3.bf16.msra.mxu1 %v9632_v16  ;;  %v4294_v24 = vor.u32 %v4293_v63, %v4290_v50  ;;  %v4309_v28 = vrot.slane %v4307_v58, 5  ;;  %v5260_v15 = vshll.u32 %v5124_v13, 16  ;;  %v5127_v13 = vld [vmem:[#allocation3 + $0x54] sm:$0xf]  ;;  %v4694_v56 = vld [vmem:[#allocation3 + $0x48] sm:$0xe] }
 0x2de   : > { %v4304_v32 = vor.u32 %v4303_v45, %v4299_v48  ;;  %v5259_v0 = vrot.slane %v5257_v22, 4  ;;  %v5266_v9 = vshll.u32 %v5125_v33, 16  ;;  %v5270_v52 = vshrl.u32 %v5125_v33, 16  ;;  %9373 = vmatprep.subr.bf16.mxu1 %v9635_v6 }
 0x2df   : > { %v4295_v49 = vrot.slane %v4294_v24, 4  ;;  %v5262_v51 = vrot.slane %v5260_v15, 5  ;;  %v5276_v36 = vshll.u32 %v5126_v17, 16  ;;  %v8141_v27 = vrot.slane %v4691_v25, 9  ;;  %v5129_v17 = vld [vmem:[#allocation3 + $0x5c] sm:$0x1] }
 0x2e0   : > { %7002 = vmatmul.mubr.bf16.gmra.mrb[196].mxu1 %v11324_v38  ;;  %v4305_v16 = vrot.slane %v4304_v32, 4  ;;  %v5268_v30 = vrot.slane %v5266_v9, 5  ;;  %v5272_v55 = vrot.slane %v5270_v52, 4  ;;  %v4805_v42 = vrot.slane %v4692_v10, 5  ;;  %v4695_v24 = vld [vmem:[#allocation3 + $0x4c] sm:$0xf] }
 0x2e1   : > { %7009 = vmatprep.mubr.bf16.mxu1 %v8155_v26  ;;  %v4300_v11 = vsel %vm10648_vm7, %v4295_v49, %v4299_v48  ;;  %v5263_v37 = vor.u32 %v5262_v51, %v5259_v0  ;;  %v5278_v61 = vrot.slane %v5276_v36, 5  ;;  %v4808_v7 = vrot.slane %v4693_v59, 5  ;;  %9374 = vmatpush3.bf16.msra.mxu1 %v9635_v6  ;;  %v5128_v6 = vld [vmem:[#allocation3 + $0x58] sm:$0xf] }
 0x2e2   : > { %v4310_v38 = vsel %vm10648_vm7, %v4305_v16, %v4309_v28  ;;  %v5273_v21 = vor.u32 %v5272_v55, %v5268_v30  ;;  %v11388_v34 = vsel %vm10798_vm10, %v8141_v27, %v4805_v42  ;;  %v4807_v47 = vrot.slane %v4805_v42, 4  ;;  %9375 = vmatprep.subr.bf16.mxu1 %v9638_v3  ;;  %v4182_v27 = vld [vmem:[#allocation3 + $0x48] sm:$0xf]  ;;  %v9633_v16 = vld [vmem:[#allocation3 + $0x3c] sm:$0xff]  }
 0x2e3   : > { %v11393_v26 = vcombine.low %v4300_v11, %v4310_v38  ;;  %v5264_v40 = vrot.slane %v5263_v37, 4  ;;  %v4312_v50 = vshrl.u32 %v4179_v8, 16  ;;  %v4315_v62 = vshll.u32 %v4179_v8, 16  ;;  %v4696_v8 = vld [vmem:[#allocation3 + $0x50] sm:$0x1] }
 0x2e4   : > { %7171 = vmatmul.mubr.bf16.gmra.mrb[232].mxu0 %v9631_v44  ;;  %v5274_v53 = vrot.slane %v5273_v21, 4  ;;  %v11397_v46 = vsel %vm10798_vm10, %v4807_v47, %v4808_v7  ;;  %v4321_v20 = vshll.u32 %v4180_v5, 16  ;;  %v4325_v60 = vshrl.u32 %v4180_v5, 16  ;;  %v9647_v11 = vld [vmem:[%s12588_s2 + $0x230] sm:$0xff]  }
 0x2e5   : > { %7178 = vmatprep.mubr.bf16.mxu0 %v8188_v31  ;;  %v5269_v41 = vsel %vm10648_vm7, %v5264_v40, %v5268_v30  ;;  %v8157_v63 = vcombine.low %v11388_v34, %v11397_v46  ;;  %v4314_v58 = vrot.slane %v4312_v50, 4  ;;  %v4317_v33 = vrot.slane %v4315_v62, 5  ;;  %9376 = vmatpush3.bf16.msra.mxu1 %v9638_v3  ;;  %v9644_v31 = vld [vmem:[%s12588_s2 + $0x228] sm:$0xff]   ;;  %v4184_v38 = vld [vmem:[#allocation3 + $0x50] sm:$0x1]  ;;  %v9650_v62 = vld [vmem:[%s12588_s2 + $0x238] sm:$0xff]  }
 0x2e6   : > { %v5279_v48 = vsel %vm10648_vm7, %v5274_v53, %v5278_v61  ;;  %v4323_v45 = vrot.slane %v4321_v20, 5  ;;  %v4327_v22 = vrot.slane %v4325_v60, 4  ;;  %v4331_v25 = vshll.u32 %v4181_v12, 16  ;;  %9377 = vmatprep.subr.bf16.mxu1 %v9641_v2  ;;  %v4183_v61 = vld [vmem:[#allocation3 + $0x4c] sm:$0xf] }
 0x2e7   : > { %v8189_v28 = vcombine.low %v5269_v41, %v5279_v48  ;;  %v4318_v15 = vor.u32 %v4317_v33, %v4314_v58  ;;  %v5281_v10 = vshrl.u32 %v5127_v13, 16  ;;  %v5284_v59 = vshll.u32 %v5127_v13, 16  ;;  %v5130_v50 = vld [vmem:[#allocation3 + $0x60] sm:$0xf] }
 0x2e8   : > { %7010 = vmatmul.mubr.bf16.gmra.mrb[200].mxu1 %v11360_v19  ;;  %v4328_v32 = vor.u32 %v4327_v22, %v4323_v45  ;;  %v4333_v0 = vrot.slane %v4331_v25, 5  ;;  %v5290_v9 = vshll.u32 %v5128_v6, 16  ;;  %v5294_v52 = vshrl.u32 %v5128_v6, 16  ;;  %v5132_v25 = vld [vmem:[#allocation3 + $0x68] sm:$0x1] }
 0x2e9   : > { %7017 = vmatprep.mubr.bf16.mxu1 %v8156_v14  ;;  %v4319_v3 = vrot.slane %v4318_v15, 4  ;;  %v5283_v49 = vrot.slane %v5281_v10, 4  ;;  %v5286_v51 = vrot.slane %v5284_v59, 5  ;;  %v5300_v36 = vshll.u32 %v5129_v17, 16  ;;  %9378 = vmatpush3.bf16.msra.mxu1 %v9641_v2  ;;  %v5131_v17 = vld [vmem:[#allocation3 + $0x64] sm:$0xf] }
 0x2ea   : > { %v4329_v30 = vrot.slane %v4328_v32, 4  ;;  %v5292_v55 = vrot.slane %v5290_v9, 5  ;;  %v5296_v42 = vrot.slane %v5294_v52, 4  ;;  %v8142_v19 = vrot.slane %v4694_v56, 9  ;;  %9379 = vmatprep.subr.bf16.mxu1 %v9644_v31  ;;  %v4698_v59 = vld [vmem:[#allocation3 + $0x58] sm:$0xf] }
 0x2eb   : > { %v4324_v18 = vsel %vm10648_vm7, %v4319_v3, %v4323_v45  ;;  %v5287_v43 = vor.u32 %v5286_v51, %v5283_v49  ;;  %v5302_v14 = vrot.slane %v5300_v36, 5  ;;  %v4812_v37 = vrot.slane %v4695_v24, 5  ;;  %v4697_v24 = vld [vmem:[#allocation3 + $0x54] sm:$0xe] }
 0x2ec   : > { %7179 = vmatmul.mubr.bf16.gmra.mrb[236].mxu0 %v9633_v16  ;;  %v4334_v7 = vsel %vm10648_vm7, %v4329_v30, %v4333_v0  ;;  %v5297_v5 = vor.u32 %v5296_v42, %v5292_v55  ;;  %v4815_v44 = vrot.slane %v4696_v8, 5  ;;  %v4336_v21 = vshrl.u32 %v4182_v27, 16  ;;  %v4699_v8 = vld [vmem:[#allocation3 + $0x5c] sm:$0x1] }
 0x2ed   : > { %7186 = vmatprep.mubr.bf16.mxu0 %v8189_v28  ;;  %v11419_v47 = vcombine.low %v4324_v18, %v4334_v7  ;;  %v5288_v12 = vrot.slane %v5287_v43, 4  ;;  %v11423_v2 = vsel %vm10798_vm10, %v8142_v19, %v4812_v37  ;;  %v4814_v40 = vrot.slane %v4812_v37, 4  ;;  %9380 = vmatpush3.bf16.msra.mxu1 %v9644_v31 }
 0x2ee   : > { %v5298_v13 = vrot.slane %v5297_v5, 4  ;;  %v4338_v53 = vrot.slane %v4336_v21, 4  ;;  %v4339_v20 = vshll.u32 %v4182_v27, 16  ;;  %v4345_v60 = vshll.u32 %v4183_v61, 16  ;;  %9381 = vmatprep.subr.bf16.mxu1 %v9647_v11  ;;  %v4185_v27 = vld [vmem:[#allocation3 + $0x54] sm:$0xf] }
 0x2ef   : > { %v5293_v6 = vsel %vm10648_vm7, %v5288_v12, %v5292_v55  ;;  %v4816_v41 = vsel %vm10798_vm10, %v4814_v40, %v4815_v44  ;;  %v4349_v58 = vshrl.u32 %v4183_v61, 16  ;;  %v4355_v33 = vshll.u32 %v4184_v38, 16  ;;  %v4187_v44 = vld [vmem:[#allocation3 + $0x5c] sm:$0x1]  ;;  %v9636_v21 = vld [vmem:[#allocation3 + $0x54] sm:$0xff]  }
 0x2f0   : > { %7018 = vmatmul.mubr.bf16.gmra.mrb[204].mxu1 %v11393_v26  ;;  %v5303_v56 = vsel %vm10648_vm7, %v5298_v13, %v5302_v14  ;;  %v8158_v48 = vcombine.low %v11423_v2, %v4816_v41  ;;  %v4341_v45 = vrot.slane %v4339_v20, 5  ;;  %v4347_v22 = vrot.slane %v4345_v60, 5  ;;  %v9634_v26 = vld [vmem:[#allocation3 + $0x48] sm:$0xff]   ;;  %v4186_v14 = vld [vmem:[#allocation3 + $0x58] sm:$0xf] }
 0x2f1   : > { %7025 = vmatprep.mubr.bf16.mxu1 %v8157_v63  ;;  %v8190_v31 = vcombine.low %v5293_v6, %v5303_v56  ;;  %v4351_v28 = vrot.slane %v4349_v58, 4  ;;  %v4357_v15 = vrot.slane %v4355_v33, 5  ;;  %v5305_v10 = vshrl.u32 %v5130_v50, 16  ;;  %9382 = vmatpush3.bf16.msra.mxu1 %v9647_v11  ;;  %v5134_v41 = vld [vmem:[#allocation3 + $0x70] sm:$0xf] }
 0x2f2   : > { %v4342_v32 = vor.u32 %v4341_v45, %v4338_v53  ;;  %v5308_v0 = vshll.u32 %v5130_v50, 16  ;;  %v5314_v9 = vshll.u32 %v5131_v17, 16  ;;  %v5318_v52 = vshrl.u32 %v5131_v17, 16  ;;  %9383 = vmatprep.subr.bf16.mxu1 %v9650_v62  ;;  %v5135_v45 = vld [vmem:[#allocation3 + $0x74] sm:$0x1] }
 0x2f3   : > { %v4352_v3 = vor.u32 %v4351_v28, %v4347_v22  ;;  %v5307_v49 = vrot.slane %v5305_v10, 4  ;;  %v5324_v51 = vshll.u32 %v5132_v25, 16  ;;  %v8143_v36 = vrot.slane %v4697_v24, 9 }
 0x2f4   : > { %7187 = vmatmul.mubr.bf16.gmra.mrb[240].mxu0 %v9634_v26  ;;  %v4343_v34 = vrot.slane %v4342_v32, 4  ;;  %v5310_v46 = vrot.slane %v5308_v0, 5  ;;  %v5316_v63 = vrot.slane %v5314_v9, 5  ;;  %v5320_v16 = vrot.slane %v5318_v52, 4  ;;  %v4702_v9 = vld [vmem:[#allocation3 + $0x68] sm:$0x1] }
 0x2f5   : > { %7194 = vmatprep.mubr.bf16.mxu0 %v8190_v31  ;;  %v4353_v30 = vrot.slane %v4352_v3, 4  ;;  %v5326_v55 = vrot.slane %v5324_v51, 5  ;;  %v4819_v42 = vrot.slane %v4698_v59, 5  ;;  %v4822_v19 = vrot.slane %v4699_v8, 5  ;;  %9384 = vmatpush3.bf16.msra.mxu1 %v9650_v62  ;;  %v5133_v62 = vld [vmem:[#allocation3 + $0x6c] sm:$0xf] }
 0x2f6   : > { %v4348_v11 = vsel %vm10648_vm7, %v4343_v34, %v4347_v22  ;;  %v5311_v18 = vor.u32 %v5310_v46, %v5307_v49  ;;  %v5321_v43 = vor.u32 %v5320_v16, %v5316_v63  ;;  %v4360_v37 = vshrl.u32 %v4185_v27, 16  ;;  %v11446_v13 = vpop.f32.mrb[160].mxu0  ;;  %v4700_v22 = vld [vmem:[#allocation3 + $0x60] sm:$0xe] }
 0x2f7   : > { %v4358_v61 = vsel %vm10648_vm7, %v4353_v30, %v4357_v15  ;;  %v4820_v7 = vsel %vm10798_vm10, %v8143_v36, %v4819_v42  ;;  %v4821_v5 = vrot.slane %v4819_v42, 4  ;;  %v4363_v38 = vshll.u32 %v4185_v27, 16  ;;  %v11450_v58 = vpop.f32.mrb[161].mxu0  ;;  %v4701_v15 = vld [vmem:[#allocation3 + $0x64] sm:$0xf] }
 0x2f8   : > { %7026 = vmatmul.mubr.bf16.gmra.mrb[208].mxu1 %v11419_v47  ;;  %v8126_v12 = vcombine.low %v4348_v11, %v4358_v61  ;;  %v5312_v2 = vrot.slane %v5311_v18, 4  ;;  %v5322_v40 = vrot.slane %v5321_v43, 4  ;;  %v4362_v50 = vrot.slane %v4360_v37, 4  ;;  %v4188_v51 = vld [vmem:[#allocation3 + $0x60] sm:$0xf] }
 0x2f9   : > { %7033 = vmatprep.mubr.bf16.mxu1 %v8158_v48  ;;  %v4823_v53 = vsel %vm10798_vm10, %v4821_v5, %v4822_v19  ;;  %v4365_v20 = vrot.slane %v4363_v38, 5  ;;  %v4369_v60 = vshll.u32 %v4186_v14, 16  ;;  %v4373_v6 = vshrl.u32 %v4186_v14, 16  ;;  %v11456_v48 = vpop.f32.mrb[162].mxu0  ;;  %v4190_v61 = vld [vmem:[#allocation3 + $0x68] sm:$0x1] }
 0x2fa   : > { %v5317_v47 = vsel %vm10648_vm7, %v5312_v2, %v5316_v63  ;;  %v5327_v33 = vsel %vm10648_vm7, %v5322_v40, %v5326_v55  ;;  %v8159_v17 = vcombine.low %v4820_v7, %v4823_v53  ;;  %v4379_v56 = vshll.u32 %v4187_v44, 16  ;;  %v11458_v10 = vpop.f32.mrb[163].mxu0  ;;  %v4189_v63 = vld [vmem:[#allocation3 + $0x64] sm:$0xf] }
 0x2fb   : > { %v8191_v25 = vcombine.low %v5317_v47, %v5327_v33  ;;  %v4366_v24 = vor.u32 %v4365_v20, %v4362_v50  ;;  %v4371_v31 = vrot.slane %v4369_v60, 5  ;;  %v4375_v28 = vrot.slane %v4373_v6, 4  ;;  %v9637_v44 = vld [vmem:[#allocation3 + $0x60] sm:$0xff]   ;;  %v5137_v33 = vld [vmem:[#allocation3 + $0x7c] sm:$0xf] }
 0x2fc   : > { %7195 = vmatmul.mubr.bf16.gmra.mrb[244].mxu0 %v9636_v21  ;;  %v4381_v59 = vrot.slane %v4379_v56, 5  ;;  %v5329_v26 = vshrl.u32 %v5133_v62, 16  ;;  %v5332_v32 = vshll.u32 %v5133_v62, 16  ;;  %v5338_v0 = vshll.u32 %v5134_v41, 16 }
 0x2fd   : > { %7202 = vmatprep.mubr.bf16.mxu0 %v8191_v25  ;;  %v4367_v52 = vrot.slane %v4366_v24, 4  ;;  %v4376_v8 = vor.u32 %v4375_v28, %v4371_v31  ;;  %v5342_v3 = vshrl.u32 %v5134_v41, 16  ;;  %v5348_v49 = vshll.u32 %v5135_v45, 16  ;;  %v4703_v24 = vld [vmem:[#allocation3 + $0x6c] sm:$0xe] }
 0x2fe   : > { %v5331_v36 = vrot.slane %v5329_v26, 4  ;;  %v5334_v27 = vrot.slane %v5332_v32, 5  ;;  %v5340_v34 = vrot.slane %v5338_v0, 5  ;;  %v8144_v46 = vrot.slane %v4700_v22, 9  ;;  %v5138_v22 = vld [vmem:[#allocation3 + $0x80] sm:$0x1] }
 0x2ff   : > { %v4372_v16 = vsel %vm10648_vm7, %v4367_v52, %v4371_v31  ;;  %v4377_v30 = vrot.slane %v4376_v8, 4  ;;  %v5344_v55 = vrot.slane %v5342_v3, 4  ;;  %v5350_v42 = vrot.slane %v5348_v49, 5  ;;  %v4704_v26 = vld [vmem:[#allocation3 + $0x70] sm:$0xf] }
 0x300   : > { %7034 = vmatmul.mubr.bf16.gmra.mrb[212].mxu1 %v8126_v12  ;;  %v5335_v19 = vor.u32 %v5334_v27, %v5331_v36  ;;  %v4826_v11 = vrot.slane %v4701_v15, 5  ;;  %v4829_v18 = vrot.slane %v4702_v9, 5  ;;  %v4384_v43 = vshrl.u32 %v4188_v51, 16  ;;  %v5136_v12 = vld [vmem:[#allocation3 + $0x78] sm:$0xf] }
 0x301   : > { %7041 = vmatprep.mubr.bf16.mxu1 %v8159_v17  ;;  %v4382_v14 = vsel %vm10648_vm7, %v4377_v30, %v4381_v59  ;;  %v5345_v37 = vor.u32 %v5344_v55, %v5340_v34  ;;  %v4387_v7 = vshll.u32 %v4188_v51, 16  ;;  %v4393_v5 = vshll.u32 %v4189_v63, 16  ;;  %v4705_v8 = vld [vmem:[#allocation3 + $0x74] sm:$0x1]  ;;  %v4191_v27 = vld [vmem:[#allocation3 + $0x6c] sm:$0xf] }
 0x302   : > { %v8127_v38 = vcombine.low %v4372_v16, %v4382_v14  ;;  %v5336_v21 = vrot.slane %v5335_v19, 4  ;;  %v4827_v2 = vsel %vm10798_vm10, %v8144_v46, %v4826_v11  ;;  %v4828_v40 = vrot.slane %v4826_v11, 4  ;;  %v4192_v30 = vld [vmem:[#allocation3 + $0x70] sm:$0xf] }
 0x303   : > { %v5346_v50 = vrot.slane %v5345_v37, 4  ;;  %v4386_v62 = vrot.slane %v4384_v43, 4  ;;  %v4389_v53 = vrot.slane %v4387_v7, 5  ;;  %v4395_v20 = vrot.slane %v4393_v5, 5  ;;  %v9639_v55 = vld [vmem:[#allocation3 + $0x6c] sm:$0xff]  }
 0x304   : > { %7203 = vmatmul.mubr.bf16.gmra.mrb[248].mxu0 %v9637_v44  ;;  %v5341_v60 = vsel %vm10648_vm7, %v5336_v21, %v5340_v34  ;;  %v4830_v6 = vsel %vm10798_vm10, %v4828_v40, %v4829_v18  ;;  %v4397_v41 = vshrl.u32 %v4189_v63, 16  ;;  %v4403_v47 = vshll.u32 %v4190_v61, 16  ;;  %v4193_v61 = vld [vmem:[#allocation3 + $0x74] sm:$0x1] }
 0x305   : > { %v5351_v17 = vsel %vm10648_vm7, %v5346_v50, %v5350_v42  ;;  %v8160_v56 = vcombine.low %v4827_v2, %v4830_v6  ;;  %v4390_v45 = vor.u32 %v4389_v53, %v4386_v62  ;;  %v5353_v25 = vshrl.u32 %v5136_v12, 16  ;;  %v5139_v2 = vld [vmem:[#allocation3 + $0x84] sm:$0xf]  ;;  %v5140_v53 = vld [vmem:[#allocation3 + $0x88] sm:$0xf] }
 0x306   : > { %v8192_v31 = vcombine.low %v5341_v60, %v5351_v17  ;;  %v4399_v28 = vrot.slane %v4397_v41, 4  ;;  %v4405_v15 = vrot.slane %v4403_v47, 5  ;;  %v5356_v59 = vshll.u32 %v5136_v12, 16 }
 0x307   : > { %v4391_v32 = vrot.slane %v4390_v45, 4  ;;  %v5355_v0 = vrot.slane %v5353_v25, 4  ;;  %v5362_v9 = vshll.u32 %v5137_v33, 16  ;;  %v5366_v52 = vshrl.u32 %v5137_v33, 16  ;;  %v9640_v25 = vld [vmem:[#allocation3 + $0x78] sm:$0xff]  }
 0x308   : > { %7042 = vmatmul.mubr.bf16.gmra.mrb[216].mxu1 %v8127_v38  ;;  %7210 = vmatprep.mubr.bf16.mxu0 %v8192_v31  ;;  %v4400_v3 = vor.u32 %v4399_v28, %v4395_v20  ;;  %v5358_v49 = vrot.slane %v5356_v59, 5  ;;  %v5372_v51 = vshll.u32 %v5138_v22, 16  ;;  %v8145_v36 = vrot.slane %v4703_v24, 9  ;;  %v4707_v59 = vld [vmem:[#allocation3 + $0x7c] sm:$0xf] }
 0x309   : > { %7049 = vmatprep.mubr.bf16.mxu1 %v8160_v56  ;;  %v4396_v34 = vsel %vm10648_vm7, %v4391_v32, %v4395_v20  ;;  %v5364_v46 = vrot.slane %v5362_v9, 5  ;;  %v5368_v63 = vrot.slane %v5366_v52, 4  ;;  %v4833_v16 = vrot.slane %v4704_v26, 5  ;;  %v5141_v56 = vld [vmem:[#allocation3 + $0x8c] sm:$0x1] }
 0x30a   : > { %v4401_v42 = vrot.slane %v4400_v3, 4  ;;  %v5359_v19 = vor.u32 %v5358_v49, %v5355_v0  ;;  %v5374_v11 = vrot.slane %v5372_v51, 5  ;;  %v4836_v18 = vrot.slane %v4705_v8, 5  ;;  %v4708_v52 = vld [vmem:[#allocation3 + $0x80] sm:$0x1] }
 0x30b   : > { %v5369_v43 = vor.u32 %v5368_v63, %v5364_v46  ;;  %v4834_v14 = vsel %vm10798_vm10, %v8145_v36, %v4833_v16  ;;  %v4835_v37 = vrot.slane %v4833_v16, 4  ;;  %v4408_v7 = vshrl.u32 %v4191_v27, 16  ;;  %v4194_v36 = vld [vmem:[#allocation3 + $0x78] sm:$0xf]  ;;  %v4195_v16 = vld [vmem:[#allocation3 + $0x7c] sm:$0xf] }
 0x30c   : > { %7211 = vmatmul.mubr.bf16.gmra.mrb[252].mxu0 %v9639_v55  ;;  %v4406_v5 = vsel %vm10648_vm7, %v4401_v42, %v4405_v15  ;;  %v5360_v44 = vrot.slane %v5359_v19, 4  ;;  %v4411_v38 = vshll.u32 %v4191_v27, 16  ;;  %v4417_v21 = vshll.u32 %v4192_v30, 16  ;;  %v4706_v15 = vld [vmem:[#allocation3 + $0x78] sm:$0xe] }
 0x30d   : > { %v8128_v40 = vcombine.low %v4396_v34, %v4406_v5  ;;  %v5370_v12 = vrot.slane %v5369_v43, 4  ;;  %v4837_v50 = vsel %vm10798_vm10, %v4835_v37, %v4836_v18  ;;  %v4410_v62 = vrot.slane %v4408_v7, 4 }
 0x30e   : > { %v5365_v20 = vsel %vm10648_vm7, %v5360_v44, %v5364_v46  ;;  %v8161_v60 = vcombine.low %v4834_v14, %v4837_v50  ;;  %v4413_v6 = vrot.slane %v4411_v38, 5  ;;  %v4419_v41 = vrot.slane %v4417_v21, 5 }
 0x30f   : > { %v5375_v47 = vsel %vm10648_vm7, %v5370_v12, %v5374_v11  ;;  %v4421_v33 = vshrl.u32 %v4192_v30, 16  ;;  %v4427_v17 = vshll.u32 %v4193_v61, 16  ;;  %v5377_v45 = vshrl.u32 %v5139_v2, 16  ;;  %v5142_v12 = vld [vmem:[#allocation3 + $0x90] sm:$0xf] }
 0x310   : > { %7050 = vmatmul.mubr.bf16.gmra.mrb[220].mxu1 %v8128_v40  ;;  %v8193_v22 = vcombine.low %v5365_v20, %v5375_v47  ;;  %v4414_v24 = vor.u32 %v4413_v6, %v4410_v62  ;;  %v5380_v31 = vshll.u32 %v5139_v2, 16  ;;  %v5386_v28 = vshll.u32 %v5140_v53, 16  ;;  %v4196_v2 = vld [vmem:[#allocation3 + $0x80] sm:$0x1] }
 0x311   : > { %7057 = vmatprep.mubr.bf16.mxu1 %v8161_v60  ;;  %v4423_v26 = vrot.slane %v4421_v33, 4  ;;  %v4429_v32 = vrot.slane %v4427_v17, 5  ;;  %v5379_v0 = vrot.slane %v5377_v45, 4  ;;  %v5390_v9 = vshrl.u32 %v5140_v53, 16  ;;  %v5143_v60 = vld [vmem:[#allocation3 + $0x94] sm:$0xf] }
 0x312   : > { %7218 = vmatprep.mubr.bf16.mxu0 %v8193_v22  ;;  %v4415_v8 = vrot.slane %v4414_v24, 4  ;;  %v5382_v3 = vrot.slane %v5380_v31, 5  ;;  %v5388_v49 = vrot.slane %v5386_v28, 5  ;;  %v5396_v51 = vshll.u32 %v5141_v56, 16  ;;  %v5144_v17 = vld [vmem:[#allocation3 + $0x98] sm:$0x1] }
 0x313   : > { %v4424_v27 = vor.u32 %v4423_v26, %v4419_v41  ;;  %v5392_v34 = vrot.slane %v5390_v9, 4  ;;  %v8146_v46 = vrot.slane %v4706_v15, 9  ;;  %v4840_v63 = vrot.slane %v4707_v59, 5  ;;  %v9642_v45 = vld [vmem:[#allocation3 + $0x84] sm:$0xff]  }
 0x314   : > { %7219 = vmatmul.mubr.bf16.gmra.mrb[0].mxu0 %v9640_v25  ;;  %v4420_v30 = vsel %vm10648_vm7, %v4415_v8, %v4419_v41  ;;  %v5383_v55 = vor.u32 %v5382_v3, %v5379_v0  ;;  %v5398_v42 = vrot.slane %v5396_v51, 5  ;;  %v4843_v19 = vrot.slane %v4708_v52, 5  ;;  %v4709_v31 = vld [vmem:[#allocation3 + $0x84] sm:$0xe]  ;;  %v4711_v0 = vld [vmem:[#allocation3 + $0x8c] sm:$0x1] }
 0x315   : > { %v4425_v11 = vrot.slane %v4424_v27, 4  ;;  %v5393_v18 = vor.u32 %v5392_v34, %v5388_v49  ;;  %v4841_v43 = vsel %vm10798_vm10, %v8146_v46, %v4840_v63  ;;  %v4842_v14 = vrot.slane %v4840_v63, 4  ;;  %v4198_v51 = vld [vmem:[#allocation3 + $0x88] sm:$0xf] }
 0x316   : > { %v5384_v37 = vrot.slane %v5383_v55, 4  ;;  %v4432_v61 = vshrl.u32 %v4194_v36, 16  ;;  %v4435_v7 = vshll.u32 %v4194_v36, 16  ;;  %v4441_v5 = vshll.u32 %v4195_v16, 16 }
 0x317   : > { %v4430_v44 = vsel %vm10648_vm7, %v4425_v11, %v4429_v32  ;;  %v5394_v38 = vrot.slane %v5393_v18, 4  ;;  %v4844_v21 = vsel %vm10798_vm10, %v4842_v14, %v4843_v19  ;;  %v4445_v40 = vshrl.u32 %v4195_v16, 16  ;;  %v4710_v32 = vld [vmem:[#allocation3 + $0x88] sm:$0xf] }
 0x318   : > { %v8129_v50 = vcombine.low %v4420_v30, %v4430_v44  ;;  %v5389_v62 = vsel %vm10648_vm7, %v5384_v37, %v5388_v49  ;;  %v8162_v53 = vcombine.low %v4841_v43, %v4844_v21  ;;  %v4434_v20 = vrot.slane %v4432_v61, 4  ;;  %v4197_v49 = vld [vmem:[#allocation3 + $0x84] sm:$0xf]  ;;  %v4199_v44 = vld [vmem:[#allocation3 + $0x8c] sm:$0x1] }
 0x319   : > { %v5399_v6 = vsel %vm10648_vm7, %v5394_v38, %v5398_v42  ;;  %v4437_v41 = vrot.slane %v4435_v7, 5  ;;  %v4443_v47 = vrot.slane %v4441_v5, 5  ;;  %v4447_v33 = vrot.slane %v4445_v40, 4 }
 0x31a   : > { %7058 = vmatmul.mubr.bf16.gmra.mrb[224].mxu1 %v8129_v50  ;;  %v8194_v56 = vcombine.low %v5389_v62, %v5399_v6  ;;  %v4451_v22 = vshll.u32 %v4196_v2, 16  ;;  %v5401_v25 = vshrl.u32 %v5142_v12, 16  ;;  %v5404_v24 = vshll.u32 %v5142_v12, 16 }
 0x31b   : > { %7065 = vmatprep.mubr.bf16.mxu1 %v8162_v53  ;;  %v4438_v28 = vor.u32 %v4437_v41, %v4434_v20  ;;  %v4448_v15 = vor.u32 %v4447_v33, %v4443_v47  ;;  %v5410_v59 = vshll.u32 %v5143_v60, 16  ;;  %v5414_v26 = vshrl.u32 %v5143_v60, 16  ;;  %v11496_v36 = vpop.f32.mrb[164].mxu0  ;;  %v11498_v27 = vpop.f32.mrb[132].mxu1 }
 0x31c   : > { %7226 = vmatprep.mubr.bf16.mxu0 %v8194_v56  ;;  %v4453_v9 = vrot.slane %v4451_v22, 5  ;;  %v5403_v52 = vrot.slane %v5401_v25, 4  ;;  %v5406_v8 = vrot.slane %v5404_v24, 5  ;;  %v5420_v3 = vshll.u32 %v5144_v17, 16  ;;  %v11500_v30 = vpop.f32.mrb[165].mxu0  ;;  %v11502_v55 = vpop.f32.mrb[133].mxu1 }
 0x31d   : > { %7227 = vmatmul.mubr.bf16.gmra.mrb[4].mxu0 %v9642_v45  ;;  %v4439_v34 = vrot.slane %v4438_v28, 4  ;;  %v4449_v46 = vrot.slane %v4448_v15, 4  ;;  %v5412_v63 = vrot.slane %v5410_v59, 5  ;;  %v5416_v16 = vrot.slane %v5414_v26, 4  ;;  %v11504_v43 = vpop.f32.mrb[166].mxu0  ;;  %v11506_v14 = vpop.f32.mrb[134].mxu1 }
 0x31e   : > { %v5407_v42 = vor.u32 %v5406_v8, %v5403_v52  ;;  %v5422_v19 = vrot.slane %v5420_v3, 5  ;;  %v8147_v11 = vrot.slane %v4709_v31, 9  ;;  %v4847_v18 = vrot.slane %v4710_v32, 5  ;;  %v11512_v38 = vpop.f32.mrb[167].mxu0  ;;  %v11514_v21 = vpop.f32.mrb[135].mxu1  ;;  %v9643_v25 = vld [vmem:[#allocation3 + $0x90] sm:$0xff]  }
 0x31f   : > { %v4444_v37 = vsel %vm10648_vm7, %v4439_v34, %v4443_v47  ;;  %v4454_v61 = vsel %vm10648_vm7, %v4449_v46, %v4453_v9  ;;  %v5417_v7 = vor.u32 %v5416_v16, %v5412_v63  ;;  %v4850_v5 = vrot.slane %v4711_v0, 5  ;;  %v5145_v17 = vld [vmem:[#allocation3 + $0x9c] sm:$0xf]  ;;  %v5146_v56 = vld [vmem:[#allocation3 + $0xa0] sm:$0xf] }
 0x320   : > { %v8130_v2 = vcombine.low %v4444_v37, %v4454_v61  ;;  %v5408_v40 = vrot.slane %v5407_v42, 4  ;;  %v4848_v12 = vsel %vm10798_vm10, %v8147_v11, %v4847_v18  ;;  %v4849_v50 = vrot.slane %v4847_v18, 4  ;;  %v5147_v28 = vld [vmem:[#allocation3 + $0xa4] sm:$0x1]  ;;  %v4712_v15 = vld [vmem:[#allocation3 + $0x90] sm:$0xe] }
 0x321   : > { %v5418_v62 = vrot.slane %v5417_v7, 4  ;;  %v4456_v53 = vshrl.u32 %v4197_v49, 16  ;;  %v4459_v20 = vshll.u32 %v4197_v49, 16  ;;  %v4465_v60 = vshll.u32 %v4198_v51, 16  ;;  %v4713_v9 = vld [vmem:[#allocation3 + $0x94] sm:$0xf] }
 0x322   : > { %7066 = vmatmul.mubr.bf16.gmra.mrb[228].mxu1 %v8130_v2  ;;  %v5413_v6 = vsel %vm10648_vm7, %v5408_v40, %v5412_v63  ;;  %v4851_v41 = vsel %vm10798_vm10, %v4849_v50, %v4850_v5  ;;  %v4469_v47 = vshrl.u32 %v4198_v51, 16  ;;  %v4475_v33 = vshll.u32 %v4199_v44, 16  ;;  %v4714_v34 = vld [vmem:[#allocation3 + $0x98] sm:$0x1]  ;;  %v11531_v11 = vld [vmem:[%s12590_s4] ss:$0 sm:$0xff] }
 0x323   : > { %v5423_v45 = vsel %vm10648_vm7, %v5418_v62, %v5422_v19  ;;  %v8163_v22 = vcombine.low %v4848_v12, %v4851_v41  ;;  %v4458_v24 = vrot.slane %v4456_v53, 4  ;;  %v4461_v31 = vrot.slane %v4459_v20, 5 }
 0x324   : > { %v8195_v59 = vcombine.low %v5413_v6, %v5423_v45  ;;  %v4467_v26 = vrot.slane %v4465_v60, 5  ;;  %v4471_v32 = vrot.slane %v4469_v47, 4  ;;  %v4477_v0 = vrot.slane %v4475_v33, 5  ;;  %v11524_v52 = vpop.f32.mrb[136].mxu1 }
 0x325   : > { %7073 = vmatprep.mubr.bf16.mxu1 %v8163_v22  ;;  %v4462_v8 = vor.u32 %v4461_v31, %v4458_v24  ;;  %v5425_v3 = vshrl.u32 %v5145_v17, 16  ;;  %v5428_v49 = vshll.u32 %v5145_v17, 16  ;;  %v5434_v51 = vshll.u32 %v5146_v56, 16  ;;  %v11526_v46 = vpop.f32.mrb[137].mxu1  ;;  %v11533_v18 = vpop.f32.mrb[168].mxu0 }
 0x326   : > { %7234 = vmatprep.mubr.bf16.mxu0 %v8195_v59  ;;  %v4472_v63 = vor.u32 %v4471_v32, %v4467_v26  ;;  %v5438_v16 = vshrl.u32 %v5146_v56, 16  ;;  %v5444_v42 = vshll.u32 %v5147_v28, 16  ;;  %v8148_v19 = vrot.slane %v4712_v15, 9  ;;  %v11535_v37 = vpop.f32.mrb[138].mxu1  ;;  %v11537_v2 = vpop.f32.mrb[169].mxu0 }
 0x327   : > { %7235 = vmatmul.mubr.bf16.gmra.mrb[8].mxu0 %v9643_v25  ;;  %v4463_v61 = vrot.slane %v4462_v8, 4  ;;  %v5427_v7 = vrot.slane %v5425_v3, 4  ;;  %v5430_v5 = vrot.slane %v5428_v49, 5  ;;  %v5436_v44 = vrot.slane %v5434_v51, 5  ;;  %v11539_v40 = vpop.f32.mrb[139].mxu1  ;;  %v11541_v20 = vpop.f32.mrb[170].mxu0 }
 0x328   : > { %v4473_v12 = vrot.slane %v4472_v63, 4  ;;  %v5440_v50 = vrot.slane %v5438_v16, 4  ;;  %v5446_v62 = vrot.slane %v5444_v42, 5  ;;  %v4854_v53 = vrot.slane %v4713_v9, 5  ;;  %v11547_v33 = vpop.f32.mrb[171].mxu0 }
 0x329   : > { %v4468_v60 = vsel %vm10648_vm7, %v4463_v61, %v4467_v26  ;;  %v5431_v6 = vor.u32 %v5430_v5, %v5427_v7  ;;  %v4857_v41 = vrot.slane %v4714_v34, 5  ;;  %v8867_v47 = vadd.f32 %v11273_v29, %v11266_v39  ;;  %v4200_v25 = vld [vmem:[#allocation3 + $0x90] sm:$0xf]  ;;  %v4201_v59 = vld [vmem:[#allocation3 + $0x94] sm:$0xf] }
 0x32a   : > { %v4478_v17 = vsel %vm10648_vm7, %v4473_v12, %v4477_v0  ;;  %v5441_v56 = vor.u32 %v5440_v50, %v5436_v44  ;;  %v4855_v45 = vsel %vm10798_vm10, %v8148_v19, %v4854_v53  ;;  %v4856_v22 = vrot.slane %v4854_v53, 4  ;;  %v4202_v3 = vld [vmem:[#allocation3 + $0x98] sm:$0x1]  ;;  %v5150_v19 = vld [vmem:[#allocation3 + $0xb0] sm:$0x1] }
 0x32b   : > { %v8131_v24 = vcombine.low %v4468_v60, %v4478_v17  ;;  %v5432_v31 = vrot.slane %v5431_v6, 4  ;;  %v6674_v28 = vadd.f32 %v8867_v47, %v11531_v11  ;;  %v8870_v15 = vadd.f32 %v11301_v23, %v11296_v4  ;;  %v5148_v23 = vld [vmem:[#allocation3 + $0xa8] sm:$0xf]  ;;  %v4715_v12 = vld [vmem:[#allocation3 + $0x9c] sm:$0xe] }
 0x32c   : > { %v5442_v39 = vrot.slane %v5441_v56, 4  ;;  %v4858_v29 = vsel %vm10798_vm10, %v4856_v22, %v4857_v41  ;;  %v8979_v26 = vadd.f32 %v11450_v58, %v11446_v13  ;;  %v8982_v32 = vadd.f32 %v11458_v10, %v11456_v48  ;;  %v5149_v58 = vld [vmem:[#allocation3 + $0xac] sm:$0xf]  ;;  %v9645_v10 = vld [vmem:[#allocation3 + $0x9c] sm:$0xff]  }
 0x32d   : > { %7074 = vmatmul.mubr.bf16.gmra.mrb[232].mxu1 %v8131_v24  ;;  %v5437_v0 = vsel %vm10648_vm7, %v5432_v31, %v5436_v44  ;;  %v8164_v9 = vcombine.low %v4855_v45, %v4858_v29  ;;  %v6677_v8 = vadd.f32 %v8870_v15, %v11531_v11  ;;  %v4480_v4 = vshrl.u32 %v4200_v25, 16  ;;  %v4716_v6 = vld [vmem:[#allocation3 + $0xa0] sm:$0xf]  ;;  %v4717_v45 = vld [vmem:[#allocation3 + $0xa4] sm:$0x1] }
 0x32e   : > { %v5447_v49 = vsel %vm10648_vm7, %v5442_v39, %v5446_v62  ;;  %v11567_v51 = vadd.f32 %v8979_v26, %v6674_v28  ;;  %v4483_v34 = vshll.u32 %v4200_v25, 16  ;;  %v4489_v13 = vshll.u32 %v4201_v59, 16 }
 0x32f   : > { %v8196_v63 = vcombine.low %v5437_v0, %v5447_v49  ;;  %7081 = vmatprep.mubr.bf16.mxu1 %v8164_v9  ;;  %v11569_v48 = vadd.f32 %v8982_v32, %v6677_v8  ;;  %v4482_v16 = vrot.slane %v4480_v4, 4  ;;  %v4493_v42 = vshrl.u32 %v4201_v59, 16  ;;  %v4203_v49 = vld [vmem:[#allocation3 + $0x9c] sm:$0xf] }
 0x330   : > { %12610 = vst [vmem:[#allocation7_spill] sm:$0xff] %v11567_v51  ;;  %v4485_v61 = vrot.slane %v4483_v34, 5  ;;  %v4491_v7 = vrot.slane %v4489_v13, 5  ;;  %v4499_v5 = vshll.u32 %v4202_v3, 16  ;;  %v5449_v44 = vshrl.u32 %v5148_v23, 16 }
 0x331   : > { %12611 = vst [vmem:[#allocation8_spill] sm:$0xff] %v11569_v48  ;;  %7242 = vmatprep.mubr.bf16.mxu0 %v8196_v63  ;;  %v4495_v50 = vrot.slane %v4493_v42, 4  ;;  %v5452_v62 = vshll.u32 %v5148_v23, 16  ;;  %v5458_v53 = vshll.u32 %v5149_v58, 16  ;;  %v5462_v60 = vshrl.u32 %v5149_v58, 16 }
 0x332   : > { %7243 = vmatmul.mubr.bf16.gmra.mrb[12].mxu0 %v9645_v10  ;;  %v4486_v41 = vor.u32 %v4485_v61, %v4482_v16  ;;  %v4501_v47 = vrot.slane %v4499_v5, 5  ;;  %v5451_v17 = vrot.slane %v5449_v44, 4  ;;  %v5468_v56 = vshll.u32 %v5150_v19, 16  ;;  %v4204_v16 = vld [vmem:[#allocation3 + $0xa0] sm:$0xf] }
 0x333   : > { %v4496_v22 = vor.u32 %v4495_v50, %v4491_v7  ;;  %v5454_v25 = vrot.slane %v5452_v62, 5  ;;  %v5460_v24 = vrot.slane %v5458_v53, 5  ;;  %v5464_v31 = vrot.slane %v5462_v60, 4  ;;  %v5151_v5 = vld [vmem:[#allocation3 + $0xb4] sm:$0xf] }
 0x334   : > { %v4487_v28 = vrot.slane %v4486_v41, 4  ;;  %v5470_v15 = vrot.slane %v5468_v56, 5  ;;  %v8149_v59 = vrot.slane %v4715_v12, 9  ;;  %v4861_v39 = vrot.slane %v4716_v6, 5  ;;  %v11571_v9 = vpop.f32.mrb[140].mxu1  ;;  %v9646_v6 = vld [vmem:[#allocation3 + $0xa8] sm:$0xff]  }
 0x335   : > { %v4497_v29 = vrot.slane %v4496_v22, 4  ;;  %v5455_v26 = vor.u32 %v5454_v25, %v5451_v17  ;;  %v5465_v32 = vor.u32 %v5464_v31, %v5460_v24  ;;  %v4864_v0 = vrot.slane %v4717_v45, 5  ;;  %v11581_v34 = vpop.f32.mrb[141].mxu1  ;;  %v5152_v62 = vld [vmem:[#allocation3 + $0xb8] sm:$0xf] }
 0x336   : > { %v4492_v8 = vsel %vm10648_vm7, %v4487_v28, %v4491_v7  ;;  %v4862_v3 = vsel %vm10798_vm10, %v8149_v59, %v4861_v39  ;;  %v4863_v4 = vrot.slane %v4861_v39, 4  ;;  %v11579_v23 = vadd.f32 %v11500_v30, %v11496_v36  ;;  %v11589_v42 = vpop.f32.mrb[142].mxu1  ;;  %v4205_v7 = vld [vmem:[#allocation3 + $0xa4] sm:$0x1]  ;;  %v5153_v53 = vld [vmem:[#allocation3 + $0xbc] sm:$0x1] }
 0x337   : > { %v4502_v13 = vsel %vm10648_vm7, %v4497_v29, %v4501_v47  ;;  %v5456_v58 = vrot.slane %v5455_v26, 4  ;;  %v5466_v63 = vrot.slane %v5465_v32, 4  ;;  %v11587_v10 = vadd.f32 %v11502_v55, %v11498_v27  ;;  %v11601_v44 = vpop.f32.mrb[172].mxu0  ;;  %v11603_v27 = vpop.f32.mrb[143].mxu1  ;;  %v4719_v28 = vld [vmem:[#allocation3 + $0xac] sm:$0xf] }
 0x338   : > { %v8132_v19 = vcombine.low %v4492_v8, %v4502_v13  ;;  %v4865_v36 = vsel %vm10798_vm10, %v4863_v4, %v4864_v0  ;;  %v11595_v30 = vadd.f32 %v11512_v38, %v11504_v43  ;;  %v11599_v61 = vadd.f32 %v11514_v21, %v11506_v14  ;;  %v11609_v43 = vpop.f32.mrb[173].mxu0  ;;  %v4718_v29 = vld [vmem:[#allocation3 + $0xa8] sm:$0xe] }
 0x339   : > { %v5461_v55 = vsel %vm10648_vm7, %v5456_v58, %v5460_v24  ;;  %v5471_v12 = vsel %vm10648_vm7, %v5466_v63, %v5470_v15  ;;  %v8165_v50 = vcombine.low %v4862_v3, %v4865_v36  ;;  %v4504_v14 = vshrl.u32 %v4203_v49, 16  ;;  %v11611_v60 = vpop.f32.mrb[174].mxu0  ;;  %v4720_v3 = vld [vmem:[#allocation3 + $0xb0] sm:$0x1] }
 0x33a   : > { %7082 = vmatmul.mubr.bf16.gmra.mrb[236].mxu1 %v8132_v19  ;;  %v8197_v38 = vcombine.low %v5461_v55, %v5471_v12  ;;  %v4507_v21 = vshll.u32 %v4203_v49, 16  ;;  %v4513_v41 = vshll.u32 %v4204_v16, 16  ;;  %v4517_v47 = vshrl.u32 %v4204_v16, 16  ;;  %v11613_v45 = vpop.f32.mrb[175].mxu0 }
 0x33b   : > { %7089 = vmatprep.mubr.bf16.mxu1 %v8165_v50  ;;  %v4523_v17 = vshll.u32 %v4205_v7, 16  ;;  %v5473_v56 = vshrl.u32 %v5151_v5, 16  ;;  %v4506_v22 = vrot.slane %v4504_v14, 4  ;;  %v5476_v24 = vshll.u32 %v5151_v5, 16 }
 0x33c   : > { %7250 = vmatprep.mubr.bf16.mxu0 %v8197_v38  ;;  %v4509_v25 = vrot.slane %v4507_v21, 5  ;;  %v5482_v31 = vshll.u32 %v5152_v62, 16  ;;  %v4515_v15 = vrot.slane %v4513_v41, 5  ;;  %v4519_v59 = vrot.slane %v4517_v47, 4  ;;  %v4206_v21 = vld [vmem:[#allocation3 + $0xa8] sm:$0xf] }
 0x33d   : > { %7251 = vmatmul.mubr.bf16.gmra.mrb[16].mxu0 %v9646_v6  ;;  %v5475_v39 = vrot.slane %v5473_v56, 4  ;;  %v5478_v32 = vrot.slane %v5476_v24, 5  ;;  %v5486_v8 = vshrl.u32 %v5152_v62, 16  ;;  %v4525_v49 = vrot.slane %v4523_v17, 5  ;;  %v4207_v17 = vld [vmem:[#allocation3 + $0xac] sm:$0xf] }
 0x33e   : > { %v4510_v26 = vor.u32 %v4509_v25, %v4506_v22  ;;  %v5484_v0 = vrot.slane %v5482_v31, 5  ;;  %v4520_v4 = vor.u32 %v4519_v59, %v4515_v15  ;;  %v5492_v13 = vshll.u32 %v5153_v53, 16  ;;  %v4208_v56 = vld [vmem:[#allocation3 + $0xb0] sm:$0x1]  ;;  %v9648_v59 = vld [vmem:[#allocation3 + $0xb4] sm:$0xff]  }
 0x33f   : > { %v4868_v58 = vrot.slane %v4719_v28, 5  ;;  %v5479_v16 = vor.u32 %v5478_v32, %v5475_v39  ;;  %v5488_v19 = vrot.slane %v5486_v8, 4  ;;  %v8150_v36 = vrot.slane %v4718_v29, 9  ;;  %v5155_v32 = vld [vmem:[#allocation3 + $0xc4] sm:$0xf] }
 0x340   : > { %v4511_v63 = vrot.slane %v4510_v26, 4  ;;  %v4521_v7 = vrot.slane %v4520_v4, 4  ;;  %v5494_v5 = vrot.slane %v5492_v13, 5  ;;  %v4871_v12 = vrot.slane %v4720_v3, 5  ;;  %v5156_v3 = vld [vmem:[#allocation3 + $0xc8] sm:$0x1] }
 0x341   : > { %v4870_v55 = vrot.slane %v4868_v58, 4  ;;  %v5480_v38 = vrot.slane %v5479_v16, 4  ;;  %v5489_v14 = vor.u32 %v5488_v19, %v5484_v0  ;;  %v11619_v62 = vadd.f32 %v11537_v2, %v11533_v18  ;;  %v4721_v16 = vld [vmem:[#allocation3 + $0xb4] sm:$0xe] }
 0x342   : > { %v4516_v50 = vsel %vm10648_vm7, %v4511_v63, %v4515_v15  ;;  %v4526_v53 = vsel %vm10648_vm7, %v4521_v7, %v4525_v49  ;;  %v11627_v41 = vadd.f32 %v11526_v46, %v11524_v52  ;;  %v11631_v47 = vadd.f32 %v11547_v33, %v11541_v20  ;;  %v5154_v33 = vld [vmem:[#allocation3 + $0xc0] sm:$0xf] }
 0x343   : > { %v4872_v6 = vsel %vm10798_vm10, %v4870_v55, %v4871_v12  ;;  %v8133_v22 = vcombine.low %v4516_v50, %v4526_v53  ;;  %v5485_v18 = vsel %vm10648_vm7, %v5480_v38, %v5484_v0  ;;  %v5490_v2 = vrot.slane %v5489_v14, 4  ;;  %v11637_v24 = vpop.f32.mrb[144].mxu1  ;;  %v4722_v12 = vld [vmem:[#allocation3 + $0xb8] sm:$0xf] }
 0x344   : > { %v4869_v25 = vsel %vm10798_vm10, %v8150_v36, %v4868_v58  ;;  %v11641_v52 = vadd.f32 %v11539_v40, %v11535_v37  ;;  %v4528_v46 = vshrl.u32 %v4206_v21, 16  ;;  %v4531_v20 = vshll.u32 %v4206_v21, 16  ;;  %v11643_v28 = vpop.f32.mrb[145].mxu1 }
 0x345   : > { %v8166_v31 = vcombine.low %v4869_v25, %v4872_v6  ;;  %7090 = vmatmul.mubr.bf16.gmra.mrb[240].mxu1 %v8133_v22  ;;  %v5495_v15 = vsel %vm10648_vm7, %v5490_v2, %v5494_v5  ;;  %v4537_v39 = vshll.u32 %v4207_v17, 16  ;;  %v4541_v29 = vshrl.u32 %v4207_v17, 16  ;;  %v11647_v0 = vpop.f32.mrb[146].mxu1  ;;  %v4723_v6 = vld [vmem:[#allocation3 + $0xbc] sm:$0x1] }
 0x346   : > { %v4547_v26 = vshll.u32 %v4208_v56, 16  ;;  %v8198_v8 = vcombine.low %v5485_v18, %v5495_v15  ;;  %v4530_v37 = vrot.slane %v4528_v46, 4  ;;  %v4533_v40 = vrot.slane %v4531_v20, 5  ;;  %v11649_v4 = vpop.f32.mrb[176].mxu0  ;;  %v11651_v49 = vpop.f32.mrb[147].mxu1 }
 0x347   : > { %7097 = vmatprep.mubr.bf16.mxu1 %v8166_v31  ;;  %v4539_v13 = vrot.slane %v4537_v39, 5  ;;  %v4543_v58 = vrot.slane %v4541_v29, 4  ;;  %v5497_v63 = vshrl.u32 %v5154_v33, 16  ;;  %v11653_v19 = vpop.f32.mrb[177].mxu0  ;;  %v5500_v7 = vshll.u32 %v5154_v33, 16 }
 0x348   : > { %7258 = vmatprep.mubr.bf16.mxu0 %v8198_v8  ;;  %v4534_v36 = vor.u32 %v4533_v40, %v4530_v37  ;;  %v5506_v5 = vshll.u32 %v5155_v32, 16  ;;  %v5510_v55 = vshrl.u32 %v5155_v32, 16  ;;  %v11655_v50 = vpop.f32.mrb[178].mxu0  ;;  %v4549_v14 = vrot.slane %v4547_v26, 5  ;;  %v4209_v29 = vld [vmem:[#allocation3 + $0xb4] sm:$0xf] }
 0x349   : > { %7259 = vmatmul.mubr.bf16.gmra.mrb[20].mxu0 %v9648_v59  ;;  %v4544_v38 = vor.u32 %v4543_v58, %v4539_v13  ;;  %v5499_v21 = vrot.slane %v5497_v63, 4  ;;  %v5516_v53 = vshll.u32 %v5156_v3, 16  ;;  %v11657_v17 = vpop.f32.mrb[179].mxu0  ;;  %v5502_v22 = vrot.slane %v5500_v7, 5 }
 0x34a   : > { %v4535_v56 = vrot.slane %v4534_v36, 4  ;;  %v5508_v18 = vrot.slane %v5506_v5, 5  ;;  %v5512_v2 = vrot.slane %v5510_v55, 4  ;;  %v8151_v46 = vrot.slane %v4721_v16, 9  ;;  %v4211_v5 = vld [vmem:[#allocation3 + $0xbc] sm:$0x1] }
 0x34b   : > { %v4545_v25 = vrot.slane %v4544_v38, 4  ;;  %v5518_v31 = vrot.slane %v5516_v53, 5  ;;  %v4875_v20 = vrot.slane %v4722_v12, 5  ;;  %v5503_v33 = vor.u32 %v5502_v22, %v5499_v21  ;;  %v11691_v12 = vld [vmem:[#allocation3 + $0xc4] sm:$0xf] }
 0x34c   : > { %v5513_v15 = vor.u32 %v5512_v2, %v5508_v18  ;;  %v4878_v39 = vrot.slane %v4723_v6, 5  ;;  %v11661_v59 = vadd.f32 %v11609_v43, %v11601_v44  ;;  %v4540_v26 = vsel %vm10648_vm7, %v4535_v56, %v4539_v13  ;;  %v4210_v44 = vld [vmem:[#allocation3 + $0xb8] sm:$0xf]  ;;  %v9649_v53 = vld [vmem:[#allocation3 + $0xc0] sm:$0xff]  }
 0x34d   : > { %v4550_v32 = vsel %vm10648_vm7, %v4545_v25, %v4549_v14  ;;  %v4877_v8 = vrot.slane %v4875_v20, 4  ;;  %v11669_v37 = vadd.f32 %v11581_v34, %v11571_v9  ;;  %v5504_v3 = vrot.slane %v5503_v33, 4  ;;  %v4724_v22 = vld [vmem:[#allocation3 + $0xc0] sm:$0xe] }
 0x34e   : > { %v8134_v40 = vcombine.low %v4540_v26, %v4550_v32  ;;  %v5514_v58 = vrot.slane %v5513_v15, 4  ;;  %v11673_v63 = vadd.f32 %v11613_v45, %v11611_v60  ;;  %v4876_v13 = vsel %vm10798_vm10, %v8151_v46, %v4875_v20  ;;  %v4212_v33 = vld [vmem:[#allocation3 + $0xc0] sm:$0xf]  ;;  %v4213_v32 = vld [vmem:[#allocation3 + $0xc4] sm:$0xf] }
 0x34f   : > { %v11675_v43 = vpop.f32.mrb[180].mxu0  ;;  %v4879_v16 = vsel %vm10798_vm10, %v4877_v8, %v4878_v39  ;;  %v11683_v9 = vadd.f32 %v11603_v27, %v11589_v42  ;;  %v4552_v34 = vshrl.u32 %v4209_v29, 16  ;;  %v5509_v60 = vsel %vm10648_vm7, %v5504_v3, %v5508_v18  ;;  %v4726_v18 = vld [vmem:[#allocation3 + $0xc8] sm:$0x1] }
 0x350   : > { %v11685_v36 = vpop.f32.mrb[181].mxu0  ;;  %7098 = vmatmul.mubr.bf16.gmra.mrb[244].mxu1 %v8134_v40  ;;  %v5519_v45 = vsel %vm10648_vm7, %v5514_v58, %v5518_v31  ;;  %v8167_v7 = vcombine.low %v4876_v13, %v4879_v16  ;;  %v4555_v55 = vshll.u32 %v4209_v29, 16  ;;  %v4561_v27 = vshll.u32 %v4210_v44, 16  ;;  %v4214_v8 = vld [vmem:[#allocation3 + $0xc8] sm:$0x1] }
 0x351   : > { %v11693_v38 = vpop.f32.mrb[182].mxu0  ;;  %v8199_v14 = vcombine.low %v5509_v60, %v5519_v45  ;;  %v4554_v42 = vrot.slane %v4552_v34, 4  ;;  %v4565_v56 = vshrl.u32 %v4210_v44, 16  ;;  %v4571_v31 = vshll.u32 %v4211_v5, 16  ;;  %v2537_v44 = vld [vmem:[#allocation3 + $0xd4] sm:$0x1] }
 0x352   : > { %v11695_v21 = vpop.f32.mrb[183].mxu0  ;;  %7105 = vmatprep.mubr.bf16.mxu1 %v8167_v7  ;;  %v4557_v6 = vrot.slane %v4555_v55, 5  ;;  %v4563_v25 = vrot.slane %v4561_v27, 5  ;;  %v4882_v46 = vrot.slane %v11691_v12, 5  ;;  %v11702_v20 = vadd.f32 %v11653_v19, %v11649_v4  ;;  %v2481_v19 = vld [vmem:[#allocation3 + $0xcc] sm:$0x1] }
 0x353   : > { %v11697_v2 = vpop.f32.mrb[148].mxu1  ;;  %7266 = vmatprep.mubr.bf16.mxu0 %v8199_v14  ;;  %v4567_v29 = vrot.slane %v4565_v56, 4  ;;  %v11708_v26 = vadd.f32 %v11643_v28, %v11637_v24  ;;  %v11714_v58 = vadd.f32 %v11657_v17, %v11655_v50  ;;  %v11718_v4 = vadd.f32 %v11651_v49, %v11647_v0  ;;  %v5158_v60 = vld [vmem:[#allocation3 + $0xd0] sm:$0xf] }
 0x354   : > { %v11704_v15 = vpop.f32.mrb[149].mxu1  ;;  %7267 = vmatmul.mubr.bf16.gmra.mrb[24].mxu0 %v9649_v53  ;;  %v4558_v39 = vor.u32 %v4557_v6, %v4554_v42  ;;  %v4884_v3 = vrot.slane %v4882_v46, 4  ;;  %v4885_v24 = vrot.slane %v4726_v18, 5  ;;  %v4576_v28 = vshrl.u32 %v4212_v33, 16  ;;  %v5625_v42 = vld [vmem:[#allocation3 + $0x1c] sm:$0xf] }
 0x355   : > { %v11710_v40 = vpop.f32.mrb[150].mxu1  ;;  %v4568_v34 = vor.u32 %v4567_v29, %v4563_v25  ;;  %v4573_v7 = vrot.slane %v4571_v31, 5  ;;  %v8152_v5 = vrot.slane %v4724_v22, 9  ;;  %v4579_v55 = vshll.u32 %v4212_v33, 16  ;;  %v11732_v31 = vld [vmem:[#allocation3 + $0x28] sm:$0xf] }
 0x356   : > { %v8899_v13 = vpop.f32.mrb[151].mxu1  ;;  %v4559_v16 = vrot.slane %v4558_v39, 4  ;;  %v4585_v12 = vshll.u32 %v4213_v32, 16  ;;  %v4886_v17 = vsel %vm10798_vm10, %v4884_v3, %v4885_v24  ;;  %v4578_v14 = vrot.slane %v4576_v28, 4 }
 0x357   : > { %v11720_v45 = vpop.f32.mrb[184].mxu0  ;;  %v4569_v49 = vrot.slane %v4568_v34, 4  ;;  %v4581_v53 = vrot.slane %v4579_v55, 5  ;;  %v4589_v56 = vshrl.u32 %v4213_v32, 16  ;;  %v4595_v18 = vshll.u32 %v4214_v8, 16 }
 0x358   : > { %v11722_v50 = vpop.f32.mrb[185].mxu0  ;;  %v4564_v0 = vsel %vm10648_vm7, %v4559_v16, %v4563_v25  ;;  %v4587_v6 = vrot.slane %v4585_v12, 5  ;;  %v2482_v25 = vsel %vm10551_vm2, 0, %v2481_v19  ;;  %v2538_v39 = vsel %vm10558_vm4, 0, %v2537_v44  ;;  %v5626_v19 = vld [vmem:[#allocation3 + $0x20] sm:$0x1] }
 0x359   : > { %v11728_v27 = vpop.f32.mrb[186].mxu0  ;;  %v4574_v33 = vsel %vm10648_vm7, %v4569_v49, %v4573_v7  ;;  %v5530_v29 = vshll.u32 %v5158_v60, 16  ;;  %v4883_v32 = vsel %vm10798_vm10, %v8152_v5, %v4882_v46  ;;  %v4582_v8 = vor.u32 %v4581_v53, %v4578_v14  ;;  %2483 = vst [vmem:[#allocation3 + $0xcc] sm:$0x1] %v2482_v25  ;;  %2539 = vst [vmem:[#allocation3 + $0xd4] sm:$0x1] %v2538_v39 }
 0x35a   : > { %v11730_v22 = vpop.f32.mrb[187].mxu0  ;;  %v8135_v16 = vcombine.low %v4564_v0, %v4574_v33  ;;  %v4591_v34 = vrot.slane %v4589_v56, 4  ;;  %v8168_v28 = vcombine.low %v4883_v32, %v4886_v17  ;;  %v5534_v1 = vshrl.u32 %v5158_v60, 16  ;;  %v5624_v49 = vld [vmem:[#allocation3 + $0x18] sm:$0xe] }
 0x35b   : > { %v11740_v3 = vpop.f32.mrb[152].mxu1  ;;  %v11744_v7 = vrot.slane %v5530_v29, 5  ;;  %v5722_v55 = vrot.slane %v5625_v42, 5  ;;  %v12594_v44 = vrot.slane %v11732_v31, 5  ;;  %v4597_v0 = vrot.slane %v4595_v18, 5 }
 0x35c   : > { %v8902_v24 = vpop.f32.mrb[153].mxu1  ;;  %7106 = vmatmul.mubr.bf16.gmra.mrb[248].mxu1 %v8135_v16  ;;  %v4592_v12 = vor.u32 %v4591_v34, %v4587_v6  ;;  %v11749_v46 = vadd.f32 %v11685_v36, %v11675_v43  ;;  %v4583_v14 = vrot.slane %v4582_v8, 4  ;;  %v5536_v17 = vrot.slane %v5534_v1, 4  ;;  %v5632_v1 = vld [vmem:[#allocation3 + $0x38] sm:$0x1] }
 0x35d   : > { %v8904_v54 = vpop.f32.mrb[154].mxu1  ;;  %7113 = vmatprep.mubr.bf16.mxu1 %v8168_v28  ;;  %v5724_v53 = vrot.slane %v5722_v55, 4  ;;  %v11753_v60 = vadd.f32 %v11704_v15, %v11697_v2  ;;  %v5725_v33 = vrot.slane %v5626_v19, 5  ;;  %v11759_v18 = vadd.f32 %v11695_v21, %v11693_v38  ;;  %v5629_v38 = vld [vmem:[#allocation3 + $0x2c] sm:$0x1] }
 0x35e   : > { %v8905_v5 = vpop.f32.mrb[155].mxu1  ;;  %v4593_v56 = vrot.slane %v4592_v12, 4  ;;  %v11762_v43 = vadd.f32 %v8899_v13, %v11710_v40  ;;  %v5537_v25 = vor.u32 %v5536_v17, %v11744_v7  ;;  %v8201_v39 = vrot.slane %v5624_v49, 9  ;;  %v5631_v21 = vld [vmem:[#allocation3 + $0x34] sm:$0xf] }
 0x35f   : > { %v11755_v42 = vpop.f32.mrb[188].mxu0  ;;  %12612 = vst [vmem:[#allocation9_spill] sm:$0xff] %v11759_v18  ;;  %v5731_v2 = vrot.slane %v12594_v44, 4  ;;  %v5726_v16 = vsel %vm10798_vm10, %v5724_v53, %v5725_v33  ;;  %v4588_v40 = vsel %vm10648_vm7, %v4583_v14, %v4587_v6  ;;  %v5627_v28 = vld [vmem:[#allocation3 + $0x24] sm:$0xe]  ;;  %v11779_v19 = vadd.f32 %v11722_v50, %v11720_v45 }
 0x360   : > { %v9020_v36 = vpop.f32.mrb[189].mxu0  ;;  %v4598_v15 = vsel %vm10648_vm7, %v4593_v56, %v4597_v0  ;;  %v5157_v13 = vld [vmem:[#allocation3 + $0xcc] sm:$0xf]  ;;  %v5159_v8 = vld [vmem:[#allocation3 + $0xd4] sm:$0x1]  ;;  %v5723_v34 = vsel %vm10798_vm10, %v8201_v39, %v5722_v55  ;;  %v5538_v56 = vrot.slane %v5537_v25, 4  ;;  %v11782_v18 = vadd.f32 %v8902_v24, %v11740_v3 }
 0x361   : > { %v11765_v29 = vpop.f32.mrb[190].mxu0  ;;  %v8136_v12 = vcombine.low %v4588_v40, %v4598_v15  ;;  %v5521_v0 = vshrl.u32 %v5157_v13, 16  ;;  %v5524_v49 = vshll.u32 %v5157_v13, 16  ;;  %v5540_v17 = vshll.u32 %v5159_v8, 16  ;;  %v5630_v6 = vld [vmem:[#allocation3 + $0x30] sm:$0xe] }
 0x362   : > { %v9023_v32 = vpop.f32.mrb[191].mxu0  ;;  %v8217_v33 = vcombine.low %v5723_v34, %v5726_v16  ;;  %v5732_v44 = vrot.slane %v5629_v38, 5  ;;  %v5736_v14 = vrot.slane %v5631_v21, 5  ;;  %v11784_v45 = vld [vmem:[#allocation3 + $0x40] sm:$0xf]  ;;  %v5739_v40 = vrot.slane %v5632_v1, 5 }
 0x363   : > { %v8907_v53 = vpop.f32.mrb[156].mxu1  ;;  %v5523_v51 = vrot.slane %v5521_v0, 4  ;;  %v5526_v55 = vrot.slane %v5524_v49, 5  ;;  %v5542_v39 = vrot.slane %v5540_v17, 5  ;;  %v11788_v25 = vadd.f32 %v11730_v22, %v11728_v27  ;;  %v11792_v38 = vld [vmem:[#allocation3 + $0x4c] sm:$0xf] }
 0x364   : > { %v8908_v48 = vpop.f32.mrb[157].mxu1  ;;  %7114 = vmatmul.mubr.bf16.gmra.mrb[252].mxu1 %v8136_v12  ;;  %v5738_v15 = vrot.slane %v5736_v14, 4  ;;  %v11790_v16 = vadd.f32 %v8905_v5, %v8904_v54  ;;  %v8202_v34 = vrot.slane %v5627_v28, 9  ;;  %v5733_v24 = vsel %vm10798_vm10, %v5731_v2, %v5732_v44 }
 0x365   : > { %v8910_v50 = vpop.f32.mrb[158].mxu1  ;;  %9385 = vmatprep.mubr.bf16.mxu1 %v8217_v33  ;;  %v5527_v8 = vor.u32 %v5526_v55, %v5523_v51  ;;  %v8203_v12 = vrot.slane %v5630_v6, 9  ;;  %v5743_v0 = vrot.slane %v11784_v45, 5  ;;  %v5543_v54 = vsel %vm10648_vm7, %v5538_v56, %v5542_v39  ;;  %v9651_v56 = vld [vmem:[#allocation3 + $0xcc] sm:$0xff]   ;;  %v5635_v39 = vld [vmem:[#allocation3 + $0x44] sm:$0x1] }
 0x366   : > { %v8911_v21 = vpop.f32.mrb[159].mxu1  ;;  %v5740_v1 = vsel %vm10798_vm10, %v5738_v15, %v5739_v40  ;;  %v5750_v5 = vrot.slane %v11792_v38, 5  ;;  %v12613_v51 = vrot.slane %v11732_v31, 5  ;;  %v11809_v2 = vadd.f32 %v9020_v36, %v11755_v42  ;;  %v5633_v40 = vld [vmem:[#allocation3 + $0x3c] sm:$0xe] }
 0x367   : > { %v9025_v13 = vpop.f32.mrb[192].mxu0  ;;  %v5528_v22 = vrot.slane %v5527_v8, 4  ;;  %v5737_v44 = vsel %vm10798_vm10, %v8203_v12, %v5736_v14  ;;  %v11814_v45 = vadd.f32 %v8908_v48, %v8907_v53  ;;  %v5745_v38 = vrot.slane %v5743_v0, 4  ;;  %v5638_v8 = vld [vmem:[#allocation3 + $0x50] sm:$0x1] }
 0x368   : > { %v9026_v3 = vpop.f32.mrb[193].mxu0  ;;  %v5730_v28 = vsel %vm10798_vm10, %v8202_v34, %v12613_v51  ;;  %v8219_v55 = vcombine.low %v5737_v44, %v5740_v1  ;;  %v11817_v14 = vadd.f32 %v9023_v32, %v11765_v29  ;;  %v11819_v42 = vadd.f32 %v8911_v21, %v8910_v50  ;;  %v5636_v53 = vld [vmem:[#allocation3 + $0x48] sm:$0xe] }
 0x369   : > { %v9028_v27 = vpop.f32.mrb[194].mxu0  ;;  %v5533_v33 = vsel %vm10648_vm7, %v5528_v22, %v11744_v7  ;;  %v8218_v6 = vcombine.low %v5730_v28, %v5733_v24  ;;  %v5752_v57 = vrot.slane %v5750_v5, 4  ;;  %v11821_v7 = vld [vmem:[#allocation3 + $0x58] sm:$0xf]  ;;  %v5746_v48 = vrot.slane %v5635_v39, 5 }
 0x36a   : > { %v9029_v49 = vpop.f32.mrb[195].mxu0  ;;  %v8200_v15 = vcombine.low %v5533_v33, %v5543_v54  ;;  %v11823_v24 = vld [vmem:[#allocation3 + $0x64] sm:$0xf]  ;;  %v8204_v1 = vrot.slane %v5633_v40, 9  ;;  %v5753_v22 = vrot.slane %v5638_v8, 5  ;;  %v11825_v29 = vadd.f32 %v9026_v3, %v9025_v13 }
 0x36b   : > { %v8913_v17 = vpop.f32.mrb[160].mxu1  ;;  %v5747_v50 = vsel %vm10798_vm10, %v5745_v38, %v5746_v48  ;;  %v5757_v21 = vrot.slane %v11821_v7, 5  ;;  %v11832_v51 = vadd.f32 %v9029_v49, %v9028_v27  ;;  %v8205_v44 = vrot.slane %v5636_v53, 9  ;;  %v5641_v27 = vld [vmem:[#allocation3 + $0x5c] sm:$0x1] }
 0x36c   : > { %v8914_v31 = vpop.f32.mrb[161].mxu1  ;;  %9386 = vmatmul.mubr.bf16.vlgmr.msra.gmra.mrb[0].mxu1 %v8218_v6  ;;  %7274 = vmatprep.mubr.bf16.mxu0 %v8200_v15  ;;  %v5754_v33 = vsel %vm10798_vm10, %v5752_v57, %v5753_v22  ;;  %v5744_v3 = vsel %vm10798_vm10, %v8204_v1, %v5743_v0  ;;  %v11849_v15 = vadd.f32 %v11599_v61, %v11531_v11  ;;  %v5644_v8 = vld [vmem:[#allocation3 + $0x68] sm:$0x1]  ;;  %v5639_v0 = vld [vmem:[#allocation3 + $0x54] sm:$0xe] }
 0x36d   : > { %v8916_v36 = vpop.f32.mrb[162].mxu1  ;;  %9389 = vmatprep.mubr.bf16.mxu1 %v8219_v55  ;;  %7275 = vmatmul.mubr.bf16.gmra.mrb[28].mxu0 %v9651_v56  ;;  %v11830_v54 = vadd.f32 %v8914_v31, %v8913_v17  ;;  %12614 = vst [vmem:[#allocation10_spill] sm:$0xff] %v11832_v51  ;;  %v5764_v56 = vrot.slane %v11823_v24, 5  ;;  %v8220_v39 = vcombine.low %v5744_v3, %v5747_v50  ;;  %v5759_v38 = vrot.slane %v5757_v21, 4  ;;  %v11851_v7 = vld [vmem:[#allocation3 + $0x70] sm:$0xf] }
 0x36e   : > { %v8917_v34 = vpop.f32.mrb[163].mxu1  ;;  %v5751_v17 = vsel %vm10798_vm10, %v8205_v44, %v5750_v5  ;;  %v11845_v31 = vadd.f32 %v11587_v10, %v11531_v11  ;;  %v11861_v61 = vadd.f32 %v11627_v41, %v11531_v11  ;;  %v11865_v53 = vadd.f32 %v11641_v52, %v11531_v11  ;;  %v5642_v1 = vld [vmem:[#allocation3 + $0x60] sm:$0xe]  ;;  %v11867_v22 = vld [vmem:[#allocation3 + $0x7c] sm:$0xf] }
 0x36f   : > { %v9031_v12 = vpop.f32.mrb[196].mxu0  ;;  %v11837_v6 = vadd.f32 %v8917_v34, %v8916_v36  ;;  %v8221_v40 = vcombine.low %v5751_v17, %v5754_v33  ;;  %v5766_v57 = vrot.slane %v5764_v56, 4  ;;  %v5760_v24 = vrot.slane %v5641_v27, 5  ;;  %v11883_v44 = vld [vmem:[#allocation3 + $0x88] sm:$0xf] }
 0x370   : > { %v9032_v32 = vpop.f32.mrb[197].mxu0  ;;  %v11873_v50 = vadd.f32 %v11669_v37, %v11531_v11  ;;  %v11877_v41 = vadd.f32 %v11683_v9, %v11531_v11  ;;  %v11881_v52 = vadd.f32 %v11708_v26, %v11531_v11  ;;  %v8206_v3 = vrot.slane %v5639_v0, 9  ;;  %v11892_v9 = vld [vmem:[#allocation3 + $0x94] sm:$0xf] }
 0x371   : > { %v9034_v28 = vpop.f32.mrb[198].mxu0  ;;  %v11853_v5 = vadd.f32 %v9032_v32, %v9031_v12  ;;  %v5761_v37 = vsel %vm10798_vm10, %v5759_v38, %v5760_v24  ;;  %v11896_v26 = vadd.f32 %v11753_v60, %v11531_v11  ;;  %v8207_v17 = vrot.slane %v5642_v1, 9  ;;  %v5647_v24 = vld [vmem:[#allocation3 + $0x74] sm:$0x1] }
 0x372   : > { %v9035_v13 = vpop.f32.mrb[199].mxu0  ;;  %v12595_v38 = vrot.slane %v11883_v44, 5  ;;  %v11910_v60 = vadd.f32 %v11762_v43, %v11531_v11  ;;  %v5792_v1 = vrot.slane %v11892_v9, 5  ;;  %v11931_v9 = vadd.f32 %v11819_v42, %v11531_v11 }
 0x373   : > { %v8919_v55 = vpop.f32.mrb[164].mxu1  ;;  %12615 = vst [vmem:[#allocation11_spill] sm:$0xff] %v11853_v5  ;;  %v11857_v48 = vadd.f32 %v9035_v13, %v9034_v28  ;;  %v5767_v28 = vrot.slane %v5644_v8, 5  ;;  %v11887_v13 = vadd.f32 %v11718_v4, %v11531_v11  ;;  %v5778_v4 = vrot.slane %v11867_v22, 5 }
 0x374   : > { %v8920_v49 = vpop.f32.mrb[165].mxu1  ;;  %9390 = vmatmul.mubr.bf16.gmra.mrb[4].mxu1 %v8220_v39  ;;  %v11917_v22 = vadd.f32 %v11782_v18, %v11531_v11 }
 0x375   : > { %v8922_v36 = vpop.f32.mrb[166].mxu1  ;;  %v11855_v34 = vadd.f32 %v8920_v49, %v8919_v55  ;;  %12616 = vst [vmem:[#allocation12_spill] sm:$0xff] %v11857_v48  ;;  %9393 = vmatprep.mubr.bf16.mxu1 %v8221_v40  ;;  %v5771_v55 = vrot.slane %v11851_v7, 5  ;;  %v5768_v27 = vsel %vm10798_vm10, %v5766_v57, %v5767_v28  ;;  %v5758_v40 = vsel %vm10798_vm10, %v8206_v3, %v5757_v21  ;;  %v5650_v3 = vld [vmem:[#allocation3 + $0x80] sm:$0x1] }
 0x376   : > { %v8923_v10 = vpop.f32.mrb[167].mxu1  ;;  %v8222_v7 = vcombine.low %v5758_v40, %v5761_v37  ;;  %v5765_v57 = vsel %vm10798_vm10, %v8207_v17, %v5764_v56  ;;  %v11923_v37 = vadd.f32 %v11790_v16, %v11531_v11  ;;  %v11927_v56 = vadd.f32 %v11814_v45, %v11531_v11  ;;  %v5651_v17 = vld [vmem:[#allocation3 + $0x84] sm:$0xe]  ;;  %v11939_v48 = vld [vmem:[#allocation3 + $0xa0] sm:$0xf] }
 0x377   : > { %v11869_v12 = vadd.f32 %v8923_v10, %v8922_v36  ;;  %v9037_v32 = vpop.f32.mrb[200].mxu0  ;;  %v5645_v10 = vld [vmem:[#allocation3 + $0x6c] sm:$0xe]  ;;  %v5773_v28 = vrot.slane %v5771_v55, 4  ;;  %v5780_v18 = vrot.slane %v5778_v4, 4  ;;  %v5787_v16 = vrot.slane %v12595_v38, 4 }
 0x378   : > { %v9038_v33 = vpop.f32.mrb[201].mxu0  ;;  %v8208_v40 = vrot.slane %v5645_v10, 9  ;;  %v11937_v45 = vadd.f32 %v11830_v54, %v11531_v11  ;;  %v11944_v10 = vld [vmem:[%s12590_s4] ss:$0 sm:$0xff]  ;;  %v5654_v54 = vld [vmem:[#allocation3 + $0x90] sm:$0xe] }
 0x379   : > { %v9040_v39 = vpop.f32.mrb[202].mxu0  ;;  %v11904_v36 = vadd.f32 %v9038_v33, %v9037_v32  ;;  %v8223_v32 = vcombine.low %v5765_v57, %v5768_v27  ;;  %v5648_v33 = vld [vmem:[#allocation3 + $0x78] sm:$0xe]  ;;  %v5653_v27 = vld [vmem:[#allocation3 + $0x8c] sm:$0x1] }
 0x37a   : > { %v9041_v49 = vpop.f32.mrb[203].mxu0  ;;  %v5656_v57 = vld [vmem:[#allocation3 + $0x98] sm:$0x1]  ;;  %v8209_v42 = vrot.slane %v5648_v33, 9  ;;  %v5788_v11 = vrot.slane %v5653_v27, 5  ;;  %v5799_v27 = vrot.slane %v11939_v48, 5 }
 0x37b   : > { %v8925_v8 = vpop.f32.mrb[168].mxu1  ;;  %12617 = vst [vmem:[#allocation13_spill] sm:$0xff] %v11904_v36  ;;  %v11906_v0 = vadd.f32 %v9041_v49, %v9040_v39  ;;  %v5781_v36 = vrot.slane %v5650_v3, 5  ;;  %v5795_v51 = vrot.slane %v5656_v57, 5  ;;  %v12620_v57 = vrot.slane %v11883_v44, 5 }
 0x37c   : > { %v8926_v21 = vpop.f32.mrb[169].mxu1  ;;  %9394 = vmatmul.mubr.bf16.gmra.mrb[8].mxu1 %v8222_v7  ;;  %v5794_v7 = vrot.slane %v5792_v1, 4 }
 0x37d   : > { %12618 = vst [vmem:[#allocation14_spill] sm:$0xff] %v11906_v0  ;;  %v11919_v39 = vadd.f32 %v8926_v21, %v8925_v8  ;;  %v8928_v43 = vpop.f32.mrb[170].mxu1  ;;  %9397 = vmatprep.mubr.bf16.mxu1 %v8223_v32  ;;  %v5774_v8 = vrot.slane %v5647_v24, 5  ;;  %v11948_v24 = vadd.f32 %v11944_v10, %v11837_v6  ;;  %v5782_v38 = vsel %vm10798_vm10, %v5780_v18, %v5781_v36  ;;  %v11969_v36 = vld [vmem:[#allocation3 + $0xac] sm:$0xf] }
 0x37e   : > { %v8929_v49 = vpop.f32.mrb[171].mxu1 }
 0x37f   : > { %v8930_v21 = vadd.f32 %v8929_v49, %v8928_v43  ;;  %v9043_v0 = vpop.f32.mrb[204].mxu0  ;;  %12619 = vst [vmem:[#allocation15_spill] sm:$0xff] %v11948_v24  ;;  %v5775_v32 = vsel %vm10798_vm10, %v5773_v28, %v5774_v8  ;;  %v5772_v43 = vsel %vm10798_vm10, %v8208_v40, %v5771_v55  ;;  %v5779_v49 = vsel %vm10798_vm10, %v8209_v42, %v5778_v4 }
 0x380   : > { %v9044_v5 = vpop.f32.mrb[205].mxu0  ;;  %v8210_v24 = vrot.slane %v5651_v17, 9  ;;  %v5789_v28 = vsel %vm10798_vm10, %v5787_v16, %v5788_v11  ;;  %v8224_v8 = vcombine.low %v5772_v43, %v5775_v32  ;;  %v6746_v55 = vadd.f32 %v11944_v10, %v11855_v34 }
 0x381   : > { %v11952_v33 = vadd.f32 %v9044_v5, %v9043_v0  ;;  %v9046_v3 = vpop.f32.mrb[206].mxu0  ;;  %v8211_v40 = vrot.slane %v5654_v54, 9  ;;  %v5796_v4 = vsel %vm10798_vm10, %v5794_v7, %v5795_v51  ;;  %v8225_v17 = vcombine.low %v5779_v49, %v5782_v38 }
 0x382   : > { %v9047_v6 = vpop.f32.mrb[207].mxu0  ;;  %v6749_v16 = vadd.f32 %v11944_v10, %v11869_v12  ;;  %v5786_v42 = vsel %vm10798_vm10, %v8210_v24, %v12620_v57  ;;  %v11981_v7 = vadd.f32 %v11579_v23, %v11845_v31  ;;  %v11985_v12 = vadd.f32 %v11595_v30, %v11849_v15 }
 0x383   : > { %v8931_v5 = vpop.f32.mrb[172].mxu1  ;;  %v11963_v0 = vadd.f32 %v9047_v6, %v9046_v3  ;;  %v8226_v34 = vcombine.low %v5786_v42, %v5789_v28  ;;  %v5793_v54 = vsel %vm10798_vm10, %v8211_v40, %v5792_v1  ;;  %v5801_v38 = vrot.slane %v5799_v27, 4 }
 0x384   : > { %v8932_v18 = vpop.f32.mrb[173].mxu1  ;;  %9398 = vmatmul.mubr.bf16.gmra.mrb[12].mxu1 %v8224_v8  ;;  %v8227_v44 = vcombine.low %v5793_v54, %v5796_v4  ;;  %v5806_v24 = vrot.slane %v11969_v36, 5  ;;  %v6754_v1 = vadd.f32 %v11944_v10, %v11919_v39  ;;  %v11994_v23 = vadd.f32 %v11619_v62, %v11861_v61  ;;  %v12627_v42 = vld [vmem:[#allocation14_spill] sm:$0xff]  ;;  %v5660_v54 = vld [vmem:[#allocation3 + $0xa8] sm:$0xe] }
 0x385   : > { %v8933_v32 = vadd.f32 %v8932_v18, %v8931_v5  ;;  %v8934_v11 = vpop.f32.mrb[174].mxu1  ;;  %9401 = vmatprep.mubr.bf16.mxu1 %v8225_v17  ;;  %v11998_v30 = vadd.f32 %v11631_v47, %v11865_v53  ;;  %v12002_v31 = vadd.f32 %v11661_v59, %v11873_v50  ;;  %v6757_v15 = vadd.f32 %v11944_v10, %v8930_v21  ;;  %v12621_v50 = vld [vmem:[#allocation9_spill] sm:$0xff]  ;;  %v12624_v18 = vld [vmem:[#allocation11_spill] sm:$0xff] }
 0x386   : > { %v8935_v51 = vpop.f32.mrb[175].mxu1  ;;  %v12009_v39 = vadd.f32 %v11673_v63, %v11877_v41  ;;  %v12013_v62 = vadd.f32 %v11702_v20, %v11881_v52  ;;  %v12018_v59 = vadd.f32 %v11714_v58, %v11887_v13  ;;  %v12022_v53 = vadd.f32 %v11749_v46, %v11896_v26  ;;  %v5659_v13 = vld [vmem:[#allocation3 + $0xa4] sm:$0x1] }
 0x387   : > { %v8936_v3 = vadd.f32 %v8935_v51, %v8934_v11  ;;  %v9049_v43 = vpop.f32.mrb[208].mxu0  ;;  %v6762_v47 = vadd.f32 %v11944_v10, %v8933_v32  ;;  %v12026_v21 = vadd.f32 %v12621_v50, %v11910_v60  ;;  %v12033_v52 = vadd.f32 %v11779_v19, %v11917_v22  ;;  %v12622_v19 = vld [vmem:[#allocation15_spill] sm:$0xff]  ;;  %v12623_v22 = vld [vmem:[#allocation10_spill] sm:$0xff] }
 0x388   : > { %v9050_v49 = vpop.f32.mrb[209].mxu0  ;;  %v12037_v58 = vadd.f32 %v11788_v25, %v11923_v37  ;;  %v12041_v26 = vadd.f32 %v11809_v2, %v11927_v56  ;;  %v12045_v60 = vadd.f32 %v11817_v14, %v11931_v9  ;;  %v12049_v5 = vadd.f32 %v11825_v29, %v11937_v45  ;;  %v5657_v25 = vld [vmem:[#allocation3 + $0x9c] sm:$0xe]  ;;  %v5662_v37 = vld [vmem:[#allocation3 + $0xb0] sm:$0x1]  ;;  %v12625_v2 = vld [vmem:[#allocation12_spill] sm:$0xff] }
 0x389   : > { %v12005_v6 = vadd.f32 %v9050_v49, %v9049_v43  ;;  %v9052_v28 = vpop.f32.mrb[210].mxu0  ;;  %v6765_v63 = vadd.f32 %v11944_v10, %v8936_v3  ;;  %v12053_v8 = vadd.f32 %v12623_v22, %v12622_v19  ;;  %v12056_v17 = vadd.f32 %v12624_v18, %v6746_v55  ;;  %v12626_v14 = vld [vmem:[#allocation13_spill] sm:$0xff]  ;;  %v5664_v45 = vld [vmem:[#allocation3 + $0xb8] sm:$0xf]  ;;  %v5670_v22 = vld [vmem:[#allocation3 + $0xd0] sm:$0xf] }
 0x38a   : > { %v9053_v61 = vpop.f32.mrb[211].mxu0  ;;  %v12059_v56 = vadd.f32 %v12625_v2, %v6749_v16  ;;  %v12062_v9 = vadd.f32 %v12626_v14, %v6754_v1  ;;  %v5808_v29 = vrot.slane %v5806_v24, 4  ;;  %v12067_v32 = vadd.f32 %v12627_v42, %v6757_v15  ;;  %v5667_v16 = vld [vmem:[#allocation3 + $0xc4] sm:$0xf]  ;;  %v5668_v2 = vld [vmem:[#allocation3 + $0xc8] sm:$0x1] }
 0x38b   : > { %v8937_v41 = vpop.f32.mrb[176].mxu1  ;;  %v12029_v20 = vadd.f32 %v9053_v61, %v9052_v28  ;;  %v12070_v11 = vadd.f32 %v11952_v33, %v6762_v47  ;;  %v5802_v55 = vrot.slane %v5659_v13, 5  ;;  %v8212_v43 = vrot.slane %v5657_v25, 9  ;;  %v5669_v42 = vld [vmem:[#allocation3 + $0xcc] sm:$0xe] }
 0x38c   : > { %v8938_v46 = vpop.f32.mrb[177].mxu1  ;;  %9402 = vmatmul.mubr.bf16.gmra.mrb[16].mxu1 %v8226_v34  ;;  %v5809_v1 = vrot.slane %v5662_v37, 5  ;;  %v5813_v28 = vrot.slane %v5664_v45, 5  ;;  %v12077_v50 = vadd.f32 %v11963_v0, %v6765_v63  ;;  %v8213_v33 = vrot.slane %v5660_v54, 9  ;;  %v5665_v63 = vld [vmem:[#allocation3 + $0xbc] sm:$0x1] }
 0x38d   : > { %v8939_v40 = vadd.f32 %v8938_v46, %v8937_v41  ;;  %v8940_v4 = vpop.f32.mrb[178].mxu1  ;;  %9405 = vmatprep.mubr.bf16.mxu1 %v8227_v44  ;;  %v5803_v49 = vsel %vm10798_vm10, %v5801_v38, %v5802_v55  ;;  %v5820_v47 = vrot.slane %v5667_v16, 5  ;;  %v5800_v13 = vsel %vm10798_vm10, %v8212_v43, %v5799_v27  ;;  %v5671_v43 = vld [vmem:[#allocation3 + $0xd4] sm:$0x1] }
 0x38e   : > { %v8941_v57 = vpop.f32.mrb[179].mxu1  ;;  %v5810_v44 = vsel %vm10798_vm10, %v5808_v29, %v5809_v1  ;;  %v8228_v19 = vcombine.low %v5800_v13, %v5803_v49  ;;  %v5807_v0 = vsel %vm10798_vm10, %v8213_v33, %v5806_v24  ;;  %v5815_v18 = vrot.slane %v5813_v28, 4  ;;  %v5666_v29 = vld [vmem:[#allocation3 + $0xc0] sm:$0xe] }
 0x38f   : > { %v8942_v51 = vadd.f32 %v8941_v57, %v8940_v4  ;;  %v9055_v3 = vpop.f32.mrb[212].mxu0  ;;  %v8229_v37 = vcombine.low %v5807_v0, %v5810_v44  ;;  %v5663_v4 = vld [vmem:[#allocation3 + $0xb4] sm:$0xe]  ;;  %v6770_v48 = vadd.f32 %v11944_v10, %v8939_v40  ;;  %v5822_v45 = vrot.slane %v5820_v47, 4 }
 0x390   : > { %v9056_v34 = vpop.f32.mrb[213].mxu0  ;;  %v5816_v36 = vrot.slane %v5665_v63, 5  ;;  %v5827_v55 = vrot.slane %v5670_v22, 5  ;;  %v8214_v16 = vrot.slane %v5663_v4, 9  ;;  %v5830_v63 = vrot.slane %v5671_v43, 5 }
 0x391   : > { %v12074_v61 = vadd.f32 %v9056_v34, %v9055_v3  ;;  %v9058_v15 = vpop.f32.mrb[214].mxu0  ;;  %v5823_v3 = vrot.slane %v5668_v2, 5  ;;  %v6773_v40 = vadd.f32 %v11944_v10, %v8942_v51  ;;  %v12098_v33 = vadd.f32 %v12005_v6, %v6770_v48 }
 0x392   : > { %v9059_v41 = vpop.f32.mrb[215].mxu0  ;;  %v5817_v34 = vsel %vm10798_vm10, %v5815_v18, %v5816_v36  ;;  %v5814_v44 = vsel %vm10798_vm10, %v8214_v16, %v5813_v28  ;;  %v5829_v0 = vrot.slane %v5827_v55, 4 }
 0x393   : > { %v8943_v46 = vpop.f32.mrb[180].mxu1  ;;  %v12085_v38 = vadd.f32 %v9059_v41, %v9058_v15  ;;  %v8215_v41 = vrot.slane %v5666_v29, 9  ;;  %v5824_v13 = vsel %vm10798_vm10, %v5822_v45, %v5823_v3  ;;  %v8230_v51 = vcombine.low %v5814_v44, %v5817_v34 }
 0x394   : > { %v8944_v25 = vpop.f32.mrb[181].mxu1  ;;  %9406 = vmatmul.mubr.bf16.gmra.mrb[20].mxu1 %v8228_v19  ;;  %v8216_v19 = vrot.slane %v5669_v42, 9  ;;  %v12107_v28 = vadd.f32 %v12029_v20, %v6773_v40  ;;  %v5831_v29 = vsel %vm10798_vm10, %v5829_v0, %v5830_v63 }
 0x395   : > { %v8945_v14 = vadd.f32 %v8944_v25, %v8943_v46  ;;  %v8946_v27 = vpop.f32.mrb[182].mxu1  ;;  %9409 = vmatprep.mubr.bf16.mxu1 %v8229_v37  ;;  %v5821_v37 = vsel %vm10798_vm10, %v8215_v41, %v5820_v47 }
 0x396   : > { %v8947_v57 = vpop.f32.mrb[183].mxu1  ;;  %v8231_v6 = vcombine.low %v5821_v37, %v5824_v13 }
 0x397   : > { %v8948_v24 = vadd.f32 %v8947_v57, %v8946_v27  ;;  %v9061_v54 = vpop.f32.mrb[216].mxu0  ;;  %v5828_v27 = vsel %vm10798_vm10, %v8216_v19, %v5827_v55  ;;  %v6778_v47 = vadd.f32 %v11944_v10, %v8945_v14 }
 0x398   : > { %v9062_v1 = vpop.f32.mrb[217].mxu0  ;;  %v8232_v16 = vcombine.low %v5828_v27, %v5831_v29 }
 0x399   : > { %v12095_v49 = vadd.f32 %v9062_v1, %v9061_v54  ;;  %v9064_v15 = vpop.f32.mrb[218].mxu0  ;;  %v6781_v1 = vadd.f32 %v11944_v10, %v8948_v24  ;;  %v12118_v55 = vadd.f32 %v12074_v61, %v6778_v47 }
 0x39a   : > { %v9065_v46 = vpop.f32.mrb[219].mxu0 }
 0x39b   : > { %v8949_v22 = vpop.f32.mrb[184].mxu1  ;;  %v9066_v25 = vadd.f32 %v9065_v46, %v9064_v15  ;;  %v12121_v13 = vadd.f32 %v12085_v38, %v6781_v1 }
 0x39c   : > { %v8950_v4 = vpop.f32.mrb[185].mxu1  ;;  %9410 = vmatmul.mubr.bf16.gmra.mrb[24].mxu1 %v8230_v51 }
 0x39d   : > { %v8951_v18 = vadd.f32 %v8950_v4, %v8949_v22  ;;  %v8952_v2 = vpop.f32.mrb[186].mxu1  ;;  %9413 = vmatprep.mubr.bf16.mxu1 %v8231_v6  ;;  %v12628_v6 = vld [vmem:[#allocation7_spill] sm:$0xff] }
 0x39e   : > { %v8953_v48 = vpop.f32.mrb[187].mxu1 }
 0x39f   : > { %v8954_v45 = vadd.f32 %v8953_v48, %v8952_v2  ;;  %v9067_v57 = vpop.f32.mrb[220].mxu0  ;;  %v6786_v61 = vadd.f32 %v11944_v10, %v8951_v18 }
 0x3a0   : > { %v9068_v36 = vpop.f32.mrb[221].mxu0 }
 0x3a1   : > { %v9069_v42 = vadd.f32 %v9068_v36, %v9067_v57  ;;  %v9070_v54 = vpop.f32.mrb[222].mxu0  ;;  %v6789_v38 = vadd.f32 %v11944_v10, %v8954_v45  ;;  %v12629_v57 = vld [vmem:[#allocation8_spill] sm:$0xff] }
 0x3a2   : > { %v9071_v3 = vpop.f32.mrb[223].mxu0 }
 0x3a3   : > { %v8955_v20 = vpop.f32.mrb[188].mxu1  ;;  %v12114_v43 = vadd.f32 %v9071_v3, %v9070_v54 }
 0x3a4   : > { %v8956_v34 = vpop.f32.mrb[189].mxu1  ;;  %9414 = vmatmul.mubr.bf16.gmra.mrb[28].mxu1 %v8232_v16  ;;  %v12130_v16 = vadd.f32 %v12095_v49, %v6786_v61 }
 0x3a5   : > { %v8957_v35 = vadd.f32 %v8956_v34, %v8955_v20  ;;  %v8958_v40 = vpop.f32.mrb[190].mxu1 }
 0x3a6   : > { %v8959_v15 = vpop.f32.mrb[191].mxu1 }
 0x3a7   : > { %v8960_v44 = vadd.f32 %v8959_v15, %v8958_v40  ;;  %v9201_v14 = vpop.f32.mrb[224].mxu0  ;;  %v6794_v34 = vadd.f32 %v11944_v10, %v8957_v35 }
 0x3a8   : > { %v9202_v41 = vpop.f32.mrb[225].mxu0 }
 0x3a9   : > { %v12123_v46 = vadd.f32 %v9202_v41, %v9201_v14  ;;  %v9204_v19 = vpop.f32.mrb[226].mxu0  ;;  %v12133_v14 = vadd.f32 %v9066_v25, %v6789_v38 }
 0x3aa   : > { %v9205_v0 = vpop.f32.mrb[227].mxu0 }
 0x3ab   : > { %v9089_v63 = vpop.f32.mrb[192].mxu1  ;;  %v9206_v24 = vadd.f32 %v9205_v0, %v9204_v19 }
 0x3ac   : > { %v9090_v22 = vpop.f32.mrb[193].mxu1 }
 0x3ad   : > { %v9091_v51 = vadd.f32 %v9090_v22, %v9089_v63  ;;  %v9092_v37 = vpop.f32.mrb[194].mxu1 }
 0x3ae   : > { %v9093_v4 = vpop.f32.mrb[195].mxu1 }
 0x3af   : > { %v6996_v2 = vadd.f32 %v9091_v51, %v12628_v6  ;;  %v9094_v48 = vadd.f32 %v9093_v4, %v9092_v37  ;;  %v9207_v27 = vpop.f32.mrb[228].mxu0  ;;  %v12137_v51 = vadd.f32 %v9069_v42, %v6794_v34 }
 0x3b0   : > { %v9208_v29 = vpop.f32.mrb[229].mxu0 }
 0x3b1   : > { %v6999_v47 = vadd.f32 %v9094_v48, %v12629_v57  ;;  %v9209_v36 = vadd.f32 %v9208_v29, %v9207_v27  ;;  %v9210_v54 = vpop.f32.mrb[230].mxu0  ;;  %v6797_v29 = vadd.f32 %v11944_v10, %v8960_v44 }
 0x3b2   : > { %v9211_v3 = vpop.f32.mrb[231].mxu0 }
 0x3b3   : > { %v9095_v20 = vpop.f32.mrb[196].mxu1  ;;  %v9212_v18 = vadd.f32 %v9211_v3, %v9210_v54 }
 0x3b4   : > { %v9096_v1 = vpop.f32.mrb[197].mxu1 }
 0x3b5   : > { %v9097_v40 = vadd.f32 %v9096_v1, %v9095_v20  ;;  %v9098_v15 = vpop.f32.mrb[198].mxu1 }
 0x3b6   : > { %v9099_v41 = vpop.f32.mrb[199].mxu1 }
 0x3b7   : > { %v7004_v45 = vadd.f32 %v9097_v40, %v11981_v7  ;;  %v9100_v19 = vadd.f32 %v9099_v41, %v9098_v15  ;;  %v9213_v0 = vpop.f32.mrb[232].mxu0  ;;  %v12143_v40 = vadd.f32 %v12114_v43, %v6797_v29 }
 0x3b8   : > { %v9214_v63 = vpop.f32.mrb[233].mxu0 }
 0x3b9   : > { %v7007_v22 = vadd.f32 %v9100_v19, %v11985_v12  ;;  %v9215_v49 = vadd.f32 %v9214_v63, %v9213_v0  ;;  %v9216_v61 = vpop.f32.mrb[234].mxu0  ;;  %v12146_v63 = vadd.f32 %v9209_v36, %v7004_v45 }
 0x3ba   : > { %v9217_v37 = vpop.f32.mrb[235].mxu0 }
 0x3bb   : > { %v9101_v4 = vpop.f32.mrb[200].mxu1  ;;  %v9218_v6 = vadd.f32 %v9217_v37, %v9216_v61  ;;  %v12151_v37 = vadd.f32 %v9212_v18, %v7007_v22 }
 0x3bc   : > { %v9102_v35 = vpop.f32.mrb[201].mxu1 }
 0x3bd   : > { %v9103_v48 = vadd.f32 %v9102_v35, %v9101_v4  ;;  %v9104_v27 = vpop.f32.mrb[202].mxu1  ;;  %v12153_v4 = vadd.f32 %v9206_v24, %v6999_v47 }
 0x3be   : > { %v9105_v25 = vpop.f32.mrb[203].mxu1 }
 0x3bf   : > { %v7012_v7 = vadd.f32 %v9103_v48, %v11994_v23  ;;  %v9106_v38 = vadd.f32 %v9105_v25, %v9104_v27  ;;  %v9219_v57 = vpop.f32.mrb[236].mxu0 }
 0x3c0   : > { %v9220_v54 = vpop.f32.mrb[237].mxu0 }
 0x3c1   : > { %v7015_v12 = vadd.f32 %v9106_v38, %v11998_v30  ;;  %v9221_v3 = vadd.f32 %v9220_v54, %v9219_v57  ;;  %v9222_v20 = vpop.f32.mrb[238].mxu0  ;;  %v12149_v30 = vadd.f32 %v12123_v46, %v6996_v2 }
 0x3c2   : > { %v9223_v42 = vpop.f32.mrb[239].mxu0 }
 0x3c3   : > { %v9107_v1 = vpop.f32.mrb[204].mxu1  ;;  %v9224_v34 = vadd.f32 %v9223_v42, %v9222_v20  ;;  %v12162_v18 = vadd.f32 %v9218_v6, %v7015_v12 }
 0x3c4   : > { %v9108_v15 = vpop.f32.mrb[205].mxu1 }
 0x3c5   : > { %v9109_v41 = vadd.f32 %v9108_v15, %v9107_v1  ;;  %v9110_v19 = vpop.f32.mrb[206].mxu1 }
 0x3c6   : > { %v9111_v0 = vpop.f32.mrb[207].mxu1 }
 0x3c7   : > { %v7020_v10 = vadd.f32 %v9109_v41, %v12002_v31  ;;  %v9112_v23 = vadd.f32 %v9111_v0, %v9110_v19  ;;  %v9225_v44 = vpop.f32.mrb[240].mxu0  ;;  %v12158_v31 = vadd.f32 %v9215_v49, %v7012_v7 }
 0x3c8   : > { %v9226_v61 = vpop.f32.mrb[241].mxu0 }
 0x3c9   : > { %v7023_v43 = vadd.f32 %v9112_v23, %v12009_v39  ;;  %v9227_v35 = vadd.f32 %v9226_v61, %v9225_v44  ;;  %v9228_v48 = vpop.f32.mrb[242].mxu0  ;;  %v12156_v27 = vadd.f32 %v9221_v3, %v7020_v10 }
 0x3ca   : > { %v9229_v25 = vpop.f32.mrb[243].mxu0 }
 0x3cb   : > { %v9113_v29 = vpop.f32.mrb[208].mxu1  ;;  %v9230_v36 = vadd.f32 %v9229_v25, %v9228_v48  ;;  %v12160_v2 = vadd.f32 %v9224_v34, %v7023_v43 }
 0x3cc   : > { %v9114_v45 = vpop.f32.mrb[209].mxu1 }
 0x3cd   : > { %v9115_v38 = vadd.f32 %v9114_v45, %v9113_v29  ;;  %v9116_v46 = vpop.f32.mrb[210].mxu1 }
 0x3ce   : > { %v9117_v24 = vpop.f32.mrb[211].mxu1 }
 0x3cf   : > { %v7028_v47 = vadd.f32 %v9115_v38, %v12013_v62  ;;  %v9118_v39 = vadd.f32 %v9117_v24, %v9116_v46  ;;  %v9231_v22 = vpop.f32.mrb[244].mxu0 }
 0x3d0   : > { %v9232_v57 = vpop.f32.mrb[245].mxu0 }
 0x3d1   : > { %v7031_v54 = vadd.f32 %v9118_v39, %v12018_v59  ;;  %v9233_v3 = vadd.f32 %v9232_v57, %v9231_v22  ;;  %v9234_v49 = vpop.f32.mrb[246].mxu0  ;;  %v12166_v20 = vadd.f32 %v9227_v35, %v7028_v47 }
 0x3d2   : > { %v9235_v7 = vpop.f32.mrb[247].mxu0 }
 0x3d3   : > { %v9119_v42 = vpop.f32.mrb[212].mxu1  ;;  %v9236_v1 = vadd.f32 %v9235_v7, %v9234_v49  ;;  %v12168_v6 = vadd.f32 %v9230_v36, %v7031_v54 }
 0x3d4   : > { %v9120_v15 = vpop.f32.mrb[213].mxu1 }
 0x3d5   : > { %v9121_v34 = vadd.f32 %v9120_v15, %v9119_v42  ;;  %v9122_v41 = vpop.f32.mrb[214].mxu1 }
 0x3d6   : > { %v9123_v12 = vpop.f32.mrb[215].mxu1 }
 0x3d7   : > { %v7036_v62 = vadd.f32 %v9121_v34, %v12022_v53  ;;  %v9124_v19 = vadd.f32 %v9123_v12, %v9122_v41  ;;  %v9237_v0 = vpop.f32.mrb[248].mxu0 }
 0x3d8   : > { %v9238_v10 = vpop.f32.mrb[249].mxu0 }
 0x3d9   : > { %v7039_v59 = vadd.f32 %v9124_v19, %v12026_v21  ;;  %v9239_v23 = vadd.f32 %v9238_v10, %v9237_v0  ;;  %v9240_v44 = vpop.f32.mrb[250].mxu0  ;;  %v12172_v61 = vadd.f32 %v9233_v3, %v7036_v62 }
 0x3da   : > { %v9241_v43 = vpop.f32.mrb[251].mxu0 }
 0x3db   : > { %v9125_v35 = vpop.f32.mrb[216].mxu1  ;;  %v9242_v48 = vadd.f32 %v9241_v43, %v9240_v44  ;;  %v12174_v25 = vadd.f32 %v9236_v1, %v7039_v59 }
 0x3dc   : > { %v9126_v29 = vpop.f32.mrb[217].mxu1 }
 0x3dd   : > { %v9127_v36 = vadd.f32 %v9126_v29, %v9125_v35  ;;  %v9128_v45 = vpop.f32.mrb[218].mxu1 }
 0x3de   : > { %v9129_v38 = vpop.f32.mrb[219].mxu1 }
 0x3df   : > { %v7044_v53 = vadd.f32 %v9127_v36, %v12033_v52  ;;  %v9130_v46 = vadd.f32 %v9129_v38, %v9128_v45  ;;  %v9243_v24 = vpop.f32.mrb[252].mxu0 }
 0x3e0   : > { %v9244_v47 = vpop.f32.mrb[253].mxu0 }
 0x3e1   : > { %v7047_v21 = vadd.f32 %v9130_v46, %v12037_v58  ;;  %v9245_v39 = vadd.f32 %v9244_v47, %v9243_v24  ;;  %v9246_v22 = vpop.f32.mrb[254].mxu0  ;;  %v12178_v57 = vadd.f32 %v9239_v23, %v7044_v53 }
 0x3e2   : > { %v9247_v54 = vpop.f32.mrb[255].mxu0 }
 0x3e3   : > { %v9131_v3 = vpop.f32.mrb[220].mxu1  ;;  %v9248_v49 = vadd.f32 %v9247_v54, %v9246_v22  ;;  %v12180_v7 = vadd.f32 %v9242_v48, %v7047_v21 }
 0x3e4   : > { %v9132_v42 = vpop.f32.mrb[221].mxu1 }
 0x3e5   : > { %v9133_v1 = vadd.f32 %v9132_v42, %v9131_v3  ;;  %v9134_v15 = vpop.f32.mrb[222].mxu1 }
 0x3e6   : > { %v9135_v34 = vpop.f32.mrb[223].mxu1 }
 0x3e7   : > { %v7052_v52 = vadd.f32 %v9133_v1, %v12041_v26  ;;  %v9136_v41 = vadd.f32 %v9135_v34, %v9134_v15  ;;  %v9249_v12 = vpop.f32.mrb[0].mxu0 }
 0x3e8   : > { %v9250_v62 = vpop.f32.mrb[1].mxu0 }
 0x3e9   : > { %v7055_v58 = vadd.f32 %v9136_v41, %v12045_v60  ;;  %v9251_v19 = vadd.f32 %v9250_v62, %v9249_v12  ;;  %v9252_v0 = vpop.f32.mrb[2].mxu0  ;;  %v12184_v10 = vadd.f32 %v9245_v39, %v7052_v52 }
 0x3ea   : > { %v9253_v59 = vpop.f32.mrb[3].mxu0 }
 0x3eb   : > { %v9254_v23 = vadd.f32 %v9253_v59, %v9252_v0  ;;  %v12186_v44 = vadd.f32 %v9248_v49, %v7055_v58 }
 0x3ed   : > { %v9137_v43 = vpop.f32.mrb[224].mxu1 }
 0x3ee   : > { %v9138_v35 = vpop.f32.mrb[225].mxu1 }
 0x3ef   : > { %v9139_v48 = vadd.f32 %v9138_v35, %v9137_v43  ;;  %v9140_v29 = vpop.f32.mrb[226].mxu1 }
 0x3f0   : > { %v9141_v36 = vpop.f32.mrb[227].mxu1  ;;  %v9255_v45 = vpop.f32.mrb[4].mxu0 }
 0x3f1   : > { %v7060_v26 = vadd.f32 %v9139_v48, %v12049_v5  ;;  %v9142_v38 = vadd.f32 %v9141_v36, %v9140_v29  ;;  %v9256_v53 = vpop.f32.mrb[5].mxu0 }
 0x3f2   : > { %v9257_v46 = vadd.f32 %v9256_v53, %v9255_v45  ;;  %v9258_v60 = vpop.f32.mrb[6].mxu0 }
 0x3f3   : > { %v7063_v24 = vadd.f32 %v9142_v38, %v12053_v8  ;;  %v9259_v47 = vpop.f32.mrb[7].mxu0  ;;  %v12190_v21 = vadd.f32 %v9251_v19, %v7060_v26 }
 0x3f4   : > { %v9260_v39 = vadd.f32 %v9259_v47, %v9258_v60 }
 0x3f5   : > { %v9143_v22 = vpop.f32.mrb[228].mxu1  ;;  %v12192_v54 = vadd.f32 %v9254_v23, %v7063_v24 }
 0x3f6   : > { %v9144_v3 = vpop.f32.mrb[229].mxu1 }
 0x3f7   : > { %v9145_v49 = vadd.f32 %v9144_v3, %v9143_v22  ;;  %v9146_v42 = vpop.f32.mrb[230].mxu1 }
 0x3f8   : > { %v9147_v1 = vpop.f32.mrb[231].mxu1 }
 0x3f9   : > { %v7068_v15 = vadd.f32 %v9145_v49, %v12056_v17  ;;  %v9148_v5 = vadd.f32 %v9147_v1, %v9146_v42 }
 0x3fa   : > { %v9261_v34 = vpop.f32.mrb[8].mxu0 }
 0x3fb   : > { %v7071_v52 = vadd.f32 %v9148_v5, %v12059_v56  ;;  %v9262_v41 = vpop.f32.mrb[9].mxu0  ;;  %v12196_v12 = vadd.f32 %v9257_v46, %v7068_v15 }
 0x3fc   : > { %v9263_v8 = vadd.f32 %v9262_v41, %v9261_v34  ;;  %v9264_v62 = vpop.f32.mrb[10].mxu0 }
 0x3fd   : > { %v9265_v58 = vpop.f32.mrb[11].mxu0  ;;  %v12198_v19 = vadd.f32 %v9260_v39, %v7071_v52 }
 0x3fe   : > { %v9266_v0 = vadd.f32 %v9265_v58, %v9264_v62 }
 0x400   : > { %v9149_v59 = vpop.f32.mrb[232].mxu1 }
 0x401   : > { %v9150_v23 = vpop.f32.mrb[233].mxu1 }
 0x402   : > { %v9151_v43 = vadd.f32 %v9150_v23, %v9149_v59  ;;  %v9152_v35 = vpop.f32.mrb[234].mxu1 }
 0x403   : > { %v9153_v48 = vpop.f32.mrb[235].mxu1 }
 0x404   : > { %v7076_v17 = vadd.f32 %v9151_v43, %v12062_v9  ;;  %v9154_v29 = vadd.f32 %v9153_v48, %v9152_v35 }
 0x405   : > { %v9267_v36 = vpop.f32.mrb[12].mxu0 }
 0x406   : > { %v7079_v56 = vadd.f32 %v9154_v29, %v12067_v32  ;;  %v9268_v45 = vpop.f32.mrb[13].mxu0  ;;  %v12202_v26 = vadd.f32 %v9263_v8, %v7076_v17 }
 0x407   : > { %v9269_v38 = vadd.f32 %v9268_v45, %v9267_v36  ;;  %v9270_v53 = vpop.f32.mrb[14].mxu0 }
 0x408   : > { %v9271_v46 = vpop.f32.mrb[15].mxu0  ;;  %v12204_v60 = vadd.f32 %v9266_v0, %v7079_v56 }
 0x409   : > { %v9272_v24 = vadd.f32 %v9271_v46, %v9270_v53 }
 0x40d   : > { %v9155_v47 = vpop.f32.mrb[236].mxu1 }
 0x40e   : > { %v9156_v39 = vpop.f32.mrb[237].mxu1 }
 0x40f   : > { %v9157_v22 = vadd.f32 %v9156_v39, %v9155_v47  ;;  %v9158_v3 = vpop.f32.mrb[238].mxu1 }
 0x410   : > { %v9159_v49 = vpop.f32.mrb[239].mxu1  ;;  %v9273_v42 = vpop.f32.mrb[16].mxu0 }
 0x411   : > { %v7084_v9 = vadd.f32 %v9157_v22, %v12070_v11  ;;  %v9160_v1 = vadd.f32 %v9159_v49, %v9158_v3  ;;  %v9274_v15 = vpop.f32.mrb[17].mxu0 }
 0x412   : > { %v9275_v32 = vadd.f32 %v9274_v15, %v9273_v42  ;;  %v9276_v5 = vpop.f32.mrb[18].mxu0 }
 0x413   : > { %v7087_v34 = vadd.f32 %v9160_v1, %v12077_v50  ;;  %v9277_v52 = vpop.f32.mrb[19].mxu0  ;;  %v12208_v41 = vadd.f32 %v9269_v38, %v7084_v9 }
 0x414   : > { %v9278_v8 = vadd.f32 %v9277_v52, %v9276_v5 }
 0x415   : > { %v12210_v62 = vadd.f32 %v9272_v24, %v7087_v34 }
 0x418   : > { %v9161_v58 = vpop.f32.mrb[240].mxu1 }
 0x419   : > { %v9162_v0 = vpop.f32.mrb[241].mxu1 }
 0x41a   : > { %v9163_v59 = vadd.f32 %v9162_v0, %v9161_v58  ;;  %v9164_v23 = vpop.f32.mrb[242].mxu1 }
 0x41b   : > { %v9165_v43 = vpop.f32.mrb[243].mxu1 }
 0x41c   : > { %v7092_v35 = vadd.f32 %v9163_v59, %v12098_v33  ;;  %v9166_v11 = vadd.f32 %v9165_v43, %v9164_v23  ;;  %v9279_v48 = vpop.f32.mrb[20].mxu0 }
 0x41d   : > { %v9280_v17 = vpop.f32.mrb[21].mxu0 }
 0x41e   : > { %v7095_v29 = vadd.f32 %v9166_v11, %v12107_v28  ;;  %v9281_v36 = vadd.f32 %v9280_v17, %v9279_v48  ;;  %v9282_v50 = vpop.f32.mrb[22].mxu0  ;;  %v12214_v56 = vadd.f32 %v9275_v32, %v7092_v35 }
 0x41f   : > { %v9283_v45 = vpop.f32.mrb[23].mxu0 }
 0x420   : > { %v9284_v38 = vadd.f32 %v9283_v45, %v9282_v50  ;;  %v12216_v53 = vadd.f32 %v9278_v8, %v7095_v29 }
 0x423   : > { %v9167_v46 = vpop.f32.mrb[244].mxu1 }
 0x424   : > { %v9168_v24 = vpop.f32.mrb[245].mxu1 }
 0x425   : > { %v9169_v47 = vadd.f32 %v9168_v24, %v9167_v46  ;;  %v9170_v39 = vpop.f32.mrb[246].mxu1 }
 0x426   : > { %v9171_v22 = vpop.f32.mrb[247].mxu1 }
 0x427   : > { %v7100_v33 = vadd.f32 %v9169_v47, %v12118_v55  ;;  %v9172_v3 = vadd.f32 %v9171_v22, %v9170_v39  ;;  %v9285_v49 = vpop.f32.mrb[24].mxu0 }
 0x428   : > { %v9286_v42 = vpop.f32.mrb[25].mxu0 }
 0x429   : > { %v7103_v28 = vadd.f32 %v9172_v3, %v12121_v13  ;;  %v9287_v9 = vadd.f32 %v9286_v42, %v9285_v49  ;;  %v9288_v1 = vpop.f32.mrb[26].mxu0  ;;  %v12220_v15 = vadd.f32 %v9281_v36, %v7100_v33 }
 0x42a   : > { %v9289_v32 = vpop.f32.mrb[27].mxu0 }
 0x42b   : > { %v9290_v5 = vadd.f32 %v9289_v32, %v9288_v1  ;;  %v12222_v34 = vadd.f32 %v9284_v38, %v7103_v28 }
 0x42f   : > { %v9173_v52 = vpop.f32.mrb[248].mxu1 }
 0x430   : > { %v9174_v8 = vpop.f32.mrb[249].mxu1 }
 0x431   : > { %v9175_v58 = vadd.f32 %v9174_v8, %v9173_v52  ;;  %v9176_v0 = vpop.f32.mrb[250].mxu1 }
 0x432   : > { %v9177_v59 = vpop.f32.mrb[251].mxu1 }
 0x433   : > { %v7108_v55 = vadd.f32 %v9175_v58, %v12130_v16  ;;  %v9178_v23 = vadd.f32 %v9177_v59, %v9176_v0 }
 0x435   : > { %v7111_v43 = vadd.f32 %v9178_v23, %v12133_v14  ;;  %v12226_v35 = vadd.f32 %v9287_v9, %v7108_v55 }
 0x437   : > { %v9179_v13 = vpop.f32.mrb[252].mxu1  ;;  %v12228_v11 = vadd.f32 %v9290_v5, %v7111_v43 }
 0x438   : > { %v9180_v48 = vpop.f32.mrb[253].mxu1 }
 0x439   : > { %v9181_v17 = vadd.f32 %v9180_v48, %v9179_v13  ;;  %v9182_v29 = vpop.f32.mrb[254].mxu1 }
 0x43a   : > { %v9183_v36 = vpop.f32.mrb[255].mxu1 }
 0x43b   : > { %v7116_v50 = vadd.f32 %v9181_v17, %v12137_v51  ;;  %v9184_v45 = vadd.f32 %v9183_v36, %v9182_v29 }
 0x43d   : > { %v7119_v38 = vadd.f32 %v9184_v45, %v12143_v40 }
 0x43f   : > { %v9387_v46 = vpop.f32.mrb[0].mxu1 }
 0x440   : > { %v12233_v16 = vadd.f32 %v9387_v46, %v12146_v63  ;;  %v7317_v24 = vpop.f32.mrb[1].mxu1  ;;  %v9291_v14 = vpop.f32.mrb[28].mxu0 }
 0x441   : > { %v12236_v47 = vadd.f32 %v7317_v24, %v12149_v30  ;;  %v9388_v39 = vpop.f32.mrb[2].mxu1  ;;  %v9292_v22 = vpop.f32.mrb[29].mxu0 }
 0x442   : > { %v12239_v33 = vadd.f32 %v9388_v39, %v12151_v37  ;;  %v7320_v3 = vpop.f32.mrb[3].mxu1  ;;  %v9293_v49 = vadd.f32 %v9292_v22, %v9291_v14  ;;  %v9294_v51 = vpop.f32.mrb[30].mxu0 }
 0x443   : > { %v12242_v42 = vadd.f32 %v7320_v3, %v12153_v4  ;;  %v9295_v40 = vpop.f32.mrb[31].mxu0 }
 0x444   : > { %v9296_v28 = vadd.f32 %v9295_v40, %v9294_v51  ;;  %v12246_v9 = vadd.f32 %v9293_v49, %v7116_v50 }
 0x445   : > { %v7444_v63 = vadd.f32 %v12242_v42, %v12236_v47 }
 0x446   : > { %v12249_v32 = vadd.f32 %v9296_v28, %v7119_v38 }
 0x447   : > { %v7445_v30 = vadd.f32 %v7444_v63, %v12233_v16  ;;  %v9391_v1 = vpop.f32.mrb[4].mxu1 }
 0x448   : > { %v12252_v37 = vadd.f32 %v9391_v1, %v12156_v27  ;;  %v7333_v5 = vpop.f32.mrb[5].mxu1 }
 0x449   : > { %v12255_v52 = vadd.f32 %v7333_v5, %v12158_v31  ;;  %v7446_v4 = vadd.f32 %v7445_v30, %v12239_v33  ;;  %v9392_v8 = vpop.f32.mrb[6].mxu1 }
 0x44a   : > { %v12259_v58 = vadd.f32 %v9392_v8, %v12160_v2  ;;  %v7336_v0 = vpop.f32.mrb[7].mxu1 }
 0x44b   : > { %v7447_v59 = vadd.f32 %v7446_v4, %v12255_v52  ;;  %v12263_v55 = vadd.f32 %v7336_v0, %v12162_v18 }
 0x44d   : > { %v7448_v23 = vadd.f32 %v7447_v59, %v12263_v55 }
 0x44f   : > { %v7449_v27 = vadd.f32 %v7448_v23, %v12252_v37  ;;  %v9395_v43 = vpop.f32.mrb[8].mxu1 }
 0x450   : > { %v12268_v31 = vadd.f32 %v9395_v43, %v12172_v61  ;;  %v7349_v13 = vpop.f32.mrb[9].mxu1 }
 0x451   : > { %v12271_v48 = vadd.f32 %v7349_v13, %v12166_v20  ;;  %v7450_v2 = vadd.f32 %v7449_v27, %v12259_v58  ;;  %v9396_v17 = vpop.f32.mrb[10].mxu1 }
 0x452   : > { %v12275_v29 = vadd.f32 %v9396_v17, %v12174_v25  ;;  %v7352_v18 = vpop.f32.mrb[11].mxu1 }
 0x453   : > { %v7451_v36 = vadd.f32 %v7450_v2, %v12271_v48  ;;  %v12279_v50 = vadd.f32 %v7352_v18, %v12168_v6 }
 0x455   : > { %v7452_v45 = vadd.f32 %v7451_v36, %v12279_v50 }
 0x457   : > { %v7453_v61 = vadd.f32 %v7452_v45, %v12268_v31  ;;  %v9399_v38 = vpop.f32.mrb[12].mxu1 }
 0x458   : > { %v12284_v20 = vadd.f32 %v9399_v38, %v12184_v10  ;;  %v7365_v46 = vpop.f32.mrb[13].mxu1 }
 0x459   : > { %v12287_v24 = vadd.f32 %v7365_v46, %v12178_v57  ;;  %v7454_v25 = vadd.f32 %v7453_v61, %v12275_v29  ;;  %v9400_v14 = vpop.f32.mrb[14].mxu1 }
 0x45a   : > { %v12291_v39 = vadd.f32 %v9400_v14, %v12186_v44  ;;  %v7368_v6 = vpop.f32.mrb[15].mxu1 }
 0x45b   : > { %v7455_v22 = vadd.f32 %v7454_v25, %v12287_v24  ;;  %v12295_v3 = vadd.f32 %v7368_v6, %v12180_v7 }
 0x45d   : > { %v7456_v49 = vadd.f32 %v7455_v22, %v12295_v3 }
 0x45f   : > { %v7457_v10 = vadd.f32 %v7456_v49, %v12284_v20  ;;  %v9403_v51 = vpop.f32.mrb[16].mxu1 }
 0x460   : > { %v12300_v57 = vadd.f32 %v9403_v51, %v12196_v12  ;;  %v7381_v40 = vpop.f32.mrb[17].mxu1 }
 0x461   : > { %v12303_v28 = vadd.f32 %v7381_v40, %v12190_v21  ;;  %v7458_v44 = vadd.f32 %v7457_v10, %v12291_v39  ;;  %v9404_v63 = vpop.f32.mrb[18].mxu1 }
 0x462   : > { %v12307_v30 = vadd.f32 %v9404_v63, %v12198_v19  ;;  %v7384_v7 = vpop.f32.mrb[19].mxu1 }
 0x463   : > { %v7459_v1 = vadd.f32 %v7458_v44, %v12303_v28  ;;  %v12311_v5 = vadd.f32 %v7384_v7, %v12192_v54 }
 0x465   : > { %v7460_v4 = vadd.f32 %v7459_v1, %v12311_v5 }
 0x467   : > { %v7461_v12 = vadd.f32 %v7460_v4, %v12300_v57  ;;  %v9407_v8 = vpop.f32.mrb[20].mxu1 }
 0x468   : > { %v12316_v21 = vadd.f32 %v9407_v8, %v12208_v41  ;;  %v7397_v0 = vpop.f32.mrb[21].mxu1 }
 0x469   : > { %v12319_v59 = vadd.f32 %v7397_v0, %v12202_v26  ;;  %v7462_v19 = vadd.f32 %v7461_v12, %v12307_v30  ;;  %v9408_v23 = vpop.f32.mrb[22].mxu1 }
 0x46a   : > { %v12323_v27 = vadd.f32 %v9408_v23, %v12210_v62  ;;  %v7400_v54 = vpop.f32.mrb[23].mxu1  ;;  %v7488_v23 = vld [vmem:[%s12592_s6] sm:$0xff] }
 0x46b   : > { %v7463_v43 = vadd.f32 %v7462_v19, %v12319_v59  ;;  %v12327_v13 = vadd.f32 %v7400_v54, %v12204_v60 }
 0x46d   : > { %v7464_v2 = vadd.f32 %v7463_v43, %v12327_v13 }
 0x46f   : > { %v7465_v41 = vadd.f32 %v7464_v2, %v12316_v21  ;;  %v9411_v17 = vpop.f32.mrb[24].mxu1 }
 0x470   : > { %v12332_v26 = vadd.f32 %v9411_v17, %v12220_v15  ;;  %v7413_v18 = vpop.f32.mrb[25].mxu1 }
 0x471   : > { %v12335_v36 = vadd.f32 %v7413_v18, %v12214_v56  ;;  %v7466_v62 = vadd.f32 %v7465_v41, %v12323_v27  ;;  %v9412_v45 = vpop.f32.mrb[26].mxu1 }
 0x472   : > { %v12339_v61 = vadd.f32 %v9412_v45, %v12222_v34  ;;  %v7416_v60 = vpop.f32.mrb[27].mxu1 }
 0x473   : > { %v7467_v38 = vadd.f32 %v7466_v62, %v12335_v36  ;;  %v12343_v46 = vadd.f32 %v7416_v60, %v12216_v53 }
 0x475   : > { %v7468_v25 = vadd.f32 %v7467_v38, %v12343_v46 }
 0x477   : > { %v7469_v15 = vadd.f32 %v7468_v25, %v12332_v26  ;;  %v9415_v14 = vpop.f32.mrb[28].mxu1 }
 0x478   : > { %v12348_v56 = vadd.f32 %v9415_v14, %v12246_v9  ;;  %v7429_v6 = vpop.f32.mrb[29].mxu1 }
 0x479   : > { %v12351_v22 = vadd.f32 %v7429_v6, %v12226_v35  ;;  %v7470_v34 = vadd.f32 %v7469_v15, %v12339_v61  ;;  %v9416_v49 = vpop.f32.mrb[30].mxu1 }
 0x47a   : > { %v12355_v10 = vadd.f32 %v9416_v49, %v12249_v32  ;;  %v7432_v53 = vpop.f32.mrb[31].mxu1  ;;  %v7483_v32 = vld [vmem:[%s12591_s5] sm:$0xff] }
 0x47b   : > { %v7471_v51 = vadd.f32 %v7470_v34, %v12351_v22  ;;  %v12359_v40 = vadd.f32 %v7432_v53, %v12228_v11 }
 0x47d   : > { %v7472_v44 = vadd.f32 %v7471_v51, %v12359_v40 }
 0x47f   : > { %v7473_v9 = vadd.f32 %v7472_v44, %v12348_v56 }
 0x481   : > { %v7474_v63 = vadd.f32 %v7473_v9, %v12355_v10 }
 0x483   : > { %v7475_v35 = vrot.slane %v7474_v63, 4 }
 0x485   : > { %v7476_v7 = vadd.f32 %v7475_v35, %v7474_v63  ;;  %v8309_v63 = vld [vmem:[%s9905_s19 + $0x31] sm:$0xff]  ;;  %v8308_v35 = vld [vmem:[%s9905_s19 + $0x21] sm:$0xff] }
 0x487   : > { %v7477_v1 = vrot.slane %v7476_v7, 2 }
 0x489   : > { %v7478_v4 = vadd.f32 %v7477_v1, %v7476_v7  ;;  %v8312_v1 = vld [vmem:[%s9905_s19 + $0x51] sm:$0xff] }
 0x48b   : > { %v7479_v12 = vrot.slane %v7478_v4, 1 }
 0x48d   : > { %v7480_v8 = vadd.f32 %v7479_v12, %v7478_v4 }
 0x48f   : > { %v7482_v0 = vmul.f32 0.00390625, %v7480_v8 }
 0x491   : > { %v7484_v19 = vmul.f32 %v7483_v32, %v7482_v0 }
 0x493   : > { %7485 = vadd.xlane.f32.xlu0 %v7484_v19 }
 0x520   : > { %v7486_v11 = vpop.xlane.xlu0 %7485 }
 0x521   : > { %v7487_v54 = vmax.f32 %v7486_v11, 0.0  ;;  %v8319_v11 = vld [vmem:[%s9905_s19 + $0xa9] sm:$0xff] }
 0x523   : > { %v7489_v43 = vmul.f32 %v7488_v23, %v7487_v54 }
 0x525   : > { %v7490_v2 = vrot.slane %v7489_v43, 4 }
 0x527   : > { %v7491_v41 = vadd.f32 %v7490_v2, %v7489_v43 }
 0x529   : > { %v7492_v17 = vrot.slane %v7491_v41, 2 }
 0x52b   : > { %v7493_v18 = vadd.f32 %v7492_v17, %v7491_v41 }
 0x52d   : > { %v7494_v62 = vrot.slane %v7493_v18, 1 }
 0x52f   : > { %v7495_v45 = vadd.f32 %v7494_v62, %v7493_v18 }
 0x531   : > { %v8306_v60 = vmul.f32 -1.442695, %v7495_v45 }
 0x533   : > { %9652 = vpow2.f32 %v8306_v60  ;;  %v8330_v60 = vld [vmem:[%s9905_s19 + $0x129] sm:$0xff] }
 0x53d   : > { %v9653_v38 = vpop.eup %9652 }
 0x53e   : > { %v7499_v25 = vadd.f32 1.0, %v9653_v38 }
 0x540   : > { %9654 = vrcp.f32 %v7499_v25 }
 0x54a   : > { %v9655_v15 = vpop.eup %9654 }
 0x54b   : > { %v7534_v14 = vmul.f32 %v9655_v15, %v12236_v47  ;;  %v7535_v6 = vmul.f32 %v9655_v15, %v12242_v42  ;;  %v7536_v34 = vmul.f32 %v9655_v15, %v12233_v16  ;;  %v7537_v49 = vmul.f32 %v9655_v15, %v12239_v33 }
 0x54c   : > { %v7538_v53 = vmul.f32 %v9655_v15, %v12255_v52  ;;  %v7539_v51 = vmul.f32 %v9655_v15, %v12263_v55  ;;  %v7540_v44 = vmul.f32 %v9655_v15, %v12252_v37  ;;  %v7541_v9 = vmul.f32 %v9655_v15, %v12259_v58  ;;  %v8307_v52 = vld [vmem:[%s9905_s19 + $0x19] sm:$0xff] }
 0x54d   : > { %v7542_v47 = vmul.f32 %v9655_v15, %v12271_v48  ;;  %v7543_v42 = vmul.f32 %v9655_v15, %v12279_v50  ;;  %v7544_v16 = vmul.f32 %v9655_v15, %v12268_v31  ;;  %v7545_v33 = vmul.f32 %v9655_v15, %v12275_v29  ;;  %v8310_v55 = vld [vmem:[%s9905_s19 + $0x39] sm:$0xff]  ;;  %v8313_v50 = vld [vmem:[%s9905_s19 + $0x61] sm:$0xff]  ;;  %v8311_v31 = vld [vmem:[%s9905_s19 + $0x49] sm:$0xff] }
 0x54e   : > { %v7546_v37 = vmul.f32 %v9655_v15, %v12287_v24  ;;  %v7547_v58 = vmul.f32 %v9655_v15, %v12295_v3  ;;  %v7548_v7 = vmul.f32 %v9655_v15, %v12284_v20  ;;  %v7549_v48 = vmul.f32 %v9655_v15, %v12291_v39  ;;  %v8314_v29 = vld [vmem:[%s9905_s19 + $0x69] sm:$0xff]  ;;  %v8317_v20 = vld [vmem:[%s9905_s19 + $0x91] sm:$0xff]  ;;  %v8315_v39 = vld [vmem:[%s9905_s19 + $0x79] sm:$0xff] }
 0x54f   : > { %v7550_v4 = vmul.f32 %v9655_v15, %v12303_v28  ;;  %v7551_v12 = vmul.f32 %v9655_v15, %v12311_v5  ;;  %v7552_v8 = vmul.f32 %v9655_v15, %v12300_v57  ;;  %v7553_v24 = vmul.f32 %v9655_v15, %v12307_v30  ;;  %v8318_v3 = vld [vmem:[%s9905_s19 + $0x99] sm:$0xff]  ;;  %v8316_v5 = vld [vmem:[%s9905_s19 + $0x81] sm:$0xff] }
 0x550   : > { %v7554_v32 = vmul.f32 %v9655_v15, %v12319_v59  ;;  %v7555_v0 = vmul.f32 %v9655_v15, %v12327_v13  ;;  %v7556_v19 = vmul.f32 %v9655_v15, %v12316_v21  ;;  %v7557_v28 = vmul.f32 %v9655_v15, %v12323_v27  ;;  %v8321_v57 = vld [vmem:[%s9905_s19 + $0xc1] sm:$0xff]  ;;  %v8322_v13 = vld [vmem:[%s9905_s19 + $0xc9] sm:$0xff]  ;;  %v8320_v21 = vld [vmem:[%s9905_s19 + $0xb1] sm:$0xff] }
 0x551   : > { %v7558_v30 = vmul.f32 %v9655_v15, %v12335_v36  ;;  %v7559_v23 = vmul.f32 %v9655_v15, %v12343_v46  ;;  %v7560_v54 = vmul.f32 %v9655_v15, %v12332_v26  ;;  %v7561_v59 = vmul.f32 %v9655_v15, %v12339_v61  ;;  %v8325_v27 = vld [vmem:[%s9905_s19 + $0xf1] sm:$0xff]  ;;  %v8323_v46 = vld [vmem:[%s9905_s19 + $0xd9] sm:$0xff]  ;;  %v8324_v61 = vld [vmem:[%s9905_s19 + $0xe1] sm:$0xff] }
 0x552   : > { %v7562_v43 = vmul.f32 %v9655_v15, %v12351_v22  ;;  %v7563_v2 = vmul.f32 %v9655_v15, %v12359_v40  ;;  %v7564_v41 = vmul.f32 %v9655_v15, %v12348_v56  ;;  %v7565_v36 = vmul.f32 %v9655_v15, %v12355_v10  ;;  %v8326_v26 = vld [vmem:[%s9905_s19 + $0xf9] sm:$0xff]  ;;  %v8329_v22 = vld [vmem:[%s9905_s19 + $0x121] sm:$0xff]  ;;  %v8327_v40 = vld [vmem:[%s9905_s19 + $0x109] sm:$0xff] }
 0x553   : > { %v7566_v17 = vadd.f32 %v8307_v52, %v7534_v14  ;;  %v7567_v18 = vadd.f32 %v8308_v35, %v7535_v6  ;;  %v7568_v62 = vadd.f32 %v8309_v63, %v7536_v34  ;;  %v7569_v45 = vadd.f32 %v8310_v55, %v7537_v49  ;;  %v8328_v15 = vld [vmem:[%s9905_s19 + $0x111] sm:$0xff]  ;;  %v8331_v6 = vld [vmem:[%s9905_s19 + $0x139] sm:$0xff]  ;;  %v8332_v35 = vld [vmem:[%s9905_s19 + $0x141] sm:$0xff] }
 0x554   : > { %v7570_v56 = vadd.f32 %v8311_v31, %v7538_v53  ;;  %v7571_v38 = vadd.f32 %v8312_v1, %v7539_v51  ;;  %v7572_v10 = vadd.f32 %v8313_v50, %v7540_v44  ;;  %v7573_v25 = vadd.f32 %v8314_v29, %v7541_v9  ;;  %v8333_v14 = vld [vmem:[%s9905_s19 + $0x151] sm:$0xff]  ;;  %v8334_v55 = vld [vmem:[%s9905_s19 + $0x159] sm:$0xff]  ;;  %v8337_v31 = vld [vmem:[%s9905_s19 + $0x181] sm:$0xff] }
 0x555   : > { %v7574_v34 = vadd.f32 %v8315_v39, %v7542_v47  ;;  %v7575_v49 = vadd.f32 %v8316_v5, %v7543_v42  ;;  %v7576_v63 = vadd.f32 %v8317_v20, %v7544_v16  ;;  %v7577_v52 = vadd.f32 %v8318_v3, %v7545_v33  ;;  %v8335_v9 = vld [vmem:[%s9905_s19 + $0x169] sm:$0xff]  ;;  %v8336_v47 = vld [vmem:[%s9905_s19 + $0x171] sm:$0xff] }
 0x556   : > { %v12432_v53 = vadd.f32 %v8319_v11, %v7546_v37  ;;  %v12434_v1 = vadd.f32 %v8320_v21, %v7547_v58  ;;  %v12436_v51 = vadd.f32 %v8321_v57, %v7548_v7  ;;  %v12438_v44 = vadd.f32 %v8322_v13, %v7549_v48  ;;  %v8338_v50 = vld [vmem:[%s9905_s19 + $0x189] sm:$0xff]  ;;  %s12480_s19 = scalar_lea.vmem [#allocation4], %s12442_s14 }
 0x557   : > { %v12447_v42 = vadd.f32 %v8323_v46, %v7550_v4  ;;  %v12449_v16 = vadd.f32 %v8324_v61, %v7551_v12  ;;  %v12451_v33 = vadd.f32 %v8325_v27, %v7552_v8  ;;  %v12453_v37 = vadd.f32 %v8326_v26, %v7553_v24  ;;  %s7676_s16 = sshll.u32 %s12480_s19, 4  ;;  %s12525_s16 = int_to_ptr.vmem [resolvable:$true] %s7676_s16 }
 0x558   : > { %v12455_v58 = vadd.f32 %v8327_v40, %v7554_v32  ;;  %v12457_v7 = vadd.f32 %v8328_v15, %v7555_v0  ;;  %v12459_v48 = vadd.f32 %v8329_v22, %v7556_v19  ;;  %v12461_v29 = vadd.f32 %v8330_v60, %v7557_v28  ;;  %s9657_s20 = scalar_lea.vmem %s12525_s16, 4096  ;;  %p9664_p0 = scmp.lt.s32.totalorder %s12525_s16, %s9662_s23 }
 0x559   : > { %v12463_v20 = vadd.f32 %v8331_v6, %v7558_v30  ;;  %v12465_v39 = vadd.f32 %v8332_v35, %v7559_v23  ;;  %v12467_v4 = vadd.f32 %v8333_v14, %v7560_v54  ;;  %v12469_v12 = vadd.f32 %v8334_v55, %v7561_v59  ;;  %p9658_p11 = scmp.ne.s32.totalorder %s12525_s16, %s9657_s20  ;;  %p9665_p1 = scmp.lt.s32.totalorder %s9663_s29, %s9657_s20 }
 0x55a   : > { %v12471_v8 = vadd.f32 %v8335_v9, %v7562_v43  ;;  %v12473_v24 = vadd.f32 %v8336_v47, %v7563_v2  ;;  %v12475_v3 = vadd.f32 %v8337_v31, %v7564_v41  ;;  %v12477_v32 = vadd.f32 %v8338_v50, %v7565_v36 }
 0x55b   : > { %v7598_v0 = vmax.f32 %v7566_v17, 0.0  ;;  %v7599_v19 = vmax.f32 %v7567_v18, 0.0  ;;  %v7600_v28 = vmax.f32 %v7568_v62, 0.0  ;;  %v7601_v5 = vmax.f32 %v7569_v45, 0.0  ;;  %p9659_p12 = pnand %p9658_p11, %p9803_p5  ;;  %p9666_p2 = por %p9665_p1, %p9664_p0 }
 0x55c   : > { %v7602_v57 = vmax.f32 %v7570_v56, 0.0  ;;  %v7603_v11 = vmax.f32 %v7571_v38, 0.0  ;;  %v7604_v30 = vmax.f32 %v7572_v10, 0.0  ;;  %v7605_v23 = vmax.f32 %v7573_v25, 0.0 }
 0x55d   : > { %v7606_v54 = vmax.f32 %v7574_v34, 0.0  ;;  %v7607_v59 = vmax.f32 %v7575_v49, 0.0  ;;  %v7608_v13 = vmax.f32 %v7576_v63, 0.0  ;;  %v7609_v21 = vmax.f32 %v7577_v52, 0.0  ;;  %7630 = vst [vmem:[%s12480_s19] sm:$0xff] %v7598_v0  ;;  %7631 = vst [vmem:[%s12480_s19 + $0x8] sm:$0xff] %v7599_v19  ;;  %p9660_p13 = pneg %p9659_p12 }
 0x55e   : > { %7632 = vst [vmem:[%s12480_s19 + $0x10] sm:$0xff] %v7600_v28  ;;  %7633 = vst [vmem:[%s12480_s19 + $0x18] sm:$0xff] %v7601_v5  ;;  %v7610_v27 = vmax.f32 %v12432_v53, 0.0  ;;  %v7611_v43 = vmax.f32 %v12434_v1, 0.0  ;;  %v7612_v2 = vmax.f32 %v12436_v51, 0.0  ;;  %v7613_v41 = vmax.f32 %v12438_v44, 0.0 }
 0x55f   : > { %7634 = vst [vmem:[%s12480_s19 + $0x20] sm:$0xff] %v7602_v57  ;;  %7635 = vst [vmem:[%s12480_s19 + $0x28] sm:$0xff] %v7603_v11  ;;  %v7614_v36 = vmax.f32 %v12447_v42, 0.0  ;;  %v7615_v46 = vmax.f32 %v12449_v16, 0.0  ;;  %v7616_v26 = vmax.f32 %v12451_v33, 0.0  ;;  %v7617_v61 = vmax.f32 %v12453_v37, 0.0  ;;  %p9667_p3 = pnand %p9666_p2, %p9660_p13 }
 0x560   : > { %7636 = vst [vmem:[%s12480_s19 + $0x30] sm:$0xff] %v7604_v30  ;;  %7637 = vst [vmem:[%s12480_s19 + $0x38] sm:$0xff] %v7605_v23  ;;  %v7618_v17 = vmax.f32 %v12455_v58, 0.0  ;;  %v7619_v18 = vmax.f32 %v12457_v7, 0.0  ;;  %v7620_v62 = vmax.f32 %v12459_v48, 0.0  ;;  %v7621_v45 = vmax.f32 %v12461_v29, 0.0 }
 0x561   : > { %7638 = vst [vmem:[%s12480_s19 + $0x40] sm:$0xff] %v7606_v54  ;;  %7639 = vst [vmem:[%s12480_s19 + $0x48] sm:$0xff] %v7607_v59  ;;  %v7622_v22 = vmax.f32 %v12463_v20, 0.0  ;;  %v7623_v40 = vmax.f32 %v12465_v39, 0.0  ;;  %v7624_v60 = vmax.f32 %v12467_v4, 0.0  ;;  %v7625_v56 = vmax.f32 %v12469_v12, 0.0 }
 0x562   : > { %7640 = vst [vmem:[%s12480_s19 + $0x50] sm:$0xff] %v7608_v13  ;;  %7641 = vst [vmem:[%s12480_s19 + $0x58] sm:$0xff] %v7609_v21  ;;  %v7626_v38 = vmax.f32 %v12471_v8, 0.0  ;;  %v7627_v10 = vmax.f32 %v12473_v24, 0.0  ;;  %v7628_v25 = vmax.f32 %v12475_v3, 0.0  ;;  %v7629_v15 = vmax.f32 %v12477_v32, 0.0 }
 0x563   : > { %7642 = vst [vmem:[%s12480_s19 + $0x60] sm:$0xff] %v7610_v27  ;;  %7643 = vst [vmem:[%s12480_s19 + $0x68] sm:$0xff] %v7611_v43 }
 0x564   : > { %7644 = vst [vmem:[%s12480_s19 + $0x70] sm:$0xff] %v7612_v2  ;;  %7645 = vst [vmem:[%s12480_s19 + $0x78] sm:$0xff] %v7613_v41 }
 0x565   : > { %7646 = vst [vmem:[%s12480_s19 + $0x80] sm:$0xff] %v7614_v36  ;;  %7647 = vst [vmem:[%s12480_s19 + $0x88] sm:$0xff] %v7615_v46 }
 0x566   : > { %7648 = vst [vmem:[%s12480_s19 + $0x90] sm:$0xff] %v7616_v26  ;;  %7649 = vst [vmem:[%s12480_s19 + $0x98] sm:$0xff] %v7617_v61 }
 0x567   : > { %7650 = vst [vmem:[%s12480_s19 + $0xa0] sm:$0xff] %v7618_v17  ;;  %7651 = vst [vmem:[%s12480_s19 + $0xa8] sm:$0xff] %v7619_v18 }
 0x568   : > { %7652 = vst [vmem:[%s12480_s19 + $0xb0] sm:$0xff] %v7620_v62  ;;  %7653 = vst [vmem:[%s12480_s19 + $0xb8] sm:$0xff] %v7621_v45 }
 0x569   : > { %7654 = vst [vmem:[%s12480_s19 + $0xc0] sm:$0xff] %v7622_v22  ;;  %7655 = vst [vmem:[%s12480_s19 + $0xc8] sm:$0xff] %v7623_v40 }
 0x56a   : > { %7656 = vst [vmem:[%s12480_s19 + $0xd0] sm:$0xff] %v7624_v60  ;;  %7657 = vst [vmem:[%s12480_s19 + $0xd8] sm:$0xff] %v7625_v56 }
 0x56b   : > { %7658 = vst [vmem:[%s12480_s19 + $0xe0] sm:$0xff] %v7626_v38  ;;  %7659 = vst [vmem:[%s12480_s19 + $0xe8] sm:$0xff] %v7627_v10 }
 0x56c   : > { %7660 = vst [vmem:[%s12480_s19 + $0xf0] sm:$0xff] %v7628_v25  ;;  %7661 = vst [vmem:[%s12480_s19 + $0xf8] sm:$0xff] %v7629_v15 }
 0x56d   : > { %9670 = shalt.err (!%p9667_p3)
}
 0x56e   : > { %s9671_s22 = scalar_lea.hbm %s12523_s13, 4096  ;;  %s9675_s14 = scalar_lea.hbm %s12593_s7, 8192 }
 0x56f   : > { %p9672_p4 = scmp.ne.s32.totalorder %s12523_s13, %s9671_s22  ;;  %p9676_p9 = scmp.lt.u32.totalorder %s12523_s13, %s12593_s7 }
 0x570   : > { %p9677_p10 = scmp.lt.u32.totalorder %s9675_s14, %s9671_s22  ;;  %p9679_p12 = scmp.lt.u32.totalorder %s9671_s22, %s12523_s13 }
 0x571   : > { %p9673_p7 = pnand %p9672_p4, %p9803_p5 }
 0x572   : > { %p9678_p11 = por %p9677_p10, %p9676_p9 }
 0x573   : > { %p9674_p8 = pneg %p9673_p7 }
 0x574   : > { %p9680_p13 = por %p9679_p12, %p9678_p11 }
 0x576   : > { %p9681_p0 = pnand %p9680_p13, %p9674_p8 }
 0x578   : > { %9684 = shalt.err (!%p9681_p0)
}
 0x579   : > { %s9723_s28 = smov 128   ;;  %s9724_s17 = smov 8  }
 0x57a   : > { %9418 = dma.vmem_to_hbm [thread:$0]  (%p9803_p5), %s12525_s16, 4096, %s12523_s13, %s12545_s18, %s9723_s28, %s9723_s28, %s9724_s17  }
 0x57b PF: > { %p9424_p1 = scmp.ge.s32.totalorder %s9719_s27, 2  ;;  %s7691_s20 = sand.u32 1, %s9707_s24  }
 0x57c   : > { %s7692_s21 = scalar_lea.sflag [#allocation5], %s7691_s20 }
 0x57d   : > { %p9421_p2 = pnand %p9424_p1, %p9807_p6 }
 0x57f   : > { %9702 = dma.done.wait (!%p9421_p2), %s7692_s21, 4096  }
 0x580   : > { %9704 = vsyncadd (!%p9421_p2), %s7692_s21, 4294963200  ;;  %p17_p3 = scmp.ge.s32.totalorder %s9790_s30, 4   ;;  %s12630_s24 = smov %s9711_s25 }
 0x581   : > { %s12631_s25 = smov %s9715_s26  ;;  %s12632_s26 = smov %s9801_s10 }
 0x582   : > { %s12633_s27 = smov %s9790_s30  ;;  %19 = sbr.rel (!%p17_p3) target bundleno = 3 (0x3), region = 88 }
 0x589   :  { %7697 = vsyncpa [#allocation5], 1 }
 0x58a   :  { %7699 = vsyncpa [#allocation5 + $0x1], 1 }

</bundles_post_ra>
